<compile_context>
chip_gen: v7x
topology: tpu7x:2x2x1
jax: 0.10.0
libtpu: 0.0.40
codegen_flags: <defaults>
</compile_context>

<pallas_src>
import functools
import math

import jax
import jax.numpy as jnp
from jax.experimental import pallas as pl
from jax.experimental.pallas import tpu as pltpu


# ---------------------------------------------------------------------------
# Kernel: one AttentionLayer per grid step on flattened (batch*tokens, E) rows.
# ---------------------------------------------------------------------------
def query_generator_kernel(q_ref, a_ref,
                           sa_w_in_ref, sa_b_in_ref, sa_w_out_ref, sa_b_out_ref,
                           ca_w_in_ref, ca_b_in_ref, ca_w_out_ref, ca_b_out_ref,
                           ln_g_ref, ln_b_ref,
                           w1_ref, b1_ref, w2_ref, b2_ref,
                           out_ref, *, num_heads, batch, eps):
    f32, bf16 = jnp.float32, jnp.bfloat16
    H = num_heads
    rows_q, E = q_ref.shape
    rows_k = a_ref.shape[0]
    nq = rows_q // batch
    nk = rows_k // batch
    hd = E // H

    def layer_norm(x, g, b):
        mu = jnp.mean(x, axis=-1, keepdims=True)
        d = x - mu
        var = jnp.mean(d * d, axis=-1, keepdims=True)
        return d * jax.lax.rsqrt(var + eps) * g + b

    def gelu(x):
        # TODO(synk): nn.GELU() is erf-exact; the tanh approximation is used
        # since erf lowering in Mosaic is not guaranteed (max abs dev ~3e-3).
        c = 0.7978845608028654  # sqrt(2/pi)
        return 0.5 * x * (1.0 + jnp.tanh(c * (x + 0.044715 * (x * x * x))))

    def split_heads(t, n):
        # (batch*n, E) f32 with head-major columns -> (batch*H, n, hd).
        # Static sublane/lane slices + stack; no in-kernel transposes.
        return jnp.stack([t[b * n:(b + 1) * n, h * hd:(h + 1) * hd]
                          for b in range(batch) for h in range(H)], axis=0)

    def merge_heads(o):
        # (batch*H, n, hd) -> (batch*n, E) with head-major columns.
        return jnp.concatenate(
            [jnp.concatenate([o[b * H + h] for h in range(H)], axis=-1)
             for b in range(batch)], axis=0)

    def attn_core(q, k, v, n_q, n_k):
        # Tiny per-(batch,head) QK^T / softmax / PV (<5% of FLOPs); stays f32.
        qh = split_heads(q, n_q)
        kh = split_heads(k, n_k)
        vh = split_heads(v, n_k)
        s = jnp.einsum('gqd,gkd->gqk', qh, kh, preferred_element_type=f32)
        # 1/sqrt(hd) is folded into W_q/b_q at pack time.  Scores are O(1) at
        # these scales, so the row-max subtraction is skipped (review item).
        p = jnp.exp(s)
        p = p / jnp.sum(p, axis=-1, keepdims=True)      # exact reciprocal
        o = jnp.einsum('gqk,gkd->gqd', p, vh, preferred_element_type=f32)
        return merge_heads(o)

    # Hoisted loads / casts: activations cast to bf16 once per stage.
    x0 = q_ref[...]                        # (rows_q, E) f32 original query
    x0_bf = x0.astype(bf16)
    a_bf = a_ref[...].astype(bf16)         # (rows_k, E)

    g1, g2, g3 = ln_g_ref[0], ln_g_ref[1], ln_g_ref[2]
    e1, e2, e3 = ln_b_ref[0], ln_b_ref[1], ln_b_ref[2]

    # ---- self-attention: one full-width (rows,256)@(256,768) projection -----
    qkv = jnp.dot(x0_bf, sa_w_in_ref[...], preferred_element_type=f32) \
        + sa_b_in_ref[...]
    sa = attn_core(qkv[:, :E], qkv[:, E:2 * E], qkv[:, 2 * E:], nq, nq)
    sa = jnp.dot(sa.astype(bf16), sa_w_out_ref[...], preferred_element_type=f32) \
        + sa_b_out_ref[...]
    x = layer_norm(x0 + sa, g1, e1)

    # ---- cross-attention -----------------------------------------------------
    x_bf = x.astype(bf16)
    q_c = jnp.dot(x_bf, ca_w_in_ref[:, :E], preferred_element_type=f32) \
        + ca_b_in_ref[:, :E]
    kv_c = jnp.dot(a_bf, ca_w_in_ref[:, E:], preferred_element_type=f32) \
        + ca_b_in_ref[:, E:]
    ca = attn_core(q_c, kv_c[:, :E], kv_c[:, E:], nq, nk)
    ca = jnp.dot(ca.astype(bf16), ca_w_out_ref[...], preferred_element_type=f32) \
        + ca_b_out_ref[...]
    x = layer_norm(x + ca, g2, e2)

    # ---- feed-forward: (rows,256)@(256,1024) -> GELU -> (rows,1024)@(1024,256)
    x_bf = x.astype(bf16)
    h = jnp.dot(x_bf, w1_ref[...], preferred_element_type=f32) + b1_ref[...]
    h = gelu(h)
    y = jnp.dot(h.astype(bf16), w2_ref[...], preferred_element_type=f32) + b2_ref[...]
    x = layer_norm(x + y, g3, e3)

    # Constant output block index across the layer grid: each layer overwrites
    # this slab and only the final layer's value reaches HBM (PyTorch loop
    # semantics: every layer reads the original avs_query, last result wins).
    out_ref[...] = x


# ---------------------------------------------------------------------------
# Wrapper: single pallas_call, grid over layers, per-layer-blocked weights.
# ---------------------------------------------------------------------------
def query_generator_forward(avs_query, sparse_embedding, stacked, num_heads):
    B, Nq, E = avs_query.shape
    Nk = sparse_embedding.shape[1]
    rows_q, rows_k = B * Nq, B * Nk
    L = stacked["sa_w_in"].shape[0]

    q_flat = avs_query.reshape(rows_q, E)
    a_flat = sparse_embedding.reshape(rows_k, E)

    weight_order = ["sa_w_in", "sa_b_in", "sa_w_out", "sa_b_out",
                    "ca_w_in", "ca_b_in", "ca_w_out", "ca_b_out",
                    "ln_gamma", "ln_beta",
                    "ffn_w1", "ffn_b1", "ffn_w2", "ffn_b2"]
    weights = [stacked[k] for k in weight_order]

    def act_spec(arr):
        return pl.BlockSpec(arr.shape, lambda l, _n=arr.ndim: (0,) * _n)

    def layer_spec(arr):
        trailing = arr.shape[1:]
        return pl.BlockSpec((None,) + trailing,
                            lambda l, _n=len(trailing): (l,) + (0,) * _n)

    kernel = functools.partial(query_generator_kernel,
                               num_heads=num_heads, batch=B, eps=1e-5)

    grid_spec = pltpu.PrefetchScalarGridSpec(
        num_scalar_prefetch=0,
        grid=(L,),
        in_specs=[act_spec(q_flat), act_spec(a_flat)]
                 + [layer_spec(w) for w in weights],
        out_specs=pl.BlockSpec((rows_q, E), lambda l: (0, 0)),
    )

    out = pl.pallas_call(
        kernel,
        out_shape=jax.ShapeDtypeStruct((rows_q, E), jnp.float32),
        grid_spec=grid_spec,
        compiler_params=pltpu.CompilerParams(
            dimension_semantics=("arbitrary",),      # output resident across layers
            vmem_limit_bytes=32 * 1024 * 1024),
    )(q_flat, a_flat, *weights)
    return out.reshape(B, Nq, E)


# ---------------------------------------------------------------------------
# Parameter construction (PyTorch layout) + packing into kernel layout.
# ---------------------------------------------------------------------------
def init_layer_params(key, embed_dim, hidden_dim):
    E, HID = embed_dim, hidden_dim
    ks = jax.random.split(key, 12)

    def xavier(k, shape):
        a = math.sqrt(6.0 / (shape[0] + shape[1]))
        return jax.random.uniform(k, shape, jnp.float32, -a, a)

    def small(k, shape, s=0.02):
        return jax.random.uniform(k, shape, jnp.float32, -s, s)

    return {
        # nn.MultiheadAttention layout: in_proj_weight (3E, E), out_proj (E, E)
        "sa_in_proj_w": xavier(ks[0], (3 * E, E)),
        "sa_in_proj_b": small(ks[1], (3 * E,)),
        "sa_out_proj_w": xavier(ks[2], (E, E)),
        "sa_out_proj_b": small(ks[3], (E,)),
        "ca_in_proj_w": xavier(ks[4], (3 * E, E)),
        "ca_in_proj_b": small(ks[5], (3 * E,)),
        "ca_out_proj_w": xavier(ks[6], (E, E)),
        "ca_out_proj_b": small(ks[7], (E,)),
        # nn.Linear layout: weight (out_features, in_features)
        "ffn_w1": xavier(ks[8], (HID, E)), "ffn_b1": small(ks[9], (HID,)),
        "ffn_w2": xavier(ks[10], (E, HID)), "ffn_b2": small(ks[11], (E,)),
        "ln1_g": jnp.ones((E,), jnp.float32), "ln1_b": jnp.zeros((E,), jnp.float32),
        "ln2_g": jnp.ones((E,), jnp.float32), "ln2_b": jnp.zeros((E,), jnp.float32),
        "ln3_g": jnp.ones((E,), jnp.float32), "ln3_b": jnp.zeros((E,), jnp.float32),
    }


def pack_layer_params(p, num_heads):
    """Repack PyTorch-layout params into full-width, bf16, lane-dense layout."""
    E = p["sa_out_proj_w"].shape[0]
    hd = E // num_heads
    scale = 1.0 / math.sqrt(hd)

    def pack_attn(wi, bi, wo, bo):
        w_in = wi.T                                  # (E, 3E): columns [Q|K|V]
        w_in = w_in.at[:, :E].multiply(scale)        # fold 1/sqrt(hd) into W_q
        b_in = bi.reshape(1, 3 * E)
        b_in = b_in.at[:, :E].multiply(scale)        # ... and into b_q
        w_out = wo.T                                 # (E, E), lane-dense
        b_out = bo.reshape(1, E)
        return (w_in.astype(jnp.bfloat16), b_in.astype(jnp.float32),
                w_out.astype(jnp.bfloat16), b_out.astype(jnp.float32))

    sa = pack_attn(p["sa_in_proj_w"], p["sa_in_proj_b"],
                   p["sa_out_proj_w"], p["sa_out_proj_b"])
    ca = pack_attn(p["ca_in_proj_w"], p["ca_in_proj_b"],
                   p["ca_out_proj_w"], p["ca_out_proj_b"])
    return {
        "sa_w_in": sa[0], "sa_b_in": sa[1], "sa_w_out": sa[2], "sa_b_out": sa[3],
        "ca_w_in": ca[0], "ca_b_in": ca[1], "ca_w_out": ca[2], "ca_b_out": ca[3],
        "ln_gamma": jnp.stack([p["ln1_g"], p["ln2_g"], p["ln3_g"]])[:, None, :],
        "ln_beta": jnp.stack([p["ln1_b"], p["ln2_b"], p["ln3_b"]])[:, None, :],
        "ffn_w1": p["ffn_w1"].T.astype(jnp.bfloat16),   # (E, HID)
        "ffn_b1": p["ffn_b1"].reshape(1, -1),
        "ffn_w2": p["ffn_w2"].T.astype(jnp.bfloat16),   # (HID, E)
        "ffn_b2": p["ffn_b2"].reshape(1, -1),
    }


def stack_layer_params(packed_layers):
    """Stack per-layer packed params along a leading L axis (grid-over-layers)."""
    return {k: jnp.stack([lp[k] for lp in packed_layers], axis=0)
            for k in packed_layers[0]}


# ---------------------------------------------------------------------------
# Pure-JAX f32 reference mirroring the PyTorch module exactly.
# ---------------------------------------------------------------------------
def _mha_ref(x, kv, w_in, b_in, w_out, b_out, num_heads):
    E = x.shape[-1]
    H = num_heads
    hd = E // H
    wq, wk, wv = jnp.split(w_in, 3, axis=0)
    bq, bk, bv = jnp.split(b_in, 3)
    q = x @ wq.T + bq
    k = kv @ wk.T + bk
    v = kv @ wv.T + bv
    B, Nq, _ = q.shape
    Nk = k.shape[1]

    def split(t, n):
        return t.reshape(B, n, H, hd).transpose(0, 2, 1, 3)

    qh, kh, vh = split(q, Nq), split(k, Nk), split(v, Nk)
    s = jnp.einsum('bhqd,bhkd->bhqk', qh, kh) / math.sqrt(hd)
    a = jax.nn.softmax(s, axis=-1)
    o = jnp.einsum('bhqk,bhkd->bhqd', a, vh)
    o = o.transpose(0, 2, 1, 3).reshape(B, Nq, E)
    return o @ w_out.T + b_out


def _layer_norm_ref(x, g, b, eps=1e-5):
    mu = jnp.mean(x, axis=-1, keepdims=True)
    var = jnp.mean((x - mu) ** 2, axis=-1, keepdims=True)
    return (x - mu) / jnp.sqrt(var + eps) * g + b


def _attention_layer_ref(query, audio, p, num_heads):
    out1 = _mha_ref(query, query, p["sa_in_proj_w"], p["sa_in_proj_b"],
                    p["sa_out_proj_w"], p["sa_out_proj_b"], num_heads)
    q = _layer_norm_ref(query + out1, p["ln1_g"], p["ln1_b"])
    out2 = _mha_ref(q, audio, p["ca_in_proj_w"], p["ca_in_proj_b"],
                    p["ca_out_proj_w"], p["ca_out_proj_b"], num_heads)
    q = _layer_norm_ref(q + out2, p["ln2_g"], p["ln2_b"])
    h = jax.nn.gelu(q @ p["ffn_w1"].T + p["ffn_b1"], approximate=False)
    out3 = h @ p["ffn_w2"].T + p["ffn_b2"]
    return _layer_norm_ref(q + out3, p["ln3_g"], p["ln3_b"])


def query_generator_ref(avs_query, sparse_embedding, layer_params, num_heads):
    query = None
    for p in layer_params:
        query = _attention_layer_ref(avs_query, sparse_embedding, p, num_heads)
    return query


# ---------------------------------------------------------------------------
if __name__ == "__main__":
    num_layers = 2
    embed_dim = 256      # module defaults
    num_heads = 8
    hidden_dim = 1024
    B, Nq, Nk = 2, 8, 16

    key = jax.random.PRNGKey(0)
    kq, ka, kp = jax.random.split(key, 3)
    avs_query = jax.random.normal(kq, (B, Nq, embed_dim), jnp.float32)
    sparse_embedding = jax.random.normal(ka, (B, Nk, embed_dim), jnp.float32)

    layer_keys = jax.random.split(kp, num_layers)
    layer_params = [init_layer_params(k, embed_dim, hidden_dim) for k in layer_keys]
    packed_layers = [pack_layer_params(p, num_heads) for p in layer_params]
    stacked = stack_layer_params(packed_layers)

    out = query_generator_forward(avs_query, sparse_embedding, stacked, num_heads)
    out = jax.block_until_ready(out)

    ref = query_generator_ref(avs_query, sparse_embedding, layer_params, num_heads)
    assert out.shape == (B, Nq, embed_dim)
    max_err = float(jnp.max(jnp.abs(out - ref)))
    # bf16 matmul operands + tanh-GELU => relaxed tolerance.
    assert jnp.allclose(out, ref, rtol=5e-2, atol=5e-2), \
        f"mismatch vs reference (max abs err {max_err:.3e})"

    print("KERNEL_OK")
</pallas_src>

<mosaic_0001>
module attributes {stable_mosaic.version = 11 : i64} {
  func.func @query_generator_kernel(%arg0: i32, %arg1: memref<16x256xf32, #tpu.memory_space<vmem>>, %arg2: memref<32x256xf32, #tpu.memory_space<vmem>>, %arg3: memref<1x256x768xbf16, #tpu.memory_space<vmem>>, %arg4: memref<1x1x768xf32, #tpu.memory_space<vmem>>, %arg5: memref<1x256x256xbf16, #tpu.memory_space<vmem>>, %arg6: memref<1x1x256xf32, #tpu.memory_space<vmem>>, %arg7: memref<1x256x768xbf16, #tpu.memory_space<vmem>>, %arg8: memref<1x1x768xf32, #tpu.memory_space<vmem>>, %arg9: memref<1x256x256xbf16, #tpu.memory_space<vmem>>, %arg10: memref<1x1x256xf32, #tpu.memory_space<vmem>>, %arg11: memref<1x3x1x256xf32, #tpu.memory_space<vmem>>, %arg12: memref<1x3x1x256xf32, #tpu.memory_space<vmem>>, %arg13: memref<1x256x1024xbf16, #tpu.memory_space<vmem>>, %arg14: memref<1x1x1024xf32, #tpu.memory_space<vmem>>, %arg15: memref<1x1024x256xbf16, #tpu.memory_space<vmem>>, %arg16: memref<1x1x256xf32, #tpu.memory_space<vmem>>, %arg17: memref<16x256xf32, #tpu.memory_space<vmem>>) attributes {dimension_semantics = [#tpu.dimension_semantics<arbitrary>], iteration_bounds = array<i64: 2>, scalar_prefetch = 0 : i64, scratch_operands = 0 : i64, tpu.core_type = #tpu.core_type<tc>, window_params = [{pipeline_mode = #tpu.pipeline_mode<synchronous>, transform_indices = @transform_0, window_bounds = array<i64: 16, 256>}, {pipeline_mode = #tpu.pipeline_mode<synchronous>, transform_indices = @transform_1, window_bounds = array<i64: 32, 256>}, {transform_indices = @transform_2, window_bounds = array<i64: 1, 256, 768>}, {transform_indices = @transform_3, window_bounds = array<i64: 1, 1, 768>}, {transform_indices = @transform_4, window_bounds = array<i64: 1, 256, 256>}, {transform_indices = @transform_5, window_bounds = array<i64: 1, 1, 256>}, {transform_indices = @transform_6, window_bounds = array<i64: 1, 256, 768>}, {transform_indices = @transform_7, window_bounds = array<i64: 1, 1, 768>}, {transform_indices = @transform_8, window_bounds = array<i64: 1, 256, 256>}, {transform_indices = @transform_9, window_bounds = array<i64: 1, 1, 256>}, {transform_indices = @transform_10, window_bounds = array<i64: 1, 3, 1, 256>}, {transform_indices = @transform_11, window_bounds = array<i64: 1, 3, 1, 256>}, {transform_indices = @transform_12, window_bounds = array<i64: 1, 256, 1024>}, {transform_indices = @transform_13, window_bounds = array<i64: 1, 1, 1024>}, {transform_indices = @transform_14, window_bounds = array<i64: 1, 1024, 256>}, {transform_indices = @transform_15, window_bounds = array<i64: 1, 1, 256>}, {pipeline_mode = #tpu.pipeline_mode<synchronous>, transform_indices = @transform_16, window_bounds = array<i64: 16, 256>}]} {
    %c0 = arith.constant 0 : index
    %c0_0 = arith.constant 0 : index
    %0 = vector.load %arg1[%c0, %c0_0] : memref<16x256xf32, #tpu.memory_space<vmem>>, vector<16x256xf32>
    %1 = arith.truncf %0 : vector<16x256xf32> to vector<16x256xbf16>
    %c0_1 = arith.constant 0 : index
    %c0_2 = arith.constant 0 : index
    %2 = vector.load %arg2[%c0_1, %c0_2] : memref<32x256xf32, #tpu.memory_space<vmem>>, vector<32x256xf32>
    %3 = arith.truncf %2 : vector<32x256xf32> to vector<32x256xbf16>
    %c0_3 = arith.constant 0 : index
    %c0_4 = arith.constant 0 : index
    %c0_5 = arith.constant 0 : index
    %c0_6 = arith.constant 0 : index
    %4 = vector.load %arg11[%c0_3, %c0_4, %c0_5, %c0_6] : memref<1x3x1x256xf32, #tpu.memory_space<vmem>>, vector<1x1x1x256xf32>
    %5 = vector.shape_cast %4 : vector<1x1x1x256xf32> to vector<1x256xf32>
    %c0_7 = arith.constant 0 : index
    %c1 = arith.constant 1 : index
    %c0_8 = arith.constant 0 : index
    %c0_9 = arith.constant 0 : index
    %6 = vector.load %arg11[%c0_7, %c1, %c0_8, %c0_9] : memref<1x3x1x256xf32, #tpu.memory_space<vmem>>, vector<1x1x1x256xf32>
    %7 = vector.shape_cast %6 : vector<1x1x1x256xf32> to vector<1x256xf32>
    %c0_10 = arith.constant 0 : index
    %c2 = arith.constant 2 : index
    %c0_11 = arith.constant 0 : index
    %c0_12 = arith.constant 0 : index
    %8 = vector.load %arg11[%c0_10, %c2, %c0_11, %c0_12] : memref<1x3x1x256xf32, #tpu.memory_space<vmem>>, vector<1x1x1x256xf32>
    %9 = vector.shape_cast %8 : vector<1x1x1x256xf32> to vector<1x256xf32>
    %c0_13 = arith.constant 0 : index
    %c0_14 = arith.constant 0 : index
    %c0_15 = arith.constant 0 : index
    %c0_16 = arith.constant 0 : index
    %10 = vector.load %arg12[%c0_13, %c0_14, %c0_15, %c0_16] : memref<1x3x1x256xf32, #tpu.memory_space<vmem>>, vector<1x1x1x256xf32>
    %11 = vector.shape_cast %10 : vector<1x1x1x256xf32> to vector<1x256xf32>
    %c0_17 = arith.constant 0 : index
    %c1_18 = arith.constant 1 : index
    %c0_19 = arith.constant 0 : index
    %c0_20 = arith.constant 0 : index
    %12 = vector.load %arg12[%c0_17, %c1_18, %c0_19, %c0_20] : memref<1x3x1x256xf32, #tpu.memory_space<vmem>>, vector<1x1x1x256xf32>
    %13 = vector.shape_cast %12 : vector<1x1x1x256xf32> to vector<1x256xf32>
    %c0_21 = arith.constant 0 : index
    %c2_22 = arith.constant 2 : index
    %c0_23 = arith.constant 0 : index
    %c0_24 = arith.constant 0 : index
    %14 = vector.load %arg12[%c0_21, %c2_22, %c0_23, %c0_24] : memref<1x3x1x256xf32, #tpu.memory_space<vmem>>, vector<1x1x1x256xf32>
    %15 = vector.shape_cast %14 : vector<1x1x1x256xf32> to vector<1x256xf32>
    %c0_25 = arith.constant 0 : index
    %c0_26 = arith.constant 0 : index
    %c0_27 = arith.constant 0 : index
    %16 = vector.load %arg3[%c0_25, %c0_26, %c0_27] : memref<1x256x768xbf16, #tpu.memory_space<vmem>>, vector<1x256x768xbf16>
    %17 = vector.shape_cast %16 : vector<1x256x768xbf16> to vector<256x768xbf16>
    %cst = arith.constant dense<0.000000e+00> : vector<16x768xf32>
    %18 = tpu.matmul %1, %17, %cst {dimension_numbers = #tpu.dot_dimension_numbers<[1], [0], [0], [1], [0, 0, 1, 1], [], []>} : vector<16x256xbf16>, vector<256x768xbf16>, vector<16x768xf32> -> vector<16x768xf32>
    %c0_28 = arith.constant 0 : index
    %c0_29 = arith.constant 0 : index
    %c0_30 = arith.constant 0 : index
    %19 = vector.load %arg4[%c0_28, %c0_29, %c0_30] : memref<1x1x768xf32, #tpu.memory_space<vmem>>, vector<1x1x768xf32>
    %20 = vector.shape_cast %19 : vector<1x1x768xf32> to vector<1x768xf32>
    %21 = vector.broadcast %20 : vector<1x768xf32> to vector<16x768xf32>
    %22 = arith.addf %18, %21 : vector<16x768xf32>
    %23 = vector.extract_strided_slice %22 {offsets = [0, 0], sizes = [16, 256], strides = [1, 1]} : vector<16x768xf32> to vector<16x256xf32>
    %24 = vector.extract_strided_slice %22 {offsets = [0, 256], sizes = [16, 256], strides = [1, 1]} : vector<16x768xf32> to vector<16x256xf32>
    %25 = vector.extract_strided_slice %22 {offsets = [0, 512], sizes = [16, 256], strides = [1, 1]} : vector<16x768xf32> to vector<16x256xf32>
    %26 = vector.extract_strided_slice %23 {offsets = [0, 0], sizes = [8, 32], strides = [1, 1]} : vector<16x256xf32> to vector<8x32xf32>
    %27 = vector.extract_strided_slice %23 {offsets = [0, 32], sizes = [8, 32], strides = [1, 1]} : vector<16x256xf32> to vector<8x32xf32>
    %28 = vector.extract_strided_slice %23 {offsets = [0, 64], sizes = [8, 32], strides = [1, 1]} : vector<16x256xf32> to vector<8x32xf32>
    %29 = vector.extract_strided_slice %23 {offsets = [0, 96], sizes = [8, 32], strides = [1, 1]} : vector<16x256xf32> to vector<8x32xf32>
    %30 = vector.extract_strided_slice %23 {offsets = [0, 128], sizes = [8, 32], strides = [1, 1]} : vector<16x256xf32> to vector<8x32xf32>
    %31 = vector.extract_strided_slice %23 {offsets = [0, 160], sizes = [8, 32], strides = [1, 1]} : vector<16x256xf32> to vector<8x32xf32>
    %32 = vector.extract_strided_slice %23 {offsets = [0, 192], sizes = [8, 32], strides = [1, 1]} : vector<16x256xf32> to vector<8x32xf32>
    %33 = vector.extract_strided_slice %23 {offsets = [0, 224], sizes = [8, 32], strides = [1, 1]} : vector<16x256xf32> to vector<8x32xf32>
    %34 = vector.extract_strided_slice %23 {offsets = [8, 0], sizes = [8, 32], strides = [1, 1]} : vector<16x256xf32> to vector<8x32xf32>
    %35 = vector.extract_strided_slice %23 {offsets = [8, 32], sizes = [8, 32], strides = [1, 1]} : vector<16x256xf32> to vector<8x32xf32>
    %36 = vector.extract_strided_slice %23 {offsets = [8, 64], sizes = [8, 32], strides = [1, 1]} : vector<16x256xf32> to vector<8x32xf32>
    %37 = vector.extract_strided_slice %23 {offsets = [8, 96], sizes = [8, 32], strides = [1, 1]} : vector<16x256xf32> to vector<8x32xf32>
    %38 = vector.extract_strided_slice %23 {offsets = [8, 128], sizes = [8, 32], strides = [1, 1]} : vector<16x256xf32> to vector<8x32xf32>
    %39 = vector.extract_strided_slice %23 {offsets = [8, 160], sizes = [8, 32], strides = [1, 1]} : vector<16x256xf32> to vector<8x32xf32>
    %40 = vector.extract_strided_slice %23 {offsets = [8, 192], sizes = [8, 32], strides = [1, 1]} : vector<16x256xf32> to vector<8x32xf32>
    %41 = vector.extract_strided_slice %23 {offsets = [8, 224], sizes = [8, 32], strides = [1, 1]} : vector<16x256xf32> to vector<8x32xf32>
    %42 = vector.shape_cast %26 : vector<8x32xf32> to vector<1x8x32xf32>
    %43 = vector.shape_cast %27 : vector<8x32xf32> to vector<1x8x32xf32>
    %44 = vector.shape_cast %28 : vector<8x32xf32> to vector<1x8x32xf32>
    %45 = vector.shape_cast %29 : vector<8x32xf32> to vector<1x8x32xf32>
    %46 = vector.shape_cast %30 : vector<8x32xf32> to vector<1x8x32xf32>
    %47 = vector.shape_cast %31 : vector<8x32xf32> to vector<1x8x32xf32>
    %48 = vector.shape_cast %32 : vector<8x32xf32> to vector<1x8x32xf32>
    %49 = vector.shape_cast %33 : vector<8x32xf32> to vector<1x8x32xf32>
    %50 = vector.shape_cast %34 : vector<8x32xf32> to vector<1x8x32xf32>
    %51 = vector.shape_cast %35 : vector<8x32xf32> to vector<1x8x32xf32>
    %52 = vector.shape_cast %36 : vector<8x32xf32> to vector<1x8x32xf32>
    %53 = vector.shape_cast %37 : vector<8x32xf32> to vector<1x8x32xf32>
    %54 = vector.shape_cast %38 : vector<8x32xf32> to vector<1x8x32xf32>
    %55 = vector.shape_cast %39 : vector<8x32xf32> to vector<1x8x32xf32>
    %56 = vector.shape_cast %40 : vector<8x32xf32> to vector<1x8x32xf32>
    %57 = vector.shape_cast %41 : vector<8x32xf32> to vector<1x8x32xf32>
    %58 = tpu.concatenate %42, %43, %44, %45, %46, %47, %48, %49, %50, %51, %52, %53, %54, %55, %56, %57 in 0 : vector<1x8x32xf32>, vector<1x8x32xf32>, vector<1x8x32xf32>, vector<1x8x32xf32>, vector<1x8x32xf32>, vector<1x8x32xf32>, vector<1x8x32xf32>, vector<1x8x32xf32>, vector<1x8x32xf32>, vector<1x8x32xf32>, vector<1x8x32xf32>, vector<1x8x32xf32>, vector<1x8x32xf32>, vector<1x8x32xf32>, vector<1x8x32xf32>, vector<1x8x32xf32> -> vector<16x8x32xf32>
    %59 = vector.extract_strided_slice %24 {offsets = [0, 0], sizes = [8, 32], strides = [1, 1]} : vector<16x256xf32> to vector<8x32xf32>
    %60 = vector.extract_strided_slice %24 {offsets = [0, 32], sizes = [8, 32], strides = [1, 1]} : vector<16x256xf32> to vector<8x32xf32>
    %61 = vector.extract_strided_slice %24 {offsets = [0, 64], sizes = [8, 32], strides = [1, 1]} : vector<16x256xf32> to vector<8x32xf32>
    %62 = vector.extract_strided_slice %24 {offsets = [0, 96], sizes = [8, 32], strides = [1, 1]} : vector<16x256xf32> to vector<8x32xf32>
    %63 = vector.extract_strided_slice %24 {offsets = [0, 128], sizes = [8, 32], strides = [1, 1]} : vector<16x256xf32> to vector<8x32xf32>
    %64 = vector.extract_strided_slice %24 {offsets = [0, 160], sizes = [8, 32], strides = [1, 1]} : vector<16x256xf32> to vector<8x32xf32>
    %65 = vector.extract_strided_slice %24 {offsets = [0, 192], sizes = [8, 32], strides = [1, 1]} : vector<16x256xf32> to vector<8x32xf32>
    %66 = vector.extract_strided_slice %24 {offsets = [0, 224], sizes = [8, 32], strides = [1, 1]} : vector<16x256xf32> to vector<8x32xf32>
    %67 = vector.extract_strided_slice %24 {offsets = [8, 0], sizes = [8, 32], strides = [1, 1]} : vector<16x256xf32> to vector<8x32xf32>
    %68 = vector.extract_strided_slice %24 {offsets = [8, 32], sizes = [8, 32], strides = [1, 1]} : vector<16x256xf32> to vector<8x32xf32>
    %69 = vector.extract_strided_slice %24 {offsets = [8, 64], sizes = [8, 32], strides = [1, 1]} : vector<16x256xf32> to vector<8x32xf32>
    %70 = vector.extract_strided_slice %24 {offsets = [8, 96], sizes = [8, 32], strides = [1, 1]} : vector<16x256xf32> to vector<8x32xf32>
    %71 = vector.extract_strided_slice %24 {offsets = [8, 128], sizes = [8, 32], strides = [1, 1]} : vector<16x256xf32> to vector<8x32xf32>
    %72 = vector.extract_strided_slice %24 {offsets = [8, 160], sizes = [8, 32], strides = [1, 1]} : vector<16x256xf32> to vector<8x32xf32>
    %73 = vector.extract_strided_slice %24 {offsets = [8, 192], sizes = [8, 32], strides = [1, 1]} : vector<16x256xf32> to vector<8x32xf32>
    %74 = vector.extract_strided_slice %24 {offsets = [8, 224], sizes = [8, 32], strides = [1, 1]} : vector<16x256xf32> to vector<8x32xf32>
    %75 = vector.shape_cast %59 : vector<8x32xf32> to vector<1x8x32xf32>
    %76 = vector.shape_cast %60 : vector<8x32xf32> to vector<1x8x32xf32>
    %77 = vector.shape_cast %61 : vector<8x32xf32> to vector<1x8x32xf32>
    %78 = vector.shape_cast %62 : vector<8x32xf32> to vector<1x8x32xf32>
    %79 = vector.shape_cast %63 : vector<8x32xf32> to vector<1x8x32xf32>
    %80 = vector.shape_cast %64 : vector<8x32xf32> to vector<1x8x32xf32>
    %81 = vector.shape_cast %65 : vector<8x32xf32> to vector<1x8x32xf32>
    %82 = vector.shape_cast %66 : vector<8x32xf32> to vector<1x8x32xf32>
    %83 = vector.shape_cast %67 : vector<8x32xf32> to vector<1x8x32xf32>
    %84 = vector.shape_cast %68 : vector<8x32xf32> to vector<1x8x32xf32>
    %85 = vector.shape_cast %69 : vector<8x32xf32> to vector<1x8x32xf32>
    %86 = vector.shape_cast %70 : vector<8x32xf32> to vector<1x8x32xf32>
    %87 = vector.shape_cast %71 : vector<8x32xf32> to vector<1x8x32xf32>
    %88 = vector.shape_cast %72 : vector<8x32xf32> to vector<1x8x32xf32>
    %89 = vector.shape_cast %73 : vector<8x32xf32> to vector<1x8x32xf32>
    %90 = vector.shape_cast %74 : vector<8x32xf32> to vector<1x8x32xf32>
    %91 = tpu.concatenate %75, %76, %77, %78, %79, %80, %81, %82, %83, %84, %85, %86, %87, %88, %89, %90 in 0 : vector<1x8x32xf32>, vector<1x8x32xf32>, vector<1x8x32xf32>, vector<1x8x32xf32>, vector<1x8x32xf32>, vector<1x8x32xf32>, vector<1x8x32xf32>, vector<1x8x32xf32>, vector<1x8x32xf32>, vector<1x8x32xf32>, vector<1x8x32xf32>, vector<1x8x32xf32>, vector<1x8x32xf32>, vector<1x8x32xf32>, vector<1x8x32xf32>, vector<1x8x32xf32> -> vector<16x8x32xf32>
    %92 = vector.extract_strided_slice %25 {offsets = [0, 0], sizes = [8, 32], strides = [1, 1]} : vector<16x256xf32> to vector<8x32xf32>
    %93 = vector.extract_strided_slice %25 {offsets = [0, 32], sizes = [8, 32], strides = [1, 1]} : vector<16x256xf32> to vector<8x32xf32>
    %94 = vector.extract_strided_slice %25 {offsets = [0, 64], sizes = [8, 32], strides = [1, 1]} : vector<16x256xf32> to vector<8x32xf32>
    %95 = vector.extract_strided_slice %25 {offsets = [0, 96], sizes = [8, 32], strides = [1, 1]} : vector<16x256xf32> to vector<8x32xf32>
    %96 = vector.extract_strided_slice %25 {offsets = [0, 128], sizes = [8, 32], strides = [1, 1]} : vector<16x256xf32> to vector<8x32xf32>
    %97 = vector.extract_strided_slice %25 {offsets = [0, 160], sizes = [8, 32], strides = [1, 1]} : vector<16x256xf32> to vector<8x32xf32>
    %98 = vector.extract_strided_slice %25 {offsets = [0, 192], sizes = [8, 32], strides = [1, 1]} : vector<16x256xf32> to vector<8x32xf32>
    %99 = vector.extract_strided_slice %25 {offsets = [0, 224], sizes = [8, 32], strides = [1, 1]} : vector<16x256xf32> to vector<8x32xf32>
    %100 = vector.extract_strided_slice %25 {offsets = [8, 0], sizes = [8, 32], strides = [1, 1]} : vector<16x256xf32> to vector<8x32xf32>
    %101 = vector.extract_strided_slice %25 {offsets = [8, 32], sizes = [8, 32], strides = [1, 1]} : vector<16x256xf32> to vector<8x32xf32>
    %102 = vector.extract_strided_slice %25 {offsets = [8, 64], sizes = [8, 32], strides = [1, 1]} : vector<16x256xf32> to vector<8x32xf32>
    %103 = vector.extract_strided_slice %25 {offsets = [8, 96], sizes = [8, 32], strides = [1, 1]} : vector<16x256xf32> to vector<8x32xf32>
    %104 = vector.extract_strided_slice %25 {offsets = [8, 128], sizes = [8, 32], strides = [1, 1]} : vector<16x256xf32> to vector<8x32xf32>
    %105 = vector.extract_strided_slice %25 {offsets = [8, 160], sizes = [8, 32], strides = [1, 1]} : vector<16x256xf32> to vector<8x32xf32>
    %106 = vector.extract_strided_slice %25 {offsets = [8, 192], sizes = [8, 32], strides = [1, 1]} : vector<16x256xf32> to vector<8x32xf32>
    %107 = vector.extract_strided_slice %25 {offsets = [8, 224], sizes = [8, 32], strides = [1, 1]} : vector<16x256xf32> to vector<8x32xf32>
    %108 = vector.shape_cast %92 : vector<8x32xf32> to vector<1x8x32xf32>
    %109 = vector.shape_cast %93 : vector<8x32xf32> to vector<1x8x32xf32>
    %110 = vector.shape_cast %94 : vector<8x32xf32> to vector<1x8x32xf32>
    %111 = vector.shape_cast %95 : vector<8x32xf32> to vector<1x8x32xf32>
    %112 = vector.shape_cast %96 : vector<8x32xf32> to vector<1x8x32xf32>
    %113 = vector.shape_cast %97 : vector<8x32xf32> to vector<1x8x32xf32>
    %114 = vector.shape_cast %98 : vector<8x32xf32> to vector<1x8x32xf32>
    %115 = vector.shape_cast %99 : vector<8x32xf32> to vector<1x8x32xf32>
    %116 = vector.shape_cast %100 : vector<8x32xf32> to vector<1x8x32xf32>
    %117 = vector.shape_cast %101 : vector<8x32xf32> to vector<1x8x32xf32>
    %118 = vector.shape_cast %102 : vector<8x32xf32> to vector<1x8x32xf32>
    %119 = vector.shape_cast %103 : vector<8x32xf32> to vector<1x8x32xf32>
    %120 = vector.shape_cast %104 : vector<8x32xf32> to vector<1x8x32xf32>
    %121 = vector.shape_cast %105 : vector<8x32xf32> to vector<1x8x32xf32>
    %122 = vector.shape_cast %106 : vector<8x32xf32> to vector<1x8x32xf32>
    %123 = vector.shape_cast %107 : vector<8x32xf32> to vector<1x8x32xf32>
    %124 = tpu.concatenate %108, %109, %110, %111, %112, %113, %114, %115, %116, %117, %118, %119, %120, %121, %122, %123 in 0 : vector<1x8x32xf32>, vector<1x8x32xf32>, vector<1x8x32xf32>, vector<1x8x32xf32>, vector<1x8x32xf32>, vector<1x8x32xf32>, vector<1x8x32xf32>, vector<1x8x32xf32>, vector<1x8x32xf32>, vector<1x8x32xf32>, vector<1x8x32xf32>, vector<1x8x32xf32>, vector<1x8x32xf32>, vector<1x8x32xf32>, vector<1x8x32xf32>, vector<1x8x32xf32> -> vector<16x8x32xf32>
    "tpu.trace_start"() <{level = 10 : i32, message = "gqd,gkd->gqk"}> : () -> ()
    %cst_31 = arith.constant dense<0.000000e+00> : vector<16x8x8xf32>
    %125 = tpu.matmul %58, %91, %cst_31 {dimension_numbers = #tpu.dot_dimension_numbers<[2], [2], [1], [1], [0, 0, 0, 1, 1, 1], [0], [0]>} : vector<16x8x32xf32>, vector<16x8x32xf32>, vector<16x8x8xf32> -> vector<16x8x8xf32>
    "tpu.trace_stop"() : () -> ()
    %126 = math.exp %125 : vector<16x8x8xf32>
    %cst_32 = arith.constant dense<0.000000e+00> : vector<16x8xf32>
    %127 = vector.multi_reduction <add>, %126, %cst_32 [2] : vector<16x8x8xf32> to vector<16x8xf32>
    %128 = vector.shape_cast %127 : vector<16x8xf32> to vector<16x8x1xf32>
    %129 = vector.broadcast %128 : vector<16x8x1xf32> to vector<16x8x8xf32>
    %130 = arith.divf %126, %129 : vector<16x8x8xf32>
    "tpu.trace_start"() <{level = 10 : i32, message = "gqk,gkd->gqd"}> : () -> ()
    %cst_33 = arith.constant dense<0.000000e+00> : vector<16x8x32xf32>
    %131 = tpu.matmul %130, %124, %cst_33 {dimension_numbers = #tpu.dot_dimension_numbers<[2], [1], [1], [2], [0, 0, 0, 1, 1, 2], [0], [0]>} : vector<16x8x8xf32>, vector<16x8x32xf32>, vector<16x8x32xf32> -> vector<16x8x32xf32>
    "tpu.trace_stop"() : () -> ()
    %132 = vector.extract_strided_slice %131 {offsets = [0, 0, 0], sizes = [1, 8, 32], strides = [1, 1, 1]} : vector<16x8x32xf32> to vector<1x8x32xf32>
    %133 = vector.shape_cast %132 : vector<1x8x32xf32> to vector<8x32xf32>
    %134 = vector.extract_strided_slice %131 {offsets = [1, 0, 0], sizes = [1, 8, 32], strides = [1, 1, 1]} : vector<16x8x32xf32> to vector<1x8x32xf32>
    %135 = vector.shape_cast %134 : vector<1x8x32xf32> to vector<8x32xf32>
    %136 = vector.extract_strided_slice %131 {offsets = [2, 0, 0], sizes = [1, 8, 32], strides = [1, 1, 1]} : vector<16x8x32xf32> to vector<1x8x32xf32>
    %137 = vector.shape_cast %136 : vector<1x8x32xf32> to vector<8x32xf32>
    %138 = vector.extract_strided_slice %131 {offsets = [3, 0, 0], sizes = [1, 8, 32], strides = [1, 1, 1]} : vector<16x8x32xf32> to vector<1x8x32xf32>
    %139 = vector.shape_cast %138 : vector<1x8x32xf32> to vector<8x32xf32>
    %140 = vector.extract_strided_slice %131 {offsets = [4, 0, 0], sizes = [1, 8, 32], strides = [1, 1, 1]} : vector<16x8x32xf32> to vector<1x8x32xf32>
    %141 = vector.shape_cast %140 : vector<1x8x32xf32> to vector<8x32xf32>
    %142 = vector.extract_strided_slice %131 {offsets = [5, 0, 0], sizes = [1, 8, 32], strides = [1, 1, 1]} : vector<16x8x32xf32> to vector<1x8x32xf32>
    %143 = vector.shape_cast %142 : vector<1x8x32xf32> to vector<8x32xf32>
    %144 = vector.extract_strided_slice %131 {offsets = [6, 0, 0], sizes = [1, 8, 32], strides = [1, 1, 1]} : vector<16x8x32xf32> to vector<1x8x32xf32>
    %145 = vector.shape_cast %144 : vector<1x8x32xf32> to vector<8x32xf32>
    %146 = vector.extract_strided_slice %131 {offsets = [7, 0, 0], sizes = [1, 8, 32], strides = [1, 1, 1]} : vector<16x8x32xf32> to vector<1x8x32xf32>
    %147 = vector.shape_cast %146 : vector<1x8x32xf32> to vector<8x32xf32>
    %148 = tpu.concatenate %133, %135, %137, %139, %141, %143, %145, %147 in 1 : vector<8x32xf32>, vector<8x32xf32>, vector<8x32xf32>, vector<8x32xf32>, vector<8x32xf32>, vector<8x32xf32>, vector<8x32xf32>, vector<8x32xf32> -> vector<8x256xf32>
    %149 = vector.extract_strided_slice %131 {offsets = [8, 0, 0], sizes = [1, 8, 32], strides = [1, 1, 1]} : vector<16x8x32xf32> to vector<1x8x32xf32>
    %150 = vector.shape_cast %149 : vector<1x8x32xf32> to vector<8x32xf32>
    %151 = vector.extract_strided_slice %131 {offsets = [9, 0, 0], sizes = [1, 8, 32], strides = [1, 1, 1]} : vector<16x8x32xf32> to vector<1x8x32xf32>
    %152 = vector.shape_cast %151 : vector<1x8x32xf32> to vector<8x32xf32>
    %153 = vector.extract_strided_slice %131 {offsets = [10, 0, 0], sizes = [1, 8, 32], strides = [1, 1, 1]} : vector<16x8x32xf32> to vector<1x8x32xf32>
    %154 = vector.shape_cast %153 : vector<1x8x32xf32> to vector<8x32xf32>
    %155 = vector.extract_strided_slice %131 {offsets = [11, 0, 0], sizes = [1, 8, 32], strides = [1, 1, 1]} : vector<16x8x32xf32> to vector<1x8x32xf32>
    %156 = vector.shape_cast %155 : vector<1x8x32xf32> to vector<8x32xf32>
    %157 = vector.extract_strided_slice %131 {offsets = [12, 0, 0], sizes = [1, 8, 32], strides = [1, 1, 1]} : vector<16x8x32xf32> to vector<1x8x32xf32>
    %158 = vector.shape_cast %157 : vector<1x8x32xf32> to vector<8x32xf32>
    %159 = vector.extract_strided_slice %131 {offsets = [13, 0, 0], sizes = [1, 8, 32], strides = [1, 1, 1]} : vector<16x8x32xf32> to vector<1x8x32xf32>
    %160 = vector.shape_cast %159 : vector<1x8x32xf32> to vector<8x32xf32>
    %161 = vector.extract_strided_slice %131 {offsets = [14, 0, 0], sizes = [1, 8, 32], strides = [1, 1, 1]} : vector<16x8x32xf32> to vector<1x8x32xf32>
    %162 = vector.shape_cast %161 : vector<1x8x32xf32> to vector<8x32xf32>
    %163 = vector.extract_strided_slice %131 {offsets = [15, 0, 0], sizes = [1, 8, 32], strides = [1, 1, 1]} : vector<16x8x32xf32> to vector<1x8x32xf32>
    %164 = vector.shape_cast %163 : vector<1x8x32xf32> to vector<8x32xf32>
    %165 = tpu.concatenate %150, %152, %154, %156, %158, %160, %162, %164 in 1 : vector<8x32xf32>, vector<8x32xf32>, vector<8x32xf32>, vector<8x32xf32>, vector<8x32xf32>, vector<8x32xf32>, vector<8x32xf32>, vector<8x32xf32> -> vector<8x256xf32>
    %166 = tpu.concatenate %148, %165 in 0 : vector<8x256xf32>, vector<8x256xf32> -> vector<16x256xf32>
    %167 = arith.truncf %166 : vector<16x256xf32> to vector<16x256xbf16>
    %c0_34 = arith.constant 0 : index
    %c0_35 = arith.constant 0 : index
    %c0_36 = arith.constant 0 : index
    %168 = vector.load %arg5[%c0_34, %c0_35, %c0_36] : memref<1x256x256xbf16, #tpu.memory_space<vmem>>, vector<1x256x256xbf16>
    %169 = vector.shape_cast %168 : vector<1x256x256xbf16> to vector<256x256xbf16>
    %cst_37 = arith.constant dense<0.000000e+00> : vector<16x256xf32>
    %170 = tpu.matmul %167, %169, %cst_37 {dimension_numbers = #tpu.dot_dimension_numbers<[1], [0], [0], [1], [0, 0, 1, 1], [], []>} : vector<16x256xbf16>, vector<256x256xbf16>, vector<16x256xf32> -> vector<16x256xf32>
    %c0_38 = arith.constant 0 : index
    %c0_39 = arith.constant 0 : index
    %c0_40 = arith.constant 0 : index
    %171 = vector.load %arg6[%c0_38, %c0_39, %c0_40] : memref<1x1x256xf32, #tpu.memory_space<vmem>>, vector<1x1x256xf32>
    %172 = vector.shape_cast %171 : vector<1x1x256xf32> to vector<1x256xf32>
    %173 = vector.broadcast %172 : vector<1x256xf32> to vector<16x256xf32>
    %174 = arith.addf %170, %173 : vector<16x256xf32>
    %175 = arith.addf %0, %174 : vector<16x256xf32>
    %cst_41 = arith.constant dense<0.000000e+00> : vector<16xf32>
    %176 = vector.multi_reduction <add>, %175, %cst_41 [1] : vector<16x256xf32> to vector<16xf32>
    %177 = vector.shape_cast %176 : vector<16xf32> to vector<16x1xf32>
    %cst_42 = arith.constant 2.560000e+02 : f32
    %178 = vector.broadcast %cst_42 : f32 to vector<16x1xf32>
    %179 = arith.divf %177, %178 : vector<16x1xf32>
    %180 = vector.broadcast %179 : vector<16x1xf32> to vector<16x256xf32>
    %181 = arith.subf %175, %180 : vector<16x256xf32>
    %182 = arith.mulf %181, %181 : vector<16x256xf32>
    %cst_43 = arith.constant dense<0.000000e+00> : vector<16xf32>
    %183 = vector.multi_reduction <add>, %182, %cst_43 [1] : vector<16x256xf32> to vector<16xf32>
    %184 = vector.shape_cast %183 : vector<16xf32> to vector<16x1xf32>
    %cst_44 = arith.constant 2.560000e+02 : f32
    %185 = vector.broadcast %cst_44 : f32 to vector<16x1xf32>
    %186 = arith.divf %184, %185 : vector<16x1xf32>
    %cst_45 = arith.constant 9.99999974E-6 : f32
    %187 = vector.broadcast %cst_45 : f32 to vector<16x1xf32>
    %188 = arith.addf %186, %187 : vector<16x1xf32>
    %189 = math.rsqrt %188 : vector<16x1xf32>
    %190 = vector.broadcast %189 : vector<16x1xf32> to vector<16x256xf32>
    %191 = arith.mulf %181, %190 : vector<16x256xf32>
    %192 = vector.broadcast %5 : vector<1x256xf32> to vector<16x256xf32>
    %193 = arith.mulf %191, %192 : vector<16x256xf32>
    %194 = vector.broadcast %11 : vector<1x256xf32> to vector<16x256xf32>
    %195 = arith.addf %193, %194 : vector<16x256xf32>
    %196 = arith.truncf %195 : vector<16x256xf32> to vector<16x256xbf16>
    %c0_46 = arith.constant 0 : index
    %c0_47 = arith.constant 0 : index
    %c0_48 = arith.constant 0 : index
    %197 = vector.load %arg7[%c0_46, %c0_47, %c0_48] : memref<1x256x768xbf16, #tpu.memory_space<vmem>>, vector<1x256x256xbf16>
    %198 = vector.shape_cast %197 : vector<1x256x256xbf16> to vector<256x256xbf16>
    %cst_49 = arith.constant dense<0.000000e+00> : vector<16x256xf32>
    %199 = tpu.matmul %196, %198, %cst_49 {dimension_numbers = #tpu.dot_dimension_numbers<[1], [0], [0], [1], [0, 0, 1, 1], [], []>} : vector<16x256xbf16>, vector<256x256xbf16>, vector<16x256xf32> -> vector<16x256xf32>
    %c0_50 = arith.constant 0 : index
    %c0_51 = arith.constant 0 : index
    %c0_52 = arith.constant 0 : index
    %200 = vector.load %arg8[%c0_50, %c0_51, %c0_52] : memref<1x1x768xf32, #tpu.memory_space<vmem>>, vector<1x1x256xf32>
    %201 = vector.shape_cast %200 : vector<1x1x256xf32> to vector<1x256xf32>
    %202 = vector.broadcast %201 : vector<1x256xf32> to vector<16x256xf32>
    %203 = arith.addf %199, %202 : vector<16x256xf32>
    %c0_53 = arith.constant 0 : index
    %c0_54 = arith.constant 0 : index
    %c256 = arith.constant 256 : index
    %204 = vector.load %arg7[%c0_53, %c0_54, %c256] : memref<1x256x768xbf16, #tpu.memory_space<vmem>>, vector<1x256x512xbf16>
    %205 = vector.shape_cast %204 : vector<1x256x512xbf16> to vector<256x512xbf16>
    %cst_55 = arith.constant dense<0.000000e+00> : vector<32x512xf32>
    %206 = tpu.matmul %3, %205, %cst_55 {dimension_numbers = #tpu.dot_dimension_numbers<[1], [0], [0], [1], [0, 0, 1, 1], [], []>} : vector<32x256xbf16>, vector<256x512xbf16>, vector<32x512xf32> -> vector<32x512xf32>
    %c0_56 = arith.constant 0 : index
    %c0_57 = arith.constant 0 : index
    %c256_58 = arith.constant 256 : index
    %207 = vector.load %arg8[%c0_56, %c0_57, %c256_58] : memref<1x1x768xf32, #tpu.memory_space<vmem>>, vector<1x1x512xf32>
    %208 = vector.shape_cast %207 : vector<1x1x512xf32> to vector<1x512xf32>
    %209 = vector.broadcast %208 : vector<1x512xf32> to vector<32x512xf32>
    %210 = arith.addf %206, %209 : vector<32x512xf32>
    %211 = vector.extract_strided_slice %210 {offsets = [0, 0], sizes = [32, 256], strides = [1, 1]} : vector<32x512xf32> to vector<32x256xf32>
    %212 = vector.extract_strided_slice %210 {offsets = [0, 256], sizes = [32, 256], strides = [1, 1]} : vector<32x512xf32> to vector<32x256xf32>
    %213 = vector.extract_strided_slice %203 {offsets = [0, 0], sizes = [8, 32], strides = [1, 1]} : vector<16x256xf32> to vector<8x32xf32>
    %214 = vector.extract_strided_slice %203 {offsets = [0, 32], sizes = [8, 32], strides = [1, 1]} : vector<16x256xf32> to vector<8x32xf32>
    %215 = vector.extract_strided_slice %203 {offsets = [0, 64], sizes = [8, 32], strides = [1, 1]} : vector<16x256xf32> to vector<8x32xf32>
    %216 = vector.extract_strided_slice %203 {offsets = [0, 96], sizes = [8, 32], strides = [1, 1]} : vector<16x256xf32> to vector<8x32xf32>
    %217 = vector.extract_strided_slice %203 {offsets = [0, 128], sizes = [8, 32], strides = [1, 1]} : vector<16x256xf32> to vector<8x32xf32>
    %218 = vector.extract_strided_slice %203 {offsets = [0, 160], sizes = [8, 32], strides = [1, 1]} : vector<16x256xf32> to vector<8x32xf32>
    %219 = vector.extract_strided_slice %203 {offsets = [0, 192], sizes = [8, 32], strides = [1, 1]} : vector<16x256xf32> to vector<8x32xf32>
    %220 = vector.extract_strided_slice %203 {offsets = [0, 224], sizes = [8, 32], strides = [1, 1]} : vector<16x256xf32> to vector<8x32xf32>
    %221 = vector.extract_strided_slice %203 {offsets = [8, 0], sizes = [8, 32], strides = [1, 1]} : vector<16x256xf32> to vector<8x32xf32>
    %222 = vector.extract_strided_slice %203 {offsets = [8, 32], sizes = [8, 32], strides = [1, 1]} : vector<16x256xf32> to vector<8x32xf32>
    %223 = vector.extract_strided_slice %203 {offsets = [8, 64], sizes = [8, 32], strides = [1, 1]} : vector<16x256xf32> to vector<8x32xf32>
    %224 = vector.extract_strided_slice %203 {offsets = [8, 96], sizes = [8, 32], strides = [1, 1]} : vector<16x256xf32> to vector<8x32xf32>
    %225 = vector.extract_strided_slice %203 {offsets = [8, 128], sizes = [8, 32], strides = [1, 1]} : vector<16x256xf32> to vector<8x32xf32>
    %226 = vector.extract_strided_slice %203 {offsets = [8, 160], sizes = [8, 32], strides = [1, 1]} : vector<16x256xf32> to vector<8x32xf32>
    %227 = vector.extract_strided_slice %203 {offsets = [8, 192], sizes = [8, 32], strides = [1, 1]} : vector<16x256xf32> to vector<8x32xf32>
    %228 = vector.extract_strided_slice %203 {offsets = [8, 224], sizes = [8, 32], strides = [1, 1]} : vector<16x256xf32> to vector<8x32xf32>
    %229 = vector.shape_cast %213 : vector<8x32xf32> to vector<1x8x32xf32>
    %230 = vector.shape_cast %214 : vector<8x32xf32> to vector<1x8x32xf32>
    %231 = vector.shape_cast %215 : vector<8x32xf32> to vector<1x8x32xf32>
    %232 = vector.shape_cast %216 : vector<8x32xf32> to vector<1x8x32xf32>
    %233 = vector.shape_cast %217 : vector<8x32xf32> to vector<1x8x32xf32>
    %234 = vector.shape_cast %218 : vector<8x32xf32> to vector<1x8x32xf32>
    %235 = vector.shape_cast %219 : vector<8x32xf32> to vector<1x8x32xf32>
    %236 = vector.shape_cast %220 : vector<8x32xf32> to vector<1x8x32xf32>
    %237 = vector.shape_cast %221 : vector<8x32xf32> to vector<1x8x32xf32>
    %238 = vector.shape_cast %222 : vector<8x32xf32> to vector<1x8x32xf32>
    %239 = vector.shape_cast %223 : vector<8x32xf32> to vector<1x8x32xf32>
    %240 = vector.shape_cast %224 : vector<8x32xf32> to vector<1x8x32xf32>
    %241 = vector.shape_cast %225 : vector<8x32xf32> to vector<1x8x32xf32>
    %242 = vector.shape_cast %226 : vector<8x32xf32> to vector<1x8x32xf32>
    %243 = vector.shape_cast %227 : vector<8x32xf32> to vector<1x8x32xf32>
    %244 = vector.shape_cast %228 : vector<8x32xf32> to vector<1x8x32xf32>
    %245 = tpu.concatenate %229, %230, %231, %232, %233, %234, %235, %236, %237, %238, %239, %240, %241, %242, %243, %244 in 0 : vector<1x8x32xf32>, vector<1x8x32xf32>, vector<1x8x32xf32>, vector<1x8x32xf32>, vector<1x8x32xf32>, vector<1x8x32xf32>, vector<1x8x32xf32>, vector<1x8x32xf32>, vector<1x8x32xf32>, vector<1x8x32xf32>, vector<1x8x32xf32>, vector<1x8x32xf32>, vector<1x8x32xf32>, vector<1x8x32xf32>, vector<1x8x32xf32>, vector<1x8x32xf32> -> vector<16x8x32xf32>
    %246 = vector.extract_strided_slice %211 {offsets = [0, 0], sizes = [16, 32], strides = [1, 1]} : vector<32x256xf32> to vector<16x32xf32>
    %247 = vector.extract_strided_slice %211 {offsets = [0, 32], sizes = [16, 32], strides = [1, 1]} : vector<32x256xf32> to vector<16x32xf32>
    %248 = vector.extract_strided_slice %211 {offsets = [0, 64], sizes = [16, 32], strides = [1, 1]} : vector<32x256xf32> to vector<16x32xf32>
    %249 = vector.extract_strided_slice %211 {offsets = [0, 96], sizes = [16, 32], strides = [1, 1]} : vector<32x256xf32> to vector<16x32xf32>
    %250 = vector.extract_strided_slice %211 {offsets = [0, 128], sizes = [16, 32], strides = [1, 1]} : vector<32x256xf32> to vector<16x32xf32>
    %251 = vector.extract_strided_slice %211 {offsets = [0, 160], sizes = [16, 32], strides = [1, 1]} : vector<32x256xf32> to vector<16x32xf32>
    %252 = vector.extract_strided_slice %211 {offsets = [0, 192], sizes = [16, 32], strides = [1, 1]} : vector<32x256xf32> to vector<16x32xf32>
    %253 = vector.extract_strided_slice %211 {offsets = [0, 224], sizes = [16, 32], strides = [1, 1]} : vector<32x256xf32> to vector<16x32xf32>
    %254 = vector.extract_strided_slice %211 {offsets = [16, 0], sizes = [16, 32], strides = [1, 1]} : vector<32x256xf32> to vector<16x32xf32>
    %255 = vector.extract_strided_slice %211 {offsets = [16, 32], sizes = [16, 32], strides = [1, 1]} : vector<32x256xf32> to vector<16x32xf32>
    %256 = vector.extract_strided_slice %211 {offsets = [16, 64], sizes = [16, 32], strides = [1, 1]} : vector<32x256xf32> to vector<16x32xf32>
    %257 = vector.extract_strided_slice %211 {offsets = [16, 96], sizes = [16, 32], strides = [1, 1]} : vector<32x256xf32> to vector<16x32xf32>
    %258 = vector.extract_strided_slice %211 {offsets = [16, 128], sizes = [16, 32], strides = [1, 1]} : vector<32x256xf32> to vector<16x32xf32>
    %259 = vector.extract_strided_slice %211 {offsets = [16, 160], sizes = [16, 32], strides = [1, 1]} : vector<32x256xf32> to vector<16x32xf32>
    %260 = vector.extract_strided_slice %211 {offsets = [16, 192], sizes = [16, 32], strides = [1, 1]} : vector<32x256xf32> to vector<16x32xf32>
    %261 = vector.extract_strided_slice %211 {offsets = [16, 224], sizes = [16, 32], strides = [1, 1]} : vector<32x256xf32> to vector<16x32xf32>
    %262 = vector.shape_cast %246 : vector<16x32xf32> to vector<1x16x32xf32>
    %263 = vector.shape_cast %247 : vector<16x32xf32> to vector<1x16x32xf32>
    %264 = vector.shape_cast %248 : vector<16x32xf32> to vector<1x16x32xf32>
    %265 = vector.shape_cast %249 : vector<16x32xf32> to vector<1x16x32xf32>
    %266 = vector.shape_cast %250 : vector<16x32xf32> to vector<1x16x32xf32>
    %267 = vector.shape_cast %251 : vector<16x32xf32> to vector<1x16x32xf32>
    %268 = vector.shape_cast %252 : vector<16x32xf32> to vector<1x16x32xf32>
    %269 = vector.shape_cast %253 : vector<16x32xf32> to vector<1x16x32xf32>
    %270 = vector.shape_cast %254 : vector<16x32xf32> to vector<1x16x32xf32>
    %271 = vector.shape_cast %255 : vector<16x32xf32> to vector<1x16x32xf32>
    %272 = vector.shape_cast %256 : vector<16x32xf32> to vector<1x16x32xf32>
    %273 = vector.shape_cast %257 : vector<16x32xf32> to vector<1x16x32xf32>
    %274 = vector.shape_cast %258 : vector<16x32xf32> to vector<1x16x32xf32>
    %275 = vector.shape_cast %259 : vector<16x32xf32> to vector<1x16x32xf32>
    %276 = vector.shape_cast %260 : vector<16x32xf32> to vector<1x16x32xf32>
    %277 = vector.shape_cast %261 : vector<16x32xf32> to vector<1x16x32xf32>
    %278 = tpu.concatenate %262, %263, %264, %265, %266, %267, %268, %269, %270, %271, %272, %273, %274, %275, %276, %277 in 0 : vector<1x16x32xf32>, vector<1x16x32xf32>, vector<1x16x32xf32>, vector<1x16x32xf32>, vector<1x16x32xf32>, vector<1x16x32xf32>, vector<1x16x32xf32>, vector<1x16x32xf32>, vector<1x16x32xf32>, vector<1x16x32xf32>, vector<1x16x32xf32>, vector<1x16x32xf32>, vector<1x16x32xf32>, vector<1x16x32xf32>, vector<1x16x32xf32>, vector<1x16x32xf32> -> vector<16x16x32xf32>
    %279 = vector.extract_strided_slice %212 {offsets = [0, 0], sizes = [16, 32], strides = [1, 1]} : vector<32x256xf32> to vector<16x32xf32>
    %280 = vector.extract_strided_slice %212 {offsets = [0, 32], sizes = [16, 32], strides = [1, 1]} : vector<32x256xf32> to vector<16x32xf32>
    %281 = vector.extract_strided_slice %212 {offsets = [0, 64], sizes = [16, 32], strides = [1, 1]} : vector<32x256xf32> to vector<16x32xf32>
    %282 = vector.extract_strided_slice %212 {offsets = [0, 96], sizes = [16, 32], strides = [1, 1]} : vector<32x256xf32> to vector<16x32xf32>
    %283 = vector.extract_strided_slice %212 {offsets = [0, 128], sizes = [16, 32], strides = [1, 1]} : vector<32x256xf32> to vector<16x32xf32>
    %284 = vector.extract_strided_slice %212 {offsets = [0, 160], sizes = [16, 32], strides = [1, 1]} : vector<32x256xf32> to vector<16x32xf32>
    %285 = vector.extract_strided_slice %212 {offsets = [0, 192], sizes = [16, 32], strides = [1, 1]} : vector<32x256xf32> to vector<16x32xf32>
    %286 = vector.extract_strided_slice %212 {offsets = [0, 224], sizes = [16, 32], strides = [1, 1]} : vector<32x256xf32> to vector<16x32xf32>
    %287 = vector.extract_strided_slice %212 {offsets = [16, 0], sizes = [16, 32], strides = [1, 1]} : vector<32x256xf32> to vector<16x32xf32>
    %288 = vector.extract_strided_slice %212 {offsets = [16, 32], sizes = [16, 32], strides = [1, 1]} : vector<32x256xf32> to vector<16x32xf32>
    %289 = vector.extract_strided_slice %212 {offsets = [16, 64], sizes = [16, 32], strides = [1, 1]} : vector<32x256xf32> to vector<16x32xf32>
    %290 = vector.extract_strided_slice %212 {offsets = [16, 96], sizes = [16, 32], strides = [1, 1]} : vector<32x256xf32> to vector<16x32xf32>
    %291 = vector.extract_strided_slice %212 {offsets = [16, 128], sizes = [16, 32], strides = [1, 1]} : vector<32x256xf32> to vector<16x32xf32>
    %292 = vector.extract_strided_slice %212 {offsets = [16, 160], sizes = [16, 32], strides = [1, 1]} : vector<32x256xf32> to vector<16x32xf32>
    %293 = vector.extract_strided_slice %212 {offsets = [16, 192], sizes = [16, 32], strides = [1, 1]} : vector<32x256xf32> to vector<16x32xf32>
    %294 = vector.extract_strided_slice %212 {offsets = [16, 224], sizes = [16, 32], strides = [1, 1]} : vector<32x256xf32> to vector<16x32xf32>
    %295 = vector.shape_cast %279 : vector<16x32xf32> to vector<1x16x32xf32>
    %296 = vector.shape_cast %280 : vector<16x32xf32> to vector<1x16x32xf32>
    %297 = vector.shape_cast %281 : vector<16x32xf32> to vector<1x16x32xf32>
    %298 = vector.shape_cast %282 : vector<16x32xf32> to vector<1x16x32xf32>
    %299 = vector.shape_cast %283 : vector<16x32xf32> to vector<1x16x32xf32>
    %300 = vector.shape_cast %284 : vector<16x32xf32> to vector<1x16x32xf32>
    %301 = vector.shape_cast %285 : vector<16x32xf32> to vector<1x16x32xf32>
    %302 = vector.shape_cast %286 : vector<16x32xf32> to vector<1x16x32xf32>
    %303 = vector.shape_cast %287 : vector<16x32xf32> to vector<1x16x32xf32>
    %304 = vector.shape_cast %288 : vector<16x32xf32> to vector<1x16x32xf32>
    %305 = vector.shape_cast %289 : vector<16x32xf32> to vector<1x16x32xf32>
    %306 = vector.shape_cast %290 : vector<16x32xf32> to vector<1x16x32xf32>
    %307 = vector.shape_cast %291 : vector<16x32xf32> to vector<1x16x32xf32>
    %308 = vector.shape_cast %292 : vector<16x32xf32> to vector<1x16x32xf32>
    %309 = vector.shape_cast %293 : vector<16x32xf32> to vector<1x16x32xf32>
    %310 = vector.shape_cast %294 : vector<16x32xf32> to vector<1x16x32xf32>
    %311 = tpu.concatenate %295, %296, %297, %298, %299, %300, %301, %302, %303, %304, %305, %306, %307, %308, %309, %310 in 0 : vector<1x16x32xf32>, vector<1x16x32xf32>, vector<1x16x32xf32>, vector<1x16x32xf32>, vector<1x16x32xf32>, vector<1x16x32xf32>, vector<1x16x32xf32>, vector<1x16x32xf32>, vector<1x16x32xf32>, vector<1x16x32xf32>, vector<1x16x32xf32>, vector<1x16x32xf32>, vector<1x16x32xf32>, vector<1x16x32xf32>, vector<1x16x32xf32>, vector<1x16x32xf32> -> vector<16x16x32xf32>
    "tpu.trace_start"() <{level = 10 : i32, message = "gqd,gkd->gqk"}> : () -> ()
    %cst_59 = arith.constant dense<0.000000e+00> : vector<16x8x16xf32>
    %312 = tpu.matmul %245, %278, %cst_59 {dimension_numbers = #tpu.dot_dimension_numbers<[2], [2], [1], [1], [0, 0, 0, 1, 1, 1], [0], [0]>} : vector<16x8x32xf32>, vector<16x16x32xf32>, vector<16x8x16xf32> -> vector<16x8x16xf32>
    "tpu.trace_stop"() : () -> ()
    %313 = math.exp %312 : vector<16x8x16xf32>
    %cst_60 = arith.constant dense<0.000000e+00> : vector<16x8xf32>
    %314 = vector.multi_reduction <add>, %313, %cst_60 [2] : vector<16x8x16xf32> to vector<16x8xf32>
    %315 = vector.shape_cast %314 : vector<16x8xf32> to vector<16x8x1xf32>
    %316 = vector.broadcast %315 : vector<16x8x1xf32> to vector<16x8x16xf32>
    %317 = arith.divf %313, %316 : vector<16x8x16xf32>
    "tpu.trace_start"() <{level = 10 : i32, message = "gqk,gkd->gqd"}> : () -> ()
    %cst_61 = arith.constant dense<0.000000e+00> : vector<16x8x32xf32>
    %318 = tpu.matmul %317, %311, %cst_61 {dimension_numbers = #tpu.dot_dimension_numbers<[2], [1], [1], [2], [0, 0, 0, 1, 1, 2], [0], [0]>} : vector<16x8x16xf32>, vector<16x16x32xf32>, vector<16x8x32xf32> -> vector<16x8x32xf32>
    "tpu.trace_stop"() : () -> ()
    %319 = vector.extract_strided_slice %318 {offsets = [0, 0, 0], sizes = [1, 8, 32], strides = [1, 1, 1]} : vector<16x8x32xf32> to vector<1x8x32xf32>
    %320 = vector.shape_cast %319 : vector<1x8x32xf32> to vector<8x32xf32>
    %321 = vector.extract_strided_slice %318 {offsets = [1, 0, 0], sizes = [1, 8, 32], strides = [1, 1, 1]} : vector<16x8x32xf32> to vector<1x8x32xf32>
    %322 = vector.shape_cast %321 : vector<1x8x32xf32> to vector<8x32xf32>
    %323 = vector.extract_strided_slice %318 {offsets = [2, 0, 0], sizes = [1, 8, 32], strides = [1, 1, 1]} : vector<16x8x32xf32> to vector<1x8x32xf32>
    %324 = vector.shape_cast %323 : vector<1x8x32xf32> to vector<8x32xf32>
    %325 = vector.extract_strided_slice %318 {offsets = [3, 0, 0], sizes = [1, 8, 32], strides = [1, 1, 1]} : vector<16x8x32xf32> to vector<1x8x32xf32>
    %326 = vector.shape_cast %325 : vector<1x8x32xf32> to vector<8x32xf32>
    %327 = vector.extract_strided_slice %318 {offsets = [4, 0, 0], sizes = [1, 8, 32], strides = [1, 1, 1]} : vector<16x8x32xf32> to vector<1x8x32xf32>
    %328 = vector.shape_cast %327 : vector<1x8x32xf32> to vector<8x32xf32>
    %329 = vector.extract_strided_slice %318 {offsets = [5, 0, 0], sizes = [1, 8, 32], strides = [1, 1, 1]} : vector<16x8x32xf32> to vector<1x8x32xf32>
    %330 = vector.shape_cast %329 : vector<1x8x32xf32> to vector<8x32xf32>
    %331 = vector.extract_strided_slice %318 {offsets = [6, 0, 0], sizes = [1, 8, 32], strides = [1, 1, 1]} : vector<16x8x32xf32> to vector<1x8x32xf32>
    %332 = vector.shape_cast %331 : vector<1x8x32xf32> to vector<8x32xf32>
    %333 = vector.extract_strided_slice %318 {offsets = [7, 0, 0], sizes = [1, 8, 32], strides = [1, 1, 1]} : vector<16x8x32xf32> to vector<1x8x32xf32>
    %334 = vector.shape_cast %333 : vector<1x8x32xf32> to vector<8x32xf32>
    %335 = tpu.concatenate %320, %322, %324, %326, %328, %330, %332, %334 in 1 : vector<8x32xf32>, vector<8x32xf32>, vector<8x32xf32>, vector<8x32xf32>, vector<8x32xf32>, vector<8x32xf32>, vector<8x32xf32>, vector<8x32xf32> -> vector<8x256xf32>
    %336 = vector.extract_strided_slice %318 {offsets = [8, 0, 0], sizes = [1, 8, 32], strides = [1, 1, 1]} : vector<16x8x32xf32> to vector<1x8x32xf32>
    %337 = vector.shape_cast %336 : vector<1x8x32xf32> to vector<8x32xf32>
    %338 = vector.extract_strided_slice %318 {offsets = [9, 0, 0], sizes = [1, 8, 32], strides = [1, 1, 1]} : vector<16x8x32xf32> to vector<1x8x32xf32>
    %339 = vector.shape_cast %338 : vector<1x8x32xf32> to vector<8x32xf32>
    %340 = vector.extract_strided_slice %318 {offsets = [10, 0, 0], sizes = [1, 8, 32], strides = [1, 1, 1]} : vector<16x8x32xf32> to vector<1x8x32xf32>
    %341 = vector.shape_cast %340 : vector<1x8x32xf32> to vector<8x32xf32>
    %342 = vector.extract_strided_slice %318 {offsets = [11, 0, 0], sizes = [1, 8, 32], strides = [1, 1, 1]} : vector<16x8x32xf32> to vector<1x8x32xf32>
    %343 = vector.shape_cast %342 : vector<1x8x32xf32> to vector<8x32xf32>
    %344 = vector.extract_strided_slice %318 {offsets = [12, 0, 0], sizes = [1, 8, 32], strides = [1, 1, 1]} : vector<16x8x32xf32> to vector<1x8x32xf32>
    %345 = vector.shape_cast %344 : vector<1x8x32xf32> to vector<8x32xf32>
    %346 = vector.extract_strided_slice %318 {offsets = [13, 0, 0], sizes = [1, 8, 32], strides = [1, 1, 1]} : vector<16x8x32xf32> to vector<1x8x32xf32>
    %347 = vector.shape_cast %346 : vector<1x8x32xf32> to vector<8x32xf32>
    %348 = vector.extract_strided_slice %318 {offsets = [14, 0, 0], sizes = [1, 8, 32], strides = [1, 1, 1]} : vector<16x8x32xf32> to vector<1x8x32xf32>
    %349 = vector.shape_cast %348 : vector<1x8x32xf32> to vector<8x32xf32>
    %350 = vector.extract_strided_slice %318 {offsets = [15, 0, 0], sizes = [1, 8, 32], strides = [1, 1, 1]} : vector<16x8x32xf32> to vector<1x8x32xf32>
    %351 = vector.shape_cast %350 : vector<1x8x32xf32> to vector<8x32xf32>
    %352 = tpu.concatenate %337, %339, %341, %343, %345, %347, %349, %351 in 1 : vector<8x32xf32>, vector<8x32xf32>, vector<8x32xf32>, vector<8x32xf32>, vector<8x32xf32>, vector<8x32xf32>, vector<8x32xf32>, vector<8x32xf32> -> vector<8x256xf32>
    %353 = tpu.concatenate %335, %352 in 0 : vector<8x256xf32>, vector<8x256xf32> -> vector<16x256xf32>
    %354 = arith.truncf %353 : vector<16x256xf32> to vector<16x256xbf16>
    %c0_62 = arith.constant 0 : index
    %c0_63 = arith.constant 0 : index
    %c0_64 = arith.constant 0 : index
    %355 = vector.load %arg9[%c0_62, %c0_63, %c0_64] : memref<1x256x256xbf16, #tpu.memory_space<vmem>>, vector<1x256x256xbf16>
    %356 = vector.shape_cast %355 : vector<1x256x256xbf16> to vector<256x256xbf16>
    %cst_65 = arith.constant dense<0.000000e+00> : vector<16x256xf32>
    %357 = tpu.matmul %354, %356, %cst_65 {dimension_numbers = #tpu.dot_dimension_numbers<[1], [0], [0], [1], [0, 0, 1, 1], [], []>} : vector<16x256xbf16>, vector<256x256xbf16>, vector<16x256xf32> -> vector<16x256xf32>
    %c0_66 = arith.constant 0 : index
    %c0_67 = arith.constant 0 : index
    %c0_68 = arith.constant 0 : index
    %358 = vector.load %arg10[%c0_66, %c0_67, %c0_68] : memref<1x1x256xf32, #tpu.memory_space<vmem>>, vector<1x1x256xf32>
    %359 = vector.shape_cast %358 : vector<1x1x256xf32> to vector<1x256xf32>
    %360 = vector.broadcast %359 : vector<1x256xf32> to vector<16x256xf32>
    %361 = arith.addf %357, %360 : vector<16x256xf32>
    %362 = arith.addf %195, %361 : vector<16x256xf32>
    %cst_69 = arith.constant dense<0.000000e+00> : vector<16xf32>
    %363 = vector.multi_reduction <add>, %362, %cst_69 [1] : vector<16x256xf32> to vector<16xf32>
    %364 = vector.shape_cast %363 : vector<16xf32> to vector<16x1xf32>
    %cst_70 = arith.constant 2.560000e+02 : f32
    %365 = vector.broadcast %cst_70 : f32 to vector<16x1xf32>
    %366 = arith.divf %364, %365 : vector<16x1xf32>
    %367 = vector.broadcast %366 : vector<16x1xf32> to vector<16x256xf32>
    %368 = arith.subf %362, %367 : vector<16x256xf32>
    %369 = arith.mulf %368, %368 : vector<16x256xf32>
    %cst_71 = arith.constant dense<0.000000e+00> : vector<16xf32>
    %370 = vector.multi_reduction <add>, %369, %cst_71 [1] : vector<16x256xf32> to vector<16xf32>
    %371 = vector.shape_cast %370 : vector<16xf32> to vector<16x1xf32>
    %cst_72 = arith.constant 2.560000e+02 : f32
    %372 = vector.broadcast %cst_72 : f32 to vector<16x1xf32>
    %373 = arith.divf %371, %372 : vector<16x1xf32>
    %cst_73 = arith.constant 9.99999974E-6 : f32
    %374 = vector.broadcast %cst_73 : f32 to vector<16x1xf32>
    %375 = arith.addf %373, %374 : vector<16x1xf32>
    %376 = math.rsqrt %375 : vector<16x1xf32>
    %377 = vector.broadcast %376 : vector<16x1xf32> to vector<16x256xf32>
    %378 = arith.mulf %368, %377 : vector<16x256xf32>
    %379 = vector.broadcast %7 : vector<1x256xf32> to vector<16x256xf32>
    %380 = arith.mulf %378, %379 : vector<16x256xf32>
    %381 = vector.broadcast %13 : vector<1x256xf32> to vector<16x256xf32>
    %382 = arith.addf %380, %381 : vector<16x256xf32>
    %383 = arith.truncf %382 : vector<16x256xf32> to vector<16x256xbf16>
    %c0_74 = arith.constant 0 : index
    %c0_75 = arith.constant 0 : index
    %c0_76 = arith.constant 0 : index
    %384 = vector.load %arg13[%c0_74, %c0_75, %c0_76] : memref<1x256x1024xbf16, #tpu.memory_space<vmem>>, vector<1x256x1024xbf16>
    %385 = vector.shape_cast %384 : vector<1x256x1024xbf16> to vector<256x1024xbf16>
    %cst_77 = arith.constant dense<0.000000e+00> : vector<16x1024xf32>
    %386 = tpu.matmul %383, %385, %cst_77 {dimension_numbers = #tpu.dot_dimension_numbers<[1], [0], [0], [1], [0, 0, 1, 1], [], []>} : vector<16x256xbf16>, vector<256x1024xbf16>, vector<16x1024xf32> -> vector<16x1024xf32>
    %c0_78 = arith.constant 0 : index
    %c0_79 = arith.constant 0 : index
    %c0_80 = arith.constant 0 : index
    %387 = vector.load %arg14[%c0_78, %c0_79, %c0_80] : memref<1x1x1024xf32, #tpu.memory_space<vmem>>, vector<1x1x1024xf32>
    %388 = vector.shape_cast %387 : vector<1x1x1024xf32> to vector<1x1024xf32>
    %389 = vector.broadcast %388 : vector<1x1024xf32> to vector<16x1024xf32>
    %390 = arith.addf %386, %389 : vector<16x1024xf32>
    %cst_81 = arith.constant 5.000000e-01 : f32
    %391 = vector.broadcast %cst_81 : f32 to vector<16x1024xf32>
    %392 = arith.mulf %391, %390 : vector<16x1024xf32>
    %393 = arith.mulf %390, %390 : vector<16x1024xf32>
    %394 = arith.mulf %393, %390 : vector<16x1024xf32>
    %cst_82 = arith.constant 4.471500e-02 : f32
    %395 = vector.broadcast %cst_82 : f32 to vector<16x1024xf32>
    %396 = arith.mulf %395, %394 : vector<16x1024xf32>
    %397 = arith.addf %390, %396 : vector<16x1024xf32>
    %cst_83 = arith.constant 0.797884583 : f32
    %398 = vector.broadcast %cst_83 : f32 to vector<16x1024xf32>
    %399 = arith.mulf %398, %397 : vector<16x1024xf32>
    %400 = math.tanh %399 : vector<16x1024xf32>
    %cst_84 = arith.constant 1.000000e+00 : f32
    %401 = vector.broadcast %cst_84 : f32 to vector<16x1024xf32>
    %402 = arith.addf %401, %400 : vector<16x1024xf32>
    %403 = arith.mulf %392, %402 : vector<16x1024xf32>
    %404 = arith.truncf %403 : vector<16x1024xf32> to vector<16x1024xbf16>
    %c0_85 = arith.constant 0 : index
    %c0_86 = arith.constant 0 : index
    %c0_87 = arith.constant 0 : index
    %405 = vector.load %arg15[%c0_85, %c0_86, %c0_87] : memref<1x1024x256xbf16, #tpu.memory_space<vmem>>, vector<1x1024x256xbf16>
    %406 = vector.shape_cast %405 : vector<1x1024x256xbf16> to vector<1024x256xbf16>
    %cst_88 = arith.constant dense<0.000000e+00> : vector<16x256xf32>
    %407 = tpu.matmul %404, %406, %cst_88 {dimension_numbers = #tpu.dot_dimension_numbers<[1], [0], [0], [1], [0, 0, 1, 1], [], []>} : vector<16x1024xbf16>, vector<1024x256xbf16>, vector<16x256xf32> -> vector<16x256xf32>
    %c0_89 = arith.constant 0 : index
    %c0_90 = arith.constant 0 : index
    %c0_91 = arith.constant 0 : index
    %408 = vector.load %arg16[%c0_89, %c0_90, %c0_91] : memref<1x1x256xf32, #tpu.memory_space<vmem>>, vector<1x1x256xf32>
    %409 = vector.shape_cast %408 : vector<1x1x256xf32> to vector<1x256xf32>
    %410 = vector.broadcast %409 : vector<1x256xf32> to vector<16x256xf32>
    %411 = arith.addf %407, %410 : vector<16x256xf32>
    %412 = arith.addf %382, %411 : vector<16x256xf32>
    %cst_92 = arith.constant dense<0.000000e+00> : vector<16xf32>
    %413 = vector.multi_reduction <add>, %412, %cst_92 [1] : vector<16x256xf32> to vector<16xf32>
    %414 = vector.shape_cast %413 : vector<16xf32> to vector<16x1xf32>
    %cst_93 = arith.constant 2.560000e+02 : f32
    %415 = vector.broadcast %cst_93 : f32 to vector<16x1xf32>
    %416 = arith.divf %414, %415 : vector<16x1xf32>
    %417 = vector.broadcast %416 : vector<16x1xf32> to vector<16x256xf32>
    %418 = arith.subf %412, %417 : vector<16x256xf32>
    %419 = arith.mulf %418, %418 : vector<16x256xf32>
    %cst_94 = arith.constant dense<0.000000e+00> : vector<16xf32>
    %420 = vector.multi_reduction <add>, %419, %cst_94 [1] : vector<16x256xf32> to vector<16xf32>
    %421 = vector.shape_cast %420 : vector<16xf32> to vector<16x1xf32>
    %cst_95 = arith.constant 2.560000e+02 : f32
    %422 = vector.broadcast %cst_95 : f32 to vector<16x1xf32>
    %423 = arith.divf %421, %422 : vector<16x1xf32>
    %cst_96 = arith.constant 9.99999974E-6 : f32
    %424 = vector.broadcast %cst_96 : f32 to vector<16x1xf32>
    %425 = arith.addf %423, %424 : vector<16x1xf32>
    %426 = math.rsqrt %425 : vector<16x1xf32>
    %427 = vector.broadcast %426 : vector<16x1xf32> to vector<16x256xf32>
    %428 = arith.mulf %418, %427 : vector<16x256xf32>
    %429 = vector.broadcast %9 : vector<1x256xf32> to vector<16x256xf32>
    %430 = arith.mulf %428, %429 : vector<16x256xf32>
    %431 = vector.broadcast %15 : vector<1x256xf32> to vector<16x256xf32>
    %432 = arith.addf %430, %431 : vector<16x256xf32>
    %c0_97 = arith.constant 0 : index
    %c0_98 = arith.constant 0 : index
    %433 = vector.load %arg17[%c0_97, %c0_98] : memref<16x256xf32, #tpu.memory_space<vmem>>, vector<16x256xf32>
    tpu.vector_store %arg17[%c0_97, %c0_98], %432 {strides = array<i32>} : memref<16x256xf32, #tpu.memory_space<vmem>>, vector<16x256xf32>,
    return
  }
  func.func @transform_0(%arg0: i32) -> (i32, i32) {
    %c0_i32 = arith.constant 0 : i32
    %c0_i32_0 = arith.constant 0 : i32
    %c0_i32_1 = arith.constant 0 : i32
    return %c0_i32, %c0_i32_0 : i32, i32
  }
  func.func @transform_1(%arg0: i32) -> (i32, i32) {
    %c0_i32 = arith.constant 0 : i32
    %c0_i32_0 = arith.constant 0 : i32
    %c0_i32_1 = arith.constant 0 : i32
    return %c0_i32, %c0_i32_0 : i32, i32
  }
  func.func @transform_2(%arg0: i32) -> (i32, i32, i32) {
    %c0_i32 = arith.constant 0 : i32
    %c0_i32_0 = arith.constant 0 : i32
    %c0_i32_1 = arith.constant 0 : i32
    return %arg0, %c0_i32, %c0_i32_0 : i32, i32, i32
  }
  func.func @transform_3(%arg0: i32) -> (i32, i32, i32) {
    %c0_i32 = arith.constant 0 : i32
    %c0_i32_0 = arith.constant 0 : i32
    %c0_i32_1 = arith.constant 0 : i32
    return %arg0, %c0_i32, %c0_i32_0 : i32, i32, i32
  }
  func.func @transform_4(%arg0: i32) -> (i32, i32, i32) {
    %c0_i32 = arith.constant 0 : i32
    %c0_i32_0 = arith.constant 0 : i32
    %c0_i32_1 = arith.constant 0 : i32
    return %arg0, %c0_i32, %c0_i32_0 : i32, i32, i32
  }
  func.func @transform_5(%arg0: i32) -> (i32, i32, i32) {
    %c0_i32 = arith.constant 0 : i32
    %c0_i32_0 = arith.constant 0 : i32
    %c0_i32_1 = arith.constant 0 : i32
    return %arg0, %c0_i32, %c0_i32_0 : i32, i32, i32
  }
  func.func @transform_6(%arg0: i32) -> (i32, i32, i32) {
    %c0_i32 = arith.constant 0 : i32
    %c0_i32_0 = arith.constant 0 : i32
    %c0_i32_1 = arith.constant 0 : i32
    return %arg0, %c0_i32, %c0_i32_0 : i32, i32, i32
  }
  func.func @transform_7(%arg0: i32) -> (i32, i32, i32) {
    %c0_i32 = arith.constant 0 : i32
    %c0_i32_0 = arith.constant 0 : i32
    %c0_i32_1 = arith.constant 0 : i32
    return %arg0, %c0_i32, %c0_i32_0 : i32, i32, i32
  }
  func.func @transform_8(%arg0: i32) -> (i32, i32, i32) {
    %c0_i32 = arith.constant 0 : i32
    %c0_i32_0 = arith.constant 0 : i32
    %c0_i32_1 = arith.constant 0 : i32
    return %arg0, %c0_i32, %c0_i32_0 : i32, i32, i32
  }
  func.func @transform_9(%arg0: i32) -> (i32, i32, i32) {
    %c0_i32 = arith.constant 0 : i32
    %c0_i32_0 = arith.constant 0 : i32
    %c0_i32_1 = arith.constant 0 : i32
    return %arg0, %c0_i32, %c0_i32_0 : i32, i32, i32
  }
  func.func @transform_10(%arg0: i32) -> (i32, i32, i32, i32) {
    %c0_i32 = arith.constant 0 : i32
    %c0_i32_0 = arith.constant 0 : i32
    %c0_i32_1 = arith.constant 0 : i32
    %c0_i32_2 = arith.constant 0 : i32
    return %arg0, %c0_i32, %c0_i32_0, %c0_i32_1 : i32, i32, i32, i32
  }
  func.func @transform_11(%arg0: i32) -> (i32, i32, i32, i32) {
    %c0_i32 = arith.constant 0 : i32
    %c0_i32_0 = arith.constant 0 : i32
    %c0_i32_1 = arith.constant 0 : i32
    %c0_i32_2 = arith.constant 0 : i32
    return %arg0, %c0_i32, %c0_i32_0, %c0_i32_1 : i32, i32, i32, i32
  }
  func.func @transform_12(%arg0: i32) -> (i32, i32, i32) {
    %c0_i32 = arith.constant 0 : i32
    %c0_i32_0 = arith.constant 0 : i32
    %c0_i32_1 = arith.constant 0 : i32
    return %arg0, %c0_i32, %c0_i32_0 : i32, i32, i32
  }
  func.func @transform_13(%arg0: i32) -> (i32, i32, i32) {
    %c0_i32 = arith.constant 0 : i32
    %c0_i32_0 = arith.constant 0 : i32
    %c0_i32_1 = arith.constant 0 : i32
    return %arg0, %c0_i32, %c0_i32_0 : i32, i32, i32
  }
  func.func @transform_14(%arg0: i32) -> (i32, i32, i32) {
    %c0_i32 = arith.constant 0 : i32
    %c0_i32_0 = arith.constant 0 : i32
    %c0_i32_1 = arith.constant 0 : i32
    return %arg0, %c0_i32, %c0_i32_0 : i32, i32, i32
  }
  func.func @transform_15(%arg0: i32) -> (i32, i32, i32) {
    %c0_i32 = arith.constant 0 : i32
    %c0_i32_0 = arith.constant 0 : i32
    %c0_i32_1 = arith.constant 0 : i32
    return %arg0, %c0_i32, %c0_i32_0 : i32, i32, i32
  }
  func.func @transform_16(%arg0: i32) -> (i32, i32) {
    %c0_i32 = arith.constant 0 : i32
    %c0_i32_0 = arith.constant 0 : i32
    %c0_i32_1 = arith.constant 0 : i32
    return %c0_i32, %c0_i32_0 : i32, i32
  }
}

</mosaic_0001>

<bundles_post_ra>
// kernel: tpu_custom_call.1
= control target key start
LH: loop header
LB: loop body
LE: loop exit
PB: predicated region body
PF: predicated region fallthrough
CT: control target
= control target key end

     0   :  { %s16095_s0 = inlined_call_operand.hbm [shape: f32[16,256], index: 0, kind: input, shape index: {}]   ;;  %s16096_s1 = inlined_call_operand.hbm [shape: f32[32,256], index: 1, kind: input, shape index: {}]   ;;  %s16097_s2 = inlined_call_operand.hbm [shape: bf16[2,256,768], index: 2, kind: input, shape index: {}]   ;;  %s16098_s3 = inlined_call_operand.hbm [shape: f32[2,1,768], index: 3, kind: input, shape index: {}]   ;;  %s16099_s4 = inlined_call_operand.hbm [shape: bf16[2,256,256], index: 4, kind: input, shape index: {}]   ;;  %s16100_s5 = inlined_call_operand.hbm [shape: f32[2,1,256], index: 5, kind: input, shape index: {}]   ;;  %s16101_s6 = inlined_call_operand.hbm [shape: bf16[2,256,768], index: 6, kind: input, shape index: {}]   ;;  %s16102_s7 = inlined_call_operand.vmem [shape: f32[2,1,768], index: 7, kind: input, shape index: {}]   ;;  %s16103_s8 = inlined_call_operand.hbm [shape: bf16[2,256,256], index: 8, kind: input, shape index: {}]   ;;  %s16104_s9 = inlined_call_operand.hbm [shape: f32[2,1,256], index: 9, kind: input, shape index: {}]   ;;  %s16105_s10 = inlined_call_operand.hbm [shape: f32[2,3,1,256], index: 10, kind: input, shape index: {}]   ;;  %s16106_s11 = inlined_call_operand.vmem [shape: f32[2,3,1,256], index: 11, kind: input, shape index: {}]   ;;  %s16107_s12 = inlined_call_operand.hbm [shape: bf16[2,256,1024], index: 12, kind: input, shape index: {}]   ;;  %s16108_s13 = inlined_call_operand.vmem [shape: f32[2,1,1024], index: 13, kind: input, shape index: {}]   ;;  %s16109_s14 = inlined_call_operand.hbm [shape: bf16[2,1024,256], index: 14, kind: input, shape index: {}]   ;;  %s16110_s15 = inlined_call_operand.vmem [shape: f32[2,1,256], index: 15, kind: input, shape index: {}]   ;;  %s16111_s16 = inlined_call_operand.hbm [shape: f32[16,256], index: 16, kind: output, shape index: {}]  }
   0x1   :  { %16151 = sst [smem:[#allocation29_spill]] %s16095_s0 }
   0x2   :  { %16152 = sst [smem:[#allocation30_spill]] %s16097_s2 }
   0x3   :  { %16153 = sst [smem:[#allocation31_spill]] %s16098_s3 }
   0x4   :  { %16154 = sst [smem:[#allocation32_spill]] %s16099_s4 }
   0x5   :  { %16155 = sst [smem:[#allocation33_spill]] %s16102_s7 }
   0x6   :  { %16156 = sst [smem:[#allocation34_spill]] %s16106_s11 }
   0x7   :  { %16157 = sst [smem:[#allocation35_spill]] %s16108_s13 }
   0x8   :  { %16158 = sst [smem:[#allocation36_spill]] %s16110_s15 }
   0x9   :  { %16159 = sst [smem:[#allocation37_spill]] %s16111_s16 }
   0xa   :  { %21 = vsyncpa [#allocation3], 0 }
   0xb   :  { %22 = vsyncpa [#allocation6], 0 }
   0xc   :  { %23 = vsyncpa [#allocation4], 0  ;;  %s13881_s21 = smov 0   ;;  %s13883_s22 = smov 0  }
   0xd   :  { %s13885_s23 = smov 0   ;;  %s13887_s24 = smov 0  }
   0xe LB: > { %16160 = sst [smem:[#allocation22_spill]] %s13756_s22  ;;  %s13900_s25 = sadd.s32 4294967295, %s13764_s24   ;;  %s13764_s24 = sphi %s13887_s24, %s16217_s24   ;;  %s13760_s23 = sphi %s13885_s23, %s16220_s23   ;;  %s13756_s22 = sphi %s13883_s22, %s16219_s22   ;;  %s13752_s21 = sphi %s13881_s21, %s16218_s21  }
   0xf   : > { %16161 = sst [smem:[#allocation23_spill]] %s13760_s23  ;;  %s13903_s26 = sadd.s32 1, %s13764_s24  }
  0x10   : > { %16162 = sst [smem:[#allocation24_spill]] %s13900_s25  ;;  %s75_s27 = ssub.s32 %s13764_s24, %s13903_s26 }
  0x11   : > { %16163 = sst [smem:[#allocation25_spill]] %s13903_s26  ;;  %s78_s28 = sadd.s32 1, %s13760_s23 }
  0x12   : > { %p76_p0 = scmp.eq.s32.totalorder %s75_s27, 0  ;;  %p85_p1 = scmp.ne.s32.totalorder %s13760_s23, %s13756_s22 }
  0x13   : > { %p86_p2 = scmp.eq.s32.totalorder %s13764_s24, 0  ;;  %p91_p3 = scmp.ne.s32.totalorder %s13756_s22, %s13752_s21 }
  0x14   : > { %s13913_s29 = scalar_select %p76_p0, %s13760_s23, %s78_s28  }
  0x15   : > { %p13915_p4 = por %p86_p2, %p85_p1  ;;  %p16117_p5 = scmp.eq.s32.totalorder %s13900_s25, 0 }
  0x16   : > { %16164 = sst [smem:[#allocation26_spill]] %s13913_s29  ;;  %p10917_p6 = scmp.ge.s32.totalorder %s13764_s24, 1 }
  0x17   : > { %p461_p7 = scmp.lt.s32.totalorder %s13764_s24, 3  ;;  %p13924_p8 = por %p16117_p5, %p91_p3 }
  0x18   : > { %s13766_s18 = smov [#allocation2]   ;;  %p12347_p12 = scmp.lt.s32.totalorder %s13764_s24, 2 }
  0x19   : > { %s16166_s0 = scalar_select %p13924_p8, 1, 0 }
  0x1a   : > { %p13928_p9 = pnand %p10917_p6, %p461_p7  ;;  %s473_s19 = sshll.u32 %s13766_s18, 4  ;;  %s474_s19 = int_to_ptr.vmem [resolvable:$true] %s473_s19 }
  0x1b   : > { %16167 = sst [smem:[#allocation27_spill]] %s16166_s0  ;;  %s13943_s27 = sand.u32 1, %s13760_s23  }
  0x1c   : > { %s16168_s17 = scalar_select %p13928_p9, 1, 0 }
  0x1d   : > { %p12307_p10 = pneg %p13928_p9  ;;  %p13947_p13 = pnand %p12347_p12, %p13915_p4 }
  0x1e   : > { %16169 = sst [smem:[#allocation28_spill]] %s16168_s17  ;;  %s16172_s26 = sld [smem:[#allocation29_spill]] }
  0x1f   : > { %p13936_p11 = pnand %p12307_p10, %p16117_p5 }
  0x20   : > { %s16171_s28 = scalar_select %p13947_p13, 1, 0 }
  0x21   : > { %s16170_s20 = scalar_select %p13936_p11, 1, 0 }
  0x22   : > { %p16127_p1 = pneg %p13936_p11 }
  0x24   : > { %s13336_s16 = scalar_lea.hbm %s16172_s26, 512 }
  0x25   : > { %p13337_p0 = scmp.ne.s32.totalorder %s16172_s26, %s13336_s16  ;;  %p13343_p4 = scmp.lt.u32.totalorder %s13336_s16, %s16172_s26 }
  0x27   : > { %p13339_p2 = pnand %p16127_p1, %p13337_p0 }
  0x29   : > { %p13340_p3 = pneg %p13339_p2 }
  0x2b   : > { %p13345_p6 = pnand %p13343_p4, %p13340_p3 }
  0x2d   : > { %13348 = shalt.err (!%p13345_p6)
}
  0x2e   : > { %s13349_s23 = scalar_lea.vmem %s474_s19, 512  ;;  %p13357_p5 = scmp.lt.s32.totalorder %s474_s19, %s474_s19 }
  0x2f   : > { %p13350_p7 = scmp.ne.s32.totalorder %s474_s19, %s13349_s23  ;;  %p13358_p8 = scmp.lt.s32.totalorder %s13349_s23, %s13349_s23 }
  0x31   : > { %p13352_p10 = pnand %p13350_p7, %p16127_p1  ;;  %p13359_p9 = por %p13358_p8, %p13357_p5 }
  0x33   : > { %p13353_p12 = pneg %p13352_p10 }
  0x35   : > { %p13360_p13 = pnand %p13359_p9, %p13353_p12 }
  0x37   : > { %13363 = shalt.err (!%p13360_p13)
}
  0x38   : > { %s16124_s13 = smov 256   ;;  %s16125_s15 = smov 16  }
  0x39   : > { %12310 = dma.hbm_to_vmem [thread:$0]  (!%p13936_p11), %s16172_s26, 512, %s474_s19, [#allocation3], %s16124_s13, %s16124_s13, %s16125_s15  }
  0x3a   : > { %s16126_s23 = smul.u32 768, %s13943_s27  ;;  %s16173_s2 = sld [smem:[#allocation30_spill]] }
  0x3b   : > { %s16130_s21 = smul.u32 12288, %s13764_s24  ;;  %s16174_s16 = sand.u32 1, %s13764_s24  }
  0x3c   : > { %s12266_s18 = smul.u32 6, %s13943_s27  ;;  %s504_s0 = scalar_lea.vmem [#allocation7], %s16126_s23 }
  0x3d   : > { %s511_s22 = sshll.u32 %s504_s0, 4  ;;  %s13992_s19 = scalar_lea.sflag [#allocation3], %s16174_s16  ;;  %s13988_s22 = int_to_ptr.vmem [resolvable:$true] %s511_s22 }
  0x3e   : > { %p16175_p8 = scmp.ne.s32.totalorder %s16171_s28, 0 }
  0x40   : > { %s13984_s11 = scalar_lea.hbm %s16173_s2, %s16130_s21  ;;  %p13998_p9 = pneg %p16175_p8 }
  0x41   : > { %s13364_s29 = scalar_lea.hbm %s13984_s11, 12288  ;;  %s13369_s0 = scalar_lea.hbm %s16173_s2, 24576 }
  0x42   : > { %p13365_p5 = scmp.ne.s32.totalorder %s13984_s11, %s13364_s29  ;;  %p13370_p2 = scmp.lt.u32.totalorder %s13984_s11, %s16173_s2 }
  0x43   : > { %s16176_s13 = scalar_select %p13998_p9, 1, 0 }
  0x44   : > { %p13367_p13 = pnand %p13998_p9, %p13365_p5  ;;  %p13371_p3 = scmp.lt.u32.totalorder %s13369_s0, %s13364_s29 }
  0x45   : > { %p13373_p6 = scmp.lt.u32.totalorder %s13364_s29, %s13984_s11 }
  0x46   : > { %p13368_p0 = pneg %p13367_p13  ;;  %p13372_p4 = por %p13371_p3, %p13370_p2 }
  0x48   : > { %p13374_p7 = por %p13373_p6, %p13372_p4 }
  0x4a   : > { %p13375_p10 = pnand %p13374_p7, %p13368_p0 }
  0x4c   : > { %13378 = shalt.err (!%p13375_p10)
}
  0x4d   : > { %s13379_s16 = scalar_lea.vmem %s13988_s22, 12288  ;;  %s13769_s7 = smov [#allocation7]  }
  0x4e   : > { %p13380_p12 = scmp.ne.s32.totalorder %s13988_s22, %s13379_s16  ;;  %s13384_s30 = sshll.u32 %s13769_s7, 4  ;;  %s13385_s30 = int_to_ptr.vmem [resolvable:$false] %s13384_s30 }
  0x4f   : > { %s13386_s15 = scalar_lea.vmem %s13385_s30, 24576  ;;  %p13387_p1 = scmp.lt.s32.totalorder %s13988_s22, %s13385_s30 }
  0x50   : > { %p13382_p5 = pnand %p13380_p12, %p13998_p9  ;;  %p13388_p11 = scmp.lt.s32.totalorder %s13386_s15, %s13379_s16 }
  0x52   : > { %p13383_p13 = pneg %p13382_p5  ;;  %p13389_p2 = por %p13388_p11, %p13387_p1 }
  0x54   : > { %p13390_p3 = pnand %p13389_p2, %p13383_p13 }
  0x56   : > { %13393 = shalt.err (!%p13390_p3)
}
  0x57   : > { %s16135_s23 = smov 384   ;;  %s16136_s29 = smov 24  }
  0x58   : > { %12317 = dma.hbm_to_vmem [thread:$0]  (!%p16175_p8), %s13984_s11, 12288, %s13988_s22, %s13992_s19, %s16135_s23, %s16135_s23, %s16136_s29  }
  0x59   : > { %s12267_s0 = smul.u32 96, %s13764_s24  ;;  %s525_s16 = scalar_lea.vmem [#allocation8], %s12266_s18 }
  0x5a   : > { %s533_s7 = sshll.u32 %s525_s16, 4  ;;  %s16177_s3 = sld [smem:[#allocation31_spill]]  ;;  %s14028_s7 = int_to_ptr.vmem [resolvable:$true] %s533_s7 }
  0x5b   : > { %s14036_s25 = scalar_lea.hbm %s16105_s10, %s12267_s0 }
  0x60   : > { %s531_s21 = scalar_lea.hbm %s16177_s3, %s12267_s0  ;;  %s13399_s16 = scalar_lea.hbm %s16177_s3, 192 }
  0x61   : > { %s13394_s17 = scalar_lea.hbm %s531_s21, 96  ;;  %p13400_p4 = scmp.lt.u32.totalorder %s531_s21, %s16177_s3 }
  0x62   : > { %p13395_p11 = scmp.ne.s32.totalorder %s531_s21, %s13394_s17  ;;  %p13401_p6 = scmp.lt.u32.totalorder %s13399_s16, %s13394_s17 }
  0x63   : > { %p13403_p10 = scmp.lt.u32.totalorder %s13394_s17, %s531_s21 }
  0x64   : > { %p13397_p1 = pnand %p13395_p11, %p13998_p9  ;;  %p13402_p7 = por %p13401_p6, %p13400_p4 }
  0x66   : > { %p13398_p0 = pneg %p13397_p1  ;;  %p13404_p12 = por %p13403_p10, %p13402_p7 }
  0x68   : > { %p13405_p5 = pnand %p13404_p12, %p13398_p0 }
  0x6a   : > { %13408 = shalt.err (!%p13405_p5)
}
  0x6b   : > { %s13409_s2 = scalar_lea.vmem %s14028_s7, 96  ;;  %s13772_s26 = smov [#allocation8]  }
  0x6c   : > { %p13410_p13 = scmp.ne.s32.totalorder %s14028_s7, %s13409_s2  ;;  %s13414_s0 = sshll.u32 %s13772_s26, 4  ;;  %s13415_s0 = int_to_ptr.vmem [resolvable:$false] %s13414_s0 }
  0x6d   : > { %s13416_s23 = scalar_lea.vmem %s13415_s0, 192  ;;  %p13417_p11 = scmp.lt.s32.totalorder %s14028_s7, %s13415_s0 }
  0x6e   : > { %p13412_p2 = pnand %p13410_p13, %p13998_p9  ;;  %p13418_p1 = scmp.lt.s32.totalorder %s13416_s23, %s13409_s2 }
  0x70   : > { %p13413_p3 = pneg %p13412_p2  ;;  %p13419_p4 = por %p13418_p1, %p13417_p11 }
  0x72   : > { %p13420_p6 = pnand %p13419_p4, %p13413_p3 }
  0x74   : > { %13423 = shalt.err (!%p13420_p6)
}
  0x75   : > { %12320 = dma.hbm_to_vmem [thread:$0]  (!%p16175_p8), %s531_s21, 96, %s14028_s7, %s13992_s19  }
  0x76   : > { %s652_s17 = scalar_lea.vmem [#allocation14], %s12266_s18  ;;  %s16137_s30 = sshll.u32 %s13943_s27, 8 }
  0x77   : > { %s659_s29 = sshll.u32 %s652_s17, 4  ;;  %s16138_s15 = sshll.u32 %s13764_s24, 12  ;;  %s14058_s29 = int_to_ptr.vmem [resolvable:$true] %s659_s29 }
  0x78   : > { %s544_s11 = scalar_lea.vmem [#allocation9], %s16137_s30  ;;  %s16178_s4 = sld [smem:[#allocation32_spill]] }
  0x79   : > { %s551_s22 = sshll.u32 %s544_s11, 4  ;;  %s14070_s22 = int_to_ptr.vmem [resolvable:$true] %s551_s22 }
  0x7e   : > { %s14068_s26 = scalar_lea.hbm %s16178_s4, %s16138_s15  ;;  %s13429_s0 = scalar_lea.hbm %s16178_s4, 8192 }
  0x7f   : > { %s13424_s21 = scalar_lea.hbm %s14068_s26, 4096  ;;  %p13430_p12 = scmp.lt.u32.totalorder %s14068_s26, %s16178_s4 }
  0x80   : > { %p13425_p0 = scmp.ne.s32.totalorder %s14068_s26, %s13424_s21  ;;  %p13431_p5 = scmp.lt.u32.totalorder %s13429_s0, %s13424_s21 }
  0x81   : > { %p13433_p2 = scmp.lt.u32.totalorder %s13424_s21, %s14068_s26 }
  0x82   : > { %p13427_p7 = pnand %p13425_p0, %p13998_p9  ;;  %p13432_p13 = por %p13431_p5, %p13430_p12 }
  0x84   : > { %p13428_p10 = pneg %p13427_p7  ;;  %p13434_p3 = por %p13433_p2, %p13432_p13 }
  0x86   : > { %p13435_p11 = pnand %p13434_p3, %p13428_p10 }
  0x88   : > { %13438 = shalt.err (!%p13435_p11)
}
  0x89   : > { %s13439_s11 = scalar_lea.vmem %s14070_s22, 4096  ;;  %s13773_s16 = smov [#allocation9]  }
  0x8a   : > { %p13440_p1 = scmp.ne.s32.totalorder %s14070_s22, %s13439_s11  ;;  %s13444_s2 = sshll.u32 %s13773_s16, 4  ;;  %s13445_s2 = int_to_ptr.vmem [resolvable:$false] %s13444_s2 }
  0x8b   : > { %s13446_s18 = scalar_lea.vmem %s13445_s2, 8192  ;;  %p13447_p0 = scmp.lt.s32.totalorder %s14070_s22, %s13445_s2 }
  0x8c   : > { %p13442_p4 = pnand %p13440_p1, %p13998_p9  ;;  %p13448_p7 = scmp.lt.s32.totalorder %s13446_s18, %s13439_s11 }
  0x8e   : > { %p13443_p6 = pneg %p13442_p4  ;;  %p13449_p12 = por %p13448_p7, %p13447_p0 }
  0x90   : > { %p13450_p5 = pnand %p13449_p12, %p13443_p6 }
  0x92   : > { %13453 = shalt.err (!%p13450_p5)
}
  0x93   : > { %s16139_s21 = smov 128   ;;  %s16141_s7 = smov 8  }
  0x94   : > { %12323 = dma.hbm_to_vmem [thread:$0]  (!%p16175_p8), %s14068_s26, 4096, %s14070_s22, %s13992_s19, %s16139_s21, %s16139_s21, %s16141_s7  }
  0x95   : > { %s16145_s0 = sshll.u32 %s13943_s27, 1  ;;  %s16143_s23 = sshll.u32 %s13764_s24, 5 }
  0x96   : > { %s14104_s16 = scalar_lea.hbm %s16100_s5, %s16143_s23  ;;  %s565_s2 = scalar_lea.vmem [#allocation10], %s16145_s0 }
  0x97   : > { %s573_s18 = sshll.u32 %s565_s2, 4  ;;  %s16179_s30 = smul.u32 12288, %s13764_s24  ;;  %s574_s18 = int_to_ptr.vmem [resolvable:$true] %s573_s18 }
  0x98   : > { %s13454_s26 = scalar_lea.hbm %s14104_s16, 32  ;;  %s13459_s21 = scalar_lea.hbm %s16100_s5, 64 }
  0x99   : > { %s14113_s22 = scalar_lea.hbm %s16101_s6, %s16179_s30  ;;  %p13455_p10 = scmp.ne.s32.totalorder %s14104_s16, %s13454_s26 }
  0x9a   : > { %p13460_p3 = scmp.lt.u32.totalorder %s14104_s16, %s16100_s5  ;;  %p13461_p11 = scmp.lt.u32.totalorder %s13459_s21, %s13454_s26 }
  0x9b   : > { %p13457_p13 = pnand %p13455_p10, %p13998_p9  ;;  %p13463_p4 = scmp.lt.u32.totalorder %s13454_s26, %s14104_s16 }
  0x9c   : > { %p13462_p1 = por %p13461_p11, %p13460_p3 }
  0x9d   : > { %p13458_p2 = pneg %p13457_p13 }
  0x9e   : > { %p13464_p6 = por %p13463_p4, %p13462_p1 }
  0xa0   : > { %p13465_p0 = pnand %p13464_p6, %p13458_p2 }
  0xa2   : > { %13468 = shalt.err (!%p13465_p0)
}
  0xa3   : > { %s13469_s3 = scalar_lea.vmem %s574_s18, 32  ;;  %s13776_s30 = smov [#allocation10]  }
  0xa4   : > { %p13470_p7 = scmp.ne.s32.totalorder %s574_s18, %s13469_s3  ;;  %s13474_s15 = sshll.u32 %s13776_s30, 4  ;;  %s13475_s15 = int_to_ptr.vmem [resolvable:$false] %s13474_s15 }
  0xa5   : > { %s13476_s2 = scalar_lea.vmem %s13475_s15, 64  ;;  %p13477_p10 = scmp.lt.s32.totalorder %s574_s18, %s13475_s15 }
  0xa6   : > { %p13472_p12 = pnand %p13470_p7, %p13998_p9  ;;  %p13478_p13 = scmp.lt.s32.totalorder %s13476_s2, %s13469_s3 }
  0xa8   : > { %p13473_p5 = pneg %p13472_p12  ;;  %p13479_p8 = por %p13478_p13, %p13477_p10 }
  0xaa   : > { %p13480_p3 = pnand %p13479_p8, %p13473_p5 }
  0xac   : > { %13483 = shalt.err (!%p13480_p3)
}
  0xad   : > { %p16180_p11 = scmp.ne.s32.totalorder %s16171_s28, 0  ;;  %s16181_s21 = smul.u32 768, %s13943_s27 }
  0xae   : > { %s16182_s26 = sshll.u32 %s13764_s24, 12  ;;  %s13484_s30 = scalar_lea.hbm %s14113_s22, 12288 }
  0xaf   : > { %12326 = dma.hbm_to_vmem [thread:$0]  (!%p16180_p11), %s14104_s16, 32, %s574_s18, %s13992_s19  }
  0xb0   : > { %s584_s7 = scalar_lea.vmem [#allocation11], %s16181_s21  ;;  %s14142_s3 = scalar_lea.hbm %s16103_s8, %s16182_s26 }
  0xb1   : > { %s591_s23 = sshll.u32 %s584_s7, 4  ;;  %p13485_p8 = scmp.ne.s32.totalorder %s14113_s22, %s13484_s30  ;;  %s14135_s23 = int_to_ptr.vmem [resolvable:$true] %s591_s23 }
  0xb2   : > { %s13489_s16 = scalar_lea.hbm %s16101_s6, 24576  ;;  %p13490_p4 = scmp.lt.u32.totalorder %s14113_s22, %s16101_s6 }
  0xb3   : > { %p13487_p2 = pnand %p13485_p8, %p13998_p9  ;;  %p13491_p6 = scmp.lt.u32.totalorder %s13489_s16, %s13484_s30 }
  0xb4   : > { %p13493_p7 = scmp.lt.u32.totalorder %s13484_s30, %s14113_s22 }
  0xb5   : > { %p13488_p1 = pneg %p13487_p2  ;;  %p13492_p0 = por %p13491_p6, %p13490_p4 }
  0xb7   : > { %p13494_p12 = por %p13493_p7, %p13492_p0 }
  0xb9   : > { %p13495_p5 = pnand %p13494_p12, %p13488_p1 }
  0xbb   : > { %13498 = shalt.err (!%p13495_p5)
}
  0xbc   : > { %s13499_s7 = scalar_lea.vmem %s14135_s23, 12288  ;;  %s13777_s26 = smov [#allocation11]  }
  0xbd   : > { %p13500_p10 = scmp.ne.s32.totalorder %s14135_s23, %s13499_s7  ;;  %s13504_s17 = sshll.u32 %s13777_s26, 4  ;;  %s13505_s17 = int_to_ptr.vmem [resolvable:$false] %s13504_s17 }
  0xbe   : > { %s13506_s11 = scalar_lea.vmem %s13505_s17, 24576  ;;  %p13507_p8 = scmp.lt.s32.totalorder %s14135_s23, %s13505_s17 }
  0xbf   : > { %p13502_p13 = pnand %p13500_p10, %p13998_p9  ;;  %p13508_p2 = scmp.lt.s32.totalorder %s13506_s11, %s13499_s7 }
  0xc1   : > { %p13503_p3 = pneg %p13502_p13  ;;  %p13509_p4 = por %p13508_p2, %p13507_p8 }
  0xc3   : > { %p13510_p6 = pnand %p13509_p4, %p13503_p3 }
  0xc5   : > { %13513 = shalt.err (!%p13510_p6)
}
  0xc6   : > { %s16183_s30 = smov 24   ;;  %s16184_s15 = smov 384  }
  0xc7   : > { %12329 = dma.hbm_to_vmem [thread:$0]  (!%p16180_p11), %s14113_s22, 12288, %s14135_s23, %s13992_s19, %s16184_s15, %s16184_s15, %s16183_s30  }
  0xc8   : > { %s16185_s2 = sshll.u32 %s13943_s27, 8  ;;  %s16186_s21 = sshll.u32 %s13764_s24, 5 }
  0xc9   : > { %s612_s16 = scalar_lea.vmem [#allocation12], %s16185_s2  ;;  %s14178_s17 = scalar_lea.hbm %s16104_s9, %s16186_s21 }
  0xca   : > { %s619_s18 = sshll.u32 %s612_s16, 4  ;;  %s13514_s11 = scalar_lea.hbm %s14142_s3, 4096  ;;  %s14171_s18 = int_to_ptr.vmem [resolvable:$true] %s619_s18 }
  0xcb   : > { %p13515_p1 = scmp.ne.s32.totalorder %s14142_s3, %s13514_s11  ;;  %s13519_s22 = scalar_lea.hbm %s16103_s8, 8192 }
  0xcc   : > { %p13520_p12 = scmp.lt.u32.totalorder %s14142_s3, %s16103_s8  ;;  %p13521_p5 = scmp.lt.u32.totalorder %s13519_s22, %s13514_s11 }
  0xcd   : > { %p13517_p0 = pnand %p13515_p1, %p13998_p9  ;;  %p13523_p13 = scmp.lt.u32.totalorder %s13514_s11, %s14142_s3 }
  0xce   : > { %p13522_p10 = por %p13521_p5, %p13520_p12 }
  0xcf   : > { %p13518_p7 = pneg %p13517_p0 }
  0xd0   : > { %p13524_p3 = por %p13523_p13, %p13522_p10 }
  0xd2   : > { %p13525_p8 = pnand %p13524_p3, %p13518_p7 }
  0xd4   : > { %13528 = shalt.err (!%p13525_p8)
}
  0xd5   : > { %s13529_s15 = scalar_lea.vmem %s14171_s18, 4096  ;;  %s13778_s4 = smov [#allocation12]  }
  0xd6   : > { %p13530_p2 = scmp.ne.s32.totalorder %s14171_s18, %s13529_s15  ;;  %s13534_s0 = sshll.u32 %s13778_s4, 4  ;;  %s13535_s0 = int_to_ptr.vmem [resolvable:$false] %s13534_s0 }
  0xd7   : > { %s13536_s2 = scalar_lea.vmem %s13535_s0, 8192  ;;  %p13537_p1 = scmp.lt.s32.totalorder %s14171_s18, %s13535_s0 }
  0xd8   : > { %p13532_p4 = pnand %p13530_p2, %p13998_p9  ;;  %p13538_p0 = scmp.lt.s32.totalorder %s13536_s2, %s13529_s15 }
  0xda   : > { %p13533_p6 = pneg %p13532_p4  ;;  %p13539_p12 = por %p13538_p0, %p13537_p1 }
  0xdc   : > { %p13540_p5 = pnand %p13539_p12, %p13533_p6 }
  0xde   : > { %13543 = shalt.err (!%p13540_p5)
}
  0xdf   : > { %s16187_s16 = smov 8   ;;  %s16188_s21 = smov 128  }
  0xe0   : > { %12332 = dma.hbm_to_vmem [thread:$0]  (!%p16180_p11), %s14142_s3, 4096, %s14171_s18, %s13992_s19, %s16188_s21, %s16188_s21, %s16187_s16  }
  0xe1   : > { %s16189_s7 = sshll.u32 %s13943_s27, 1  ;;  %s13544_s22 = scalar_lea.hbm %s14178_s17, 32 }
  0xe2   : > { %s633_s26 = scalar_lea.vmem [#allocation13], %s16189_s7  ;;  %p13545_p7 = scmp.ne.s32.totalorder %s14178_s17, %s13544_s22 }
  0xe3   : > { %s641_s11 = sshll.u32 %s633_s26, 4  ;;  %s13549_s15 = scalar_lea.hbm %s16104_s9, 64  ;;  %s642_s11 = int_to_ptr.vmem [resolvable:$true] %s641_s11 }
  0xe4   : > { %p13547_p10 = pnand %p13545_p7, %p13998_p9  ;;  %p13550_p3 = scmp.lt.u32.totalorder %s14178_s17, %s16104_s9 }
  0xe5   : > { %p13551_p8 = scmp.lt.u32.totalorder %s13549_s15, %s13544_s22  ;;  %p13553_p4 = scmp.lt.u32.totalorder %s13544_s22, %s14178_s17 }
  0xe6   : > { %p13548_p13 = pneg %p13547_p10 }
  0xe7   : > { %p13552_p2 = por %p13551_p8, %p13550_p3 }
  0xe9   : > { %p13554_p6 = por %p13553_p4, %p13552_p2 }
  0xeb   : > { %p13555_p1 = pnand %p13554_p6, %p13548_p13 }
  0xed   : > { %13558 = shalt.err (!%p13555_p1)
}
  0xee   : > { %s13559_s3 = scalar_lea.vmem %s642_s11, 32  ;;  %s13779_s18 = smov [#allocation13]  }
  0xef   : > { %p13560_p0 = scmp.ne.s32.totalorder %s642_s11, %s13559_s3  ;;  %s13564_s2 = sshll.u32 %s13779_s18, 4  ;;  %s13565_s2 = int_to_ptr.vmem [resolvable:$false] %s13564_s2 }
  0xf0   : > { %s13566_s7 = scalar_lea.vmem %s13565_s2, 64  ;;  %p13567_p7 = scmp.lt.s32.totalorder %s642_s11, %s13565_s2 }
  0xf1   : > { %p13562_p12 = pnand %p13560_p0, %p13998_p9  ;;  %p13568_p10 = scmp.lt.s32.totalorder %s13566_s7, %s13559_s3 }
  0xf3   : > { %p13563_p5 = pneg %p13562_p12  ;;  %p13569_p11 = por %p13568_p10, %p13567_p7 }
  0xf5   : > { %p13570_p3 = pnand %p13569_p11, %p13563_p5 }
  0xf7   : > { %13573 = shalt.err (!%p13570_p3)
}
  0xf8   : > { %p16190_p8 = scmp.ne.s32.totalorder %s16171_s28, 0  ;;  %s13574_s26 = scalar_lea.hbm %s14036_s25, 96 }
  0xf9   : > { %p13575_p13 = scmp.ne.s32.totalorder %s14036_s25, %s13574_s26  ;;  %s13579_s30 = scalar_lea.hbm %s16105_s10, 192 }
  0xfa   : > { %12335 = dma.hbm_to_vmem [thread:$0]  (!%p16190_p8), %s14178_s17, 32, %s642_s11, %s13992_s19  }
  0xfb   : > { %p13577_p2 = pnand %p13575_p13, %p13998_p9  ;;  %p13580_p11 = scmp.lt.u32.totalorder %s14036_s25, %s16105_s10 }
  0xfc   : > { %p13581_p6 = scmp.lt.u32.totalorder %s13579_s30, %s13574_s26  ;;  %p13583_p0 = scmp.lt.u32.totalorder %s13574_s26, %s14036_s25 }
  0xfd   : > { %p13578_p4 = pneg %p13577_p2 }
  0xfe   : > { %p13582_p1 = por %p13581_p6, %p13580_p11 }
 0x100   : > { %p13584_p12 = por %p13583_p0, %p13582_p1 }
 0x102   : > { %p13585_p5 = pnand %p13584_p12, %p13578_p4 }
 0x104   : > { %13588 = shalt.err (!%p13585_p5)
}
 0x105   : > { %s13589_s17 = scalar_lea.vmem %s14058_s29, 96  ;;  %s13780_s11 = smov [#allocation14]  }
 0x106   : > { %p13590_p7 = scmp.ne.s32.totalorder %s14058_s29, %s13589_s17  ;;  %s13594_s0 = sshll.u32 %s13780_s11, 4  ;;  %s13595_s0 = int_to_ptr.vmem [resolvable:$false] %s13594_s0 }
 0x107   : > { %s13596_s3 = scalar_lea.vmem %s13595_s0, 192  ;;  %p13597_p13 = scmp.lt.s32.totalorder %s14058_s29, %s13595_s0 }
 0x108   : > { %p13592_p10 = pnand %p13590_p7, %p13998_p9  ;;  %p13598_p2 = scmp.lt.s32.totalorder %s13596_s3, %s13589_s17 }
 0x10a   : > { %p13593_p3 = pneg %p13592_p10  ;;  %p13599_p11 = por %p13598_p2, %p13597_p13 }
 0x10c   : > { %p13600_p6 = pnand %p13599_p11, %p13593_p3 }
 0x10e   : > { %13603 = shalt.err (!%p13600_p6)
}
 0x10f   : > { %s13781_s18 = smov 32   ;;  %s13782_s2 = smov 2  }
 0x110   : > { %12338 = dma.hbm_to_vmem [thread:$0]  (!%p16190_p8), %s14036_s25, 96, %s14058_s29, %s13992_s19, %s13781_s18, %s13781_s18, %s13782_s2  }
 0x111   : > { %s16147_s7 = sshll.u32 %s13943_s27, 10  ;;  %s11590_s26 = sshll.u32 %s13764_s24, 14 }
 0x112   : > { %s14256_s30 = scalar_lea.hbm %s16107_s12, %s11590_s26  ;;  %s680_s15 = scalar_lea.vmem [#allocation15], %s16147_s7 }
 0x113   : > { %s687_s4 = sshll.u32 %s680_s15, 4  ;;  %s13604_s17 = scalar_lea.hbm %s14256_s30, 16384  ;;  %s14260_s4 = int_to_ptr.vmem [resolvable:$true] %s687_s4 }
 0x114   : > { %p13605_p4 = scmp.ne.s32.totalorder %s14256_s30, %s13604_s17  ;;  %s13609_s11 = scalar_lea.hbm %s16107_s12, 32768 }
 0x115   : > { %p13610_p12 = scmp.lt.u32.totalorder %s14256_s30, %s16107_s12  ;;  %p13611_p5 = scmp.lt.u32.totalorder %s13609_s11, %s13604_s17 }
 0x116   : > { %p13607_p1 = pnand %p13605_p4, %p13998_p9  ;;  %p13613_p10 = scmp.lt.u32.totalorder %s13604_s17, %s14256_s30 }
 0x117   : > { %p13612_p7 = por %p13611_p5, %p13610_p12 }
 0x118   : > { %p13608_p0 = pneg %p13607_p1 }
 0x119   : > { %p13614_p3 = por %p13613_p10, %p13612_p7 }
 0x11b   : > { %p13615_p13 = pnand %p13614_p3, %p13608_p0 }
 0x11d   : > { %13618 = shalt.err (!%p13615_p13)
}
 0x11e   : > { %s13619_s2 = scalar_lea.vmem %s14260_s4, 16384  ;;  %s13783_s22 = smov [#allocation15]  }
 0x11f   : > { %p13620_p2 = scmp.ne.s32.totalorder %s14260_s4, %s13619_s2  ;;  %s13624_s23 = sshll.u32 %s13783_s22, 4  ;;  %s13625_s23 = int_to_ptr.vmem [resolvable:$false] %s13624_s23 }
 0x120   : > { %s13626_s15 = scalar_lea.vmem %s13625_s23, 32768  ;;  %p13627_p4 = scmp.lt.s32.totalorder %s14260_s4, %s13625_s23 }
 0x121   : > { %p13622_p11 = pnand %p13620_p2, %p13998_p9  ;;  %p13628_p1 = scmp.lt.s32.totalorder %s13626_s15, %s13619_s2 }
 0x123   : > { %p13623_p6 = pneg %p13622_p11  ;;  %p13629_p12 = por %p13628_p1, %p13627_p4 }
 0x125   : > { %p13630_p5 = pnand %p13629_p12, %p13623_p6 }
 0x127   : > { %13633 = shalt.err (!%p13630_p5)
}
 0x128   : > { %s13784_s17 = smov 512   ;;  %s13785_s25 = smov [#allocation5]  }
 0x129   : > { %12341 = dma.hbm_to_vmem [thread:$0]  (!%p16190_p8), %s14256_s30, 16384, %s14260_s4, %s13992_s19, %s13784_s17, %s13784_s17, %s13781_s18  }
 0x12a   : > { %s486_s29 = sshll.u32 %s13785_s25, 4  ;;  %s14290_s3 = scalar_lea.hbm %s16109_s14, %s11590_s26  ;;  %s487_s29 = int_to_ptr.vmem [resolvable:$true] %s486_s29 }
 0x12b   : > { %s13634_s23 = scalar_lea.hbm %s16096_s1, 1024  ;;  %p16191_p7 = scmp.ne.s32.totalorder %s16170_s20, 0 }
 0x12c   : > { %p13635_p0 = scmp.ne.s32.totalorder %s16096_s1, %s13634_s23  ;;  %p13641_p2 = scmp.lt.u32.totalorder %s13634_s23, %s16096_s1 }
 0x12d   : > { %p16192_p10 = pneg %p16191_p7 }
 0x12f   : > { %p13637_p3 = pnand %p13635_p0, %p16192_p10 }
 0x131   : > { %p13638_p13 = pneg %p13637_p3 }
 0x133   : > { %p13643_p11 = pnand %p13641_p2, %p13638_p13 }
 0x135   : > { %13646 = shalt.err (!%p13643_p11)
}
 0x136   : > { %s13647_s24 = scalar_lea.vmem %s487_s29, 1024  ;;  %p16193_p4 = pmov %p16192_p10 }
 0x137   : > { %p13648_p6 = scmp.ne.s32.totalorder %s487_s29, %s13647_s24  ;;  %p13655_p5 = scmp.lt.s32.totalorder %s487_s29, %s487_s29 }
 0x138   : > { %p13656_p8 = scmp.lt.s32.totalorder %s13647_s24, %s13647_s24 }
 0x139   : > { %p13650_p1 = pnand %p13648_p6, %p16193_p4 }
 0x13a   : > { %p13657_p9 = por %p13656_p8, %p13655_p5 }
 0x13b   : > { %p13651_p12 = pneg %p13650_p1 }
 0x13d   : > { %p13658_p0 = pnand %p13657_p9, %p13651_p12 }
 0x13f   : > { %13661 = shalt.err (!%p13658_p0)
}
 0x140   : > { %s16194_s7 = smov 16   ;;  %s16195_s26 = smov 256  }
 0x141   : > { %12313 = dma.hbm_to_vmem [thread:$0]  (!%p16191_p7), %s16096_s1, 1024, %s487_s29, [#allocation6], %s16195_s26, %s16195_s26, %s16194_s7  }
 0x142   : > { %s16196_s25 = sshll.u32 %s13943_s27, 10  ;;  %s13662_s2 = scalar_lea.hbm %s14290_s3, 16384 }
 0x143   : > { %s708_s11 = scalar_lea.vmem [#allocation16], %s16196_s25  ;;  %p13663_p9 = scmp.ne.s32.totalorder %s14290_s3, %s13662_s2 }
 0x144   : > { %s715_s0 = sshll.u32 %s708_s11, 4  ;;  %p16197_p8 = scmp.ne.s32.totalorder %s16176_s13, 0  ;;  %s14317_s0 = int_to_ptr.vmem [resolvable:$true] %s715_s0 }
 0x145   : > { %s13667_s23 = scalar_lea.hbm %s16109_s14, 32768  ;;  %p13668_p13 = scmp.lt.u32.totalorder %s14290_s3, %s16109_s14 }
 0x146   : > { %p13665_p10 = pnand %p13663_p9, %p16197_p8  ;;  %p13669_p2 = scmp.lt.u32.totalorder %s13667_s23, %s13662_s2 }
 0x147   : > { %p13671_p11 = scmp.lt.u32.totalorder %s13662_s2, %s14290_s3 }
 0x148   : > { %p13666_p3 = pneg %p13665_p10  ;;  %p13670_p7 = por %p13669_p2, %p13668_p13 }
 0x14a   : > { %p13672_p6 = por %p13671_p11, %p13670_p7 }
 0x14c   : > { %p13673_p4 = pnand %p13672_p6, %p13666_p3 }
 0x14e   : > { %13676 = shalt.err (!%p13673_p4)
}
 0x14f   : > { %s13677_s27 = scalar_lea.vmem %s14317_s0, 16384  ;;  %s13786_s29 = smov [#allocation16]  }
 0x150   : > { %p13678_p1 = scmp.ne.s32.totalorder %s14317_s0, %s13677_s27  ;;  %s13682_s30 = sshll.u32 %s13786_s29, 4  ;;  %s13683_s30 = int_to_ptr.vmem [resolvable:$false] %s13682_s30 }
 0x151   : > { %s13684_s24 = scalar_lea.vmem %s13683_s30, 32768  ;;  %p13685_p0 = scmp.lt.s32.totalorder %s14317_s0, %s13683_s30 }
 0x152   : > { %p13680_p12 = pnand %p13678_p1, %p16197_p8  ;;  %p13686_p9 = scmp.lt.s32.totalorder %s13684_s24, %s13677_s27 }
 0x154   : > { %p13681_p5 = pneg %p13680_p12  ;;  %p13687_p10 = por %p13686_p9, %p13685_p0 }
 0x156   : > { %p13688_p13 = pnand %p13687_p10, %p13681_p5 }
 0x158   : > { %13691 = shalt.err (!%p13688_p13)
}
 0x159   : > { %p16198_p3 = scmp.ne.s32.totalorder %s16171_s28, 0  ;;  %s16199_s13 = sld [smem:[#allocation28_spill]] }
 0x15b   : > { %12344 = dma.hbm_to_vmem [thread:$0]  (!%p16198_p3), %s14290_s3, 16384, %s14317_s0, %s13992_s19, %s16188_s21, %s16188_s21, %s16187_s16  }
 0x15f   : > { %p16200_p8 = scmp.ne.s32.totalorder %s16199_s13, 0 }
 0x160   : > { %s16201_s7 = sld [smem:[#allocation24_spill]] (!%p16200_p8) }
 0x161   : > { %734 = sbr.rel (%p16200_p8) target bundleno = 4778 (0x12aa), region = 84 }
 0x166   : > { %p16202_p2 = scmp.eq.s32.totalorder (!%p16200_p8), %s16201_s7, 0 }
 0x168   : > { %13735 = dma.done.wait (%p16202_p2), [#allocation3], 512   ;;  %p16203_p7 = pmov %p16202_p2 }
 0x169   : > { %p16204_p11 = pmov %p16202_p2 }
 0x16a   : > { %13737 = vsyncadd (%p16203_p7), [#allocation3], 4294966784 }
 0x16b   : > { %13739 = dma.done.wait (%p16204_p11), [#allocation6], 1024   ;;  %p16205_p6 = pmov %p16202_p2 }
 0x16c   : > { %s16206_s28 = sld [smem:[#allocation22_spill]]  ;;  %s16207_s26 = sld [smem:[#allocation27_spill]] }
 0x16d   : > { %13741 = vsyncadd (%p16205_p6), [#allocation6], 4294966272  ;;  %s744_s4 = sand.u32 1, %s16201_s7  }
 0x16e   : > { %s745_s21 = scalar_lea.sflag [#allocation3], %s744_s4 }
 0x172   : > { %s14356_s19 = sand.u32 1, %s16206_s28   ;;  %p16208_p4 = scmp.ne.s32.totalorder %s16207_s26, 0 }
 0x173   : > { %s12272_s16 = smul.u32 768, %s14356_s19 }
 0x175   : > { %s14361_s3 = scalar_lea.vmem [#allocation7], %s12272_s16 }
 0x176   : > { %13743 = dma.done.wait (%p16208_p4), %s745_s21, 65792  }
 0x177   : > { %13745 = vsyncadd (%p16208_p4), %s745_s21, 4294901504  ;;  %v12584_v0 = vld [vmem:[%s14361_s3 + $0xc] ss:$24 sps:$4 sm:$0xff]   ;;  %v12586_v1 = vld [vmem:[%s14361_s3 + $0x8] ss:$24 sps:$4 sm:$0xff]   ;;  %vm13788_vm0 = vmmov 0  }
 0x178   : > { %1629 = vmatprep.subr.bf16.mxu1 %v12584_v0  ;;  %v12587_v2 = vld [vmem:[%s14361_s3 + $0x4] ss:$24 sps:$4 sm:$0xff]   ;;  %v12589_v3 = vld [vmem:[%s14361_s3] ss:$24 sps:$4 sm:$0xff]   ;;  %v12593_v6 = vld [vmem:[%s14361_s3 + $0x34] ss:$24 sps:$4 sm:$0xff]  }
 0x179   : > { %1630 = vmatpush1.bf16.msra.mxu1 %v12586_v1  ;;  %v12590_v4 = vld [vmem:[%s14361_s3 + $0x3c] ss:$24 sps:$4 sm:$0xff]   ;;  %v12592_v5 = vld [vmem:[%s14361_s3 + $0x38] ss:$24 sps:$4 sm:$0xff]   ;;  %1586 = vmatprep.subr.bf16.mxu0 %v12587_v2  ;;  %v12596_v8 = vld [vmem:[%s14361_s3 + $0x6c] ss:$24 sps:$4 sm:$0xff]  }
 0x17a   : > { %1587 = vmatpush1.bf16.msra.mxu0 %v12589_v3  ;;  %1631 = vmatprep.subr.bf16.mxu1 %v12590_v4  ;;  %v12595_v7 = vld [vmem:[%s14361_s3 + $0x30] ss:$24 sps:$4 sm:$0xff]   ;;  %v12599_v10 = vld [vmem:[%s14361_s3 + $0x64] ss:$24 sps:$4 sm:$0xff]   ;;  %v12601_v12 = vld [vmem:[%s14361_s3 + $0x60] ss:$24 sps:$4 sm:$0xff]  }
 0x17b   : > { %1588 = vmatprep.subr.bf16.mxu0 %v12593_v6  ;;  %v12598_v9 = vld [vmem:[%s14361_s3 + $0x68] ss:$24 sps:$4 sm:$0xff]   ;;  %v12602_v11 = vld [vmem:[%s14361_s3 + $0x9c] ss:$24 sps:$4 sm:$0xff]   ;;  %v12604_v14 = vld [vmem:[%s14361_s3 + $0x98] ss:$24 sps:$4 sm:$0xff]  }
 0x17c   : > { %v12605_v13 = vld [vmem:[%s14361_s3 + $0x94] ss:$24 sps:$4 sm:$0xff]   ;;  %v12607_v16 = vld [vmem:[%s14361_s3 + $0x90] ss:$24 sps:$4 sm:$0xff]   ;;  %v12611_v17 = vld [vmem:[%s14361_s3 + $0xc4] ss:$24 sps:$4 sm:$0xff]  }
 0x17d   : > { %1632 = vmatpush1.bf16.msra.mxu1 %v12592_v5  ;;  %v12608_v15 = vld [vmem:[%s14361_s3 + $0xcc] ss:$24 sps:$4 sm:$0xff]   ;;  %v12610_v18 = vld [vmem:[%s14361_s3 + $0xc8] ss:$24 sps:$4 sm:$0xff]   ;;  %v12614_v19 = vld [vmem:[%s14361_s3 + $0xfc] ss:$24 sps:$4 sm:$0xff]  }
 0x17e   : > { %1633 = vmatprep.subr.bf16.mxu1 %v12596_v8  ;;  %1589 = vmatpush1.bf16.msra.mxu0 %v12595_v7  ;;  %v12613_v20 = vld [vmem:[%s14361_s3 + $0xc0] ss:$24 sps:$4 sm:$0xff]   ;;  %v12617_v21 = vld [vmem:[%s14361_s3 + $0xf4] ss:$24 sps:$4 sm:$0xff]   ;;  %v12619_v24 = vld [vmem:[%s14361_s3 + $0xf0] ss:$24 sps:$4 sm:$0xff]  }
 0x17f   : > { %1590 = vmatprep.subr.bf16.mxu0 %v12599_v10  ;;  %v12616_v22 = vld [vmem:[%s14361_s3 + $0xf8] ss:$24 sps:$4 sm:$0xff]   ;;  %v12620_v23 = vld [vmem:[%s14361_s3 + $0x12c] ss:$24 sps:$4 sm:$0xff]   ;;  %v12622_v26 = vld [vmem:[%s14361_s3 + $0x128] ss:$24 sps:$4 sm:$0xff]  }
 0x180   : > { %v12623_v25 = vld [vmem:[%s14361_s3 + $0x124] ss:$24 sps:$4 sm:$0xff]   ;;  %v12625_v28 = vld [vmem:[%s14361_s3 + $0x120] ss:$24 sps:$4 sm:$0xff]   ;;  %v12629_v29 = vld [vmem:[%s14361_s3 + $0x154] ss:$24 sps:$4 sm:$0xff]  }
 0x181   : > { %1634 = vmatpush1.bf16.msra.mxu1 %v12598_v9  ;;  %v12626_v27 = vld [vmem:[%s14361_s3 + $0x15c] ss:$24 sps:$4 sm:$0xff]   ;;  %v12628_v30 = vld [vmem:[%s14361_s3 + $0x158] ss:$24 sps:$4 sm:$0xff]   ;;  %v12632_v31 = vld [vmem:[%s14361_s3 + $0x18c] ss:$24 sps:$4 sm:$0xff]  }
 0x182   : > { %1635 = vmatprep.subr.bf16.mxu1 %v12602_v11  ;;  %1591 = vmatpush1.bf16.msra.mxu0 %v12601_v12  ;;  %v12631_v32 = vld [vmem:[%s14361_s3 + $0x150] ss:$24 sps:$4 sm:$0xff]   ;;  %v12635_v33 = vld [vmem:[%s14361_s3 + $0x184] ss:$24 sps:$4 sm:$0xff]   ;;  %v12637_v36 = vld [vmem:[%s14361_s3 + $0x180] ss:$24 sps:$4 sm:$0xff]  }
 0x183   : > { %1592 = vmatprep.subr.bf16.mxu0 %v12605_v13  ;;  %v12634_v34 = vld [vmem:[%s14361_s3 + $0x188] ss:$24 sps:$4 sm:$0xff]   ;;  %v12638_v35 = vld [vmem:[%s14361_s3 + $0x1bc] ss:$24 sps:$4 sm:$0xff]   ;;  %v12640_v38 = vld [vmem:[%s14361_s3 + $0x1b8] ss:$24 sps:$4 sm:$0xff]  }
 0x184   : > { %v12641_v37 = vld [vmem:[%s14361_s3 + $0x1b4] ss:$24 sps:$4 sm:$0xff]   ;;  %v12643_v40 = vld [vmem:[%s14361_s3 + $0x1b0] ss:$24 sps:$4 sm:$0xff]   ;;  %v12647_v41 = vld [vmem:[%s14361_s3 + $0x1e4] ss:$24 sps:$4 sm:$0xff]  }
 0x185   : > { %1636 = vmatpush1.bf16.msra.mxu1 %v12604_v14  ;;  %v12644_v39 = vld [vmem:[%s14361_s3 + $0x1ec] ss:$24 sps:$4 sm:$0xff]   ;;  %v12646_v42 = vld [vmem:[%s14361_s3 + $0x1e8] ss:$24 sps:$4 sm:$0xff]   ;;  %v12650_v43 = vld [vmem:[%s14361_s3 + $0x21c] ss:$24 sps:$4 sm:$0xff]  }
 0x186   : > { %1637 = vmatprep.subr.bf16.mxu1 %v12608_v15  ;;  %1593 = vmatpush1.bf16.msra.mxu0 %v12607_v16  ;;  %v12649_v44 = vld [vmem:[%s14361_s3 + $0x1e0] ss:$24 sps:$4 sm:$0xff]   ;;  %v12653_v45 = vld [vmem:[%s14361_s3 + $0x214] ss:$24 sps:$4 sm:$0xff]   ;;  %v12655_v51 = vld [vmem:[%s14361_s3 + $0x210] ss:$24 sps:$4 sm:$0xff]  }
 0x187   : > { %1594 = vmatprep.subr.bf16.mxu0 %v12611_v17  ;;  %v951_v46 = vld [vmem:[#allocation2 + $0x8] sm:$0xff]  ;;  %v953_v47 = vld [vmem:[#allocation2 + $0x18] sm:$0xff]  ;;  %v950_v2 = vld [vmem:[#allocation2] sm:$0xff]  ;;  %s12273_s17 = smul.u32 6, %s14356_s19  ;;  %vm1811_vm1 = vcmask 261120   ;;  %s13789_s11 = smov 64  }
 0x188   : > { %v12652_v48 = vld [vmem:[%s14361_s3 + $0x218] ss:$24 sps:$4 sm:$0xff]   ;;  %v955_v49 = vpack.c.bf16 %v953_v47, %v951_v46  ;;  %v12656_v50 = vld [vmem:[%s14361_s3 + $0x24c] ss:$24 sps:$4 sm:$0xff]   ;;  %v12658_v53 = vld [vmem:[%s14361_s3 + $0x248] ss:$24 sps:$4 sm:$0xff]  }
 0x189   : > { %1638 = vmatpush1.bf16.msra.mxu1 %v12610_v18  ;;  %v12659_v52 = vld [vmem:[%s14361_s3 + $0x244] ss:$24 sps:$4 sm:$0xff]   ;;  %v12661_v55 = vld [vmem:[%s14361_s3 + $0x240] ss:$24 sps:$4 sm:$0xff]   ;;  %v12665_v56 = vld [vmem:[%s14361_s3 + $0x274] ss:$24 sps:$4 sm:$0xff]  }
 0x18a   : > { %1639 = vmatprep.subr.bf16.mxu1 %v12614_v19  ;;  %1595 = vmatpush1.bf16.msra.mxu0 %v12613_v20  ;;  %v12662_v54 = vld [vmem:[%s14361_s3 + $0x27c] ss:$24 sps:$4 sm:$0xff]   ;;  %v12664_v57 = vld [vmem:[%s14361_s3 + $0x278] ss:$24 sps:$4 sm:$0xff]   ;;  %v12668_v58 = vld [vmem:[%s14361_s3 + $0x2ac] ss:$24 sps:$4 sm:$0xff]  }
 0x18b   : > { %1596 = vmatprep.subr.bf16.mxu0 %v12617_v21  ;;  %1661 = vmatprep.mubr.bf16.mxu1 %v955_v49  ;;  %v12667_v59 = vld [vmem:[%s14361_s3 + $0x270] ss:$24 sps:$4 sm:$0xff]   ;;  %v12671_v60 = vld [vmem:[%s14361_s3 + $0x2a4] ss:$24 sps:$4 sm:$0xff]   ;;  %v12673_v63 = vld [vmem:[%s14361_s3 + $0x2a0] ss:$24 sps:$4 sm:$0xff]  }
 0x18c   : > { %1618 = vmatprep.mubr.bf16.mxu0 %v955_v49  ;;  %v12670_v61 = vld [vmem:[%s14361_s3 + $0x2a8] ss:$24 sps:$4 sm:$0xff]   ;;  %v12674_v62 = vld [vmem:[%s14361_s3 + $0x2dc] ss:$24 sps:$4 sm:$0xff]   ;;  %v12676_v0 = vld [vmem:[%s14361_s3 + $0x2d8] ss:$24 sps:$4 sm:$0xff]  }
 0x18d   : > { %1640 = vmatpush1.bf16.msra.mxu1 %v12616_v22  ;;  %v12677_v1 = vld [vmem:[%s14361_s3 + $0x2d4] ss:$24 sps:$4 sm:$0xff]   ;;  %v12679_v4 = vld [vmem:[%s14361_s3 + $0x2d0] ss:$24 sps:$4 sm:$0xff]   ;;  %v12685_v8 = vld [vmem:[%s14361_s3 + $0x44] ss:$24 sps:$4 sm:$0xff]  }
 0x18e   : > { %1641 = vmatprep.subr.bf16.mxu1 %v12620_v23  ;;  %1597 = vmatpush1.bf16.msra.mxu0 %v12619_v24  ;;  %v952_v3 = vld [vmem:[#allocation2 + $0x10] sm:$0xff]  ;;  %v12683_v9 = vld [vmem:[%s14361_s3 + $0x40] ss:$24 sps:$4 sm:$0xff]   ;;  %v12691_v12 = vld [vmem:[%s14361_s3 + $0xa4] ss:$24 sps:$4 sm:$0xff]   ;;  %s757_s25 = scalar_lea.vmem [#allocation8], %s12273_s17 }
 0x18f   : > { %1598 = vmatprep.subr.bf16.mxu0 %v12623_v25  ;;  %v14431_v5 = vpack.c.bf16 %v952_v3, %v950_v2  ;;  %v12682_v6 = vld [vmem:[%s14361_s3 + $0x14] ss:$24 sps:$4 sm:$0xff]   ;;  %v12680_v7 = vld [vmem:[%s14361_s3 + $0x10] ss:$24 sps:$4 sm:$0xff]   ;;  %v12689_v13 = vld [vmem:[%s14361_s3 + $0xa0] ss:$24 sps:$4 sm:$0xff]  }
 0x190   : > { %v12688_v10 = vld [vmem:[%s14361_s3 + $0x74] ss:$24 sps:$4 sm:$0xff]   ;;  %v12686_v11 = vld [vmem:[%s14361_s3 + $0x70] ss:$24 sps:$4 sm:$0xff]   ;;  %v12697_v16 = vld [vmem:[%s14361_s3 + $0x104] ss:$24 sps:$4 sm:$0xff]  }
 0x191   : > { %1642 = vmatpush1.bf16.msra.mxu1 %v12622_v26  ;;  %v12694_v14 = vld [vmem:[%s14361_s3 + $0xd4] ss:$24 sps:$4 sm:$0xff]   ;;  %v12692_v15 = vld [vmem:[%s14361_s3 + $0xd0] ss:$24 sps:$4 sm:$0xff]   ;;  %v12695_v17 = vld [vmem:[%s14361_s3 + $0x100] ss:$24 sps:$4 sm:$0xff]  }
 0x192   : > { %1643 = vmatprep.subr.bf16.mxu1 %v12626_v27  ;;  %1599 = vmatpush1.bf16.msra.mxu0 %v12625_v28  ;;  %v12700_v18 = vld [vmem:[%s14361_s3 + $0x134] ss:$24 sps:$4 sm:$0xff]   ;;  %v12698_v19 = vld [vmem:[%s14361_s3 + $0x130] ss:$24 sps:$4 sm:$0xff]   ;;  %v12703_v20 = vld [vmem:[%s14361_s3 + $0x164] ss:$24 sps:$4 sm:$0xff]  }
 0x193   : > { %1600 = vmatprep.subr.bf16.mxu0 %v12629_v29  ;;  %v12701_v21 = vld [vmem:[%s14361_s3 + $0x160] ss:$24 sps:$4 sm:$0xff]   ;;  %v12706_v22 = vld [vmem:[%s14361_s3 + $0x194] ss:$24 sps:$4 sm:$0xff]   ;;  %v12704_v23 = vld [vmem:[%s14361_s3 + $0x190] ss:$24 sps:$4 sm:$0xff]  }
 0x194   : > { %v12709_v24 = vld [vmem:[%s14361_s3 + $0x1c4] ss:$24 sps:$4 sm:$0xff]   ;;  %v12707_v25 = vld [vmem:[%s14361_s3 + $0x1c0] ss:$24 sps:$4 sm:$0xff]   ;;  %v12712_v26 = vld [vmem:[%s14361_s3 + $0x1f4] ss:$24 sps:$4 sm:$0xff]  }
 0x195   : > { %1644 = vmatpush1.bf16.msra.mxu1 %v12628_v30  ;;  %v12710_v27 = vld [vmem:[%s14361_s3 + $0x1f0] ss:$24 sps:$4 sm:$0xff]   ;;  %v12715_v28 = vld [vmem:[%s14361_s3 + $0x224] ss:$24 sps:$4 sm:$0xff]   ;;  %v12713_v29 = vld [vmem:[%s14361_s3 + $0x220] ss:$24 sps:$4 sm:$0xff]  }
 0x196   : > { %1645 = vmatprep.subr.bf16.mxu1 %v12632_v31  ;;  %1601 = vmatpush1.bf16.msra.mxu0 %v12631_v32  ;;  %v12718_v30 = vld [vmem:[%s14361_s3 + $0x254] ss:$24 sps:$4 sm:$0xff]   ;;  %v12716_v31 = vld [vmem:[%s14361_s3 + $0x250] ss:$24 sps:$4 sm:$0xff]   ;;  %v12721_v32 = vld [vmem:[%s14361_s3 + $0x284] ss:$24 sps:$4 sm:$0xff]  }
 0x197   : > { %1602 = vmatprep.subr.bf16.mxu0 %v12635_v33  ;;  %v12719_v33 = vld [vmem:[%s14361_s3 + $0x280] ss:$24 sps:$4 sm:$0xff]   ;;  %s13790_s0 = smov 96   ;;  %s13791_s2 = smov 32   ;;  %vm3028_vm2 = vcmask 64512   ;;  %vm4302_vm3 = vcmask 523264   ;;  %vm15102_vm5 = vmpackc.low %vm1811_vm1, %vm1811_vm1 }
 0x198   : > { %s10946_s20 = sshll.u32 %s14356_s19, 8  ;;  %vm4304_vm4 = vcmask 785408   ;;  %s10947_s23 = sshll.u32 %s14356_s19, 1  ;;  %vm6828_vm6 = vcmask 130048  }
 0x199   : > { %1646 = vmatpush1.bf16.msra.mxu1 %v12634_v34  ;;  %v12724_v34 = vld [vmem:[%s14361_s3 + $0x2b4] ss:$24 sps:$4 sm:$0xff]   ;;  %s14837_s22 = scalar_lea.vmem [#allocation9], %s10946_s20  ;;  %s775_s15 = scalar_lea.vmem [#allocation10], %s10947_s23 }
 0x19a   : > { %1647 = vmatprep.subr.bf16.mxu1 %v12638_v35  ;;  %1603 = vmatpush1.bf16.msra.mxu0 %v12637_v36  ;;  %v12722_v35 = vld [vmem:[%s14361_s3 + $0x2b0] ss:$24 sps:$4 sm:$0xff]   ;;  %v12727_v36 = vld [vmem:[%s14361_s3 + $0x2e4] ss:$24 sps:$4 sm:$0xff]   ;;  %s14912_s18 = scalar_lea.vmem [#allocation11], %s12272_s16  ;;  %p934_p1 = scmp.lt.s32.totalorder %s16201_s7, 1 }
 0x19b   : > { %1604 = vmatprep.subr.bf16.mxu0 %v12641_v37  ;;  %v12725_v37 = vld [vmem:[%s14361_s3 + $0x2e0] ss:$24 sps:$4 sm:$0xff]   ;;  %s16209_s13 = sld [smem:[#allocation34_spill]]  ;;  %s15058_s26 = scalar_lea.vmem [#allocation14], %s12273_s17 }
 0x19c   : > { %s15048_s27 = scalar_select %p934_p1, %s16201_s7, 1 }
 0x19d   : > { %1648 = vmatpush1.bf16.msra.mxu1 %v12640_v38  ;;  %v13787_v38 = vmov 0.0   ;;  %s16210_s21 = sld [smem:[#allocation33_spill]]  ;;  %s15494_s17 = scalar_lea.vmem [#allocation12], %s10946_s20 }
 0x19e   : > { %1649 = vmatprep.subr.bf16.mxu1 %v12644_v39  ;;  %1605 = vmatpush1.bf16.msra.mxu0 %v12643_v40  ;;  %v1076_v39 = vlaneseq  ;;  %s12274_s29 = smul.u32 6, %s15048_s27  ;;  %s16214_s24 = sld [smem:[#allocation36_spill]] }
 0x19f   : > { %1606 = vmatprep.subr.bf16.mxu0 %v12647_v41  ;;  %p12350_p12 = scmp.eq.s32.totalorder %s16201_s7, 1 }
 0x1a0   : > { %v14475_v40 = vshrl.u32 %v1076_v39, 7 }
 0x1a1   : > { %1650 = vmatpush1.bf16.msra.mxu1 %v12646_v42  ;;  %v14482_v42 = vld [vmem:[%s757_s25] sm:$0x3f]  ;;  %s15054_s28 = scalar_lea.vmem %s16209_s13, %s12274_s29  ;;  %s802_s25 = scalar_lea.vmem [#allocation13], %s10947_s23 }
 0x1a2   : > { %1651 = vmatprep.subr.bf16.mxu1 %v12650_v43  ;;  %1607 = vmatpush1.bf16.msra.mxu0 %v12649_v44  ;;  %v14478_v41 = vsub.s32 2, %v14475_v40  ;;  %v14485_v43 = vsub.s32 0, %v14475_v40  ;;  %v1094_v2 = vsub.s32 4, %v14475_v40  ;;  %s16213_s23 = sld [smem:[#allocation35_spill]] }
 0x1a3   : > { %1608 = vmatprep.subr.bf16.mxu0 %v12653_v45  ;;  %s15087_s3 = scalar_lea.vmem %s16210_s21, %s12274_s29 }
 0x1a4   : > { %v1087_v44 = vrot.slane %v14482_v42, %v14478_v41  ;;  %v1079_v45 = vrot.slane %v14482_v42, %v14485_v43  ;;  %v1095_v3 = vrot.slane %v14482_v42, %v1094_v2 }
 0x1a5   : > { %1652 = vmatpush1.bf16.msra.mxu1 %v12652_v48 }
 0x1a6   : > { %1653 = vmatprep.subr.bf16.mxu1 %v12656_v50  ;;  %1609 = vmatpush1.bf16.msra.mxu0 %v12655_v51 }
 0x1a7   : > { %1610 = vmatprep.subr.bf16.mxu0 %v12659_v52 }
 0x1a9   : > { %1654 = vmatpush1.bf16.msra.mxu1 %v12658_v53 }
 0x1aa   : > { %1655 = vmatprep.subr.bf16.mxu1 %v12662_v54  ;;  %1611 = vmatpush1.bf16.msra.mxu0 %v12661_v55  ;;  %v14495_v55 = vsub.s32 1, %v14475_v40 }
 0x1ab   : > { %1612 = vmatprep.subr.bf16.mxu0 %v12665_v56 }
 0x1ad   : > { %1656 = vmatpush1.bf16.msra.mxu1 %v12664_v57  ;;  %v14499_v57 = vsub.s32 3, %v14475_v40 }
 0x1ae   : > { %1657 = vmatprep.subr.bf16.mxu1 %v12668_v58  ;;  %1613 = vmatpush1.bf16.msra.mxu0 %v12667_v59  ;;  %v1083_v58 = vrot.slane %v14482_v42, %v14495_v55 }
 0x1af   : > { %1614 = vmatprep.subr.bf16.mxu0 %v12671_v60  ;;  %v1091_v59 = vrot.slane %v14482_v42, %v14499_v57 }
 0x1b1   : > { %1658 = vmatpush1.bf16.msra.mxu1 %v12670_v61 }
 0x1b2   : > { %1659 = vmatprep.subr.bf16.mxu1 %v12674_v62  ;;  %1615 = vmatpush1.bf16.msra.mxu0 %v12673_v63 }
 0x1b3   : > { %1616 = vmatprep.subr.bf16.mxu0 %v12677_v1 }
 0x1b5   : > { %1660 = vmatpush1.bf16.msra.mxu1 %v12676_v0 }
 0x1b6   : > { %1617 = vmatpush1.bf16.msra.mxu0 %v12679_v4  ;;  %11757 = vmatprep.subr.mxu1 %v13787_v38  ;;  %v1098_v4 = vsub.s32 5, %v14475_v40 }
 0x1b7   : > { %1672 = vmatprep.subr.bf16.mxu0 %v12682_v6 }
 0x1b8   : > { %1662 = vmatmul.mubr.bf16.vlgmr.msra.gmra.mrb[0].mxu1 %v14431_v5 }
 0x1b9   : > { %1619 = vmatmul.mubr.bf16.vlgmr.msra.gmra.mrb[0].mxu0 %v14431_v5  ;;  %11759 = vmatprep.mubr.msk.f32.mxu1 %vm13788_vm0, %v13787_v38 }
 0x1ba   : > { %1673 = vmatpush1.bf16.msra.mxu0 %v12680_v7  ;;  %1704 = vmatprep.mubr.bf16.mxu0 %v955_v49 }
 0x1bb   : > { %1674 = vmatprep.subr.bf16.mxu0 %v12685_v8 }
 0x1be   : > { %1675 = vmatpush1.bf16.msra.mxu0 %v12683_v9  ;;  %v1099_v9 = vrot.slane %v14482_v42, %v1098_v4 }
 0x1bf   : > { %1676 = vmatprep.subr.bf16.mxu0 %v12688_v10 }
 0x1c2   : > { %1677 = vmatpush1.bf16.msra.mxu0 %v12686_v11 }
 0x1c3   : > { %1678 = vmatprep.subr.bf16.mxu0 %v12691_v12 }
 0x1c6   : > { %1679 = vmatpush1.bf16.msra.mxu0 %v12689_v13 }
 0x1c7   : > { %1680 = vmatprep.subr.bf16.mxu0 %v12694_v14 }
 0x1ca   : > { %1681 = vmatpush1.bf16.msra.mxu0 %v12692_v15 }
 0x1cb   : > { %1682 = vmatprep.subr.bf16.mxu0 %v12697_v16 }
 0x1ce   : > { %1683 = vmatpush1.bf16.msra.mxu0 %v12695_v17 }
 0x1cf   : > { %1684 = vmatprep.subr.bf16.mxu0 %v12700_v18 }
 0x1d2   : > { %1685 = vmatpush1.bf16.msra.mxu0 %v12698_v19 }
 0x1d3   : > { %1686 = vmatprep.subr.bf16.mxu0 %v12703_v20 }
 0x1d6   : > { %1687 = vmatpush1.bf16.msra.mxu0 %v12701_v21 }
 0x1d7   : > { %1688 = vmatprep.subr.bf16.mxu0 %v12706_v22 }
 0x1da   : > { %1689 = vmatpush1.bf16.msra.mxu0 %v12704_v23 }
 0x1db   : > { %1690 = vmatprep.subr.bf16.mxu0 %v12709_v24 }
 0x1de   : > { %1691 = vmatpush1.bf16.msra.mxu0 %v12707_v25 }
 0x1df   : > { %1692 = vmatprep.subr.bf16.mxu0 %v12712_v26 }
 0x1e2   : > { %1693 = vmatpush1.bf16.msra.mxu0 %v12710_v27 }
 0x1e3   : > { %1694 = vmatprep.subr.bf16.mxu0 %v12715_v28 }
 0x1e6   : > { %1695 = vmatpush1.bf16.msra.mxu0 %v12713_v29 }
 0x1e7   : > { %1696 = vmatprep.subr.bf16.mxu0 %v12718_v30 }
 0x1ea   : > { %1697 = vmatpush1.bf16.msra.mxu0 %v12716_v31 }
 0x1eb   : > { %1698 = vmatprep.subr.bf16.mxu0 %v12721_v32 }
 0x1ee   : > { %1699 = vmatpush1.bf16.msra.mxu0 %v12719_v33 }
 0x1ef   : > { %1700 = vmatprep.subr.bf16.mxu0 %v12724_v34 }
 0x1f2   : > { %1701 = vmatpush1.bf16.msra.mxu0 %v12722_v35 }
 0x1f3   : > { %1702 = vmatprep.subr.bf16.mxu0 %v12727_v36 }
 0x1f6   : > { %1703 = vmatpush1.bf16.msra.mxu0 %v12725_v37 }
 0x1f7   : > { %11752 = vmatprep.subr.mxu0 %v13787_v38 }
 0x1f9   : > { %1705 = vmatmul.mubr.bf16.vlgmr.msra.gmra.mrb[4].mxu0 %v14431_v5 }
 0x1fa   : > { %11754 = vmatprep.mubr.msk.f32.mxu0 %vm13788_vm0, %v13787_v38 }
 0x28b   : > { %v1663_v46 = vpop.f32.mrb[0].mxu1 }
 0x28c   : > { %v1664_v47 = vadd.f32 %v1663_v46, %v1087_v44  ;;  %v1665_v48 = vpop.f32.mrb[1].mxu1  ;;  %v1620_v50 = vpop.f32.mrb[0].mxu0 }
 0x28d   : > { %v1667_v49 = vpop.f32.mrb[2].mxu1  ;;  %v1621_v52 = vadd.f32 %v1620_v50, %v1079_v45  ;;  %v1622_v53 = vpop.f32.mrb[1].mxu0  ;;  %v14514_v61 = vadd.f32 %v1665_v48, %v1091_v59 }
 0x28e   : > { %v1669_v51 = vpop.f32.mrb[3].mxu1  ;;  %1746 = vrot.lane.b32.xlu1 %v1664_v47, %s13789_s11  ;;  %1744 = vrot.lane.b32.xlu0 %v1664_v47, %s13790_s0  ;;  %v1624_v54 = vpop.f32.mrb[2].mxu0  ;;  %v14512_v60 = vadd.f32 %v1622_v53, %v1083_v58  ;;  %v14530_v63 = vadd.f32 %v1667_v49, %v1087_v44 }
 0x28f   : > { %11753 = vmatpush3.xpose.msk.msra.mxu0 %vm1811_vm1, %v1664_v47  ;;  %v1626_v56 = vpop.f32.mrb[3].mxu0  ;;  %v14528_v62 = vadd.f32 %v1624_v54, %v1079_v45  ;;  %v14546_v1 = vadd.f32 %v1669_v51, %v1091_v59 }
 0x290   : > { %11832 = vmatprep.subr.mxu0 %v13787_v38  ;;  %v14544_v0 = vadd.f32 %v1626_v56, %v1083_v58 }
 0x292   : > { %11755 = vmatmul.mubr.msk.f32.vlgmr.msra.gmra.mrb[8].mxu0 %vm1811_vm1, %v1621_v52  ;;  %1718 = vrot.lane.b32.xlu1 %v1621_v52, %s13789_s11 }
 0x293   : > { %1716 = vrot.lane.b32.xlu0 %v1621_v52, %s13790_s0  ;;  %11834 = vmatprep.mubr.msk.f32.mxu0 %vm13788_vm0, %v13787_v38 }
 0x296   : > { %1720 = vrot.lane.b32.xlu1 %v1621_v52, %s13791_s2 }
 0x297   : > { %1748 = vrot.lane.b32.xlu0 %v1664_v47, %s13791_s2 }
 0x29a   : > { %1723 = vrot.lane.b32.xlu1 %v14512_v60, %s13790_s0 }
 0x29b   : > { %1751 = vrot.lane.b32.xlu0 %v14514_v61, %s13790_s0 }
 0x29e   : > { %1725 = vrot.lane.b32.xlu1 %v14512_v60, %s13789_s11 }
 0x29f   : > { %1753 = vrot.lane.b32.xlu0 %v14514_v61, %s13789_s11 }
 0x2a2   : > { %1727 = vrot.lane.b32.xlu1 %v14512_v60, %s13791_s2 }
 0x2a3   : > { %1755 = vrot.lane.b32.xlu0 %v14514_v61, %s13791_s2 }
 0x2a6   : > { %1730 = vrot.lane.b32.xlu1 %v14528_v62, %s13790_s0 }
 0x2a7   : > { %1758 = vrot.lane.b32.xlu0 %v14530_v63, %s13790_s0 }
 0x2aa   : > { %1732 = vrot.lane.b32.xlu1 %v14528_v62, %s13789_s11 }
 0x2ab   : > { %1760 = vrot.lane.b32.xlu0 %v14530_v63, %s13789_s11 }
 0x2ae   : > { %1734 = vrot.lane.b32.xlu1 %v14528_v62, %s13791_s2 }
 0x2af   : > { %1762 = vrot.lane.b32.xlu0 %v14530_v63, %s13791_s2 }
 0x2b2   : > { %1737 = vrot.lane.b32.xlu1 %v14544_v0, %s13790_s0 }
 0x2b3   : > { %1765 = vrot.lane.b32.xlu0 %v14546_v1, %s13790_s0 }
 0x2b6   : > { %1739 = vrot.lane.b32.xlu1 %v14544_v0, %s13789_s11 }
 0x2b7   : > { %1767 = vrot.lane.b32.xlu0 %v14546_v1, %s13789_s11 }
 0x2ba   : > { %1741 = vrot.lane.b32.xlu1 %v14544_v0, %s13791_s2 }
 0x2bb   : > { %1769 = vrot.lane.b32.xlu0 %v14546_v1, %s13791_s2 }
 0x2cc   : > { %v1706_v5 = vpop.f32.mrb[4].mxu0 }
 0x2cd   : > { %v1707_v6 = vadd.f32 %v1706_v5, %v1095_v3  ;;  %v1708_v7 = vpop.f32.mrb[5].mxu0 }
 0x2ce   : > { %v1710_v8 = vpop.f32.mrb[6].mxu0  ;;  %v14573_v12 = vadd.f32 %v1708_v7, %v1099_v9 }
 0x2cf   : > { %1775 = vrot.lane.b32.xlu0 %v1707_v6, %s13789_s11  ;;  %v14569_v10 = vadd.f32 %v1710_v8, %v1095_v3  ;;  %v1712_v11 = vpop.f32.mrb[7].mxu0  ;;  %1772 = vrot.lane.b32.xlu1 %v1707_v6, %s13790_s0 }
 0x2d0   : > { %11833 = vmatpush3.msra.mxu0 %v1707_v6  ;;  %v14586_v13 = vadd.f32 %v1712_v11, %v1099_v9 }
 0x2d1   : > { %11842 = vmatprep.subr.mxu0 %v13787_v38 }
 0x2d3   : > { %1792 = vrot.lane.b32.xlu0 %v14569_v10, %s13790_s0  ;;  %1778 = vrot.lane.b32.xlu1 %v1707_v6, %s13791_s2 }
 0x2d7   : > { %1798 = vrot.lane.b32.xlu0 %v14569_v10, %s13791_s2  ;;  %1782 = vrot.lane.b32.xlu1 %v14573_v12, %s13790_s0 }
 0x2db   : > { %1785 = vrot.lane.b32.xlu1 %v14573_v12, %s13789_s11 }
 0x2df   : > { %1788 = vrot.lane.b32.xlu1 %v14573_v12, %s13791_s2 }
 0x2e3   : > { %1795 = vrot.lane.b32.xlu1 %v14569_v10, %s13789_s11 }
 0x2e7   : > { %1802 = vrot.lane.b32.xlu1 %v14586_v13, %s13790_s0 }
 0x300   : > { %v1747_v14 = vpop.permute.xlu1 %1746  ;;  %v1745_v15 = vpop.permute.xlu0 %1744 }
 0x301   : > { %11758 = vmatpush3.xpose.msk.msra.mxu1 %vm1811_vm1, %v1745_v15 }
 0x302   : > { %11762 = vmatprep.subr.mxu1 %v13787_v38 }
 0x304   : > { %v1719_v16 = vpop.permute.xlu1 %1718 }
 0x305   : > { %v1717_v17 = vpop.permute.xlu0 %1716 }
 0x306   : > { %11760 = vmatmul.mubr.msk.f32.vlgmr.msra.gmra.mrb[4].mxu1 %vm1811_vm1, %v1717_v17 }
 0x307   : > { %11763 = vmatpush3.xpose.msk.msra.mxu1 %vm1811_vm1, %v1747_v14  ;;  %11764 = vmatprep.mubr.msk.f32.mxu1 %vm13788_vm0, %v13787_v38 }
 0x308   : > { %v1721_v18 = vpop.permute.xlu1 %1720  ;;  %11767 = vmatprep.subr.mxu1 %v13787_v38 }
 0x309   : > { %v1749_v19 = vpop.permute.xlu0 %1748 }
 0x30a   : > { %11765 = vmatmul.mubr.msk.f32.vlgmr.msra.gmra.mrb[6].mxu1 %vm1811_vm1, %v1719_v16 }
 0x30b   : > { %11768 = vmatpush3.xpose.msk.msra.mxu1 %vm1811_vm1, %v1749_v19  ;;  %11769 = vmatprep.mubr.msk.f32.mxu1 %vm13788_vm0, %v13787_v38 }
 0x30c   : > { %11772 = vmatprep.subr.mxu1 %v13787_v38  ;;  %v1724_v20 = vpop.permute.xlu1 %1723 }
 0x30d   : > { %v1752_v21 = vpop.permute.xlu0 %1751 }
 0x30e   : > { %11770 = vmatmul.mubr.msk.f32.vlgmr.msra.gmra.mrb[8].mxu1 %vm1811_vm1, %v1721_v18 }
 0x30f   : > { %11773 = vmatpush3.xpose.msk.msra.mxu1 %vm1811_vm1, %v14514_v61  ;;  %11774 = vmatprep.mubr.msk.f32.mxu1 %vm13788_vm0, %v13787_v38 }
 0x310   : > { %11777 = vmatprep.subr.mxu1 %v13787_v38  ;;  %v1726_v23 = vpop.permute.xlu1 %1725 }
 0x311   : > { %v1754_v22 = vpop.permute.xlu0 %1753 }
 0x312   : > { %11775 = vmatmul.mubr.msk.f32.vlgmr.msra.gmra.mrb[10].mxu1 %vm1811_vm1, %v14512_v60 }
 0x313   : > { %11778 = vmatpush3.xpose.msk.msra.mxu1 %vm1811_vm1, %v1752_v21  ;;  %11779 = vmatprep.mubr.msk.f32.mxu1 %vm13788_vm0, %v13787_v38 }
 0x314   : > { %11782 = vmatprep.subr.mxu1 %v13787_v38  ;;  %v1728_v25 = vpop.permute.xlu1 %1727 }
 0x315   : > { %v1756_v24 = vpop.permute.xlu0 %1755 }
 0x316   : > { %11780 = vmatmul.mubr.msk.f32.vlgmr.msra.gmra.mrb[12].mxu1 %vm1811_vm1, %v1724_v20 }
 0x317   : > { %11783 = vmatpush3.xpose.msk.msra.mxu1 %vm1811_vm1, %v1754_v22  ;;  %11784 = vmatprep.mubr.msk.f32.mxu1 %vm13788_vm0, %v13787_v38 }
 0x318   : > { %11787 = vmatprep.subr.mxu1 %v13787_v38  ;;  %v1731_v27 = vpop.permute.xlu1 %1730 }
 0x319   : > { %v1759_v26 = vpop.permute.xlu0 %1758 }
 0x31a   : > { %11785 = vmatmul.mubr.msk.f32.vlgmr.msra.gmra.mrb[14].mxu1 %vm1811_vm1, %v1726_v23 }
 0x31b   : > { %11788 = vmatpush3.xpose.msk.msra.mxu1 %vm1811_vm1, %v1756_v24  ;;  %11789 = vmatprep.mubr.msk.f32.mxu1 %vm13788_vm0, %v13787_v38 }
 0x31c   : > { %11792 = vmatprep.subr.mxu1 %v13787_v38  ;;  %v1733_v29 = vpop.permute.xlu1 %1732 }
 0x31d   : > { %v1761_v28 = vpop.permute.xlu0 %1760 }
 0x31e   : > { %11790 = vmatmul.mubr.msk.f32.vlgmr.msra.gmra.mrb[16].mxu1 %vm1811_vm1, %v1728_v25 }
 0x31f   : > { %11793 = vmatpush3.xpose.msk.msra.mxu1 %vm1811_vm1, %v14530_v63  ;;  %11794 = vmatprep.mubr.msk.f32.mxu1 %vm13788_vm0, %v13787_v38 }
 0x320   : > { %11797 = vmatprep.subr.mxu1 %v13787_v38  ;;  %v1735_v31 = vpop.permute.xlu1 %1734 }
 0x321   : > { %v1763_v30 = vpop.permute.xlu0 %1762 }
 0x322   : > { %11795 = vmatmul.mubr.msk.f32.vlgmr.msra.gmra.mrb[18].mxu1 %vm1811_vm1, %v14528_v62 }
 0x323   : > { %11798 = vmatpush3.xpose.msk.msra.mxu1 %vm1811_vm1, %v1759_v26  ;;  %11799 = vmatprep.mubr.msk.f32.mxu1 %vm13788_vm0, %v13787_v38 }
 0x324   : > { %11802 = vmatprep.subr.mxu1 %v13787_v38  ;;  %v1738_v33 = vpop.permute.xlu1 %1737 }
 0x325   : > { %v1766_v32 = vpop.permute.xlu0 %1765 }
 0x326   : > { %11800 = vmatmul.mubr.msk.f32.vlgmr.msra.gmra.mrb[20].mxu1 %vm1811_vm1, %v1731_v27 }
 0x327   : > { %11803 = vmatpush3.xpose.msk.msra.mxu1 %vm1811_vm1, %v1761_v28  ;;  %11804 = vmatprep.mubr.msk.f32.mxu1 %vm13788_vm0, %v13787_v38 }
 0x328   : > { %11807 = vmatprep.subr.mxu1 %v13787_v38  ;;  %v1740_v35 = vpop.permute.xlu1 %1739 }
 0x329   : > { %v1768_v34 = vpop.permute.xlu0 %1767 }
 0x32a   : > { %11805 = vmatmul.mubr.msk.f32.vlgmr.msra.gmra.mrb[22].mxu1 %vm1811_vm1, %v1733_v29 }
 0x32b   : > { %11808 = vmatpush3.xpose.msk.msra.mxu1 %vm1811_vm1, %v1763_v30  ;;  %11809 = vmatprep.mubr.msk.f32.mxu1 %vm13788_vm0, %v13787_v38 }
 0x32c   : > { %11812 = vmatprep.subr.mxu1 %v13787_v38  ;;  %v1742_v37 = vpop.permute.xlu1 %1741 }
 0x32d   : > { %v1770_v36 = vpop.permute.xlu0 %1769 }
 0x32e   : > { %11810 = vmatmul.mubr.msk.f32.vlgmr.msra.gmra.mrb[24].mxu1 %vm1811_vm1, %v1735_v31 }
 0x32f   : > { %11813 = vmatpush3.xpose.msk.msra.mxu1 %vm1811_vm1, %v14546_v1  ;;  %11814 = vmatprep.mubr.msk.f32.mxu1 %vm13788_vm0, %v13787_v38 }
 0x330   : > { %11817 = vmatprep.subr.mxu1 %v13787_v38 }
 0x332   : > { %11815 = vmatmul.mubr.msk.f32.vlgmr.msra.gmra.mrb[26].mxu1 %vm1811_vm1, %v14544_v0 }
 0x333   : > { %11818 = vmatpush3.xpose.msk.msra.mxu1 %vm1811_vm1, %v1766_v32  ;;  %11819 = vmatprep.mubr.msk.f32.mxu1 %vm13788_vm0, %v13787_v38 }
 0x334   : > { %11822 = vmatprep.subr.mxu1 %v13787_v38 }
 0x336   : > { %11820 = vmatmul.mubr.msk.f32.vlgmr.msra.gmra.mrb[28].mxu1 %vm1811_vm1, %v1738_v33 }
 0x337   : > { %11823 = vmatpush3.xpose.msk.msra.mxu1 %vm1811_vm1, %v1768_v34  ;;  %11824 = vmatprep.mubr.msk.f32.mxu1 %vm13788_vm0, %v13787_v38 }
 0x338   : > { %11827 = vmatprep.subr.mxu1 %v13787_v38 }
 0x33a   : > { %11825 = vmatmul.mubr.msk.f32.vlgmr.msra.gmra.mrb[30].mxu1 %vm1811_vm1, %v1740_v35 }
 0x33b   : > { %11828 = vmatpush3.xpose.msk.msra.mxu1 %vm1811_vm1, %v1770_v36  ;;  %11829 = vmatprep.mubr.msk.f32.mxu1 %vm13788_vm0, %v13787_v38 }
 0x33c   : > { %11837 = vmatprep.subr.mxu1 %v13787_v38 }
 0x33e   : > { %11830 = vmatmul.mubr.msk.f32.vlgmr.msra.gmra.mrb[32].mxu1 %vm1811_vm1, %v1742_v37 }
 0x33f   : > { %11839 = vmatprep.mubr.msk.f32.mxu1 %vm13788_vm0, %v13787_v38 }
 0x341   : > { %v1773_v47 = vpop.permute.xlu1 %1772  ;;  %v14690_v15 = vpop.permute.xlu0 %1775 }
 0x342   : > { %11838 = vmatpush3.msra.mxu1 %v1773_v47 }
 0x343   : > { %11847 = vmatprep.subr.mxu1 %v13787_v38 }
 0x345   : > { %v14696_v22 = vpop.permute.xlu0 %1792 }
 0x349   : > { %v14706_v32 = vpop.permute.xlu0 %1798 }
 0x365   : > { %v1882_v39 = vpop.f32.mrb[8].mxu0 }
 0x366   : > { %v2996_v42 = vmul.f32 1.442695, %v1882_v39  ;;  %v11756_v44 = vpop.f32.mrb[9].mxu0 }
 0x368   : > { %13160 = vpow2.f32 %v2996_v42 }
 0x372   : > { %v14673_v45 = vpop.eup %13160 }
 0x373   : > { %v3029_v46 = vsel %vm3028_vm2, %v14673_v45, 0.0 }
 0x374   : > { %3030 = vadd.xlane.f32.xlu0 %v3029_v46 }
 0x3d9   : > { %v1956_v48 = vpop.f32.mrb[4].mxu1 }
 0x3da   : > { %v2998_v49 = vmul.f32 1.442695, %v1956_v48  ;;  %v11761_v50 = vpop.f32.mrb[5].mxu1 }
 0x3dc   : > { %13162 = vpow2.f32 %v2998_v49 }
 0x3dd   : > { %v2030_v51 = vpop.f32.mrb[6].mxu1 }
 0x3de   : > { %v3000_v52 = vmul.f32 1.442695, %v2030_v51  ;;  %v11766_v53 = vpop.f32.mrb[7].mxu1 }
 0x3e0   : > { %13164 = vpow2.f32 %v3000_v52 }
 0x3e1   : > { %v2104_v54 = vpop.f32.mrb[8].mxu1 }
 0x3e2   : > { %v3002_v56 = vmul.f32 1.442695, %v2104_v54  ;;  %v11771_v58 = vpop.f32.mrb[9].mxu1 }
 0x3e4   : > { %13166 = vpow2.f32 %v3002_v56 }
 0x3e5   : > { %v2178_v59 = vpop.f32.mrb[10].mxu1 }
 0x3e6   : > { %v14678_v60 = vpop.eup %13162  ;;  %v3004_v61 = vmul.f32 1.442695, %v2178_v59  ;;  %v11776_v62 = vpop.f32.mrb[11].mxu1 }
 0x3e7   : > { %v3032_v63 = vsel %vm3028_vm2, %v14678_v60, 0.0 }
 0x3e8   : > { %13168 = vpow2.f32 %v3004_v61  ;;  %3033 = vadd.xlane.f32.xlu1 %v3032_v63 }
 0x3e9   : > { %v2252_v0 = vpop.f32.mrb[12].mxu1 }
 0x3ea   : > { %v14682_v1 = vpop.eup %13164  ;;  %v3006_v3 = vmul.f32 1.442695, %v2252_v0  ;;  %v11781_v5 = vpop.f32.mrb[13].mxu1 }
 0x3eb   : > { %v3035_v6 = vsel %vm3028_vm2, %v14682_v1, 0.0 }
 0x3ec   : > { %13170 = vpow2.f32 %v3006_v3  ;;  %3036 = vadd.xlane.f32.xlu0 %v3035_v6 }
 0x3ed   : > { %v2326_v7 = vpop.f32.mrb[14].mxu1 }
 0x3ee   : > { %v14686_v8 = vpop.eup %13166  ;;  %v3008_v9 = vmul.f32 1.442695, %v2326_v7  ;;  %v11786_v11 = vpop.f32.mrb[15].mxu1 }
 0x3ef   : > { %v3038_v14 = vsel %vm3028_vm2, %v14686_v8, 0.0 }
 0x3f0   : > { %13172 = vpow2.f32 %v3008_v9  ;;  %3039 = vadd.xlane.f32.xlu0 %v3038_v14 }
 0x3f1   : > { %v2400_v16 = vpop.f32.mrb[16].mxu1 }
 0x3f2   : > { %v14692_v17 = vpop.eup %13168  ;;  %v3010_v18 = vmul.f32 1.442695, %v2400_v16  ;;  %v11791_v19 = vpop.f32.mrb[17].mxu1 }
 0x3f3   : > { %v3041_v20 = vsel %vm3028_vm2, %v14692_v17, 0.0 }
 0x3f4   : > { %13174 = vpow2.f32 %v3010_v18  ;;  %3042 = vadd.xlane.f32.xlu1 %v3041_v20 }
 0x3f5   : > { %v2474_v21 = vpop.f32.mrb[18].mxu1 }
 0x3f6   : > { %v14698_v23 = vpop.eup %13170  ;;  %v3012_v24 = vmul.f32 1.442695, %v2474_v21  ;;  %v11796_v25 = vpop.f32.mrb[19].mxu1 }
 0x3f7   : > { %v3044_v26 = vsel %vm3028_vm2, %v14698_v23, 0.0  ;;  %v1779_v25 = vpop.permute.xlu1 %1778 }
 0x3f8   : > { %13176 = vpow2.f32 %v3012_v24  ;;  %3045 = vadd.xlane.f32.xlu0 %v3044_v26 }
 0x3f9   : > { %v2548_v27 = vpop.f32.mrb[20].mxu1 }
 0x3fa   : > { %v14702_v28 = vpop.eup %13172  ;;  %v3014_v29 = vmul.f32 1.442695, %v2548_v27  ;;  %v11801_v30 = vpop.f32.mrb[21].mxu1 }
 0x3fb   : > { %v3047_v31 = vsel %vm3028_vm2, %v14702_v28, 0.0  ;;  %v1783_v26 = vpop.permute.xlu1 %1782 }
 0x3fc   : > { %13178 = vpow2.f32 %v3014_v29  ;;  %3048 = vadd.xlane.f32.xlu1 %v3047_v31 }
 0x3fd   : > { %v2622_v33 = vpop.f32.mrb[22].mxu1 }
 0x3fe   : > { %v14708_v34 = vpop.eup %13174  ;;  %v3016_v35 = vmul.f32 1.442695, %v2622_v33  ;;  %v11806_v36 = vpop.f32.mrb[23].mxu1 }
 0x3ff   : > { %v3050_v37 = vsel %vm3028_vm2, %v14708_v34, 0.0  ;;  %v1786_v27 = vpop.permute.xlu1 %1785 }
 0x400   : > { %13180 = vpow2.f32 %v3016_v35  ;;  %3051 = vadd.xlane.f32.xlu0 %v3050_v37 }
 0x401   : > { %v2696_v39 = vpop.f32.mrb[24].mxu1  ;;  %v3031_v42 = vpop.xlane.xlu0 %3030 }
 0x402   : > { %v14712_v44 = vpop.eup %13176  ;;  %v3018_v46 = vmul.f32 1.442695, %v2696_v39  ;;  %13182 = vrcp.f32 %v3031_v42  ;;  %v11811_v47 = vpop.f32.mrb[25].mxu1 }
 0x403   : > { %v3053_v48 = vsel %vm3028_vm2, %v14712_v44, 0.0  ;;  %v1789_v29 = vpop.permute.xlu1 %1788 }
 0x404   : > { %13184 = vpow2.f32 %v3018_v46  ;;  %3054 = vadd.xlane.f32.xlu1 %v3053_v48 }
 0x405   : > { %v2770_v49 = vpop.f32.mrb[26].mxu1 }
 0x406   : > { %v14716_v50 = vpop.eup %13178  ;;  %v3020_v51 = vmul.f32 1.442695, %v2770_v49  ;;  %v11816_v52 = vpop.f32.mrb[27].mxu1 }
 0x407   : > { %v3056_v53 = vsel %vm3028_vm2, %v14716_v50, 0.0  ;;  %v14754_v30 = vpop.permute.xlu1 %1795 }
 0x408   : > { %13186 = vpow2.f32 %v3020_v51  ;;  %3057 = vadd.xlane.f32.xlu0 %v3056_v53 }
 0x409   : > { %v2844_v54 = vpop.f32.mrb[28].mxu1 }
 0x40a   : > { %v14720_v56 = vpop.eup %13180  ;;  %v3022_v58 = vmul.f32 1.442695, %v2844_v54  ;;  %v11821_v59 = vpop.f32.mrb[29].mxu1 }
 0x40b   : > { %v3059_v61 = vsel %vm3028_vm2, %v14720_v56, 0.0  ;;  %v14756_v31 = vpop.permute.xlu1 %1802 }
 0x40c   : > { %v13183_v62 = vpop.eup %13182  ;;  %13188 = vpow2.f32 %v3022_v58  ;;  %3060 = vadd.xlane.f32.xlu1 %v3059_v61 }
 0x40d   : > { %v2918_v63 = vpop.f32.mrb[30].mxu1  ;;  %v3078_v0 = vmul.f32 %v13183_v62, %v14673_v45 }
 0x40e   : > { %v14725_v3 = vpop.eup %13184  ;;  %v3024_v5 = vmul.f32 1.442695, %v2918_v63  ;;  %v11826_v6 = vpop.f32.mrb[31].mxu1 }
 0x40f   : > { %11835 = vmatmul.mubr.msk.f32.vlgmr.msra.gmra.mrb[10].mxu0 %vm3028_vm2, %v3078_v0  ;;  %v3062_v7 = vsel %vm3028_vm2, %v14725_v3, 0.0 }
 0x410   : > { %13190 = vpow2.f32 %v3024_v5  ;;  %3063 = vadd.xlane.f32.xlu0 %v3062_v7  ;;  %11843 = vmatpush3.msra.mxu0 %v14690_v15 }
 0x411   : > { %v2992_v9 = vpop.f32.mrb[32].mxu1  ;;  %11844 = vmatprep.mubr.msk.f32.mxu0 %vm13788_vm0, %v13787_v38  ;;  %11852 = vmatprep.subr.mxu0 %v13787_v38 }
 0x412   : > { %v14734_v45 = vpop.eup %13186  ;;  %v3026_v11 = vmul.f32 1.442695, %v2992_v9  ;;  %v11831_v14 = vpop.f32.mrb[33].mxu1 }
 0x413   : > { %v3065_v16 = vsel %vm3028_vm2, %v14734_v45, 0.0 }
 0x414   : > { %13192 = vpow2.f32 %v3026_v11  ;;  %3066 = vadd.xlane.f32.xlu1 %v3065_v16 }
 0x416   : > { %v14738_v18 = vpop.eup %13188 }
 0x417   : > { %v3068_v15 = vsel %vm3028_vm2, %v14738_v18, 0.0 }
 0x418   : > { %3069 = vadd.xlane.f32.xlu0 %v3068_v15 }
 0x41a   : > { %v14742_v19 = vpop.eup %13190 }
 0x41b   : > { %v3071_v20 = vsel %vm3028_vm2, %v14742_v19, 0.0 }
 0x41c   : > { %3072 = vadd.xlane.f32.xlu0 %v3071_v20 }
 0x41e   : > { %v14746_v21 = vpop.eup %13192 }
 0x41f   : > { %v3074_v24 = vsel %vm3028_vm2, %v14746_v21, 0.0 }
 0x420   : > { %3075 = vadd.xlane.f32.xlu0 %v3074_v24 }
 0x425   : > { %1808 = vrot.lane.b32.xlu1 %v14586_v13, %s13791_s2 }
 0x436   : > { %1805 = vrot.lane.b32.xlu0 %v14586_v13, %s13789_s11 }
 0x475   : > { %v3034_v33 = vpop.xlane.xlu1 %3033 }
 0x476   : > { %13194 = vrcp.f32 %v3034_v33  ;;  %v12737_v33 = vld [vmem:[%s14837_s22 + $0x30] ss:$8 sps:$4 sm:$0xff]  }
 0x479   : > { %v3037_v35 = vpop.xlane.xlu0 %3036 }
 0x47a   : > { %13196 = vrcp.f32 %v3037_v35  ;;  %v12742_v35 = vld [vmem:[%s14837_s22 + $0x44] ss:$8 sps:$4 sm:$0xff]  }
 0x47d   : > { %v3040_v36 = vpop.xlane.xlu0 %3039 }
 0x47e   : > { %13198 = vrcp.f32 %v3040_v36  ;;  %v12740_v36 = vld [vmem:[%s14837_s22 + $0x40] ss:$8 sps:$4 sm:$0xff]  }
 0x480   : > { %v13195_v37 = vpop.eup %13194 }
 0x481   : > { %v3080_v39 = vmul.f32 %v13195_v37, %v14678_v60  ;;  %v3043_v42 = vpop.xlane.xlu1 %3042  ;;  %v12745_v37 = vld [vmem:[%s14837_s22 + $0x54] ss:$8 sps:$4 sm:$0xff]  }
 0x482   : > { %13200 = vrcp.f32 %v3043_v42  ;;  %v12748_v42 = vld [vmem:[%s14837_s22 + $0x64] ss:$8 sps:$4 sm:$0xff]  }
 0x483   : > { %11840 = vmatmul.mubr.msk.f32.vlgmr.msra.gmra.mrb[34].mxu1 %vm3028_vm2, %v3080_v39  ;;  %v12743_v39 = vld [vmem:[%s14837_s22 + $0x50] ss:$8 sps:$4 sm:$0xff]  }
 0x484   : > { %v13197_v46 = vpop.eup %13196  ;;  %11848 = vmatpush3.msra.mxu1 %v1779_v25  ;;  %11849 = vmatprep.mubr.msk.f32.mxu1 %vm13788_vm0, %v13787_v38 }
 0x485   : > { %v3082_v47 = vmul.f32 %v13197_v46, %v14682_v1  ;;  %v3046_v48 = vpop.xlane.xlu0 %3045  ;;  %11857 = vmatprep.subr.mxu1 %v13787_v38  ;;  %v12746_v46 = vld [vmem:[%s14837_s22 + $0x60] ss:$8 sps:$4 sm:$0xff]  }
 0x486   : > { %13202 = vrcp.f32 %v3046_v48  ;;  %v12749_v48 = vld [vmem:[%s14837_s22 + $0x70] ss:$8 sps:$4 sm:$0xff]  }
 0x487   : > { %11845 = vmatmul.mubr.msk.f32.vlgmr.msra.gmra.mrb[12].mxu0 %vm3028_vm2, %v3082_v47  ;;  %v12751_v47 = vld [vmem:[%s14837_s22 + $0x74] ss:$8 sps:$4 sm:$0xff]  }
 0x488   : > { %v13199_v49 = vpop.eup %13198  ;;  %11853 = vmatpush3.msra.mxu0 %v14573_v12  ;;  %11854 = vmatprep.mubr.msk.f32.mxu0 %vm13788_vm0, %v13787_v38 }
 0x489   : > { %v3084_v60 = vmul.f32 %v13199_v49, %v14686_v8  ;;  %v3049_v51 = vpop.xlane.xlu1 %3048  ;;  %11862 = vmatprep.subr.mxu0 %v13787_v38  ;;  %v12754_v49 = vld [vmem:[%s14837_s22 + $0x84] ss:$8 sps:$4 sm:$0xff]  }
 0x48a   : > { %13204 = vrcp.f32 %v3049_v51 }
 0x48b   : > { %11850 = vmatmul.mubr.msk.f32.vlgmr.msra.gmra.mrb[36].mxu1 %vm3028_vm2, %v3084_v60  ;;  %v12752_v60 = vld [vmem:[%s14837_s22 + $0x80] ss:$8 sps:$4 sm:$0xff]  }
 0x48c   : > { %v13201_v1 = vpop.eup %13200  ;;  %11858 = vmatpush3.msra.mxu1 %v1783_v26  ;;  %11859 = vmatprep.mubr.msk.f32.mxu1 %vm13788_vm0, %v13787_v38  ;;  %v12733_v26 = vld [vmem:[%s14837_s22 + $0x14] ss:$8 sps:$4 sm:$0xff]  }
 0x48d   : > { %v3086_v52 = vmul.f32 %v13201_v1, %v14692_v17  ;;  %v3052_v53 = vpop.xlane.xlu0 %3051  ;;  %11867 = vmatprep.subr.mxu1 %v13787_v38 }
 0x48e   : > { %13206 = vrcp.f32 %v3052_v53 }
 0x48f   : > { %11855 = vmatmul.mubr.msk.f32.vlgmr.msra.gmra.mrb[14].mxu0 %vm3028_vm2, %v3086_v52 }
 0x490   : > { %v13203_v12 = vpop.eup %13202  ;;  %11863 = vmatpush3.msra.mxu0 %v1786_v27  ;;  %11864 = vmatprep.mubr.msk.f32.mxu0 %vm13788_vm0, %v13787_v38  ;;  %v12731_v27 = vld [vmem:[%s14837_s22 + $0x10] ss:$8 sps:$4 sm:$0xff]  }
 0x491   : > { %v3088_v8 = vmul.f32 %v13203_v12, %v14698_v23  ;;  %v3055_v54 = vpop.xlane.xlu1 %3054  ;;  %11872 = vmatprep.subr.mxu0 %v13787_v38 }
 0x492   : > { %13208 = vrcp.f32 %v3055_v54 }
 0x493   : > { %11860 = vmatmul.mubr.msk.f32.vlgmr.msra.gmra.mrb[38].mxu1 %vm3028_vm2, %v3088_v8 }
 0x494   : > { %v13205_v17 = vpop.eup %13204  ;;  %11868 = vmatpush3.msra.mxu1 %v1789_v29  ;;  %11869 = vmatprep.mubr.msk.f32.mxu1 %vm13788_vm0, %v13787_v38  ;;  %v12736_v29 = vld [vmem:[%s14837_s22 + $0x24] ss:$8 sps:$4 sm:$0xff]  }
 0x495   : > { %v3090_v58 = vmul.f32 %v13205_v17, %v14702_v28  ;;  %v3058_v59 = vpop.xlane.xlu0 %3057  ;;  %11877 = vmatprep.subr.mxu1 %v13787_v38 }
 0x496   : > { %13210 = vrcp.f32 %v3058_v59 }
 0x497   : > { %11865 = vmatmul.mubr.msk.f32.vlgmr.msra.gmra.mrb[16].mxu0 %vm3028_vm2, %v3090_v58 }
 0x498   : > { %v13207_v23 = vpop.eup %13206  ;;  %11873 = vmatpush3.msra.mxu0 %v14569_v10  ;;  %11874 = vmatprep.mubr.msk.f32.mxu0 %vm13788_vm0, %v13787_v38 }
 0x499   : > { %v3092_v61 = vmul.f32 %v13207_v23, %v14708_v34  ;;  %v3061_v62 = vpop.xlane.xlu1 %3060  ;;  %11882 = vmatprep.subr.mxu0 %v13787_v38 }
 0x49a   : > { %13212 = vrcp.f32 %v3061_v62  ;;  %v12757_v62 = vld [vmem:[%s14837_s22 + $0x94] ss:$8 sps:$4 sm:$0xff]  }
 0x49b   : > { %11870 = vmatmul.mubr.msk.f32.vlgmr.msra.gmra.mrb[40].mxu1 %vm3028_vm2, %v3092_v61 }
 0x49c   : > { %v13209_v28 = vpop.eup %13208  ;;  %11878 = vmatpush3.msra.mxu1 %v14696_v22  ;;  %11879 = vmatprep.mubr.msk.f32.mxu1 %vm13788_vm0, %v13787_v38 }
 0x49d   : > { %v3094_v63 = vmul.f32 %v13209_v28, %v14712_v44  ;;  %v3064_v10 = vpop.xlane.xlu0 %3063  ;;  %11887 = vmatprep.subr.mxu1 %v13787_v38 }
 0x49e   : > { %13214 = vrcp.f32 %v3064_v10 }
 0x49f   : > { %11875 = vmatmul.mubr.msk.f32.vlgmr.msra.gmra.mrb[18].mxu0 %vm3028_vm2, %v3094_v63  ;;  %v12755_v63 = vld [vmem:[%s14837_s22 + $0x90] ss:$8 sps:$4 sm:$0xff]  }
 0x4a0   : > { %v13211_v34 = vpop.eup %13210  ;;  %11883 = vmatpush3.msra.mxu0 %v14754_v30  ;;  %11884 = vmatprep.mubr.msk.f32.mxu0 %vm13788_vm0, %v13787_v38  ;;  %v12734_v30 = vld [vmem:[%s14837_s22 + $0x20] ss:$8 sps:$4 sm:$0xff]  }
 0x4a1   : > { %v3096_v0 = vmul.f32 %v13211_v34, %v14716_v50  ;;  %v3067_v22 = vpop.xlane.xlu1 %3066  ;;  %11892 = vmatprep.subr.mxu0 %v13787_v38  ;;  %v12760_v34 = vld [vmem:[%s14837_s22 + $0xa4] ss:$8 sps:$4 sm:$0xff]  }
 0x4a2   : > { %13216 = vrcp.f32 %v3067_v22  ;;  %v12758_v22 = vld [vmem:[%s14837_s22 + $0xa0] ss:$8 sps:$4 sm:$0xff]  }
 0x4a3   : > { %11880 = vmatmul.mubr.msk.f32.vlgmr.msra.gmra.mrb[42].mxu1 %vm3028_vm2, %v3096_v0 }
 0x4a4   : > { %v13213_v44 = vpop.eup %13212  ;;  %11888 = vmatpush3.msra.mxu1 %v14706_v32  ;;  %11889 = vmatprep.mubr.msk.f32.mxu1 %vm13788_vm0, %v13787_v38 }
 0x4a5   : > { %v3098_v5 = vmul.f32 %v13213_v44, %v14720_v56  ;;  %v3070_v6 = vpop.xlane.xlu0 %3069  ;;  %11897 = vmatprep.subr.mxu1 %v13787_v38  ;;  %v1809_v16 = vpop.permute.xlu1 %1808 }
 0x4a6   : > { %13218 = vrcp.f32 %v3070_v6 }
 0x4a7   : > { %11885 = vmatmul.mubr.msk.f32.vlgmr.msra.gmra.mrb[20].mxu0 %vm3028_vm2, %v3098_v5  ;;  %v12763_v5 = vld [vmem:[%s14837_s22 + $0xb4] ss:$8 sps:$4 sm:$0xff]  }
 0x4a8   : > { %v13215_v50 = vpop.eup %13214  ;;  %11893 = vmatpush3.msra.mxu0 %v14586_v13  ;;  %11894 = vmatprep.mubr.msk.f32.mxu0 %vm13788_vm0, %v13787_v38 }
 0x4a9   : > { %v3100_v7 = vmul.f32 %v13215_v50, %v14725_v3  ;;  %v3073_v32 = vpop.xlane.xlu0 %3072  ;;  %11902 = vmatprep.subr.mxu0 %v13787_v38  ;;  %v12761_v50 = vld [vmem:[%s14837_s22 + $0xb0] ss:$8 sps:$4 sm:$0xff]  }
 0x4aa   : > { %13220 = vrcp.f32 %v3073_v32 }
 0x4ab   : > { %11890 = vmatmul.mubr.msk.f32.vlgmr.msra.gmra.mrb[44].mxu1 %vm3028_vm2, %v3100_v7 }
 0x4ac   : > { %v13217_v56 = vpop.eup %13216  ;;  %11898 = vmatpush3.msra.mxu1 %v14756_v31  ;;  %11899 = vmatprep.mubr.msk.f32.mxu1 %vm13788_vm0, %v13787_v38  ;;  %v12739_v31 = vld [vmem:[%s14837_s22 + $0x34] ss:$8 sps:$4 sm:$0xff]  }
 0x4ad   : > { %v3102_v9 = vmul.f32 %v13217_v56, %v14734_v45  ;;  %v3076_v13 = vpop.xlane.xlu0 %3075  ;;  %11907 = vmatprep.subr.mxu1 %v13787_v38  ;;  %v12766_v56 = vld [vmem:[%s14837_s22 + $0xc4] ss:$8 sps:$4 sm:$0xff]  }
 0x4ae   : > { %13222 = vrcp.f32 %v3076_v13 }
 0x4af   : > { %11895 = vmatmul.mubr.msk.f32.vlgmr.msra.gmra.mrb[22].mxu0 %vm3028_vm2, %v3102_v9  ;;  %v12764_v9 = vld [vmem:[%s14837_s22 + $0xc0] ss:$8 sps:$4 sm:$0xff]  }
 0x4b0   : > { %v13219_v3 = vpop.eup %13218  ;;  %11904 = vmatprep.mubr.msk.f32.mxu0 %vm13788_vm0, %v13787_v38 }
 0x4b1   : > { %v3104_v11 = vmul.f32 %v13219_v3, %v14738_v18  ;;  %v1806_v14 = vpop.permute.xlu0 %1805 }
 0x4b2   : > { %11903 = vmatpush3.msra.mxu0 %v1806_v14  ;;  %v12769_v14 = vld [vmem:[%s14837_s22 + $0xd4] ss:$8 sps:$4 sm:$0xff]  }
 0x4b3   : > { %11900 = vmatmul.mubr.msk.f32.vlgmr.msra.gmra.mrb[46].mxu1 %vm3028_vm2, %v3104_v11 }
 0x4b4   : > { %v13221_v45 = vpop.eup %13220  ;;  %11908 = vmatpush3.msra.mxu1 %v1809_v16  ;;  %11909 = vmatprep.mubr.msk.f32.mxu1 %vm13788_vm0, %v13787_v38 }
 0x4b5   : > { %v3106_v15 = vmul.f32 %v13221_v45, %v14742_v19  ;;  %v12728_v19 = vld [vmem:[%s14837_s22] ss:$8 sps:$4 sm:$0xff]   ;;  %v12767_v45 = vld [vmem:[%s14837_s22 + $0xd0] ss:$8 sps:$4 sm:$0xff]  }
 0x4b7   : > { %11905 = vmatmul.mubr.msk.f32.vlgmr.msra.gmra.mrb[24].mxu0 %vm3028_vm2, %v3106_v15 }
 0x4b8   : > { %v13223_v20 = vpop.eup %13222 }
 0x4b9   : > { %v3108_v24 = vmul.f32 %v13223_v20, %v14746_v21  ;;  %v12730_v21 = vld [vmem:[%s14837_s22 + $0x4] ss:$8 sps:$4 sm:$0xff]  }
 0x4ba   : > { %4545 = vmatprep.subr.bf16.mxu0 %v12730_v21 }
 0x4bb   : > { %11910 = vmatmul.mubr.msk.f32.vlgmr.msra.gmra.mrb[48].mxu1 %vm3028_vm2, %v3108_v24  ;;  %4546 = vmatpush1.bf16.msra.mxu0 %v12728_v19  ;;  %v12772_v24 = vld [vmem:[%s14837_s22 + $0xe4] ss:$8 sps:$4 sm:$0xff]   ;;  %v12770_v19 = vld [vmem:[%s14837_s22 + $0xe0] ss:$8 sps:$4 sm:$0xff]  }
 0x4bc   : > { %4547 = vmatprep.subr.bf16.mxu0 %v12733_v26  ;;  %v12773_v26 = vld [vmem:[%s14837_s22 + $0xf0] ss:$8 sps:$4 sm:$0xff]  }
 0x4bf   : > { %4548 = vmatpush1.bf16.msra.mxu0 %v12731_v27  ;;  %v12775_v27 = vld [vmem:[%s14837_s22 + $0xf4] ss:$8 sps:$4 sm:$0xff]  }
 0x4c0   : > { %4549 = vmatprep.subr.bf16.mxu0 %v12736_v29 }
 0x4c3   : > { %4550 = vmatpush1.bf16.msra.mxu0 %v12734_v30 }
 0x4c4   : > { %4551 = vmatprep.subr.bf16.mxu0 %v12739_v31 }
 0x4c7   : > { %4552 = vmatpush1.bf16.msra.mxu0 %v12737_v33 }
 0x4c8   : > { %4553 = vmatprep.subr.bf16.mxu0 %v12742_v35 }
 0x4cb   : > { %4554 = vmatpush1.bf16.msra.mxu0 %v12740_v36 }
 0x4cc   : > { %4555 = vmatprep.subr.bf16.mxu0 %v12745_v37 }
 0x4cf   : > { %4556 = vmatpush1.bf16.msra.mxu0 %v12743_v39 }
 0x4d0   : > { %4557 = vmatprep.subr.bf16.mxu0 %v12748_v42 }
 0x4d3   : > { %4558 = vmatpush1.bf16.msra.mxu0 %v12746_v46 }
 0x4d4   : > { %4559 = vmatprep.subr.bf16.mxu0 %v12751_v47 }
 0x4d7   : > { %4560 = vmatpush1.bf16.msra.mxu0 %v12749_v48 }
 0x4d8   : > { %4561 = vmatprep.subr.bf16.mxu0 %v12754_v49 }
 0x4db   : > { %4562 = vmatpush1.bf16.msra.mxu0 %v12752_v60 }
 0x4dc   : > { %4563 = vmatprep.subr.bf16.mxu0 %v12757_v62 }
 0x4df   : > { %4564 = vmatpush1.bf16.msra.mxu0 %v12755_v63 }
 0x4e0   : > { %4565 = vmatprep.subr.bf16.mxu0 %v12760_v34 }
 0x4e2   : > { %v14832_v18 = vpop.f32.mrb[10].mxu0 }
 0x4e3   : > { %v11836_v25 = vpop.f32.mrb[11].mxu0  ;;  %4566 = vmatpush1.bf16.msra.mxu0 %v12758_v22 }
 0x4e4   : > { %4567 = vmatprep.subr.bf16.mxu0 %v12763_v5 }
 0x4e7   : > { %4568 = vmatpush1.bf16.msra.mxu0 %v12761_v50 }
 0x4e8   : > { %4569 = vmatprep.subr.bf16.mxu0 %v12766_v56 }
 0x4eb   : > { %4570 = vmatpush1.bf16.msra.mxu0 %v12764_v9 }
 0x4ec   : > { %4571 = vmatprep.subr.bf16.mxu0 %v12769_v14 }
 0x4ef   : > { %4572 = vmatpush1.bf16.msra.mxu0 %v12767_v45 }
 0x4f0   : > { %4573 = vmatprep.subr.bf16.mxu0 %v12772_v24 }
 0x4f3   : > { %4574 = vmatpush1.bf16.msra.mxu0 %v12770_v19 }
 0x4f4   : > { %4575 = vmatprep.subr.bf16.mxu0 %v12775_v27 }
 0x4f7   : > { %4576 = vmatpush1.bf16.msra.mxu0 %v12773_v26 }
 0x556   : > { %v3251_v51 = vpop.f32.mrb[34].mxu1 }
 0x557   : > { %v11841_v1 = vpop.f32.mrb[35].mxu1 }
 0x55a   : > { %v3324_v52 = vpop.f32.mrb[12].mxu0 }
 0x55b   : > { %v11846_v53 = vpop.f32.mrb[13].mxu0 }
 0x55e   : > { %v3397_v12 = vpop.f32.mrb[36].mxu1 }
 0x55f   : > { %v11851_v8 = vpop.f32.mrb[37].mxu1 }
 0x562   : > { %v14857_v54 = vpop.f32.mrb[14].mxu0 }
 0x563   : > { %v11856_v17 = vpop.f32.mrb[15].mxu0 }
 0x566   : > { %v3543_v58 = vpop.f32.mrb[38].mxu1 }
 0x567   : > { %v11861_v59 = vpop.f32.mrb[39].mxu1 }
 0x56a   : > { %v3616_v23 = vpop.f32.mrb[16].mxu0 }
 0x56b   : > { %v11866_v61 = vpop.f32.mrb[17].mxu0 }
 0x56e   : > { %v3689_v28 = vpop.f32.mrb[40].mxu1 }
 0x56f   : > { %v11871_v10 = vpop.f32.mrb[41].mxu1 }
 0x572   : > { %v3762_v0 = vpop.f32.mrb[18].mxu0 }
 0x573   : > { %v11876_v44 = vpop.f32.mrb[19].mxu0 }
 0x576   : > { %v3835_v6 = vpop.f32.mrb[42].mxu1 }
 0x577   : > { %v12404_v7 = vpack.i.bf16 %v3835_v6, %v3251_v51  ;;  %v11881_v32 = vpop.f32.mrb[43].mxu1 }
 0x579   : > { %12405 = vrot.lane.b32.xlu1 %v12404_v7, %s13791_s2 }
 0x57a   : > { %v3908_v13 = vpop.f32.mrb[20].mxu0 }
 0x57b   : > { %v12409_v3 = vpack.i.bf16 %v3908_v13, %v3324_v52  ;;  %v11886_v11 = vpop.f32.mrb[21].mxu0  ;;  %v4373_v13 = vld [vmem:[%s775_s15] sm:$0x3] }
 0x57d   : > { %12410 = vrot.lane.b32.xlu1 %v12409_v3, %s13789_s11  ;;  %v4382_v3 = vrot.slane %v4373_v13, %v14495_v55 }
 0x57e   : > { %v3981_v16 = vpop.f32.mrb[44].mxu1 }
 0x57f   : > { %v12429_v15 = vpack.i.bf16 %v3981_v16, %v3397_v12  ;;  %v11891_v20 = vpop.f32.mrb[45].mxu1 }
 0x580   : > { %v13332_v20 = vld [vmem:[#allocation2] sm:$0xff] }
 0x581   : > { %12430 = vrot.lane.b32.xlu1 %v12429_v15, %s13790_s0 }
 0x582   : > { %v4054_v25 = vpop.f32.mrb[22].mxu0 }
 0x583   : > { %v11896_v21 = vpop.f32.mrb[23].mxu0 }
 0x584   : > { %v13333_v21 = vld [vmem:[#allocation2 + $0x8] sm:$0xff] }
 0x586   : > { %v4127_v29 = vpop.f32.mrb[46].mxu1 }
 0x587   : > { %v12414_v30 = vpack.i.bf16 %v4127_v29, %v3543_v58  ;;  %v11901_v31 = vpop.f32.mrb[47].mxu1  ;;  %v13334_v29 = vld [vmem:[#allocation2 + $0x10] sm:$0xff] }
 0x588   : > { %v13335_v31 = vld [vmem:[#allocation2 + $0x18] sm:$0xff] }
 0x589   : > { %12415 = vrot.lane.b32.xlu0 %v12414_v30, %s13791_s2 }
 0x58a   : > { %v4200_v33 = vpop.f32.mrb[24].mxu0 }
 0x58b   : > { %v12419_v35 = vpack.i.bf16 %v4200_v33, %v3616_v23  ;;  %v11906_v36 = vpop.f32.mrb[25].mxu0 }
 0x58d   : > { %12420 = vrot.lane.b32.xlu0 %v12419_v35, %s13789_s11 }
 0x58e   : > { %v4273_v37 = vpop.f32.mrb[48].mxu1 }
 0x58f   : > { %v12424_v39 = vpack.i.bf16 %v4273_v37, %v3689_v28  ;;  %v11911_v42 = vpop.f32.mrb[49].mxu1  ;;  %v12776_v37 = vld [vmem:[%s14912_s18 + $0x8] ss:$24 sps:$4 sm:$0xff]  }
 0x590   : > { %v12781_v42 = vld [vmem:[%s14912_s18 + $0x3c] ss:$24 sps:$4 sm:$0xff]  }
 0x591   : > { %12425 = vrot.lane.b32.xlu0 %v12424_v39, %s13790_s0  ;;  %v12778_v39 = vld [vmem:[%s14912_s18 + $0xc] ss:$24 sps:$4 sm:$0xff]  }
 0x592   : > { %5310 = vmatprep.subr.bf16.mxu0 %v12778_v39 }
 0x5eb   : > { %v12406_v46 = vpop.permute.xlu1 %12405 }
 0x5ec   : > { %v12408_v48 = vunpack.i.h.bf16 %v12406_v46  ;;  %v12407_v49 = vunpack.i.l.bf16 %v12406_v46  ;;  %v12779_v46 = vld [vmem:[%s14912_s18 + $0x38] ss:$24 sps:$4 sm:$0xff]  }
 0x5ee   : > { %v4301_v52 = vsel %vm1811_vm1, %v14832_v18, %v12407_v49  ;;  %v4333_v53 = vsel %vm1811_vm1, %v3762_v0, %v12408_v48  ;;  %v12788_v48 = vld [vmem:[%s14912_s18] ss:$24 sps:$4 sm:$0xff]   ;;  %v12790_v49 = vld [vmem:[%s14912_s18 + $0x4] ss:$24 sps:$4 sm:$0xff]  }
 0x5ef   : > { %v12411_v47 = vpop.permute.xlu1 %12410  ;;  %4861 = vmatprep.subr.bf16.mxu1 %v12790_v49  ;;  %v12850_v49 = vld [vmem:[%s14912_s18 + $0x1e4] ss:$24 sps:$4 sm:$0xff]  }
 0x5f0   : > { %v12413_v60 = vunpack.i.h.bf16 %v12411_v47  ;;  %v12412_v51 = vunpack.i.l.bf16 %v12411_v47  ;;  %v12784_v47 = vld [vmem:[%s14912_s18 + $0x6c] ss:$24 sps:$4 sm:$0xff]   ;;  %4862 = vmatpush1.bf16.msra.mxu1 %v12788_v48  ;;  %v12845_v48 = vld [vmem:[%s14912_s18 + $0x278] ss:$24 sps:$4 sm:$0xff]  }
 0x5f2   : > { %v4334_v17 = vsel %vm4302_vm3, %v4333_v53, %v12413_v60  ;;  %v4303_v58 = vsel %vm4302_vm3, %v4301_v52, %v12412_v51  ;;  %v12782_v60 = vld [vmem:[%s14912_s18 + $0x68] ss:$24 sps:$4 sm:$0xff]   ;;  %v12787_v51 = vld [vmem:[%s14912_s18 + $0x9c] ss:$24 sps:$4 sm:$0xff]   ;;  %v12785_v53 = vld [vmem:[%s14912_s18 + $0x98] ss:$24 sps:$4 sm:$0xff]  }
 0x5f3   : > { %v12431_v1 = vpop.permute.xlu1 %12430  ;;  %v12796_v52 = vld [vmem:[%s14912_s18 + $0x34] ss:$24 sps:$4 sm:$0xff]  }
 0x5f4   : > { %v12433_v12 = vunpack.i.h.bf16 %v12431_v1  ;;  %v12432_v8 = vunpack.i.l.bf16 %v12431_v1  ;;  %v12794_v1 = vld [vmem:[%s14912_s18 + $0x30] ss:$24 sps:$4 sm:$0xff]   ;;  %4863 = vmatprep.subr.bf16.mxu1 %v12796_v52  ;;  %v12856_v52 = vld [vmem:[%s14912_s18 + $0x214] ss:$24 sps:$4 sm:$0xff]  }
 0x5f5   : > { %4864 = vmatpush1.bf16.msra.mxu1 %v12794_v1  ;;  %v12851_v1 = vld [vmem:[%s14912_s18 + $0x2a8] ss:$24 sps:$4 sm:$0xff]  }
 0x5f6   : > { %v4305_v59 = vsel %vm4304_vm4, %v4303_v58, %v12432_v8  ;;  %v4335_v23 = vsel %vm4304_vm4, %v4334_v17, %v12433_v12  ;;  %v12802_v12 = vld [vmem:[%s14912_s18 + $0x64] ss:$24 sps:$4 sm:$0xff]   ;;  %v12800_v17 = vld [vmem:[%s14912_s18 + $0x60] ss:$24 sps:$4 sm:$0xff]   ;;  %v12808_v58 = vld [vmem:[%s14912_s18 + $0x94] ss:$24 sps:$4 sm:$0xff]  }
 0x5f7   : > { %v4339_v61 = vpack.c.bf16 %v4335_v23, %v4305_v59  ;;  %v12793_v8 = vld [vmem:[%s14912_s18 + $0xcc] ss:$24 sps:$4 sm:$0xff]   ;;  %4865 = vmatprep.subr.bf16.mxu1 %v12802_v12  ;;  %v12791_v59 = vld [vmem:[%s14912_s18 + $0xc8] ss:$24 sps:$4 sm:$0xff]   ;;  %v12799_v23 = vld [vmem:[%s14912_s18 + $0xfc] ss:$24 sps:$4 sm:$0xff]  }
 0x5f8   : > { %v12854_v12 = vld [vmem:[%s14912_s18 + $0x210] ss:$24 sps:$4 sm:$0xff]  }
 0x5f9   : > { %4866 = vmatpush1.bf16.msra.mxu1 %v12800_v17  ;;  %v957_v17 = vld [vmem:[#allocation5 + $0x8] sm:$0xff] }
 0x5fa   : > { %4867 = vmatprep.subr.bf16.mxu1 %v12808_v58  ;;  %v959_v58 = vld [vmem:[#allocation5 + $0x18] sm:$0xff] }
 0x5fb   : > { %v12416_v62 = vpop.permute.xlu0 %12415 }
 0x5fc   : > { %v12418_v63 = vunpack.i.h.bf16 %v12416_v62  ;;  %v12417_v10 = vunpack.i.l.bf16 %v12416_v62  ;;  %v12814_v62 = vld [vmem:[%s14912_s18 + $0xc4] ss:$24 sps:$4 sm:$0xff]  }
 0x5fe   : > { %v4306_v22 = vsel %vm1811_vm1, %v14857_v54, %v12417_v10  ;;  %v4336_v44 = vsel %vm1811_vm1, %v4054_v25, %v12418_v63  ;;  %v4378_v54 = vrot.slane %v4373_v13, %v14485_v43  ;;  %v12805_v63 = vld [vmem:[%s14912_s18 + $0x12c] ss:$24 sps:$4 sm:$0xff]   ;;  %v12812_v10 = vld [vmem:[%s14912_s18 + $0xc0] ss:$24 sps:$4 sm:$0xff]  }
 0x5ff   : > { %v12421_v28 = vpop.permute.xlu0 %12420  ;;  %v12838_v13 = vld [vmem:[%s14912_s18 + $0x184] ss:$24 sps:$4 sm:$0xff]  }
 0x600   : > { %v12423_v18 = vunpack.i.h.bf16 %v12421_v28  ;;  %v12422_v34 = vunpack.i.l.bf16 %v12421_v28  ;;  %v12797_v28 = vld [vmem:[%s14912_s18 + $0xf8] ss:$24 sps:$4 sm:$0xff]  }
 0x602   : > { %v4337_v50 = vsel %vm4302_vm3, %v4336_v44, %v12423_v18  ;;  %v4307_v7 = vsel %vm4302_vm3, %v4306_v22, %v12422_v34  ;;  %v12820_v18 = vld [vmem:[%s14912_s18 + $0xf4] ss:$24 sps:$4 sm:$0xff]   ;;  %v12803_v34 = vld [vmem:[%s14912_s18 + $0x128] ss:$24 sps:$4 sm:$0xff]   ;;  %v12826_v44 = vld [vmem:[%s14912_s18 + $0x124] ss:$24 sps:$4 sm:$0xff]  }
 0x603   : > { %v12426_v0 = vpop.permute.xlu0 %12425  ;;  %v12818_v22 = vld [vmem:[%s14912_s18 + $0xf0] ss:$24 sps:$4 sm:$0xff]  }
 0x604   : > { %v12428_v5 = vunpack.i.h.bf16 %v12426_v0  ;;  %v12427_v6 = vunpack.i.l.bf16 %v12426_v0  ;;  %v12811_v0 = vld [vmem:[%s14912_s18 + $0x15c] ss:$24 sps:$4 sm:$0xff]  }
 0x606   : > { %v4308_v32 = vsel %vm4304_vm4, %v4307_v7, %v12427_v6  ;;  %v4338_v56 = vsel %vm4304_vm4, %v4337_v50, %v12428_v5  ;;  %v12809_v5 = vld [vmem:[%s14912_s18 + $0x158] ss:$24 sps:$4 sm:$0xff]   ;;  %v12817_v6 = vld [vmem:[%s14912_s18 + $0x18c] ss:$24 sps:$4 sm:$0xff]  }
 0x607   : > { %v4340_v9 = vpack.c.bf16 %v4338_v56, %v4308_v32  ;;  %v12824_v50 = vld [vmem:[%s14912_s18 + $0x120] ss:$24 sps:$4 sm:$0xff]   ;;  %v12832_v7 = vld [vmem:[%s14912_s18 + $0x154] ss:$24 sps:$4 sm:$0xff]  }
 0x608   : > { %v12815_v32 = vld [vmem:[%s14912_s18 + $0x188] ss:$24 sps:$4 sm:$0xff]   ;;  %v12823_v56 = vld [vmem:[%s14912_s18 + $0x1bc] ss:$24 sps:$4 sm:$0xff]  }
 0x609   : > { %4577 = vmatprep.mubr.bf16.mxu0 %v4340_v9  ;;  %v12830_v9 = vld [vmem:[%s14912_s18 + $0x150] ss:$24 sps:$4 sm:$0xff]  }
 0x60a   : > { %4578 = vmatmul.mubr.bf16.vlgmr.msra.gmra.mrb[28].mxu0 %v4339_v61  ;;  %v12806_v61 = vld [vmem:[%s14912_s18 + $0x90] ss:$24 sps:$4 sm:$0xff]  }
 0x60b   : > { %5311 = vmatpush1.bf16.msra.mxu0 %v12776_v37  ;;  %4868 = vmatpush1.bf16.msra.mxu1 %v12806_v61  ;;  %v958_v61 = vld [vmem:[#allocation5 + $0x10] sm:$0xff] }
 0x60c   : > { %5312 = vmatprep.subr.bf16.mxu0 %v12781_v42  ;;  %4869 = vmatprep.subr.bf16.mxu1 %v12814_v62  ;;  %v12844_v42 = vld [vmem:[%s14912_s18 + $0x1b4] ss:$24 sps:$4 sm:$0xff]   ;;  %v12862_v62 = vld [vmem:[%s14912_s18 + $0x244] ss:$24 sps:$4 sm:$0xff]  }
 0x60f   : > { %5313 = vmatpush1.bf16.msra.mxu0 %v12779_v46  ;;  %4870 = vmatpush1.bf16.msra.mxu1 %v12812_v10  ;;  %v12847_v46 = vld [vmem:[%s14912_s18 + $0x27c] ss:$24 sps:$4 sm:$0xff]  }
 0x610   : > { %5314 = vmatprep.subr.bf16.mxu0 %v12784_v47  ;;  %4871 = vmatprep.subr.bf16.mxu1 %v12820_v18  ;;  %v12842_v47 = vld [vmem:[%s14912_s18 + $0x1b0] ss:$24 sps:$4 sm:$0xff]   ;;  %v12865_v10 = vld [vmem:[%s14912_s18 + $0x274] ss:$24 sps:$4 sm:$0xff]  }
 0x611   : > { %v12863_v18 = vld [vmem:[%s14912_s18 + $0x270] ss:$24 sps:$4 sm:$0xff]  }
 0x613   : > { %5315 = vmatpush1.bf16.msra.mxu0 %v12782_v60  ;;  %4872 = vmatpush1.bf16.msra.mxu1 %v12818_v22  ;;  %v12853_v60 = vld [vmem:[%s14912_s18 + $0x2ac] ss:$24 sps:$4 sm:$0xff]  }
 0x614   : > { %5316 = vmatprep.subr.bf16.mxu0 %v12787_v51  ;;  %4873 = vmatprep.subr.bf16.mxu1 %v12826_v44  ;;  %v12848_v51 = vld [vmem:[%s14912_s18 + $0x1e0] ss:$24 sps:$4 sm:$0xff]   ;;  %v12871_v22 = vld [vmem:[%s14912_s18 + $0x2d4] ss:$24 sps:$4 sm:$0xff]   ;;  %v12869_v44 = vld [vmem:[%s14912_s18 + $0x2d0] ss:$24 sps:$4 sm:$0xff]  }
 0x617   : > { %5317 = vmatpush1.bf16.msra.mxu0 %v12785_v53  ;;  %4874 = vmatpush1.bf16.msra.mxu1 %v12824_v50  ;;  %v12859_v53 = vld [vmem:[%s14912_s18 + $0x2dc] ss:$24 sps:$4 sm:$0xff]  }
 0x618   : > { %5318 = vmatprep.subr.bf16.mxu0 %v12793_v8  ;;  %4875 = vmatprep.subr.bf16.mxu1 %v12832_v7  ;;  %v12857_v8 = vld [vmem:[%s14912_s18 + $0x2d8] ss:$24 sps:$4 sm:$0xff]  }
 0x619   : > { %v960_v50 = vld [vmem:[#allocation5 + $0x20] sm:$0xff] }
 0x61b   : > { %5319 = vmatpush1.bf16.msra.mxu0 %v12791_v59  ;;  %4876 = vmatpush1.bf16.msra.mxu1 %v12830_v9  ;;  %v965_v59 = vpack.c.bf16 %v959_v58, %v957_v17  ;;  %v12874_v9 = vld [vmem:[%s14912_s18 + $0x14] ss:$24 sps:$4 sm:$0xff]   ;;  %v13792_v17 = vmov 0.0|0.0  }
 0x61c   : > { %5320 = vmatprep.subr.bf16.mxu0 %v12799_v23  ;;  %4877 = vmatprep.subr.bf16.mxu1 %v12838_v13  ;;  %v956_v23 = vld [vmem:[#allocation5] sm:$0xff] }
 0x61d   : > { %5342 = vmatprep.mubr.bf16.mxu0 %v965_v59 }
 0x61f   : > { %5321 = vmatpush1.bf16.msra.mxu0 %v12797_v28  ;;  %v14991_v28 = vpack.c.bf16 %v958_v61, %v956_v23 }
 0x620   : > { %5322 = vmatprep.subr.bf16.mxu0 %v12805_v63  ;;  %v12860_v63 = vld [vmem:[%s14912_s18 + $0x240] ss:$24 sps:$4 sm:$0xff]  }
 0x623   : > { %5323 = vmatpush1.bf16.msra.mxu0 %v12803_v34  ;;  %v12866_v34 = vld [vmem:[%s14912_s18 + $0x2a0] ss:$24 sps:$4 sm:$0xff]  }
 0x624   : > { %5324 = vmatprep.subr.bf16.mxu0 %v12811_v0  ;;  %v12868_v0 = vld [vmem:[%s14912_s18 + $0x2a4] ss:$24 sps:$4 sm:$0xff]  }
 0x627   : > { %5325 = vmatpush1.bf16.msra.mxu0 %v12809_v5  ;;  %v961_v5 = vld [vmem:[#allocation5 + $0x28] sm:$0xff] }
 0x628   : > { %5326 = vmatprep.subr.bf16.mxu0 %v12817_v6  ;;  %v963_v6 = vld [vmem:[#allocation5 + $0x38] sm:$0xff] }
 0x629   : > { %v15001_v7 = vpack.c.bf16 %v963_v6, %v961_v5 }
 0x62b   : > { %5327 = vmatpush1.bf16.msra.mxu0 %v12815_v32  ;;  %v962_v32 = vld [vmem:[#allocation5 + $0x30] sm:$0xff] }
 0x62c   : > { %5328 = vmatprep.subr.bf16.mxu0 %v12823_v56  ;;  %v12872_v56 = vld [vmem:[%s14912_s18 + $0x10] ss:$24 sps:$4 sm:$0xff]   ;;  %v15005_v13 = vpack.c.bf16 %v962_v32, %v960_v50 }
 0x6dd   : > { %v4579_v11 = vpop.f32.mrb[28].mxu0 }
 0x6de   : > { %v4580_v14 = vadd.f32 %v4579_v11, %v4378_v54  ;;  %v4581_v16 = vpop.f32.mrb[29].mxu0  ;;  %v12836_v11 = vld [vmem:[%s14912_s18 + $0x180] ss:$24 sps:$4 sm:$0xff]  }
 0x6df   : > { %v4582_v45 = vadd.f32 %v4581_v16, %v4382_v3  ;;  %v4583_v15 = vpop.f32.mrb[30].mxu0  ;;  %v12835_v16 = vld [vmem:[%s14912_s18 + $0x21c] ss:$24 sps:$4 sm:$0xff]   ;;  %4878 = vmatpush1.bf16.msra.mxu1 %v12836_v11 }
 0x6e0   : > { %v14898_v24 = vadd.f32 %v13332_v20, %v4580_v14  ;;  %v4584_v25 = vadd.f32 %v4583_v15, %v4378_v54  ;;  %v4585_v19 = vpop.f32.mrb[31].mxu0  ;;  %v12821_v54 = vld [vmem:[%s14912_s18 + $0x1b8] ss:$24 sps:$4 sm:$0xff]   ;;  %v12827_v14 = vld [vmem:[%s14912_s18 + $0x1e8] ss:$24 sps:$4 sm:$0xff]   ;;  %4879 = vmatprep.subr.bf16.mxu1 %v12844_v42 }
 0x6e1   : > { %v14900_v26 = vadd.f32 %v13333_v21, %v4582_v45  ;;  %v4586_v27 = vadd.f32 %v4585_v19, %v4382_v3  ;;  %v12829_v3 = vld [vmem:[%s14912_s18 + $0x1ec] ss:$24 sps:$4 sm:$0xff]   ;;  %5329 = vmatpush1.bf16.msra.mxu0 %v12821_v54  ;;  %v12833_v45 = vld [vmem:[%s14912_s18 + $0x218] ss:$24 sps:$4 sm:$0xff]   ;;  %v12839_v20 = vld [vmem:[%s14912_s18 + $0x248] ss:$24 sps:$4 sm:$0xff]  }
 0x6e2   : > { %v14902_v30 = vadd.f32 %v13334_v29, %v4584_v25  ;;  %5330 = vmatprep.subr.bf16.mxu0 %v12829_v3  ;;  %v12841_v15 = vld [vmem:[%s14912_s18 + $0x24c] ss:$24 sps:$4 sm:$0xff]   ;;  %v12875_v3 = vld [vmem:[%s14912_s18 + $0x40] ss:$24 sps:$4 sm:$0xff]  }
 0x6e3   : > { %v14904_v33 = vadd.f32 %v13335_v31, %v4586_v27  ;;  %v4592_v35 = vadd.f32 %v14900_v26, %v14898_v24  ;;  %4880 = vmatpush1.bf16.msra.mxu1 %v12842_v47  ;;  %v12877_v54 = vld [vmem:[%s14912_s18 + $0x44] ss:$24 sps:$4 sm:$0xff]   ;;  %v12880_v11 = vld [vmem:[%s14912_s18 + $0x74] ss:$24 sps:$4 sm:$0xff]  }
 0x6e4   : > { %4881 = vmatprep.subr.bf16.mxu1 %v12850_v49  ;;  %v12904_v42 = vld [vmem:[%s14912_s18 + $0x1f4] ss:$24 sps:$4 sm:$0xff]   ;;  %v12907_v47 = vld [vmem:[%s14912_s18 + $0x224] ss:$24 sps:$4 sm:$0xff]  }
 0x6e5   : > { %4593 = vadd.xlane.f32.xlu0 %v4592_v35  ;;  %v4595_v36 = vadd.f32 %v14904_v33, %v14902_v30  ;;  %5331 = vmatpush1.bf16.msra.mxu0 %v12827_v14  ;;  %v12878_v14 = vld [vmem:[%s14912_s18 + $0x70] ss:$24 sps:$4 sm:$0xff]   ;;  %v12910_v49 = vld [vmem:[%s14912_s18 + $0x254] ss:$24 sps:$4 sm:$0xff]  }
 0x6e6   : > { %5332 = vmatprep.subr.bf16.mxu0 %v12835_v16  ;;  %v12883_v16 = vld [vmem:[%s14912_s18 + $0xa4] ss:$24 sps:$4 sm:$0xff]  }
 0x6e7   : > { %4596 = vadd.xlane.f32.xlu1 %v4595_v36  ;;  %4882 = vmatpush1.bf16.msra.mxu1 %v12848_v51  ;;  %v12913_v51 = vld [vmem:[%s14912_s18 + $0x284] ss:$24 sps:$4 sm:$0xff]  }
 0x6e8   : > { %4883 = vmatprep.subr.bf16.mxu1 %v12856_v52  ;;  %v12916_v52 = vld [vmem:[%s14912_s18 + $0x2b4] ss:$24 sps:$4 sm:$0xff]  }
 0x6e9   : > { %5333 = vmatpush1.bf16.msra.mxu0 %v12833_v45  ;;  %v12881_v45 = vld [vmem:[%s14912_s18 + $0xa0] ss:$24 sps:$4 sm:$0xff]  }
 0x6ea   : > { %5334 = vmatprep.subr.bf16.mxu0 %v12841_v15  ;;  %v12886_v15 = vld [vmem:[%s14912_s18 + $0xd4] ss:$24 sps:$4 sm:$0xff]  }
 0x6eb   : > { %4884 = vmatpush1.bf16.msra.mxu1 %v12854_v12  ;;  %v12919_v12 = vld [vmem:[%s14912_s18 + $0x2e4] ss:$24 sps:$4 sm:$0xff]  }
 0x6ec   : > { %4885 = vmatprep.subr.bf16.mxu1 %v12862_v62 }
 0x6ed   : > { %5335 = vmatpush1.bf16.msra.mxu0 %v12839_v20  ;;  %v12884_v20 = vld [vmem:[%s14912_s18 + $0xd0] ss:$24 sps:$4 sm:$0xff]  }
 0x6ee   : > { %5336 = vmatprep.subr.bf16.mxu0 %v12847_v46  ;;  %v12902_v46 = vld [vmem:[%s14912_s18 + $0x1f0] ss:$24 sps:$4 sm:$0xff]  }
 0x6ef   : > { %4886 = vmatpush1.bf16.msra.mxu1 %v12860_v63  ;;  %v968_v63 = vld [vmem:[%s15058_s26] sm:$0x3] }
 0x6f0   : > { %4887 = vmatprep.subr.bf16.mxu1 %v12865_v10 }
 0x6f1   : > { %5337 = vmatpush1.bf16.msra.mxu0 %v12845_v48  ;;  %v12905_v48 = vld [vmem:[%s14912_s18 + $0x220] ss:$24 sps:$4 sm:$0xff]  }
 0x6f2   : > { %5338 = vmatprep.subr.bf16.mxu0 %v12853_v60  ;;  %v12908_v60 = vld [vmem:[%s14912_s18 + $0x250] ss:$24 sps:$4 sm:$0xff]  }
 0x6f3   : > { %4888 = vmatpush1.bf16.msra.mxu1 %v12863_v18 }
 0x6f4   : > { %4889 = vmatprep.subr.bf16.mxu1 %v12868_v0 }
 0x6f5   : > { %5339 = vmatpush1.bf16.msra.mxu0 %v12851_v1  ;;  %v12911_v1 = vld [vmem:[%s14912_s18 + $0x280] ss:$24 sps:$4 sm:$0xff]  }
 0x6f6   : > { %5340 = vmatprep.subr.bf16.mxu0 %v12859_v53  ;;  %v12914_v53 = vld [vmem:[%s14912_s18 + $0x2b0] ss:$24 sps:$4 sm:$0xff]  }
 0x6f7   : > { %4890 = vmatpush1.bf16.msra.mxu1 %v12866_v34  ;;  %v973_v34 = vld [vmem:[%s15054_s28] sm:$0x3] }
 0x6f8   : > { %4891 = vmatprep.subr.bf16.mxu1 %v12871_v22  ;;  %v4629_v22 = vrot.slane %v968_v63, %v14485_v43  ;;  %v4644_v6 = vrot.slane %v973_v34, %v14485_v43  ;;  %v4648_v50 = vrot.slane %v973_v34, %v14495_v55 }
 0x6f9   : > { %5341 = vmatpush1.bf16.msra.mxu0 %v12857_v8  ;;  %v12917_v8 = vld [vmem:[%s14912_s18 + $0x2e0] ss:$24 sps:$4 sm:$0xff]  }
 0x6fa   : > { %5363 = vmatprep.subr.bf16.mxu0 %v12874_v9 }
 0x6fb   : > { %4892 = vmatpush1.bf16.msra.mxu1 %v12869_v44  ;;  %v4633_v44 = vrot.slane %v968_v63, %v14495_v55 }
 0x6fc   : > { %5343 = vmatmul.mubr.bf16.vlgmr.msra.gmra.mrb[32].mxu0 %v14991_v28  ;;  %12164 = vmatprep.subr.bf16.mxu1 %v13792_v17 }
 0x6fd   : > { %5352 = vmatprep.mubr.bf16.mxu0 %v15001_v7  ;;  %5364 = vmatpush1.bf16.msra.mxu0 %v12872_v56 }
 0x6fe   : > { %5365 = vmatprep.subr.bf16.mxu0 %v12877_v54 }
 0x701   : > { %5366 = vmatpush1.bf16.msra.mxu0 %v12875_v3 }
 0x702   : > { %5367 = vmatprep.subr.bf16.mxu0 %v12880_v11 }
 0x704   : > { %5353 = vmatmul.mubr.bf16.gmra.mrb[36].mxu0 %v15005_v13 }
 0x705   : > { %5395 = vmatprep.mubr.bf16.mxu0 %v965_v59  ;;  %5368 = vmatpush1.bf16.msra.mxu0 %v12878_v14 }
 0x706   : > { %5369 = vmatprep.subr.bf16.mxu0 %v12883_v16 }
 0x709   : > { %5370 = vmatpush1.bf16.msra.mxu0 %v12881_v45 }
 0x70a   : > { %5371 = vmatprep.subr.bf16.mxu0 %v12886_v15 }
 0x70d   : > { %5372 = vmatpush1.bf16.msra.mxu0 %v12884_v20 }
 0x772   : > { %v4594_v25 = vpop.xlane.xlu0 %4593 }
 0x773   : > { %v4599_v19 = vmul.f32 0.00390625, %v4594_v25  ;;  %v12889_v25 = vld [vmem:[%s14912_s18 + $0x104] ss:$24 sps:$4 sm:$0xff]  }
 0x774   : > { %v4597_v21 = vpop.xlane.xlu1 %4596  ;;  %5373 = vmatprep.subr.bf16.mxu0 %v12889_v25 }
 0x775   : > { %v14959_v27 = vsub.f32 %v14898_v24, %v4599_v19  ;;  %v14962_v29 = vsub.f32 %v14900_v26, %v4599_v19  ;;  %v4600_v31 = vmul.f32 0.00390625, %v4597_v21  ;;  %v12887_v19 = vld [vmem:[%s14912_s18 + $0x100] ss:$24 sps:$4 sm:$0xff]   ;;  %v12892_v21 = vld [vmem:[%s14912_s18 + $0x134] ss:$24 sps:$4 sm:$0xff]  }
 0x776   : > { %5374 = vmatpush1.bf16.msra.mxu0 %v12887_v19 }
 0x777   : > { %v14965_v35 = vsub.f32 %v14902_v30, %v4600_v31  ;;  %v14968_v36 = vsub.f32 %v14904_v33, %v4600_v31  ;;  %v4605_v37 = vmul.f32 %v14959_v27, %v14959_v27  ;;  %v4606_v39 = vmul.f32 %v14962_v29, %v14962_v29  ;;  %v12890_v31 = vld [vmem:[%s14912_s18 + $0x130] ss:$24 sps:$4 sm:$0xff]   ;;  %5375 = vmatprep.subr.bf16.mxu0 %v12892_v21 }
 0x779   : > { %v4609_v24 = vadd.f32 %v4606_v39, %v4605_v37  ;;  %v4607_v26 = vmul.f32 %v14965_v35, %v14965_v35  ;;  %v4608_v30 = vmul.f32 %v14968_v36, %v14968_v36  ;;  %v12895_v37 = vld [vmem:[%s14912_s18 + $0x164] ss:$24 sps:$4 sm:$0xff]   ;;  %v12893_v39 = vld [vmem:[%s14912_s18 + $0x160] ss:$24 sps:$4 sm:$0xff]  }
 0x77a   : > { %5376 = vmatpush1.bf16.msra.mxu0 %v12890_v31 }
 0x77b   : > { %4610 = vadd.xlane.f32.xlu0 %v4609_v24  ;;  %v4612_v33 = vadd.f32 %v4608_v30, %v4607_v26  ;;  %5377 = vmatprep.subr.bf16.mxu0 %v12895_v37  ;;  %v12898_v24 = vld [vmem:[%s14912_s18 + $0x194] ss:$24 sps:$4 sm:$0xff]   ;;  %v12896_v26 = vld [vmem:[%s14912_s18 + $0x190] ss:$24 sps:$4 sm:$0xff]   ;;  %v12901_v30 = vld [vmem:[%s14912_s18 + $0x1c4] ss:$24 sps:$4 sm:$0xff]  }
 0x77e   : > { %5378 = vmatpush1.bf16.msra.mxu0 %v12893_v39 }
 0x77f   : > { %4613 = vadd.xlane.f32.xlu0 %v4612_v33  ;;  %5379 = vmatprep.subr.bf16.mxu0 %v12898_v24  ;;  %v12899_v33 = vld [vmem:[%s14912_s18 + $0x1c0] ss:$24 sps:$4 sm:$0xff]   ;;  %s10953_s18 = sshll.u32 %s15048_s27, 1 }
 0x780   : > { %s949_s13 = scalar_lea.vmem %s16214_s24, %s10953_s18 }
 0x782   : > { %5380 = vmatpush1.bf16.msra.mxu0 %v12896_v26 }
 0x783   : > { %5381 = vmatprep.subr.bf16.mxu0 %v12901_v30 }
 0x786   : > { %5382 = vmatpush1.bf16.msra.mxu0 %v12899_v33 }
 0x787   : > { %5383 = vmatprep.subr.bf16.mxu0 %v12904_v42 }
 0x78a   : > { %5384 = vmatpush1.bf16.msra.mxu0 %v12902_v46 }
 0x78b   : > { %5385 = vmatprep.subr.bf16.mxu0 %v12907_v47 }
 0x78e   : > { %5386 = vmatpush1.bf16.msra.mxu0 %v12905_v48 }
 0x78f   : > { %5387 = vmatprep.subr.bf16.mxu0 %v12910_v49 }
 0x792   : > { %5388 = vmatpush1.bf16.msra.mxu0 %v12908_v60 }
 0x793   : > { %5389 = vmatprep.subr.bf16.mxu0 %v12913_v51 }
 0x796   : > { %5390 = vmatpush1.bf16.msra.mxu0 %v12911_v1 }
 0x797   : > { %5391 = vmatprep.subr.bf16.mxu0 %v12916_v52 }
 0x79a   : > { %5392 = vmatpush1.bf16.msra.mxu0 %v12914_v53 }
 0x79b   : > { %5393 = vmatprep.subr.bf16.mxu0 %v12919_v12 }
 0x79e   : > { %5394 = vmatpush1.bf16.msra.mxu0 %v12917_v8 }
 0x79f   : > { %12136 = vmatprep.subr.bf16.mxu0 %v13792_v17 }
 0x7a1   : > { %5396 = vmatmul.mubr.bf16.vlgmr.msra.gmra.mrb[40].mxu0 %v14991_v28 }
 0x7a2   : > { %5405 = vmatprep.mubr.bf16.mxu0 %v15001_v7 }
 0x7a9   : > { %5406 = vmatmul.mubr.bf16.gmra.mrb[44].mxu0 %v15005_v13 }
 0x7aa   : > { %11916 = vmatprep.mubr.msk.f32.mxu0 %vm13788_vm0, %v13787_v38 }
 0x7cf   : > { %v5344_v15 = vpop.f32.mrb[32].mxu0 }
 0x7d0   : > { %v5346_v25 = vpop.f32.mrb[33].mxu0 }
 0x7d1   : > { %v5348_v21 = vpop.f32.mrb[34].mxu0 }
 0x7d2   : > { %v5350_v37 = vpop.f32.mrb[35].mxu0 }
 0x7d7   : > { %v5354_v46 = vpop.f32.mrb[36].mxu0 }
 0x7d8   : > { %v5356_v48 = vpop.f32.mrb[37].mxu0 }
 0x7d9   : > { %v5358_v49 = vpop.f32.mrb[38].mxu0 }
 0x7da   : > { %v5360_v53 = vpop.f32.mrb[39].mxu0 }
 0x808   : > { %v4611_v58 = vpop.xlane.xlu0 %4610 }
 0x809   : > { %v4615_v59 = vmul.f32 0.00390625, %v4611_v58 }
 0x80b   : > { %v4617_v23 = vadd.f32 1e-05, %v4615_v59  ;;  %v4689_v59 = vld [vmem:[%s15087_s3] sm:$0x3] }
 0x80c   : > { %v4614_v61 = vpop.xlane.xlu0 %4613  ;;  %v4698_v63 = vrot.slane %v4689_v59, %v14495_v55 }
 0x80d   : > { %13224 = vrsqrt.f32 %v4617_v23  ;;  %v4616_v62 = vmul.f32 0.00390625, %v4614_v61  ;;  %v4694_v61 = vrot.slane %v4689_v59, %v14485_v43 }
 0x80f   : > { %v4618_v28 = vadd.f32 1e-05, %v4616_v62 }
 0x811   : > { %13226 = vrsqrt.f32 %v4618_v28 }
 0x817   : > { %v13225_v10 = vpop.eup %13224 }
 0x818   : > { %v4621_v18 = vmul.f32 %v13225_v10, %v14959_v27  ;;  %v4622_v0 = vmul.f32 %v13225_v10, %v14962_v29 }
 0x81a   : > { %v4637_v56 = vmul.f32 %v4633_v44, %v4622_v0  ;;  %v4636_v9 = vmul.f32 %v4629_v22, %v4621_v18 }
 0x81b   : > { %v13227_v5 = vpop.eup %13226 }
 0x81c   : > { %v4623_v7 = vmul.f32 %v13227_v5, %v14965_v35  ;;  %v4624_v32 = vmul.f32 %v13227_v5, %v14968_v36  ;;  %v15070_v54 = vadd.f32 %v4648_v50, %v4637_v56  ;;  %v15074_v3 = vadd.f32 %v4644_v6, %v4636_v9  ;;  %v15090_v36 = vld [vmem:[%s15087_s3 + $0x2] sm:$0xf] }
 0x81d   : > { %v4973_v16 = vrot.slane %v15090_v36, %v14485_v43  ;;  %v4977_v45 = vrot.slane %v15090_v36, %v14495_v55  ;;  %v4985_v9 = vrot.slane %v15090_v36, %v14499_v57 }
 0x81e   : > { %v4639_v13 = vmul.f32 %v4633_v44, %v4624_v32  ;;  %v4638_v27 = vmul.f32 %v4629_v22, %v4623_v7  ;;  %v4981_v7 = vrot.slane %v15090_v36, %v14478_v41 }
 0x81f   : > { %v5345_v20 = vadd.f32 %v5344_v15, %v4973_v16  ;;  %v15096_v19 = vadd.f32 %v5346_v25, %v4977_v45  ;;  %v5349_v31 = vadd.f32 %v5348_v21, %v4973_v16  ;;  %v15098_v39 = vadd.f32 %v5350_v37, %v4977_v45 }
 0x820   : > { %v15072_v29 = vadd.f32 %v4648_v50, %v4639_v13  ;;  %v15076_v11 = vadd.f32 %v4644_v6, %v4638_v27  ;;  %v15115_v47 = vadd.f32 %v5354_v46, %v4973_v16  ;;  %v15117_v60 = vadd.f32 %v5358_v49, %v4973_v16 }
 0x821   : > { %v12137_v26 = vpack.c.bf16 %v5349_v31, %v5345_v20  ;;  %v12434_v30 = vpack.i.bf16 %v5349_v31, %v5345_v20  ;;  %v12153_v33 = vpack.c.bf16 %v15098_v39, %v15096_v19  ;;  %v12449_v42 = vpack.i.bf16 %v15098_v39, %v15096_v19 }
 0x822   : > { %v4656_v14 = vpack.c.bf16 %v15072_v29, %v15070_v54  ;;  %v4655_v35 = vpack.c.bf16 %v15076_v11, %v15074_v3  ;;  %v15119_v51 = vadd.f32 %v5356_v48, %v4977_v45  ;;  %v12169_v1 = vpack.c.bf16 %v15117_v60, %v15115_v47 }
 0x823   : > { %12435 = vrot.lane.b32.xlu1 %v12434_v30, %s13790_s0  ;;  %12139 = vmatpush3.bf16.xpose.msk.msra.mxu0 %vm15102_vm5, %v12137_v26  ;;  %v12464_v52 = vpack.i.bf16 %v15117_v60, %v15115_v47  ;;  %v15125_v12 = vadd.f32 %v5360_v53, %v4977_v45 }
 0x824   : > { %4893 = vmatprep.mubr.bf16.mxu1 %v4656_v14  ;;  %12440 = vrot.lane.b32.xlu0 %v12434_v30, %s13789_s11 }
 0x825   : > { %4894 = vmatmul.mubr.bf16.vlgmr.msra.gmra.mrb[52].mxu1 %v4655_v35  ;;  %12140 = vmatprep.subr.bf16.mxu0 %v13792_v17  ;;  %v12185_v8 = vpack.c.bf16 %v15125_v12, %v15119_v51  ;;  %v12479_v58 = vpack.i.bf16 %v15125_v12, %v15119_v51 }
 0x826   : > { %11965 = vmatprep.mubr.msk.f32.mxu1 %vm13788_vm0, %v13787_v38 }
 0x874   : > { %v5397_v32 = vpop.f32.mrb[40].mxu0 }
 0x875   : > { %v5399_v56 = vpop.f32.mrb[41].mxu0  ;;  %v15181_v27 = vadd.f32 %v5397_v32, %v4981_v7 }
 0x876   : > { %v5401_v13 = vpop.f32.mrb[42].mxu0  ;;  %v15185_v35 = vadd.f32 %v5399_v56, %v4985_v9 }
 0x877   : > { %v15183_v14 = vadd.f32 %v5401_v13, %v4981_v7  ;;  %v5403_v16 = vpop.f32.mrb[43].mxu0 }
 0x878   : > { %v15189_v15 = vadd.f32 %v5403_v16, %v4985_v9 }
 0x879   : > { %v12499_v45 = vpack.i.bf16 %v15183_v14, %v15181_v27 }
 0x87a   : > { %v12514_v36 = vpack.i.bf16 %v15189_v15, %v15185_v35 }
 0x87c   : > { %v5407_v20 = vpop.f32.mrb[44].mxu0 }
 0x87d   : > { %v5409_v25 = vpop.f32.mrb[45].mxu0  ;;  %v15203_v46 = vadd.f32 %v5407_v20, %v4981_v7 }
 0x87e   : > { %v15194_v21 = vadd.f32 %v5409_v25, %v4985_v9  ;;  %v5411_v31 = vpop.f32.mrb[46].mxu0 }
 0x87f   : > { %v5413_v37 = vpop.f32.mrb[47].mxu0  ;;  %v15205_v48 = vadd.f32 %v5411_v31, %v4981_v7 }
 0x880   : > { %v15196_v26 = vadd.f32 %v5413_v37, %v4985_v9 }
 0x881   : > { %v15211_v53 = vpack.i.bf16 %v15205_v48, %v15203_v46 }
 0x882   : > { %v15322_v24 = vpack.i.bf16 %v15196_v26, %v15194_v21  ;;  %v12237_v12 = vpack.c.bf16 %v15196_v26, %v15194_v21 }
 0x895   : > { %v12436_v23 = vpop.permute.xlu1 %12435 }
 0x896   : > { %v12438_v62 = vunpack.i.h.bf16 %v12436_v23  ;;  %v12437_v28 = vunpack.i.l.bf16 %v12436_v23 }
 0x898   : > { %v12141_v0 = vpack.c.bf16 %v12438_v62, %v12437_v28 }
 0x8f8   : > { %v4895_v10 = vpop.f32.mrb[52].mxu1 }
 0x8f9   : > { %v4896_v18 = vadd.f32 %v4895_v10, %v4694_v61  ;;  %v4897_v34 = vpop.f32.mrb[53].mxu1 }
 0x8fa   : > { %v15134_v22 = vadd.f32 %v4897_v34, %v4698_v63  ;;  %v4899_v44 = vpop.f32.mrb[54].mxu1 }
 0x8fb   : > { %v15136_v5 = vadd.f32 %v4899_v44, %v4694_v61  ;;  %v4901_v6 = vpop.f32.mrb[55].mxu1  ;;  %5419 = vrot.lane.b32.xlu0 %v4896_v18, %s13789_s11  ;;  %5417 = vrot.lane.b32.xlu1 %v4896_v18, %s13790_s0 }
 0x8fc   : > { %v15140_v50 = vadd.f32 %v4901_v6, %v4698_v63  ;;  %11917 = vmatmul.mubr.msk.f32.vlgmr.msra.gmra.mrb[26].mxu0 %vm1811_vm1, %v4896_v18 }
 0x8fd   : > { %12143 = vmatpush3.bf16.xpose.msk.msra.mxu0 %vm15102_vm5, %v12141_v0  ;;  %11923 = vmatprep.mubr.msk.f32.mxu0 %vm13788_vm0, %v13787_v38 }
 0x8fe   : > { %12144 = vmatprep.subr.bf16.mxu0 %v13792_v17 }
 0x8ff   : > { %12450 = vrot.lane.b32.xlu0 %v12449_v42, %s13790_s0  ;;  %12445 = vrot.lane.b32.xlu1 %v12434_v30, %s13791_s2  ;;  %v12201_v30 = vpack.c.bf16 %v15183_v14, %v15181_v27 }
 0x903   : > { %12460 = vrot.lane.b32.xlu0 %v12449_v42, %s13791_s2  ;;  %5421 = vrot.lane.b32.xlu1 %v4896_v18, %s13791_s2 }
 0x907   : > { %12465 = vrot.lane.b32.xlu0 %v12464_v52, %s13790_s0  ;;  %12455 = vrot.lane.b32.xlu1 %v12449_v42, %s13789_s11  ;;  %v12441_v42 = vpop.permute.xlu0 %12440 }
 0x908   : > { %v12443_v49 = vunpack.i.h.bf16 %v12441_v42 }
 0x90b   : > { %5428 = vrot.lane.b32.xlu0 %v15134_v22, %s13791_s2  ;;  %5424 = vrot.lane.b32.xlu1 %v15134_v22, %s13790_s0 }
 0x90f   : > { %12475 = vrot.lane.b32.xlu0 %v12464_v52, %s13791_s2  ;;  %5426 = vrot.lane.b32.xlu1 %v15134_v22, %s13789_s11 }
 0x913   : > { %12480 = vrot.lane.b32.xlu0 %v12479_v58, %s13790_s0  ;;  %12470 = vrot.lane.b32.xlu1 %v12464_v52, %s13789_s11  ;;  %v12442_v52 = vunpack.i.l.bf16 %v12441_v42 }
 0x917   : > { %5435 = vrot.lane.b32.xlu0 %v15136_v5, %s13791_s2  ;;  %5431 = vrot.lane.b32.xlu1 %v15136_v5, %s13790_s0 }
 0x91b   : > { %12490 = vrot.lane.b32.xlu0 %v12479_v58, %s13791_s2  ;;  %5433 = vrot.lane.b32.xlu1 %v15136_v5, %s13789_s11 }
 0x91f   : > { %5440 = vrot.lane.b32.xlu0 %v15140_v50, %s13789_s11  ;;  %12485 = vrot.lane.b32.xlu1 %v12479_v58, %s13789_s11  ;;  %v12145_v58 = vpack.c.bf16 %v12443_v49, %v12442_v52 }
 0x923   : > { %5438 = vrot.lane.b32.xlu1 %v15140_v50, %s13790_s0  ;;  %12500 = vrot.lane.b32.xlu0 %v12499_v45, %s13789_s11 }
 0x927   : > { %5442 = vrot.lane.b32.xlu1 %v15140_v50, %s13791_s2  ;;  %12515 = vrot.lane.b32.xlu0 %v12514_v36, %s13789_s11 }
 0x92b   : > { %12495 = vrot.lane.b32.xlu1 %v12499_v45, %s13790_s0 }
 0x92f   : > { %12505 = vrot.lane.b32.xlu1 %v12499_v45, %s13791_s2 }
 0x933   : > { %12510 = vrot.lane.b32.xlu1 %v12514_v36, %s13790_s0 }
 0x937   : > { %12520 = vrot.lane.b32.xlu1 %v12514_v36, %s13791_s2 }
 0x93b   : > { %12525 = vrot.lane.b32.xlu1 %v15211_v53, %s13790_s0 }
 0x93f   : > { %12530 = vrot.lane.b32.xlu1 %v15211_v53, %s13789_s11 }
 0x96d   : > { %v5418_v59 = vpop.permute.xlu1 %5417  ;;  %v5420_v23 = vpop.permute.xlu0 %5419 }
 0x96e   : > { %11924 = vmatmul.mubr.msk.f32.vlgmr.msra.gmra.mrb[48].mxu0 %vm1811_vm1, %v5418_v59 }
 0x96f   : > { %12147 = vmatpush3.bf16.xpose.msk.msra.mxu0 %vm15102_vm5, %v12145_v58  ;;  %11930 = vmatprep.mubr.msk.f32.mxu0 %vm13788_vm0, %v13787_v38 }
 0x970   : > { %12148 = vmatprep.subr.bf16.mxu0 %v13792_v17 }
 0x971   : > { %v12446_v61 = vpop.permute.xlu1 %12445  ;;  %v12451_v62 = vpop.permute.xlu0 %12450 }
 0x972   : > { %v12448_v28 = vunpack.i.h.bf16 %v12446_v61  ;;  %v12447_v63 = vunpack.i.l.bf16 %v12446_v61  ;;  %v12453_v20 = vunpack.i.h.bf16 %v12451_v62  ;;  %v12452_v25 = vunpack.i.l.bf16 %v12451_v62 }
 0x974   : > { %v12149_v10 = vpack.c.bf16 %v12448_v28, %v12447_v63  ;;  %v12157_v19 = vpack.c.bf16 %v12453_v20, %v12452_v25 }
 0x975   : > { %v5422_v18 = vpop.permute.xlu1 %5421  ;;  %v12461_v34 = vpop.permute.xlu0 %12460 }
 0x976   : > { %v12463_v0 = vunpack.i.h.bf16 %v12461_v34  ;;  %v12462_v44 = vunpack.i.l.bf16 %v12461_v34  ;;  %11931 = vmatmul.mubr.msk.f32.vlgmr.msra.gmra.mrb[50].mxu0 %vm1811_vm1, %v5420_v23 }
 0x977   : > { %12151 = vmatpush3.bf16.xpose.msk.msra.mxu0 %vm15102_vm5, %v12149_v10  ;;  %11937 = vmatprep.mubr.msk.f32.mxu0 %vm13788_vm0, %v13787_v38 }
 0x978   : > { %v12165_v6 = vpack.c.bf16 %v12463_v0, %v12462_v44  ;;  %12152 = vmatprep.subr.bf16.mxu0 %v13792_v17 }
 0x979   : > { %v12456_v7 = vpop.permute.xlu1 %12455  ;;  %v12466_v32 = vpop.permute.xlu0 %12465 }
 0x97a   : > { %12167 = vmatpush3.bf16.xpose.msk.msra.mxu1 %vm15102_vm5, %v12165_v6  ;;  %v12468_v56 = vunpack.i.h.bf16 %v12466_v32  ;;  %v12467_v9 = vunpack.i.l.bf16 %v12466_v32  ;;  %v12458_v49 = vunpack.i.h.bf16 %v12456_v7  ;;  %v12457_v52 = vunpack.i.l.bf16 %v12456_v7 }
 0x97b   : > { %12172 = vmatprep.subr.bf16.mxu1 %v13792_v17 }
 0x97c   : > { %v12173_v45 = vpack.c.bf16 %v12468_v56, %v12467_v9  ;;  %v12161_v23 = vpack.c.bf16 %v12458_v49, %v12457_v52 }
 0x97d   : > { %v5425_v13 = vpop.permute.xlu1 %5424  ;;  %v5429_v16 = vpop.permute.xlu0 %5428 }
 0x97e   : > { %11938 = vmatmul.mubr.msk.f32.vlgmr.msra.gmra.mrb[52].mxu0 %vm1811_vm1, %v5422_v18 }
 0x97f   : > { %12155 = vmatpush3.bf16.xpose.msk.msra.mxu0 %vm15102_vm5, %v12153_v33  ;;  %11944 = vmatprep.mubr.msk.f32.mxu0 %vm13788_vm0, %v13787_v38 }
 0x980   : > { %12156 = vmatprep.subr.bf16.mxu0 %v13792_v17 }
 0x981   : > { %v5427_v36 = vpop.permute.xlu1 %5426  ;;  %v12476_v31 = vpop.permute.xlu0 %12475  ;;  %11966 = vmatmul.mubr.msk.f32.vlgmr.msra.gmra.mrb[50].mxu1 %vm1811_vm1, %v5429_v16 }
 0x982   : > { %12175 = vmatpush3.bf16.xpose.msk.msra.mxu1 %vm15102_vm5, %v12173_v45  ;;  %11979 = vmatprep.mubr.msk.f32.mxu1 %vm13788_vm0, %v13787_v38  ;;  %v12478_v39 = vunpack.i.h.bf16 %v12476_v31  ;;  %v12477_v33 = vunpack.i.l.bf16 %v12476_v31 }
 0x983   : > { %12180 = vmatprep.subr.bf16.mxu1 %v13792_v17 }
 0x984   : > { %v12181_v58 = vpack.c.bf16 %v12478_v39, %v12477_v33 }
 0x985   : > { %v12471_v37 = vpop.permute.xlu1 %12470  ;;  %v12481_v42 = vpop.permute.xlu0 %12480 }
 0x986   : > { %11945 = vmatmul.mubr.msk.f32.vlgmr.msra.gmra.mrb[54].mxu0 %vm1811_vm1, %v15134_v22  ;;  %v12483_v61 = vunpack.i.h.bf16 %v12481_v42  ;;  %v12482_v62 = vunpack.i.l.bf16 %v12481_v42  ;;  %v12473_v44 = vunpack.i.h.bf16 %v12471_v37  ;;  %v12472_v6 = vunpack.i.l.bf16 %v12471_v37 }
 0x987   : > { %12159 = vmatpush3.bf16.xpose.msk.msra.mxu0 %vm15102_vm5, %v12157_v19  ;;  %11951 = vmatprep.mubr.msk.f32.mxu0 %vm13788_vm0, %v13787_v38 }
 0x988   : > { %12160 = vmatprep.subr.bf16.mxu0 %v13792_v17  ;;  %v12189_v63 = vpack.c.bf16 %v12483_v61, %v12482_v62  ;;  %v12177_v47 = vpack.c.bf16 %v12473_v44, %v12472_v6 }
 0x989   : > { %v5432_v59 = vpop.permute.xlu1 %5431  ;;  %v5436_v22 = vpop.permute.xlu0 %5435 }
 0x98a   : > { %11980 = vmatmul.mubr.msk.f32.vlgmr.msra.gmra.mrb[56].mxu1 %vm1811_vm1, %v5432_v59 }
 0x98b   : > { %12183 = vmatpush3.bf16.xpose.msk.msra.mxu1 %vm15102_vm5, %v12181_v58  ;;  %11993 = vmatprep.mubr.msk.f32.mxu1 %vm13788_vm0, %v13787_v38 }
 0x98c   : > { %12188 = vmatprep.subr.bf16.mxu1 %v13792_v17 }
 0x98d   : > { %v5434_v28 = vpop.permute.xlu1 %5433  ;;  %v12491_v10 = vpop.permute.xlu0 %12490 }
 0x98e   : > { %11952 = vmatmul.mubr.msk.f32.vlgmr.msra.gmra.mrb[56].mxu0 %vm1811_vm1, %v5425_v13  ;;  %v12493_v34 = vunpack.i.h.bf16 %v12491_v10  ;;  %v12492_v0 = vunpack.i.l.bf16 %v12491_v10 }
 0x98f   : > { %12163 = vmatpush3.bf16.xpose.msk.msra.mxu0 %vm15102_vm5, %v12161_v23  ;;  %11958 = vmatprep.mubr.msk.f32.mxu0 %vm13788_vm0, %v13787_v38 }
 0x990   : > { %12168 = vmatprep.subr.bf16.mxu0 %v13792_v17  ;;  %v12197_v7 = vpack.c.bf16 %v12493_v34, %v12492_v0 }
 0x991   : > { %v12486_v18 = vpop.permute.xlu1 %12485  ;;  %v5441_v51 = vpop.permute.xlu0 %5440 }
 0x992   : > { %11994 = vmatmul.mubr.msk.f32.vlgmr.msra.gmra.mrb[58].mxu1 %vm1811_vm1, %v5436_v22 }
 0x993   : > { %12191 = vmatpush3.bf16.xpose.msk.msra.mxu1 %vm15102_vm5, %v12189_v63  ;;  %12007 = vmatprep.mubr.msk.f32.mxu1 %vm13788_vm0, %v13787_v38 }
 0x994   : > { %12196 = vmatprep.subr.bf16.mxu1 %v13792_v17 }
 0x995   : > { %v5439_v32 = vpop.permute.xlu1 %5438 }
 0x996   : > { %11959 = vmatmul.mubr.msk.f32.vlgmr.msra.gmra.mrb[58].mxu0 %vm1811_vm1, %v5427_v36 }
 0x997   : > { %12171 = vmatpush3.bf16.xpose.msk.msra.mxu0 %vm15102_vm5, %v12169_v1  ;;  %11972 = vmatprep.mubr.msk.f32.mxu0 %vm13788_vm0, %v13787_v38  ;;  %v12488_v1 = vunpack.i.h.bf16 %v12486_v18 }
 0x998   : > { %12176 = vmatprep.subr.bf16.mxu0 %v13792_v17 }
 0x999   : > { %v5443_v60 = vpop.permute.xlu1 %5442 }
 0x99a   : > { %12008 = vmatmul.mubr.msk.f32.vlgmr.msra.gmra.mrb[60].mxu1 %vm1811_vm1, %v5439_v32 }
 0x99b   : > { %12199 = vmatpush3.bf16.xpose.msk.msra.mxu1 %vm15102_vm5, %v12197_v7  ;;  %12021 = vmatprep.mubr.msk.f32.mxu1 %vm13788_vm0, %v13787_v38 }
 0x99c   : > { %12203 = vmatprep.subr.bf16.mxu1 %v13792_v17 }
 0x99d   : > { %v12496_v14 = vpop.permute.xlu1 %12495 }
 0x99e   : > { %11973 = vmatmul.mubr.msk.f32.vlgmr.msra.gmra.mrb[60].mxu0 %vm1811_vm1, %v15136_v5  ;;  %v12487_v5 = vunpack.i.l.bf16 %v12486_v18  ;;  %v12497_v16 = vunpack.i.l.bf16 %v12496_v14  ;;  %v12501_v18 = vpop.permute.xlu0 %12500 }
 0x99f   : > { %12179 = vmatpush3.bf16.xpose.msk.msra.mxu0 %vm15102_vm5, %v12177_v47  ;;  %11986 = vmatprep.mubr.msk.f32.mxu0 %vm13788_vm0, %v13787_v38 }
 0x9a0   : > { %12184 = vmatprep.subr.bf16.mxu0 %v13792_v17  ;;  %v12193_v56 = vpack.c.bf16 %v12488_v1, %v12487_v5 }
 0x9a2   : > { %12022 = vmatmul.mubr.msk.f32.vlgmr.msra.gmra.mrb[62].mxu1 %vm1811_vm1, %v5443_v60  ;;  %v15341_v47 = vpop.permute.xlu0 %12515 }
 0x9a3   : > { %12035 = vmatprep.mubr.msk.f32.mxu1 %vm13788_vm0, %v13787_v38 }
 0x9a6   : > { %11987 = vmatmul.mubr.msk.f32.vlgmr.msra.gmra.mrb[62].mxu0 %vm1811_vm1, %v5434_v28 }
 0x9a7   : > { %12187 = vmatpush3.bf16.xpose.msk.msra.mxu0 %vm15102_vm5, %v12185_v8  ;;  %12000 = vmatprep.mubr.msk.f32.mxu0 %vm13788_vm0, %v13787_v38 }
 0x9a8   : > { %12192 = vmatprep.subr.bf16.mxu0 %v13792_v17 }
 0x9ae   : > { %12001 = vmatmul.mubr.msk.f32.vlgmr.msra.gmra.mrb[64].mxu0 %vm1811_vm1, %v15140_v50 }
 0x9af   : > { %12195 = vmatpush3.bf16.xpose.msk.msra.mxu0 %vm15102_vm5, %v12193_v56  ;;  %12014 = vmatprep.mubr.msk.f32.mxu0 %vm13788_vm0, %v13787_v38 }
 0x9b0   : > { %12200 = vmatprep.subr.bf16.mxu0 %v13792_v17 }
 0x9b6   : > { %12015 = vmatmul.mubr.msk.f32.vlgmr.msra.gmra.mrb[66].mxu0 %vm1811_vm1, %v5441_v51 }
 0x9b7   : > { %12202 = vmatpush3.bf16.msra.mxu0 %v12201_v30  ;;  %12028 = vmatprep.mubr.msk.f32.mxu0 %vm13788_vm0, %v13787_v38  ;;  %v12498_v30 = vunpack.i.h.bf16 %v12496_v14 }
 0x9b8   : > { %12206 = vmatprep.subr.bf16.mxu0 %v13792_v17 }
 0x9b9   : > { %v12204_v45 = vpack.c.bf16 %v12498_v30, %v12497_v16 }
 0x9bb   : > { %12205 = vmatpush3.bf16.msra.mxu1 %v12204_v45 }
 0x9bc   : > { %12209 = vmatprep.subr.bf16.mxu1 %v13792_v17 }
 0x9cf   : > { %v5652_v8 = vpop.f32.mrb[26].mxu0 }
 0x9d0   : > { %v6796_v50 = vmul.f32 1.442695, %v5652_v8  ;;  %v11918_v9 = vpop.f32.mrb[27].mxu0 }
 0x9d2   : > { %13228 = vpow2.f32 %v6796_v50 }
 0x9dc   : > { %v15326_v13 = vpop.eup %13228 }
 0x9dd   : > { %v6829_v27 = vsel %vm6828_vm6, %v15326_v13, 0.0 }
 0x9de   : > { %6830 = vadd.xlane.f32.xlu0 %v6829_v27 }
 0xa41   : > { %v5728_v20 = vpop.f32.mrb[48].mxu0 }
 0xa42   : > { %v6798_v25 = vmul.f32 1.442695, %v5728_v20  ;;  %v11925_v36 = vpop.f32.mrb[49].mxu0 }
 0xa44   : > { %13230 = vpow2.f32 %v6798_v25 }
 0xa49   : > { %v5804_v31 = vpop.f32.mrb[50].mxu0 }
 0xa4a   : > { %v11932_v19 = vpop.f32.mrb[51].mxu0  ;;  %v6800_v52 = vmul.f32 1.442695, %v5804_v31 }
 0xa4e   : > { %v15331_v39 = vpop.eup %13230 }
 0xa4f   : > { %v6832_v33 = vsel %vm6828_vm6, %v15331_v39, 0.0 }
 0xa50   : > { %6833 = vadd.xlane.f32.xlu1 %v6832_v33 }
 0xa51   : > { %v5880_v37 = vpop.f32.mrb[52].mxu0 }
 0xa52   : > { %v11939_v42 = vpop.f32.mrb[53].mxu0  ;;  %v6802_v28 = vmul.f32 1.442695, %v5880_v37  ;;  %v12503_v37 = vunpack.i.h.bf16 %v12501_v18 }
 0xa53   : > { %v12502_v42 = vunpack.i.l.bf16 %v12501_v18 }
 0xa54   : > { %v6184_v49 = vpop.f32.mrb[50].mxu1 }
 0xa55   : > { %v6810_v58 = vmul.f32 1.442695, %v6184_v49  ;;  %v11967_v59 = vpop.f32.mrb[51].mxu1 }
 0xa57   : > { %13232 = vpow2.f32 %v6810_v58 }
 0xa58   : > { %13234 = vpow2.f32 %v6800_v52 }
 0xa59   : > { %v5956_v22 = vpop.f32.mrb[54].mxu0 }
 0xa5a   : > { %v6804_v23 = vmul.f32 1.442695, %v5956_v22  ;;  %v11946_v61 = vpop.f32.mrb[55].mxu0  ;;  %v12207_v22 = vpack.c.bf16 %v12503_v37, %v12502_v42  ;;  %v12506_v42 = vpop.permute.xlu1 %12505 }
 0xa5c   : > { %13236 = vpow2.f32 %v6804_v23 }
 0xa5d   : > { %v6336_v62 = vpop.f32.mrb[56].mxu1 }
 0xa5e   : > { %v6814_v63 = vmul.f32 1.442695, %v6336_v62  ;;  %v11981_v10 = vpop.f32.mrb[57].mxu1 }
 0xa60   : > { %13238 = vpow2.f32 %v6814_v63 }
 0xa61   : > { %v15335_v34 = vpop.eup %13232  ;;  %v6032_v0 = vpop.f32.mrb[56].mxu0  ;;  %13240 = vpow2.f32 %v6802_v28 }
 0xa62   : > { %v11953_v44 = vpop.f32.mrb[57].mxu0  ;;  %v6850_v6 = vsel %vm6828_vm6, %v15335_v34, 0.0  ;;  %v15339_v7 = vpop.eup %13234  ;;  %v6806_v45 = vmul.f32 1.442695, %v6032_v0 }
 0xa63   : > { %6851 = vadd.xlane.f32.xlu0 %v6850_v6  ;;  %v6835_v56 = vsel %vm6828_vm6, %v15339_v7, 0.0 }
 0xa65   : > { %v6488_v32 = vpop.f32.mrb[58].mxu1 }
 0xa66   : > { %v15343_v60 = vpop.eup %13236  ;;  %v6818_v1 = vmul.f32 1.442695, %v6488_v32  ;;  %v11995_v5 = vpop.f32.mrb[59].mxu1 }
 0xa67   : > { %6836 = vadd.xlane.f32.xlu0 %v6835_v56  ;;  %v6841_v51 = vsel %vm6828_vm6, %v15343_v60, 0.0 }
 0xa68   : > { %13242 = vpow2.f32 %v6818_v1  ;;  %6842 = vadd.xlane.f32.xlu1 %v6841_v51 }
 0xa69   : > { %v6108_v8 = vpop.f32.mrb[58].mxu0 }
 0xa6a   : > { %v15349_v50 = vpop.eup %13238  ;;  %v11960_v9 = vpop.f32.mrb[59].mxu0  ;;  %v6808_v32 = vmul.f32 1.442695, %v6108_v8 }
 0xa6b   : > { %v6831_v27 = vpop.xlane.xlu0 %6830  ;;  %v6856_v14 = vsel %vm6828_vm6, %v15349_v50, 0.0  ;;  %v15353_v30 = vpop.eup %13240 }
 0xa6c   : > { %6857 = vadd.xlane.f32.xlu0 %v6856_v14  ;;  %13244 = vrcp.f32 %v6831_v27  ;;  %v6838_v36 = vsel %vm6828_vm6, %v15353_v30, 0.0 }
 0xa6d   : > { %v6640_v16 = vpop.f32.mrb[60].mxu1 }
 0xa6e   : > { %v6822_v20 = vmul.f32 1.442695, %v6640_v16  ;;  %v12009_v25 = vpop.f32.mrb[61].mxu1 }
 0xa70   : > { %13246 = vpow2.f32 %v6822_v20  ;;  %6839 = vadd.xlane.f32.xlu0 %v6838_v36 }
 0xa71   : > { %v6260_v31 = vpop.f32.mrb[60].mxu0  ;;  %13248 = vpow2.f32 %v6806_v45 }
 0xa72   : > { %v15357_v19 = vpop.eup %13242  ;;  %v11974_v33 = vpop.f32.mrb[61].mxu0  ;;  %13250 = vpow2.f32 %v6808_v32  ;;  %v6812_v1 = vmul.f32 1.442695, %v6260_v31 }
 0xa73   : > { %v6862_v49 = vsel %vm6828_vm6, %v15357_v19, 0.0 }
 0xa74   : > { %6863 = vadd.xlane.f32.xlu0 %v6862_v49  ;;  %13252 = vpow2.f32 %v6812_v1  ;;  %v12511_v49 = vpop.permute.xlu1 %12510 }
 0xa75   : > { %v6792_v52 = vpop.f32.mrb[62].mxu1 }
 0xa76   : > { %v12023_v58 = vpop.f32.mrb[63].mxu1  ;;  %v13245_v59 = vpop.eup %13244  ;;  %v6826_v16 = vmul.f32 1.442695, %v6792_v52 }
 0xa77   : > { %v6878_v23 = vmul.f32 %v13245_v59, %v15326_v13 }
 0xa78   : > { %v12521_v52 = vpop.permute.xlu1 %12520 }
 0xa79   : > { %12540 = vrot.lane.b32.xlu1 %v15322_v24, %s13790_s0  ;;  %v6412_v61 = vpop.f32.mrb[62].mxu0  ;;  %12029 = vmatmul.mubr.msk.f32.vlgmr.msra.gmra.mrb[68].mxu0 %vm6828_vm6, %v6878_v23  ;;  %v12508_v23 = vunpack.i.h.bf16 %v12506_v42 }
 0xa7a   : > { %v15364_v62 = vpop.eup %13246  ;;  %v11988_v28 = vpop.f32.mrb[63].mxu0  ;;  %12208 = vmatpush3.bf16.msra.mxu0 %v12207_v22  ;;  %12042 = vmatprep.mubr.msk.f32.mxu0 %vm13788_vm0, %v13787_v38  ;;  %v6816_v5 = vmul.f32 1.442695, %v6412_v61  ;;  %v12507_v61 = vunpack.i.l.bf16 %v12506_v42 }
 0xa7b   : > { %v6868_v63 = vsel %vm6828_vm6, %v15364_v62, 0.0  ;;  %v15371_v10 = vpop.eup %13248  ;;  %12212 = vmatprep.subr.bf16.mxu0 %v13792_v17 }
 0xa7c   : > { %6869 = vadd.xlane.f32.xlu0 %v6868_v63  ;;  %v6844_v13 = vsel %vm6828_vm6, %v15371_v10, 0.0  ;;  %13254 = vpow2.f32 %v6816_v5  ;;  %v15378_v51 = vpop.eup %13250  ;;  %v15406_v58 = vpop.permute.xlu1 %12525  ;;  %v12518_v5 = vunpack.i.h.bf16 %v15341_v47 }
 0xa7d   : > { %v6847_v9 = vsel %vm6828_vm6, %v15378_v51, 0.0 }
 0xa7e   : > { %v15382_v27 = vpop.eup %13252 }
 0xa7f   : > { %v6853_v8 = vsel %vm6828_vm6, %v15382_v27, 0.0 }
 0xa80   : > { %6845 = vadd.xlane.f32.xlu0 %v6844_v13  ;;  %v15408_v59 = vpop.permute.xlu1 %12530  ;;  %v12210_v13 = vpack.c.bf16 %v12508_v23, %v12507_v61  ;;  %v12528_v23 = vunpack.i.h.bf16 %v15406_v58  ;;  %v12527_v61 = vunpack.i.l.bf16 %v15406_v58 }
 0xa81   : > { %v6564_v18 = vpop.f32.mrb[64].mxu0 }
 0xa82   : > { %v12002_v0 = vpop.f32.mrb[65].mxu0  ;;  %v6820_v20 = vmul.f32 1.442695, %v6564_v18 }
 0xa86   : > { %v15386_v14 = vpop.eup %13254 }
 0xa89   : > { %v6716_v44 = vpop.f32.mrb[66].mxu0 }
 0xa8a   : > { %v12016_v6 = vpop.f32.mrb[67].mxu0  ;;  %v6824_v56 = vmul.f32 1.442695, %v6716_v44 }
 0xa8c   : > { %13256 = vpow2.f32 %v6824_v56  ;;  %v12517_v56 = vunpack.i.l.bf16 %v15341_v47 }
 0xa8d   : > { %13258 = vpow2.f32 %v6826_v16 }
 0xa8e   : > { %13260 = vpow2.f32 %v6820_v20  ;;  %v12219_v16 = vpack.c.bf16 %v12518_v5, %v12517_v56  ;;  %v12512_v20 = vunpack.i.l.bf16 %v12511_v49 }
 0xa96   : > { %12535 = vrot.lane.b32.xlu0 %v15211_v53, %s13791_s2  ;;  %v6859_v53 = vsel %vm6828_vm6, %v15386_v14, 0.0  ;;  %v15390_v45 = vpop.eup %13256 }
 0xa97   : > { %v6871_v25 = vsel %vm6828_vm6, %v15390_v45, 0.0  ;;  %v15394_v36 = vpop.eup %13258 }
 0xa98   : > { %v6874_v31 = vsel %vm6828_vm6, %v15394_v36, 0.0  ;;  %v15398_v33 = vpop.eup %13260 }
 0xa99   : > { %v6865_v37 = vsel %vm6828_vm6, %v15398_v33, 0.0 }
 0xa9d   : > { %6848 = vadd.xlane.f32.xlu1 %v6847_v9  ;;  %v12213_v9 = vpack.c.bf16 %v15189_v15, %v15185_v35 }
 0xaa1   : > { %6854 = vadd.xlane.f32.xlu1 %v6853_v8 }
 0xaa5   : > { %6860 = vadd.xlane.f32.xlu1 %v6859_v53  ;;  %v12513_v53 = vunpack.i.h.bf16 %v12511_v49 }
 0xaa9   : > { %6872 = vadd.xlane.f32.xlu1 %v6871_v25  ;;  %v12216_v25 = vpack.c.bf16 %v12513_v53, %v12512_v20  ;;  %v12225_v53 = vpack.c.bf16 %v15205_v48, %v15203_v46 }
 0xab5   : > { %6875 = vadd.xlane.f32.xlu0 %v6874_v31  ;;  %v12523_v31 = vunpack.i.h.bf16 %v12521_v52 }
 0xab9   : > { %6866 = vadd.xlane.f32.xlu0 %v6865_v37  ;;  %v12522_v37 = vunpack.i.l.bf16 %v12521_v52 }
 0xaba   : > { %12550 = vrot.lane.b32.xlu1 %v15322_v24, %s13791_s2 }
 0xacf   : > { %12545 = vrot.lane.b32.xlu0 %v15322_v24, %s13789_s11 }
 0xadd   : > { %v6834_v22 = vpop.xlane.xlu1 %6833 }
 0xade   : > { %13262 = vrcp.f32 %v6834_v22  ;;  %v12222_v22 = vpack.c.bf16 %v12523_v31, %v12522_v37 }
 0xae8   : > { %v13263_v28 = vpop.eup %13262 }
 0xae9   : > { %v6880_v63 = vmul.f32 %v13263_v28, %v15331_v39 }
 0xaeb   : > { %12036 = vmatmul.mubr.msk.f32.vlgmr.msra.gmra.mrb[64].mxu1 %vm6828_vm6, %v6880_v63 }
 0xaec   : > { %12211 = vmatpush3.bf16.msra.mxu1 %v12210_v13  ;;  %12049 = vmatprep.mubr.msk.f32.mxu1 %vm13788_vm0, %v13787_v38 }
 0xaed   : > { %12215 = vmatprep.subr.bf16.mxu1 %v13792_v17 }
 0xaf0   : > { %v6852_v24 = vpop.xlane.xlu0 %6851 }
 0xaf4   : > { %v6837_v18 = vpop.xlane.xlu0 %6836 }
 0xaf5   : > { %13264 = vrcp.f32 %v6837_v18  ;;  %v6843_v0 = vpop.xlane.xlu1 %6842 }
 0xaf6   : > { %13266 = vrcp.f32 %v6843_v0 }
 0xaf9   : > { %v6858_v44 = vpop.xlane.xlu0 %6857  ;;  %v12541_v18 = vpop.permute.xlu1 %12540 }
 0xafd   : > { %v6840_v6 = vpop.xlane.xlu0 %6839 }
 0xafe   : > { %13268 = vrcp.f32 %v6840_v6 }
 0xaff   : > { %v13265_v32 = vpop.eup %13264 }
 0xb00   : > { %v6882_v39 = vmul.f32 %v13265_v32, %v15339_v7  ;;  %v13267_v1 = vpop.eup %13266 }
 0xb01   : > { %v6886_v8 = vmul.f32 %v13267_v1, %v15343_v60  ;;  %v6864_v7 = vpop.xlane.xlu0 %6863 }
 0xb02   : > { %12043 = vmatmul.mubr.msk.f32.vlgmr.msra.gmra.mrb[70].mxu0 %vm6828_vm6, %v6882_v39 }
 0xb03   : > { %12214 = vmatpush3.bf16.msra.mxu0 %v12213_v9  ;;  %12056 = vmatprep.mubr.msk.f32.mxu0 %vm13788_vm0, %v13787_v38 }
 0xb04   : > { %12218 = vmatprep.subr.bf16.mxu0 %v13792_v17 }
 0xb06   : > { %12057 = vmatmul.mubr.msk.f32.vlgmr.msra.gmra.mrb[72].mxu0 %vm6828_vm6, %v6886_v8 }
 0xb07   : > { %12220 = vmatpush3.bf16.msra.mxu0 %v12219_v16  ;;  %12070 = vmatprep.mubr.msk.f32.mxu0 %vm13788_vm0, %v13787_v38 }
 0xb08   : > { %v13269_v35 = vpop.eup %13268  ;;  %12224 = vmatprep.subr.bf16.mxu0 %v13792_v17 }
 0xb09   : > { %v6884_v15 = vmul.f32 %v13269_v35, %v15353_v30  ;;  %v6870_v47 = vpop.xlane.xlu0 %6869 }
 0xb0b   : > { %12050 = vmatmul.mubr.msk.f32.vlgmr.msra.gmra.mrb[66].mxu1 %vm6828_vm6, %v6884_v15 }
 0xb0c   : > { %12217 = vmatpush3.bf16.msra.mxu1 %v12216_v25  ;;  %12063 = vmatprep.mubr.msk.f32.mxu1 %vm13788_vm0, %v13787_v38 }
 0xb0d   : > { %v6846_v60 = vpop.xlane.xlu0 %6845  ;;  %12221 = vmatprep.subr.bf16.mxu1 %v13792_v17 }
 0xb0e   : > { %13270 = vrcp.f32 %v6846_v60 }
 0xb0f   : > { %13272 = vrcp.f32 %v6852_v24 }
 0xb10   : > { %13274 = vrcp.f32 %v6858_v44  ;;  %v12543_v44 = vunpack.i.h.bf16 %v12541_v18 }
 0xb11   : > { %13276 = vrcp.f32 %v6864_v7  ;;  %v12536_v28 = vpop.permute.xlu0 %12535  ;;  %v12533_v7 = vunpack.i.h.bf16 %v15408_v59 }
 0xb12   : > { %13278 = vrcp.f32 %v6870_v47  ;;  %v12538_v13 = vunpack.i.h.bf16 %v12536_v28  ;;  %v12537_v24 = vunpack.i.l.bf16 %v12536_v28 }
 0xb14   : > { %v12234_v6 = vpack.c.bf16 %v12538_v13, %v12537_v24 }
 0xb18   : > { %v13271_v42 = vpop.eup %13270 }
 0xb19   : > { %v6888_v30 = vmul.f32 %v13271_v42, %v15371_v10  ;;  %v13273_v49 = vpop.eup %13272  ;;  %v12228_v10 = vpack.c.bf16 %v12528_v23, %v12527_v61 }
 0xb1a   : > { %v6892_v52 = vmul.f32 %v13273_v49, %v15335_v34  ;;  %v13275_v63 = vpop.eup %13274  ;;  %v12542_v34 = vunpack.i.l.bf16 %v12541_v18  ;;  %v12923_v18 = vld [vmem:[%s15494_s17 + $0x10] ss:$8 sps:$4 sm:$0xff]  }
 0xb1b   : > { %12064 = vmatmul.mubr.msk.f32.vlgmr.msra.gmra.mrb[68].mxu1 %vm6828_vm6, %v6888_v30  ;;  %v6896_v58 = vmul.f32 %v13275_v63, %v15349_v50  ;;  %v13277_v0 = vpop.eup %13276 }
 0xb1c   : > { %12223 = vmatpush3.bf16.msra.mxu1 %v12222_v22  ;;  %12077 = vmatprep.mubr.msk.f32.mxu1 %vm13788_vm0, %v13787_v38  ;;  %v6900_v32 = vmul.f32 %v13277_v0, %v15357_v19  ;;  %v13279_v39 = vpop.eup %13278  ;;  %v12240_v1 = vpack.c.bf16 %v12543_v44, %v12542_v34  ;;  %v12928_v34 = vld [vmem:[%s15494_s17 + $0x24] ss:$8 sps:$4 sm:$0xff]  }
 0xb1d   : > { %12227 = vmatprep.subr.bf16.mxu1 %v13792_v17  ;;  %v6904_v50 = vmul.f32 %v13279_v39, %v15364_v62  ;;  %v12532_v62 = vunpack.i.l.bf16 %v15408_v59 }
 0xb1f   : > { %12078 = vmatmul.mubr.msk.f32.vlgmr.msra.gmra.mrb[70].mxu1 %vm6828_vm6, %v6892_v52 }
 0xb20   : > { %12229 = vmatpush3.bf16.msra.mxu1 %v12228_v10  ;;  %12091 = vmatprep.mubr.msk.f32.mxu1 %vm13788_vm0, %v13787_v38 }
 0xb21   : > { %12233 = vmatprep.subr.bf16.mxu1 %v13792_v17 }
 0xb23   : > { %12092 = vmatmul.mubr.msk.f32.vlgmr.msra.gmra.mrb[72].mxu1 %vm6828_vm6, %v6896_v58  ;;  %v12925_v58 = vld [vmem:[%s15494_s17 + $0x14] ss:$8 sps:$4 sm:$0xff]  }
 0xb24   : > { %12235 = vmatpush3.bf16.msra.mxu1 %v12234_v6  ;;  %12105 = vmatprep.mubr.msk.f32.mxu1 %vm13788_vm0, %v13787_v38 }
 0xb25   : > { %12239 = vmatprep.subr.bf16.mxu1 %v13792_v17 }
 0xb27   : > { %12106 = vmatmul.mubr.msk.f32.vlgmr.msra.gmra.mrb[74].mxu1 %vm6828_vm6, %v6900_v32  ;;  %v12926_v32 = vld [vmem:[%s15494_s17 + $0x20] ss:$8 sps:$4 sm:$0xff]  }
 0xb28   : > { %12241 = vmatpush3.bf16.msra.mxu1 %v12240_v1  ;;  %12119 = vmatprep.mubr.msk.f32.mxu1 %vm13788_vm0, %v13787_v38  ;;  %v12929_v1 = vld [vmem:[%s15494_s17 + $0x30] ss:$8 sps:$4 sm:$0xff]  }
 0xb29   : > { %12245 = vmatprep.subr.bf16.mxu1 %v13792_v17 }
 0xb2a   : > { %v6849_v5 = vpop.xlane.xlu1 %6848 }
 0xb2b   : > { %13280 = vrcp.f32 %v6849_v5  ;;  %12120 = vmatmul.mubr.msk.f32.vlgmr.msra.gmra.mrb[76].mxu1 %vm6828_vm6, %v6904_v50  ;;  %v12931_v50 = vld [vmem:[%s15494_s17 + $0x34] ss:$8 sps:$4 sm:$0xff]  }
 0xb2c   : > { %12133 = vmatprep.mubr.msk.f32.mxu1 %vm13788_vm0, %v13787_v38 }
 0xb2e   : > { %v6855_v19 = vpop.xlane.xlu1 %6854 }
 0xb2f   : > { %13282 = vrcp.f32 %v6855_v19 }
 0xb32   : > { %v6861_v56 = vpop.xlane.xlu1 %6860 }
 0xb33   : > { %13284 = vrcp.f32 %v6861_v56  ;;  %v12934_v56 = vld [vmem:[%s15494_s17 + $0x44] ss:$8 sps:$4 sm:$0xff]  }
 0xb35   : > { %v13281_v9 = vpop.eup %13280 }
 0xb36   : > { %v6890_v8 = vmul.f32 %v13281_v9, %v15378_v51  ;;  %v6873_v16 = vpop.xlane.xlu1 %6872  ;;  %v12231_v51 = vpack.c.bf16 %v12533_v7, %v12532_v62  ;;  %v12932_v9 = vld [vmem:[%s15494_s17 + $0x40] ss:$8 sps:$4 sm:$0xff]  }
 0xb38   : > { %12071 = vmatmul.mubr.msk.f32.vlgmr.msra.gmra.mrb[74].mxu0 %vm6828_vm6, %v6890_v8 }
 0xb39   : > { %v13283_v20 = vpop.eup %13282  ;;  %12226 = vmatpush3.bf16.msra.mxu0 %v12225_v53  ;;  %12084 = vmatprep.mubr.msk.f32.mxu0 %vm13788_vm0, %v13787_v38  ;;  %v12935_v53 = vld [vmem:[%s15494_s17 + $0x50] ss:$8 sps:$4 sm:$0xff]  }
 0xb3a   : > { %v6894_v35 = vmul.f32 %v13283_v20, %v15382_v27  ;;  %v12551_v15 = vpop.permute.xlu1 %12550  ;;  %12230 = vmatprep.subr.bf16.mxu0 %v13792_v17 }
 0xb3b   : > { %v12553_v47 = vunpack.i.h.bf16 %v12551_v15  ;;  %v12552_v25 = vunpack.i.l.bf16 %v12551_v15 }
 0xb3c   : > { %12085 = vmatmul.mubr.msk.f32.vlgmr.msra.gmra.mrb[76].mxu0 %vm6828_vm6, %v6894_v35  ;;  %v12940_v35 = vld [vmem:[%s15494_s17 + $0x64] ss:$8 sps:$4 sm:$0xff]  }
 0xb3d   : > { %v13285_v59 = vpop.eup %13284  ;;  %v12246_v60 = vpack.c.bf16 %v12553_v47, %v12552_v25  ;;  %12232 = vmatpush3.bf16.msra.mxu0 %v12231_v51  ;;  %12098 = vmatprep.mubr.msk.f32.mxu0 %vm13788_vm0, %v13787_v38  ;;  %v12938_v47 = vld [vmem:[%s15494_s17 + $0x60] ss:$8 sps:$4 sm:$0xff]   ;;  %v12943_v25 = vld [vmem:[%s15494_s17 + $0x74] ss:$8 sps:$4 sm:$0xff]  }
 0xb3e   : > { %v6898_v46 = vmul.f32 %v13285_v59, %v15386_v14  ;;  %12236 = vmatprep.subr.bf16.mxu0 %v13792_v17  ;;  %v12941_v59 = vld [vmem:[%s15494_s17 + $0x70] ss:$8 sps:$4 sm:$0xff]  }
 0xb3f   : > { %12247 = vmatpush3.bf16.msra.mxu1 %v12246_v60  ;;  %v12946_v60 = vld [vmem:[%s15494_s17 + $0x84] ss:$8 sps:$4 sm:$0xff]  }
 0xb40   : > { %12099 = vmatmul.mubr.msk.f32.vlgmr.msra.gmra.mrb[78].mxu0 %vm6828_vm6, %v6898_v46 }
 0xb41   : > { %12238 = vmatpush3.bf16.msra.mxu0 %v12237_v12  ;;  %12112 = vmatprep.mubr.msk.f32.mxu0 %vm13788_vm0, %v13787_v38 }
 0xb42   : > { %v6876_v48 = vpop.xlane.xlu0 %6875  ;;  %12242 = vmatprep.subr.bf16.mxu0 %v13792_v17 }
 0xb43   : > { %13286 = vrcp.f32 %v6876_v48  ;;  %v12944_v48 = vld [vmem:[%s15494_s17 + $0x80] ss:$8 sps:$4 sm:$0xff]  }
 0xb46   : > { %v6867_v27 = vpop.xlane.xlu0 %6866 }
 0xb47   : > { %13288 = vrcp.f32 %v6867_v27 }
 0xb48   : > { %13290 = vrcp.f32 %v6873_v16  ;;  %v12937_v16 = vld [vmem:[%s15494_s17 + $0x54] ss:$8 sps:$4 sm:$0xff]  }
 0xb4a   : > { %v12546_v14 = vpop.permute.xlu0 %12545 }
 0xb4b   : > { %v12548_v21 = vunpack.i.h.bf16 %v12546_v14  ;;  %v12547_v26 = vunpack.i.l.bf16 %v12546_v14  ;;  %v12949_v14 = vld [vmem:[%s15494_s17 + $0x94] ss:$8 sps:$4 sm:$0xff]  }
 0xb4c   : > { %v15482_v37 = vpop.f32.mrb[68].mxu0 }
 0xb4d   : > { %v13287_v31 = vpop.eup %13286  ;;  %v12030_v30 = vpop.f32.mrb[69].mxu0  ;;  %v12243_v22 = vpack.c.bf16 %v12548_v21, %v12547_v26  ;;  %v12952_v21 = vld [vmem:[%s15494_s17 + $0xa4] ss:$8 sps:$4 sm:$0xff]   ;;  %v12950_v26 = vld [vmem:[%s15494_s17 + $0xa0] ss:$8 sps:$4 sm:$0xff]  }
 0xb4e   : > { %v6908_v42 = vmul.f32 %v13287_v31, %v15394_v36  ;;  %v12920_v36 = vld [vmem:[%s15494_s17] ss:$8 sps:$4 sm:$0xff]  }
 0xb50   : > { %12134 = vmatmul.mubr.msk.f32.vlgmr.msra.gmra.mrb[78].mxu1 %vm6828_vm6, %v6908_v42  ;;  %v12947_v42 = vld [vmem:[%s15494_s17 + $0x90] ss:$8 sps:$4 sm:$0xff]  }
 0xb51   : > { %v13289_v12 = vpop.eup %13288 }
 0xb52   : > { %v6902_v49 = vmul.f32 %v13289_v12, %v15398_v33  ;;  %v13291_v17 = vpop.eup %13290  ;;  %v12922_v33 = vld [vmem:[%s15494_s17 + $0x4] ss:$8 sps:$4 sm:$0xff]   ;;  %v12955_v12 = vld [vmem:[%s15494_s17 + $0xb4] ss:$8 sps:$4 sm:$0xff]  }
 0xb53   : > { %v6906_v23 = vmul.f32 %v13291_v17, %v15390_v45 }
 0xb54   : > { %12113 = vmatmul.mubr.msk.f32.vlgmr.msra.gmra.mrb[80].mxu0 %vm6828_vm6, %v6902_v49 }
 0xb55   : > { %12244 = vmatpush3.bf16.msra.mxu0 %v12243_v22  ;;  %12126 = vmatprep.mubr.msk.f32.mxu0 %vm13788_vm0, %v13787_v38 }
 0xb56   : > { %8343 = vmatprep.subr.bf16.mxu0 %v12922_v33  ;;  %v12956_v33 = vld [vmem:[%s15494_s17 + $0xc0] ss:$8 sps:$4 sm:$0xff]  }
 0xb58   : > { %12127 = vmatmul.mubr.msk.f32.vlgmr.msra.gmra.mrb[82].mxu0 %vm6828_vm6, %v6906_v23  ;;  %v12953_v23 = vld [vmem:[%s15494_s17 + $0xb0] ss:$8 sps:$4 sm:$0xff]  }
 0xb59   : > { %8344 = vmatpush1.bf16.msra.mxu0 %v12920_v36  ;;  %v12958_v36 = vld [vmem:[%s15494_s17 + $0xc4] ss:$8 sps:$4 sm:$0xff]  }
 0xb5a   : > { %8345 = vmatprep.subr.bf16.mxu0 %v12925_v58 }
 0xb5d   : > { %8346 = vmatpush1.bf16.msra.mxu0 %v12923_v18  ;;  %v12967_v18 = vld [vmem:[%s15494_s17 + $0xf4] ss:$8 sps:$4 sm:$0xff]  }
 0xb5e   : > { %8347 = vmatprep.subr.bf16.mxu0 %v12928_v34 }
 0xb61   : > { %8348 = vmatpush1.bf16.msra.mxu0 %v12926_v32 }
 0xb62   : > { %8349 = vmatprep.subr.bf16.mxu0 %v12931_v50 }
 0xb65   : > { %8350 = vmatpush1.bf16.msra.mxu0 %v12929_v1 }
 0xb66   : > { %8351 = vmatprep.subr.bf16.mxu0 %v12934_v56 }
 0xb69   : > { %8352 = vmatpush1.bf16.msra.mxu0 %v12932_v9 }
 0xb6a   : > { %8353 = vmatprep.subr.bf16.mxu0 %v12937_v16 }
 0xb6d   : > { %8354 = vmatpush1.bf16.msra.mxu0 %v12935_v53 }
 0xb6e   : > { %8355 = vmatprep.subr.bf16.mxu0 %v12940_v35 }
 0xb71   : > { %8356 = vmatpush1.bf16.msra.mxu0 %v12938_v47 }
 0xb72   : > { %8357 = vmatprep.subr.bf16.mxu0 %v12943_v25 }
 0xb75   : > { %8358 = vmatpush1.bf16.msra.mxu0 %v12941_v59 }
 0xb76   : > { %8359 = vmatprep.subr.bf16.mxu0 %v12946_v60 }
 0xb79   : > { %8360 = vmatpush1.bf16.msra.mxu0 %v12944_v48 }
 0xb7a   : > { %8361 = vmatprep.subr.bf16.mxu0 %v12949_v14 }
 0xb7d   : > { %8362 = vmatpush1.bf16.msra.mxu0 %v12947_v42 }
 0xb7e   : > { %8363 = vmatprep.subr.bf16.mxu0 %v12952_v21 }
 0xb81   : > { %8364 = vmatpush1.bf16.msra.mxu0 %v12950_v26 }
 0xb82   : > { %8365 = vmatprep.subr.bf16.mxu0 %v12955_v12 }
 0xb85   : > { %8366 = vmatpush1.bf16.msra.mxu0 %v12953_v23 }
 0xb86   : > { %8367 = vmatprep.subr.bf16.mxu0 %v12958_v36 }
 0xb89   : > { %8368 = vmatpush1.bf16.msra.mxu0 %v12956_v33 }
 0xbbe   : > { %v7051_v61 = vpop.f32.mrb[64].mxu1 }
 0xbbf   : > { %v12037_v28 = vpop.f32.mrb[65].mxu1 }
 0xbc0   : > { %v12959_v28 = vld [vmem:[%s15494_s17 + $0xd0] ss:$8 sps:$4 sm:$0xff]  }
 0xbd5   : > { %v15498_v38 = vpop.f32.mrb[70].mxu0 }
 0xbd6   : > { %v12044_v45 = vpop.f32.mrb[71].mxu0 }
 0xbd9   : > { %v15500_v52 = vpop.f32.mrb[72].mxu0 }
 0xbda   : > { %v12058_v63 = vpop.f32.mrb[73].mxu0 }
 0xbdb   : > { %v12962_v63 = vld [vmem:[%s15494_s17 + $0xe0] ss:$8 sps:$4 sm:$0xff]  }
 0xbde   : > { %v15502_v10 = vpop.f32.mrb[66].mxu1 }
 0xbdf   : > { %v12051_v13 = vpop.f32.mrb[67].mxu1 }
 0xbee   : > { %v7343_v24 = vpop.f32.mrb[68].mxu1 }
 0xbef   : > { %v12065_v0 = vpop.f32.mrb[69].mxu1 }
 0xbf2   : > { %v15506_v44 = vpop.f32.mrb[70].mxu1 }
 0xbf3   : > { %v12079_v6 = vpop.f32.mrb[71].mxu1 }
 0xbf6   : > { %v7635_v39 = vpop.f32.mrb[72].mxu1 }
 0xbf7   : > { %v12554_v5 = vpack.i.bf16 %v7635_v39, %v7051_v61  ;;  %v12093_v19 = vpop.f32.mrb[73].mxu1  ;;  %v12961_v61 = vld [vmem:[%s15494_s17 + $0xd4] ss:$8 sps:$4 sm:$0xff]  }
 0xbf8   : > { %8369 = vmatprep.subr.bf16.mxu0 %v12961_v61 }
 0xbf9   : > { %12555 = vrot.lane.b32.xlu1 %v12554_v5, %s13791_s2  ;;  %8370 = vmatpush1.bf16.msra.mxu0 %v12959_v28 }
 0xbfa   : > { %v7781_v8 = vpop.f32.mrb[74].mxu1 }
 0xbfb   : > { %v12579_v7 = vpack.i.bf16 %v7781_v8, %v15502_v10  ;;  %v12107_v62 = vpop.f32.mrb[75].mxu1 }
 0xbfe   : > { %v7927_v20 = vpop.f32.mrb[76].mxu1 }
 0xbff   : > { %v12559_v15 = vpack.i.bf16 %v7927_v20, %v7343_v24  ;;  %v12121_v51 = vpop.f32.mrb[77].mxu1  ;;  %v12965_v24 = vld [vmem:[%s15494_s17 + $0xf0] ss:$8 sps:$4 sm:$0xff]  }
 0xc01   : > { %12560 = vrot.lane.b32.xlu0 %v12559_v15, %s13791_s2 }
 0xc0b   : > { %v7416_v46 = vpop.f32.mrb[74].mxu0 }
 0xc0c   : > { %v12072_v27 = vpop.f32.mrb[75].mxu0 }
 0xc0f   : > { %v7562_v31 = vpop.f32.mrb[76].mxu0 }
 0xc10   : > { %v12086_v30 = vpop.f32.mrb[77].mxu0 }
 0xc13   : > { %v7708_v49 = vpop.f32.mrb[78].mxu0 }
 0xc14   : > { %v12564_v17 = vpack.i.bf16 %v7708_v49, %v15498_v38  ;;  %v12100_v22 = vpop.f32.mrb[79].mxu0  ;;  %v12964_v38 = vld [vmem:[%s15494_s17 + $0xe4] ss:$8 sps:$4 sm:$0xff]   ;;  %v8171_v49 = vld [vmem:[%s802_s25] sm:$0x3] }
 0xc15   : > { %8371 = vmatprep.subr.bf16.mxu0 %v12964_v38 }
 0xc16   : > { %12565 = vrot.lane.b32.xlu1 %v12564_v17, %s13789_s11  ;;  %8372 = vmatpush1.bf16.msra.mxu0 %v12962_v63  ;;  %v8180_v17 = vrot.slane %v8171_v49, %v14495_v55 }
 0xc17   : > { %8373 = vmatprep.subr.bf16.mxu0 %v12967_v18 }
 0xc1a   : > { %12580 = vrot.lane.b32.xlu1 %v12579_v7, %s13790_s0  ;;  %8374 = vmatpush1.bf16.msra.mxu0 %v12965_v24 }
 0xc23   : > { %v8073_v45 = vpop.f32.mrb[78].mxu1 }
 0xc24   : > { %v12574_v10 = vpack.i.bf16 %v8073_v45, %v15506_v44  ;;  %v12135_v13 = vpop.f32.mrb[79].mxu1 }
 0xc27   : > { %v7854_v58 = vpop.f32.mrb[80].mxu0 }
 0xc28   : > { %v12114_v0 = vpop.f32.mrb[81].mxu0 }
 0xc2b   : > { %v8000_v34 = vpop.f32.mrb[82].mxu0 }
 0xc2c   : > { %v12569_v6 = vpack.i.bf16 %v8000_v34, %v7416_v46  ;;  %v12128_v32 = vpop.f32.mrb[83].mxu0 }
 0xc2e   : > { %12570 = vrot.lane.b32.xlu0 %v12569_v6, %s13789_s11  ;;  %s10950_s11 = sshll.u32 %s14356_s19, 10  ;;  %s10952_s19 = sshll.u32 %s15048_s27, 3 }
 0xc2f   : > { %s15674_s2 = scalar_lea.vmem [#allocation16], %s10950_s11  ;;  %s945_s15 = scalar_lea.vmem %s16213_s23, %s10952_s19 }
 0xc30   : > { %s13793_s27 = smov [#allocation17]  }
 0xc32   : > { %12575 = vrot.lane.b32.xlu0 %v12574_v10, %s13790_s0  ;;  %s15582_s0 = scalar_lea.vmem [#allocation15], %s10950_s11 }
 0xc33   : > { %v8459_v34 = vld [vmem:[%s15582_s0 + $0x28] sm:$0xff]  ;;  %v8462_v6 = vld [vmem:[%s15582_s0 + $0x40] sm:$0xff] }
 0xc34   : > { %v8466_v32 = vld [vmem:[%s15582_s0 + $0x60] sm:$0xff] }
 0xc6b   : > { %v12556_v39 = vpop.permute.xlu1 %12555 }
 0xc6c   : > { %v12558_v50 = vunpack.i.h.bf16 %v12556_v39  ;;  %v12557_v44 = vunpack.i.l.bf16 %v12556_v39 }
 0xc6e   : > { %v8101_v9 = vsel %vm1811_vm1, %v15482_v37, %v12557_v44  ;;  %v8131_v8 = vsel %vm1811_vm1, %v7562_v31, %v12558_v50  ;;  %v11335_v50 = vcombine.high %v8462_v6, %v8466_v32  ;;  %v8463_v44 = vld [vmem:[%s15582_s0 + $0x48] sm:$0xff] }
 0xc73   : > { %v12561_v51 = vpop.permute.xlu0 %12560 }
 0xc74   : > { %v12563_v25 = vunpack.i.h.bf16 %v12561_v51  ;;  %v12562_v59 = vunpack.i.l.bf16 %v12561_v51  ;;  %v8479_v51 = vld [vmem:[%s15582_s0 + $0xc8] sm:$0xff] }
 0xc76   : > { %v8104_v48 = vsel %vm1811_vm1, %v15500_v52, %v12562_v59  ;;  %v8134_v27 = vsel %vm1811_vm1, %v7854_v58, %v12563_v25  ;;  %v8176_v52 = vrot.slane %v8171_v49, %v14485_v43  ;;  %v8495_v49 = vld [vmem:[%s15582_s0 + $0x148] sm:$0xff] }
 0xc88   : > { %v12566_v1 = vpop.permute.xlu1 %12565 }
 0xc89   : > { %v12568_v5 = vunpack.i.h.bf16 %v12566_v1  ;;  %v12567_v19 = vunpack.i.l.bf16 %v12566_v1 }
 0xc8b   : > { %v8132_v62 = vsel %vm4302_vm3, %v8131_v8, %v12568_v5  ;;  %v8102_v53 = vsel %vm4302_vm3, %v8101_v9, %v12567_v19  ;;  %v8467_v5 = vld [vmem:[%s15582_s0 + $0x68] sm:$0xff]  ;;  %v8470_v19 = vld [vmem:[%s15582_s0 + $0x80] sm:$0xff] }
 0xc8c   : > { %v12581_v56 = vpop.permute.xlu1 %12580  ;;  %v8474_v9 = vld [vmem:[%s15582_s0 + $0xa0] sm:$0xff]  ;;  %v8471_v8 = vld [vmem:[%s15582_s0 + $0x88] sm:$0xff] }
 0xc8d   : > { %v12583_v16 = vunpack.i.h.bf16 %v12581_v56  ;;  %v12582_v7 = vunpack.i.l.bf16 %v12581_v56  ;;  %v11337_v56 = vcombine.high %v8463_v44, %v8467_v5  ;;  %v11342_v25 = vcombine.low %v8470_v19, %v8474_v9 }
 0xc8f   : > { %v8103_v20 = vsel %vm4304_vm4, %v8102_v53, %v12582_v7  ;;  %v8133_v35 = vsel %vm4304_vm4, %v8132_v62, %v12583_v16  ;;  %v8475_v16 = vld [vmem:[%s15582_s0 + $0xa8] sm:$0xff]  ;;  %v11334_v7 = vcombine.low %v8462_v6, %v8466_v32  ;;  %v11336_v62 = vcombine.low %v8463_v44, %v8467_v5 }
 0xc90   : > { %v8137_v15 = vpack.c.bf16 %v8133_v35, %v8103_v20  ;;  %v11343_v53 = vcombine.high %v8470_v19, %v8474_v9  ;;  %v11345_v20 = vcombine.high %v8471_v8, %v8475_v16  ;;  %v8478_v35 = vld [vmem:[%s15582_s0 + $0xc0] sm:$0xff]  ;;  %v11344_v59 = vcombine.low %v8471_v8, %v8475_v16  ;;  %v8519_v44 = vld [vmem:[%s15582_s0 + $0x208] sm:$0xff] }
 0xc91   : > { %v8523_v5 = vld [vmem:[%s15582_s0 + $0x228] sm:$0xff]  ;;  %v8526_v16 = vld [vmem:[%s15582_s0 + $0x240] sm:$0xff] }
 0xc92   : > { %v11393_v8 = vcombine.high %v8519_v44, %v8523_v5 }
 0xca0   : > { %v12571_v47 = vpop.permute.xlu0 %12570 }
 0xca1   : > { %v12573_v60 = vunpack.i.h.bf16 %v12571_v47  ;;  %v12572_v37 = vunpack.i.l.bf16 %v12571_v47  ;;  %v8483_v47 = vld [vmem:[%s15582_s0 + $0xe8] sm:$0xff] }
 0xca3   : > { %v8135_v42 = vsel %vm4302_vm3, %v8134_v27, %v12573_v60  ;;  %v8105_v30 = vsel %vm4302_vm3, %v8104_v48, %v12572_v37  ;;  %v11353_v37 = vcombine.high %v8479_v51, %v8483_v47  ;;  %v8490_v48 = vld [vmem:[%s15582_s0 + $0x120] sm:$0xff]  ;;  %v8487_v27 = vld [vmem:[%s15582_s0 + $0x108] sm:$0xff] }
 0xca4   : > { %v12576_v46 = vpop.permute.xlu0 %12575 }
 0xca5   : > { %v12578_v14 = vunpack.i.h.bf16 %v12576_v46  ;;  %v12577_v31 = vunpack.i.l.bf16 %v12576_v46  ;;  %v8486_v46 = vld [vmem:[%s15582_s0 + $0x100] sm:$0xff] }
 0xca7   : > { %v8106_v21 = vsel %vm4304_vm4, %v8105_v30, %v12577_v31  ;;  %v8136_v26 = vsel %vm4304_vm4, %v8135_v42, %v12578_v14  ;;  %v8491_v14 = vld [vmem:[%s15582_s0 + $0x128] sm:$0xff]  ;;  %v11352_v42 = vcombine.low %v8479_v51, %v8483_v47  ;;  %v11359_v30 = vcombine.high %v8486_v46, %v8490_v48 }
 0xca8   : > { %v8138_v12 = vpack.c.bf16 %v8136_v26, %v8106_v21  ;;  %v11361_v21 = vcombine.high %v8487_v27, %v8491_v14  ;;  %v8494_v26 = vld [vmem:[%s15582_s0 + $0x140] sm:$0xff] }
 0xcaa   : > { %8375 = vmatprep.mubr.bf16.mxu0 %v8138_v12  ;;  %v8498_v12 = vld [vmem:[%s15582_s0 + $0x160] sm:$0xff] }
 0xcab   : > { %8376 = vmatmul.mubr.bf16.vlgmr.msra.gmra.mrb[84].mxu0 %v8137_v15  ;;  %v8482_v15 = vld [vmem:[%s15582_s0 + $0xe0] sm:$0xff] }
 0xcac   : > { %v11351_v60 = vcombine.high %v8478_v35, %v8482_v15  ;;  %v11350_v31 = vcombine.low %v8478_v35, %v8482_v15  ;;  %v11392_v35 = vcombine.low %v8519_v44, %v8523_v5  ;;  %v8563_v5 = vld [vmem:[%s15582_s0 + $0x368] sm:$0xff] }
 0xd7e   : > { %v8377_v22 = vpop.f32.mrb[84].mxu0 }
 0xd7f   : > { %v8378_v23 = vadd.f32 %v8377_v22, %v8176_v52  ;;  %v8379_v36 = vpop.f32.mrb[85].mxu0  ;;  %v11360_v22 = vcombine.low %v8487_v27, %v8491_v14 }
 0xd80   : > { %v8380_v33 = vadd.f32 %v8379_v36, %v8180_v17  ;;  %v8381_v61 = vpop.f32.mrb[86].mxu0 }
 0xd81   : > { %v15564_v28 = vadd.f32 %v8378_v23, %v15074_v3  ;;  %v8382_v38 = vadd.f32 %v8381_v61, %v8176_v52  ;;  %v8383_v45 = vpop.f32.mrb[87].mxu0  ;;  %v8499_v52 = vld [vmem:[%s15582_s0 + $0x168] sm:$0xff]  ;;  %v11367_v23 = vcombine.high %v8494_v26, %v8498_v12  ;;  %v8506_v61 = vld [vmem:[%s15582_s0 + $0x1a0] sm:$0xff] }
 0xd82   : > { %v15567_v63 = vadd.f32 %v8380_v33, %v15070_v54  ;;  %v8384_v10 = vadd.f32 %v8383_v45, %v8180_v17  ;;  %v8454_v54 = vld [vmem:[%s15582_s0] sm:$0xff]  ;;  %v11358_v17 = vcombine.low %v8486_v46, %v8490_v48  ;;  %v11369_v36 = vcombine.high %v8495_v49, %v8499_v52  ;;  %v8507_v45 = vld [vmem:[%s15582_s0 + $0x1a8] sm:$0xff] }
 0xd83   : > { %v15570_v13 = vadd.f32 %v8382_v38, %v15076_v11  ;;  %v8455_v11 = vld [vmem:[%s15582_s0 + $0x8] sm:$0xff]  ;;  %v8502_v33 = vld [vmem:[%s15582_s0 + $0x180] sm:$0xff] }
 0xd84   : > { %v15573_v24 = vadd.f32 %v8384_v10, %v15072_v29  ;;  %v8390_v18 = vadd.f32 %v15567_v63, %v15564_v28  ;;  %v8458_v29 = vld [vmem:[%s15582_s0 + $0x20] sm:$0xff]  ;;  %v11328_v39 = vcombine.low %v8455_v11, %v8459_v34  ;;  %v11329_v1 = vcombine.high %v8455_v11, %v8459_v34  ;;  %v8503_v38 = vld [vmem:[%s15582_s0 + $0x188] sm:$0xff] }
 0xd85   : > { %v11326_v58 = vcombine.low %v8454_v54, %v8458_v29  ;;  %v11327_v0 = vcombine.high %v8454_v54, %v8458_v29  ;;  %v11366_v10 = vcombine.low %v8494_v26, %v8498_v12  ;;  %v11377_v54 = vcombine.high %v8503_v38, %v8507_v45  ;;  %v8510_v29 = vld [vmem:[%s15582_s0 + $0x1c0] sm:$0xff] }
 0xd86   : > { %8391 = vadd.xlane.f32.xlu0 %v8390_v18  ;;  %v8393_v3 = vadd.f32 %v15573_v24, %v15570_v13  ;;  %9307 = vmatprep.subr.bf16.mxu0 %v11329_v1  ;;  %v11368_v18 = vcombine.low %v8495_v49, %v8499_v52  ;;  %v8514_v11 = vld [vmem:[%s15582_s0 + $0x1e0] sm:$0xff]  ;;  %v11374_v34 = vcombine.low %v8502_v33, %v8506_v61  ;;  %v8535_v49 = vld [vmem:[%s15582_s0 + $0x288] sm:$0xff] }
 0xd87   : > { %9264 = vmatprep.subr.bf16.mxu1 %v11327_v0  ;;  %9308 = vmatpush1.bf16.msra.mxu0 %v11328_v39  ;;  %v8515_v0 = vld [vmem:[%s15582_s0 + $0x1e8] sm:$0xff]  ;;  %v11376_v6 = vcombine.low %v8503_v38, %v8507_v45  ;;  %v11383_v32 = vcombine.high %v8510_v29, %v8514_v11  ;;  %v8518_v1 = vld [vmem:[%s15582_s0 + $0x200] sm:$0xff]  ;;  %v11382_v19 = vcombine.low %v8510_v29, %v8514_v11 }
 0xd88   : > { %8394 = vadd.xlane.f32.xlu1 %v8393_v3  ;;  %9265 = vmatpush1.bf16.msra.mxu1 %v11326_v58  ;;  %v11375_v3 = vcombine.high %v8502_v33, %v8506_v61  ;;  %v8511_v58 = vld [vmem:[%s15582_s0 + $0x1c8] sm:$0xff]  ;;  %v8534_v12 = vld [vmem:[%s15582_s0 + $0x280] sm:$0xff] }
 0xd89   : > { %9266 = vmatprep.subr.bf16.mxu1 %v11335_v50  ;;  %9309 = vmatprep.subr.bf16.mxu0 %v11337_v56  ;;  %v11385_v39 = vcombine.high %v8511_v58, %v8515_v0  ;;  %v8522_v50 = vld [vmem:[%s15582_s0 + $0x220] sm:$0xff]  ;;  %v11384_v56 = vcombine.low %v8511_v58, %v8515_v0  ;;  %v8543_v61 = vld [vmem:[%s15582_s0 + $0x2c8] sm:$0xff] }
 0xd8a   : > { %v11391_v9 = vcombine.high %v8518_v1, %v8522_v50  ;;  %v8546_v33 = vld [vmem:[%s15582_s0 + $0x2e0] sm:$0xff]  ;;  %v8547_v45 = vld [vmem:[%s15582_s0 + $0x2e8] sm:$0xff] }
 0xd8b   : > { %9310 = vmatpush1.bf16.msra.mxu0 %v11336_v62  ;;  %v8527_v62 = vld [vmem:[%s15582_s0 + $0x248] sm:$0xff]  ;;  %v8554_v29 = vld [vmem:[%s15582_s0 + $0x320] sm:$0xff] }
 0xd8c   : > { %9267 = vmatpush1.bf16.msra.mxu1 %v11334_v7  ;;  %9311 = vmatprep.subr.bf16.mxu0 %v11345_v20  ;;  %v8530_v7 = vld [vmem:[%s15582_s0 + $0x260] sm:$0xff]  ;;  %v11390_v20 = vcombine.low %v8518_v1, %v8522_v50  ;;  %v8551_v11 = vld [vmem:[%s15582_s0 + $0x308] sm:$0xff] }
 0xd8d   : > { %9268 = vmatprep.subr.bf16.mxu1 %v11343_v53  ;;  %v8531_v53 = vld [vmem:[%s15582_s0 + $0x268] sm:$0xff]  ;;  %v11399_v15 = vcombine.high %v8526_v16, %v8530_v7  ;;  %v11398_v47 = vcombine.low %v8526_v16, %v8530_v7  ;;  %v8562_v1 = vld [vmem:[%s15582_s0 + $0x360] sm:$0xff] }
 0xd8e   : > { %v11401_v51 = vcombine.high %v8527_v62, %v8531_v53  ;;  %v8555_v0 = vld [vmem:[%s15582_s0 + $0x328] sm:$0xff]  ;;  %v8570_v16 = vld [vmem:[%s15582_s0 + $0x3a0] sm:$0xff] }
 0xd8f   : > { %9312 = vmatpush1.bf16.msra.mxu0 %v11344_v59  ;;  %v8559_v50 = vld [vmem:[%s15582_s0 + $0x348] sm:$0xff] }
 0xd90   : > { %9269 = vmatpush1.bf16.msra.mxu1 %v11342_v25  ;;  %9313 = vmatprep.subr.bf16.mxu0 %v11353_v37  ;;  %v11400_v25 = vcombine.low %v8527_v62, %v8531_v53  ;;  %v8567_v7 = vld [vmem:[%s15582_s0 + $0x388] sm:$0xff] }
 0xd91   : > { %9270 = vmatprep.subr.bf16.mxu1 %v11351_v60  ;;  %v8571_v53 = vld [vmem:[%s15582_s0 + $0x3a8] sm:$0xff] }
 0xd93   : > { %9314 = vmatpush1.bf16.msra.mxu0 %v11352_v42 }
 0xd94   : > { %9271 = vmatpush1.bf16.msra.mxu1 %v11350_v31  ;;  %9315 = vmatprep.subr.bf16.mxu0 %v11361_v21 }
 0xd95   : > { %9272 = vmatprep.subr.bf16.mxu1 %v11359_v30 }
 0xd97   : > { %9316 = vmatpush1.bf16.msra.mxu0 %v11360_v22 }
 0xd98   : > { %9273 = vmatpush1.bf16.msra.mxu1 %v11358_v17  ;;  %9317 = vmatprep.subr.bf16.mxu0 %v11369_v36  ;;  %v8542_v36 = vld [vmem:[%s15582_s0 + $0x2c0] sm:$0xff] }
 0xd99   : > { %9274 = vmatprep.subr.bf16.mxu1 %v11367_v23  ;;  %v11415_v38 = vcombine.high %v8542_v36, %v8546_v33 }
 0xd9b   : > { %9318 = vmatpush1.bf16.msra.mxu0 %v11368_v18  ;;  %v11416_v18 = vcombine.low %v8543_v61, %v8547_v45 }
 0xd9c   : > { %9275 = vmatpush1.bf16.msra.mxu1 %v11366_v10  ;;  %9319 = vmatprep.subr.bf16.mxu0 %v11377_v54  ;;  %v11414_v10 = vcombine.low %v8542_v36, %v8546_v33  ;;  %v8550_v54 = vld [vmem:[%s15582_s0 + $0x300] sm:$0xff]  ;;  %v10954_v33 = vld [vmem:[%s15058_s26 + $0x2] sm:$0x3] }
 0xd9d   : > { %9276 = vmatprep.subr.bf16.mxu1 %v11375_v3  ;;  %v11417_v3 = vcombine.high %v8543_v61, %v8547_v45  ;;  %v11423_v58 = vcombine.high %v8550_v54, %v8554_v29 }
 0xd9f   : > { %9320 = vmatpush1.bf16.msra.mxu0 %v11376_v6  ;;  %v11424_v6 = vcombine.low %v8551_v11, %v8555_v0 }
 0xda0   : > { %9277 = vmatpush1.bf16.msra.mxu1 %v11374_v34  ;;  %9321 = vmatprep.subr.bf16.mxu0 %v11385_v39  ;;  %v11422_v34 = vcombine.low %v8550_v54, %v8554_v29  ;;  %v8558_v39 = vld [vmem:[%s15582_s0 + $0x340] sm:$0xff] }
 0xda1   : > { %9278 = vmatprep.subr.bf16.mxu1 %v11383_v32  ;;  %v11425_v32 = vcombine.high %v8551_v11, %v8555_v0  ;;  %v11431_v44 = vcombine.high %v8558_v39, %v8562_v1 }
 0xda3   : > { %9322 = vmatpush1.bf16.msra.mxu0 %v11384_v56  ;;  %v11432_v56 = vcombine.low %v8559_v50, %v8563_v5 }
 0xda4   : > { %9279 = vmatpush1.bf16.msra.mxu1 %v11382_v19  ;;  %9323 = vmatprep.subr.bf16.mxu0 %v11393_v8  ;;  %v11430_v19 = vcombine.low %v8558_v39, %v8562_v1  ;;  %v8566_v8 = vld [vmem:[%s15582_s0 + $0x380] sm:$0xff] }
 0xda5   : > { %9280 = vmatprep.subr.bf16.mxu1 %v11391_v9  ;;  %v11433_v9 = vcombine.high %v8559_v50, %v8563_v5  ;;  %v11439_v62 = vcombine.high %v8566_v8, %v8570_v16  ;;  %v8465_v5 = vld [vmem:[%s15582_s0 + $0x58] sm:$0xff] }
 0xda7   : > { %9324 = vmatpush1.bf16.msra.mxu0 %v11392_v35  ;;  %v11440_v35 = vcombine.low %v8567_v7, %v8571_v53 }
 0xda8   : > { %9281 = vmatpush1.bf16.msra.mxu1 %v11390_v20  ;;  %9325 = vmatprep.subr.bf16.mxu0 %v11401_v51  ;;  %v11438_v20 = vcombine.low %v8566_v8, %v8570_v16  ;;  %v8574_v51 = vld [vmem:[%s15582_s0 + $0x3c0] sm:$0xff] }
 0xda9   : > { %9282 = vmatprep.subr.bf16.mxu1 %v11399_v15  ;;  %v11441_v15 = vcombine.high %v8567_v7, %v8571_v53  ;;  %v8476_v7 = vld [vmem:[%s15582_s0 + $0xb0] sm:$0xff]  ;;  %v8477_v53 = vld [vmem:[%s15582_s0 + $0xb8] sm:$0xff] }
 0xdab   : > { %9326 = vmatpush1.bf16.msra.mxu0 %v11400_v25  ;;  %v8575_v25 = vld [vmem:[%s15582_s0 + $0x3c8] sm:$0xff] }
 0xdac   : > { %9283 = vmatpush1.bf16.msra.mxu1 %v11398_v47  ;;  %v8578_v47 = vld [vmem:[%s15582_s0 + $0x3e0] sm:$0xff] }
 0xe13   : > { %v8392_v59 = vpop.xlane.xlu0 %8391 }
 0xe14   : > { %v8396_v60 = vmul.f32 0.00390625, %v8392_v59  ;;  %v11447_v59 = vcombine.high %v8574_v51, %v8578_v47 }
 0xe15   : > { %v8395_v37 = vpop.xlane.xlu1 %8394 }
 0xe16   : > { %v15625_v46 = vsub.f32 %v15564_v28, %v8396_v60  ;;  %v15628_v48 = vsub.f32 %v15567_v63, %v8396_v60  ;;  %v8397_v27 = vmul.f32 0.00390625, %v8395_v37  ;;  %v8579_v60 = vld [vmem:[%s15582_s0 + $0x3e8] sm:$0xff]  ;;  %v11446_v37 = vcombine.low %v8574_v51, %v8578_v47  ;;  %v8480_v47 = vld [vmem:[%s15582_s0 + $0xd0] sm:$0xff] }
 0xe18   : > { %v8402_v14 = vmul.f32 %v15625_v46, %v15625_v46  ;;  %v8403_v31 = vmul.f32 %v15628_v48, %v15628_v48  ;;  %v15635_v42 = vsub.f32 %v15570_v13, %v8397_v27  ;;  %v15638_v30 = vsub.f32 %v15573_v24, %v8397_v27  ;;  %v8538_v13 = vld [vmem:[%s15582_s0 + $0x2a0] sm:$0xff]  ;;  %v8539_v24 = vld [vmem:[%s15582_s0 + $0x2a8] sm:$0xff] }
 0xe19   : > { %v11407_v52 = vcombine.high %v8534_v12, %v8538_v13  ;;  %v11406_v17 = vcombine.low %v8534_v12, %v8538_v13  ;;  %v11408_v22 = vcombine.low %v8535_v49, %v8539_v24  ;;  %v11409_v23 = vcombine.high %v8535_v49, %v8539_v24 }
 0xe1a   : > { %v8404_v28 = vmul.f32 %v15635_v42, %v15635_v42  ;;  %v8405_v63 = vmul.f32 %v15638_v30, %v15638_v30  ;;  %v8406_v21 = vadd.f32 %v8403_v31, %v8402_v14  ;;  %v11449_v27 = vcombine.high %v8575_v25, %v8579_v60  ;;  %v8456_v31 = vld [vmem:[%s15582_s0 + $0x10] sm:$0xff] }
 0xe1b   : > { %9284 = vmatprep.subr.bf16.mxu1 %v11407_v52  ;;  %9327 = vmatprep.subr.bf16.mxu0 %v11409_v23  ;;  %v11448_v14 = vcombine.low %v8575_v25, %v8579_v60  ;;  %v8484_v25 = vld [vmem:[%s15582_s0 + $0xf0] sm:$0xff]  ;;  %v8485_v60 = vld [vmem:[%s15582_s0 + $0xf8] sm:$0xff] }
 0xe1c   : > { %8407 = vadd.xlane.f32.xlu0 %v8406_v21  ;;  %v8409_v26 = vadd.f32 %v8405_v63, %v8404_v28  ;;  %9285 = vmatpush1.bf16.msra.mxu1 %v11406_v17  ;;  %v8460_v28 = vld [vmem:[%s15582_s0 + $0x30] sm:$0xff]  ;;  %v8457_v63 = vld [vmem:[%s15582_s0 + $0x18] sm:$0xff] }
 0xe1d   : > { %9328 = vmatpush1.bf16.msra.mxu0 %v11408_v22  ;;  %9286 = vmatprep.subr.bf16.mxu1 %v11415_v38  ;;  %v11331_v21 = vcombine.high %v8456_v31, %v8460_v28  ;;  %v11330_v12 = vcombine.low %v8456_v31, %v8460_v28  ;;  %v8488_v28 = vld [vmem:[%s15582_s0 + $0x110] sm:$0xff] }
 0xe1e   : > { %9329 = vmatprep.subr.bf16.mxu0 %v11417_v3  ;;  %v8426_v3 = vrot.slane %v10954_v33, %v14485_v43 }
 0xe20   : > { %8410 = vadd.xlane.f32.xlu0 %v8409_v26  ;;  %9287 = vmatpush1.bf16.msra.mxu1 %v11414_v10  ;;  %v8461_v26 = vld [vmem:[%s15582_s0 + $0x38] sm:$0xff]  ;;  %v10956_v10 = vld [vmem:[%s15054_s28 + $0x2] sm:$0x3] }
 0xe21   : > { %9330 = vmatpush1.bf16.msra.mxu0 %v11416_v18  ;;  %9288 = vmatprep.subr.bf16.mxu1 %v11423_v58  ;;  %v11332_v13 = vcombine.low %v8457_v63, %v8461_v26  ;;  %v11333_v49 = vcombine.high %v8457_v63, %v8461_v26  ;;  %v8430_v18 = vrot.slane %v10954_v33, %v14495_v55  ;;  %v8492_v63 = vld [vmem:[%s15582_s0 + $0x130] sm:$0xff]  ;;  %v8493_v26 = vld [vmem:[%s15582_s0 + $0x138] sm:$0xff] }
 0xe22   : > { %9331 = vmatprep.subr.bf16.mxu0 %v11425_v32  ;;  %v8445_v29 = vrot.slane %v10956_v10, %v14495_v55  ;;  %v8441_v11 = vrot.slane %v10956_v10, %v14485_v43  ;;  %v8508_v10 = vld [vmem:[%s15582_s0 + $0x1b0] sm:$0xff] }
 0xe24   : > { %9289 = vmatpush1.bf16.msra.mxu1 %v11422_v34 }
 0xe25   : > { %9332 = vmatpush1.bf16.msra.mxu0 %v11424_v6  ;;  %9290 = vmatprep.subr.bf16.mxu1 %v11431_v44  ;;  %v8464_v44 = vld [vmem:[%s15582_s0 + $0x50] sm:$0xff] }
 0xe26   : > { %9333 = vmatprep.subr.bf16.mxu0 %v11433_v9  ;;  %v8472_v9 = vld [vmem:[%s15582_s0 + $0x90] sm:$0xff] }
 0xe28   : > { %9291 = vmatpush1.bf16.msra.mxu1 %v11430_v19  ;;  %v8469_v19 = vld [vmem:[%s15582_s0 + $0x78] sm:$0xff] }
 0xe29   : > { %9334 = vmatpush1.bf16.msra.mxu0 %v11432_v56  ;;  %9292 = vmatprep.subr.bf16.mxu1 %v11439_v62  ;;  %v11341_v16 = vcombine.high %v8465_v5, %v8469_v19  ;;  %v8473_v62 = vld [vmem:[%s15582_s0 + $0x98] sm:$0xff] }
 0xe2a   : > { %9335 = vmatprep.subr.bf16.mxu0 %v11441_v15  ;;  %v11347_v15 = vcombine.high %v8472_v9, %v8476_v7  ;;  %v11349_v51 = vcombine.high %v8473_v62, %v8477_v53 }
 0xe2c   : > { %9293 = vmatpush1.bf16.msra.mxu1 %v11438_v20 }
 0xe2d   : > { %9336 = vmatpush1.bf16.msra.mxu0 %v11440_v35  ;;  %9294 = vmatprep.subr.bf16.mxu1 %v11447_v59  ;;  %v11340_v35 = vcombine.low %v8465_v5, %v8469_v19  ;;  %v8481_v59 = vld [vmem:[%s15582_s0 + $0xd8] sm:$0xff]  ;;  %v8520_v19 = vld [vmem:[%s15582_s0 + $0x210] sm:$0xff] }
 0xe2e   : > { %9337 = vmatprep.subr.bf16.mxu0 %v11449_v27  ;;  %v11348_v27 = vcombine.low %v8473_v62, %v8477_v53  ;;  %v11357_v31 = vcombine.high %v8481_v59, %v8485_v60 }
 0xe30   : > { %9295 = vmatpush1.bf16.msra.mxu1 %v11446_v37  ;;  %v11346_v37 = vcombine.low %v8472_v9, %v8476_v7  ;;  %v8521_v9 = vld [vmem:[%s15582_s0 + $0x218] sm:$0xff] }
 0xe31   : > { %9338 = vmatpush1.bf16.msra.mxu0 %v11448_v14  ;;  %9350 = vmatprep.subr.bf16.mxu1 %v11331_v21  ;;  %v11355_v14 = vcombine.high %v8480_v47, %v8484_v25  ;;  %v8489_v21 = vld [vmem:[%s15582_s0 + $0x118] sm:$0xff] }
 0xe32   : > { %9393 = vmatprep.subr.bf16.mxu0 %v11333_v49  ;;  %v11363_v49 = vcombine.high %v8488_v28, %v8492_v63  ;;  %v11364_v33 = vcombine.low %v8489_v21, %v8493_v26 }
 0xea9   : > { %v8408_v52 = vpop.xlane.xlu0 %8407 }
 0xeaa   : > { %v8412_v24 = vmul.f32 0.00390625, %v8408_v52  ;;  %v11365_v52 = vcombine.high %v8489_v21, %v8493_v26 }
 0xeac   : > { %v8414_v17 = vadd.f32 1e-05, %v8412_v24  ;;  %v8496_v24 = vld [vmem:[%s15582_s0 + $0x150] sm:$0xff] }
 0xead   : > { %v8411_v22 = vpop.xlane.xlu0 %8410 }
 0xeae   : > { %13292 = vrsqrt.f32 %v8414_v17  ;;  %v8413_v23 = vmul.f32 0.00390625, %v8411_v22  ;;  %v8500_v17 = vld [vmem:[%s15582_s0 + $0x170] sm:$0xff]  ;;  %v8497_v22 = vld [vmem:[%s15582_s0 + $0x158] sm:$0xff] }
 0xeb0   : > { %v8415_v36 = vadd.f32 1e-05, %v8413_v23  ;;  %v8501_v23 = vld [vmem:[%s15582_s0 + $0x178] sm:$0xff] }
 0xeb2   : > { %13294 = vrsqrt.f32 %v8415_v36  ;;  %v11362_v36 = vcombine.low %v8488_v28, %v8492_v63 }
 0xeb8   : > { %v13293_v61 = vpop.eup %13292 }
 0xeb9   : > { %v8418_v38 = vmul.f32 %v13293_v61, %v15625_v46  ;;  %v8419_v45 = vmul.f32 %v13293_v61, %v15628_v48  ;;  %v11371_v61 = vcombine.high %v8496_v24, %v8500_v17 }
 0xebb   : > { %v8434_v48 = vmul.f32 %v8430_v18, %v8419_v45  ;;  %v8433_v0 = vmul.f32 %v8426_v3, %v8418_v38  ;;  %v11373_v38 = vcombine.high %v8497_v22, %v8501_v23  ;;  %v8504_v45 = vld [vmem:[%s15582_s0 + $0x190] sm:$0xff] }
 0xebc   : > { %v13295_v54 = vpop.eup %13294 }
 0xebd   : > { %v8420_v58 = vmul.f32 %v13295_v54, %v15635_v42  ;;  %v8421_v46 = vmul.f32 %v13295_v54, %v15638_v30  ;;  %v15686_v32 = vadd.f32 %v8445_v29, %v8434_v48  ;;  %v15690_v1 = vadd.f32 %v8441_v11, %v8433_v0  ;;  %v8468_v42 = vld [vmem:[%s15582_s0 + $0x70] sm:$0xff]  ;;  %v8513_v0 = vld [vmem:[%s15582_s0 + $0x1d8] sm:$0xff] }
 0xebe   : > { %v11339_v8 = vcombine.high %v8464_v44, %v8468_v42  ;;  %v11338_v20 = vcombine.low %v8464_v44, %v8468_v42  ;;  %v11370_v54 = vcombine.low %v8496_v24, %v8500_v17  ;;  %v8516_v48 = vld [vmem:[%s15582_s0 + $0x1f0] sm:$0xff] }
 0xebf   : > { %v8436_v34 = vmul.f32 %v8430_v18, %v8421_v46  ;;  %v8435_v6 = vmul.f32 %v8426_v3, %v8420_v58  ;;  %v8505_v18 = vld [vmem:[%s15582_s0 + $0x198] sm:$0xff]  ;;  %v8512_v46 = vld [vmem:[%s15582_s0 + $0x1d0] sm:$0xff] }
 0xec0   : > { %v8509_v3 = vld [vmem:[%s15582_s0 + $0x1b8] sm:$0xff]  ;;  %v11387_v42 = vcombine.high %v8512_v46, %v8516_v48 }
 0xec1   : > { %v15688_v39 = vadd.f32 %v8445_v29, %v8436_v34  ;;  %v15692_v50 = vadd.f32 %v8441_v11, %v8435_v6  ;;  %v11372_v29 = vcombine.low %v8497_v22, %v8501_v23  ;;  %v11379_v11 = vcombine.high %v8504_v45, %v8508_v10  ;;  %v8517_v34 = vld [vmem:[%s15582_s0 + $0x1f8] sm:$0xff] }
 0xec2   : > { %v11381_v58 = vcombine.high %v8505_v18, %v8509_v3  ;;  %v11378_v6 = vcombine.low %v8504_v45, %v8508_v10  ;;  %v11380_v44 = vcombine.low %v8505_v18, %v8509_v3  ;;  %v11389_v5 = vcombine.high %v8513_v0, %v8517_v34 }
 0xec3   : > { %v8453_v30 = vpack.c.bf16 %v15688_v39, %v15686_v32  ;;  %v15702_v56 = vpack.c.bf16 %v15692_v50, %v15690_v1  ;;  %v11388_v7 = vcombine.low %v8513_v0, %v8517_v34 }
 0xec5   : > { %9296 = vmatprep.mubr.bf16.mxu1 %v8453_v30  ;;  %9339 = vmatprep.mubr.bf16.mxu0 %v8453_v30 }
 0xec6   : > { %9297 = vmatmul.mubr.bf16.vlgmr.msra.gmra.mrb[80].mxu1 %v15702_v56  ;;  %9340 = vmatmul.mubr.bf16.vlgmr.msra.gmra.mrb[88].mxu0 %v15702_v56 }
 0xec7   : > { %9351 = vmatpush1.bf16.msra.mxu1 %v11330_v12  ;;  %9394 = vmatpush1.bf16.msra.mxu0 %v11332_v13  ;;  %v11354_v12 = vcombine.low %v8480_v47, %v8484_v25  ;;  %v11356_v13 = vcombine.low %v8481_v59, %v8485_v60 }
 0xec8   : > { %9382 = vmatprep.mubr.bf16.mxu1 %v8453_v30  ;;  %9425 = vmatprep.mubr.bf16.mxu0 %v8453_v30  ;;  %v8524_v30 = vld [vmem:[%s15582_s0 + $0x230] sm:$0xff] }
 0xec9   : > { %9352 = vmatprep.subr.bf16.mxu1 %v11339_v8  ;;  %9395 = vmatprep.subr.bf16.mxu0 %v11341_v16  ;;  %v8525_v8 = vld [vmem:[%s15582_s0 + $0x238] sm:$0xff]  ;;  %v11386_v16 = vcombine.low %v8512_v46, %v8516_v48  ;;  %v11395_v62 = vcombine.high %v8520_v19, %v8524_v30  ;;  %v11394_v47 = vcombine.low %v8520_v19, %v8524_v30 }
 0xeca   : > { %v11397_v53 = vcombine.high %v8521_v9, %v8525_v8  ;;  %v11396_v25 = vcombine.low %v8521_v9, %v8525_v8 }
 0xecb   : > { %9353 = vmatpush1.bf16.msra.mxu1 %v11338_v20  ;;  %9396 = vmatpush1.bf16.msra.mxu0 %v11340_v35  ;;  %v8528_v20 = vld [vmem:[%s15582_s0 + $0x250] sm:$0xff] }
 0xecc   : > { %9354 = vmatprep.subr.bf16.mxu1 %v11347_v15  ;;  %9397 = vmatprep.subr.bf16.mxu0 %v11349_v51  ;;  %v8532_v35 = vld [vmem:[%s15582_s0 + $0x270] sm:$0xff]  ;;  %v8529_v15 = vld [vmem:[%s15582_s0 + $0x258] sm:$0xff] }
 0xecd   : > { %v8533_v51 = vld [vmem:[%s15582_s0 + $0x278] sm:$0xff]  ;;  %v11403_v59 = vcombine.high %v8528_v20, %v8532_v35  ;;  %v11402_v28 = vcombine.low %v8528_v20, %v8532_v35 }
 0xece   : > { %v11405_v60 = vcombine.high %v8529_v15, %v8533_v51  ;;  %v11404_v63 = vcombine.low %v8529_v15, %v8533_v51 }
 0xecf   : > { %9355 = vmatpush1.bf16.msra.mxu1 %v11346_v37  ;;  %9398 = vmatpush1.bf16.msra.mxu0 %v11348_v27  ;;  %v8536_v37 = vld [vmem:[%s15582_s0 + $0x290] sm:$0xff] }
 0xed0   : > { %9356 = vmatprep.subr.bf16.mxu1 %v11355_v14  ;;  %9399 = vmatprep.subr.bf16.mxu0 %v11357_v31  ;;  %v8540_v27 = vld [vmem:[%s15582_s0 + $0x2b0] sm:$0xff]  ;;  %v8537_v14 = vld [vmem:[%s15582_s0 + $0x298] sm:$0xff] }
 0xed1   : > { %v8541_v31 = vld [vmem:[%s15582_s0 + $0x2b8] sm:$0xff]  ;;  %v11411_v21 = vcombine.high %v8536_v37, %v8540_v27  ;;  %v11410_v24 = vcombine.low %v8536_v37, %v8540_v27 }
 0xed2   : > { %v11413_v26 = vcombine.high %v8537_v14, %v8541_v31  ;;  %v11412_v17 = vcombine.low %v8537_v14, %v8541_v31  ;;  %v12973_v37 = vld [vmem:[%s15674_s2 + $0x14] ss:$8 sps:$4 sm:$0xff]   ;;  %v12971_v27 = vld [vmem:[%s15674_s2 + $0x10] ss:$8 sps:$4 sm:$0xff]   ;;  %v12976_v14 = vld [vmem:[%s15674_s2 + $0x24] ss:$8 sps:$4 sm:$0xff]  }
 0xed3   : > { %9357 = vmatpush1.bf16.msra.mxu1 %v11354_v12  ;;  %9400 = vmatpush1.bf16.msra.mxu0 %v11356_v13  ;;  %v8544_v12 = vld [vmem:[%s15582_s0 + $0x2d0] sm:$0xff]  ;;  %v12974_v31 = vld [vmem:[%s15674_s2 + $0x20] ss:$8 sps:$4 sm:$0xff]  }
 0xed4   : > { %9358 = vmatprep.subr.bf16.mxu1 %v11363_v49  ;;  %9401 = vmatprep.subr.bf16.mxu0 %v11365_v52  ;;  %v8548_v13 = vld [vmem:[%s15582_s0 + $0x2f0] sm:$0xff]  ;;  %v8545_v49 = vld [vmem:[%s15582_s0 + $0x2d8] sm:$0xff] }
 0xed5   : > { %v8549_v52 = vld [vmem:[%s15582_s0 + $0x2f8] sm:$0xff]  ;;  %v11419_v22 = vcombine.high %v8544_v12, %v8548_v13  ;;  %v11418_v45 = vcombine.low %v8544_v12, %v8548_v13  ;;  %v12988_v13 = vld [vmem:[%s15674_s2 + $0x64] ss:$8 sps:$4 sm:$0xff]  }
 0xed6   : > { %v11421_v23 = vcombine.high %v8545_v49, %v8549_v52  ;;  %v11420_v10 = vcombine.low %v8545_v49, %v8549_v52  ;;  %v12983_v12 = vld [vmem:[%s15674_s2 + $0x50] ss:$8 sps:$4 sm:$0xff]   ;;  %v12986_v49 = vld [vmem:[%s15674_s2 + $0x60] ss:$8 sps:$4 sm:$0xff]   ;;  %v12991_v52 = vld [vmem:[%s15674_s2 + $0x74] ss:$8 sps:$4 sm:$0xff]  }
 0xed7   : > { %9359 = vmatpush1.bf16.msra.mxu1 %v11362_v36  ;;  %9402 = vmatpush1.bf16.msra.mxu0 %v11364_v33  ;;  %v8552_v36 = vld [vmem:[%s15582_s0 + $0x310] sm:$0xff] }
 0xed8   : > { %9360 = vmatprep.subr.bf16.mxu1 %v11371_v61  ;;  %9403 = vmatprep.subr.bf16.mxu0 %v11373_v38  ;;  %v8556_v33 = vld [vmem:[%s15582_s0 + $0x330] sm:$0xff]  ;;  %v8553_v61 = vld [vmem:[%s15582_s0 + $0x318] sm:$0xff] }
 0xed9   : > { %v8557_v38 = vld [vmem:[%s15582_s0 + $0x338] sm:$0xff]  ;;  %v11427_v18 = vcombine.high %v8552_v36, %v8556_v33  ;;  %v11426_v46 = vcombine.low %v8552_v36, %v8556_v33  ;;  %v13000_v33 = vld [vmem:[%s15674_s2 + $0xa4] ss:$8 sps:$4 sm:$0xff]  }
 0xeda   : > { %v11429_v3 = vcombine.high %v8553_v61, %v8557_v38  ;;  %v11428_v48 = vcombine.low %v8553_v61, %v8557_v38  ;;  %v12995_v36 = vld [vmem:[%s15674_s2 + $0x90] ss:$8 sps:$4 sm:$0xff]   ;;  %v12998_v61 = vld [vmem:[%s15674_s2 + $0xa0] ss:$8 sps:$4 sm:$0xff]   ;;  %v13003_v38 = vld [vmem:[%s15674_s2 + $0xb4] ss:$8 sps:$4 sm:$0xff]  }
 0xedb   : > { %9361 = vmatpush1.bf16.msra.mxu1 %v11370_v54  ;;  %9404 = vmatpush1.bf16.msra.mxu0 %v11372_v29  ;;  %v8560_v54 = vld [vmem:[%s15582_s0 + $0x350] sm:$0xff] }
 0xedc   : > { %9362 = vmatprep.subr.bf16.mxu1 %v11379_v11  ;;  %9405 = vmatprep.subr.bf16.mxu0 %v11381_v58  ;;  %v8564_v29 = vld [vmem:[%s15582_s0 + $0x370] sm:$0xff]  ;;  %v8561_v11 = vld [vmem:[%s15582_s0 + $0x358] sm:$0xff] }
 0xedd   : > { %v8565_v58 = vld [vmem:[%s15582_s0 + $0x378] sm:$0xff]  ;;  %v11435_v0 = vcombine.high %v8560_v54, %v8564_v29  ;;  %v11434_v19 = vcombine.low %v8560_v54, %v8564_v29  ;;  %v13012_v29 = vld [vmem:[%s15674_s2 + $0xe4] ss:$8 sps:$4 sm:$0xff]  }
 0xede   : > { %v11437_v34 = vcombine.high %v8561_v11, %v8565_v58  ;;  %v11436_v30 = vcombine.low %v8561_v11, %v8565_v58  ;;  %v13007_v54 = vld [vmem:[%s15674_s2 + $0xd0] ss:$8 sps:$4 sm:$0xff]   ;;  %v13010_v11 = vld [vmem:[%s15674_s2 + $0xe0] ss:$8 sps:$4 sm:$0xff]   ;;  %v13015_v58 = vld [vmem:[%s15674_s2 + $0xf4] ss:$8 sps:$4 sm:$0xff]  }
 0xedf   : > { %9363 = vmatpush1.bf16.msra.mxu1 %v11378_v6  ;;  %9406 = vmatpush1.bf16.msra.mxu0 %v11380_v44  ;;  %v8568_v6 = vld [vmem:[%s15582_s0 + $0x390] sm:$0xff] }
 0xee0   : > { %9364 = vmatprep.subr.bf16.mxu1 %v11387_v42  ;;  %9407 = vmatprep.subr.bf16.mxu0 %v11389_v5  ;;  %v8572_v44 = vld [vmem:[%s15582_s0 + $0x3b0] sm:$0xff]  ;;  %v8569_v42 = vld [vmem:[%s15582_s0 + $0x398] sm:$0xff] }
 0xee1   : > { %v8573_v5 = vld [vmem:[%s15582_s0 + $0x3b8] sm:$0xff]  ;;  %v11443_v9 = vcombine.high %v8568_v6, %v8572_v44  ;;  %v11442_v20 = vcombine.low %v8568_v6, %v8572_v44 }
 0xee2   : > { %v11445_v8 = vcombine.high %v8569_v42, %v8573_v5  ;;  %v11444_v35 = vcombine.low %v8569_v42, %v8573_v5 }
 0xee3   : > { %9365 = vmatpush1.bf16.msra.mxu1 %v11386_v16  ;;  %9408 = vmatpush1.bf16.msra.mxu0 %v11388_v7  ;;  %v8576_v16 = vld [vmem:[%s15582_s0 + $0x3d0] sm:$0xff] }
 0xee4   : > { %9366 = vmatprep.subr.bf16.mxu1 %v11395_v62  ;;  %9409 = vmatprep.subr.bf16.mxu0 %v11397_v53  ;;  %v8580_v7 = vld [vmem:[%s15582_s0 + $0x3f0] sm:$0xff]  ;;  %v8577_v62 = vld [vmem:[%s15582_s0 + $0x3d8] sm:$0xff] }
 0xee5   : > { %v8581_v53 = vld [vmem:[%s15582_s0 + $0x3f8] sm:$0xff]  ;;  %v11451_v15 = vcombine.high %v8576_v16, %v8580_v7 }
 0xee6   : > { %v11453_v51 = vcombine.high %v8577_v62, %v8581_v53 }
 0xee7   : > { %9367 = vmatpush1.bf16.msra.mxu1 %v11394_v47  ;;  %9410 = vmatpush1.bf16.msra.mxu0 %v11396_v25  ;;  %v11450_v47 = vcombine.low %v8576_v16, %v8580_v7  ;;  %v11452_v25 = vcombine.low %v8577_v62, %v8581_v53 }
 0xee8   : > { %9368 = vmatprep.subr.bf16.mxu1 %v11403_v59  ;;  %9411 = vmatprep.subr.bf16.mxu0 %v11405_v60  ;;  %v12970_v59 = vld [vmem:[%s15674_s2 + $0x4] ss:$8 sps:$4 sm:$0xff]   ;;  %v12968_v60 = vld [vmem:[%s15674_s2] ss:$8 sps:$4 sm:$0xff]  }
 0xeeb   : > { %9369 = vmatpush1.bf16.msra.mxu1 %v11402_v28  ;;  %9412 = vmatpush1.bf16.msra.mxu0 %v11404_v63  ;;  %v12979_v28 = vld [vmem:[%s15674_s2 + $0x34] ss:$8 sps:$4 sm:$0xff]   ;;  %v12977_v63 = vld [vmem:[%s15674_s2 + $0x30] ss:$8 sps:$4 sm:$0xff]  }
 0xeec   : > { %9370 = vmatprep.subr.bf16.mxu1 %v11411_v21  ;;  %9413 = vmatprep.subr.bf16.mxu0 %v11413_v26  ;;  %v12982_v21 = vld [vmem:[%s15674_s2 + $0x44] ss:$8 sps:$4 sm:$0xff]   ;;  %v12985_v26 = vld [vmem:[%s15674_s2 + $0x54] ss:$8 sps:$4 sm:$0xff]  }
 0xeef   : > { %9371 = vmatpush1.bf16.msra.mxu1 %v11410_v24  ;;  %9414 = vmatpush1.bf16.msra.mxu0 %v11412_v17  ;;  %v12989_v24 = vld [vmem:[%s15674_s2 + $0x70] ss:$8 sps:$4 sm:$0xff]   ;;  %v12994_v17 = vld [vmem:[%s15674_s2 + $0x84] ss:$8 sps:$4 sm:$0xff]  }
 0xef0   : > { %9372 = vmatprep.subr.bf16.mxu1 %v11419_v22  ;;  %9415 = vmatprep.subr.bf16.mxu0 %v11421_v23  ;;  %v12992_v22 = vld [vmem:[%s15674_s2 + $0x80] ss:$8 sps:$4 sm:$0xff]   ;;  %v12997_v23 = vld [vmem:[%s15674_s2 + $0x94] ss:$8 sps:$4 sm:$0xff]  }
 0xef3   : > { %9373 = vmatpush1.bf16.msra.mxu1 %v11418_v45  ;;  %9416 = vmatpush1.bf16.msra.mxu0 %v11420_v10  ;;  %v13001_v45 = vld [vmem:[%s15674_s2 + $0xb0] ss:$8 sps:$4 sm:$0xff]   ;;  %v13006_v10 = vld [vmem:[%s15674_s2 + $0xc4] ss:$8 sps:$4 sm:$0xff]  }
 0xef4   : > { %9374 = vmatprep.subr.bf16.mxu1 %v11427_v18  ;;  %9417 = vmatprep.subr.bf16.mxu0 %v11429_v3  ;;  %v13004_v18 = vld [vmem:[%s15674_s2 + $0xc0] ss:$8 sps:$4 sm:$0xff]   ;;  %v13009_v3 = vld [vmem:[%s15674_s2 + $0xd4] ss:$8 sps:$4 sm:$0xff]  }
 0xef7   : > { %9375 = vmatpush1.bf16.msra.mxu1 %v11426_v46  ;;  %9418 = vmatpush1.bf16.msra.mxu0 %v11428_v48  ;;  %v13013_v46 = vld [vmem:[%s15674_s2 + $0xf0] ss:$8 sps:$4 sm:$0xff]   ;;  %v13018_v48 = vld [vmem:[%s15674_s2 + $0x104] ss:$8 sps:$4 sm:$0xff]  }
 0xef8   : > { %9376 = vmatprep.subr.bf16.mxu1 %v11435_v0  ;;  %9419 = vmatprep.subr.bf16.mxu0 %v11437_v34  ;;  %v15801_v0 = vld [vmem:[%s945_s15] sm:$0xff] }
 0xef9   : > { %v8587_v34 = vrot.slane %v15801_v0, %v14485_v43  ;;  %v8595_v6 = vrot.slane %v15801_v0, %v14478_v41  ;;  %v8591_v44 = vrot.slane %v15801_v0, %v14495_v55  ;;  %v8599_v42 = vrot.slane %v15801_v0, %v14499_v57 }
 0xefb   : > { %9377 = vmatpush1.bf16.msra.mxu1 %v11434_v19  ;;  %9420 = vmatpush1.bf16.msra.mxu0 %v11436_v30 }
 0xefc   : > { %9378 = vmatprep.subr.bf16.mxu1 %v11443_v9  ;;  %9421 = vmatprep.subr.bf16.mxu0 %v11445_v8 }
 0xeff   : > { %9379 = vmatpush1.bf16.msra.mxu1 %v11442_v20  ;;  %9422 = vmatpush1.bf16.msra.mxu0 %v11444_v35 }
 0xf00   : > { %9380 = vmatprep.subr.bf16.mxu1 %v11451_v15  ;;  %9423 = vmatprep.subr.bf16.mxu0 %v11453_v51 }
 0xf03   : > { %9381 = vmatpush1.bf16.msra.mxu1 %v11450_v47  ;;  %9424 = vmatpush1.bf16.msra.mxu0 %v11452_v25 }
 0xf04   : > { %10368 = vmatprep.subr.bf16.mxu1 %v12970_v59 }
 0xf06   : > { %9383 = vmatmul.mubr.bf16.vlgmr.msra.gmra.mrb[84].mxu1 %v15702_v56  ;;  %9426 = vmatmul.mubr.bf16.vlgmr.msra.gmra.mrb[92].mxu0 %v15702_v56  ;;  %v12980_v56 = vld [vmem:[%s15674_s2 + $0x40] ss:$8 sps:$4 sm:$0xff]  }
 0xf07   : > { %10369 = vmatpush1.bf16.msra.mxu1 %v12968_v60 }
 0xf08   : > { %10370 = vmatprep.subr.bf16.mxu1 %v12973_v37 }
 0xf0b   : > { %10371 = vmatpush1.bf16.msra.mxu1 %v12971_v27 }
 0xf0c   : > { %10372 = vmatprep.subr.bf16.mxu1 %v12976_v14 }
 0xf0f   : > { %10373 = vmatpush1.bf16.msra.mxu1 %v12974_v31 }
 0xf10   : > { %10374 = vmatprep.subr.bf16.mxu1 %v12979_v28 }
 0xf13   : > { %10375 = vmatpush1.bf16.msra.mxu1 %v12977_v63 }
 0xf14   : > { %10376 = vmatprep.subr.bf16.mxu1 %v12982_v21 }
 0xf17   : > { %10377 = vmatpush1.bf16.msra.mxu1 %v12980_v56 }
 0xf18   : > { %10378 = vmatprep.subr.bf16.mxu1 %v12985_v26 }
 0xf1b   : > { %10379 = vmatpush1.bf16.msra.mxu1 %v12983_v12 }
 0xf1c   : > { %10380 = vmatprep.subr.bf16.mxu1 %v12988_v13 }
 0xf1f   : > { %10381 = vmatpush1.bf16.msra.mxu1 %v12986_v49 }
 0xf20   : > { %10382 = vmatprep.subr.bf16.mxu1 %v12991_v52 }
 0xf23   : > { %10383 = vmatpush1.bf16.msra.mxu1 %v12989_v24 }
 0xf24   : > { %10384 = vmatprep.subr.bf16.mxu1 %v12994_v17 }
 0xf27   : > { %10385 = vmatpush1.bf16.msra.mxu1 %v12992_v22 }
 0xf28   : > { %10386 = vmatprep.subr.bf16.mxu1 %v12997_v23 }
 0xf2b   : > { %10387 = vmatpush1.bf16.msra.mxu1 %v12995_v36 }
 0xf2c   : > { %10388 = vmatprep.subr.bf16.mxu1 %v13000_v33 }
 0xf2f   : > { %10389 = vmatpush1.bf16.msra.mxu1 %v12998_v61 }
 0xf30   : > { %10390 = vmatprep.subr.bf16.mxu1 %v13003_v38 }
 0xf33   : > { %10391 = vmatpush1.bf16.msra.mxu1 %v13001_v45 }
 0xf34   : > { %10392 = vmatprep.subr.bf16.mxu1 %v13006_v10 }
 0xf37   : > { %10393 = vmatpush1.bf16.msra.mxu1 %v13004_v18 }
 0xf38   : > { %10394 = vmatprep.subr.bf16.mxu1 %v13009_v3 }
 0xf3b   : > { %10395 = vmatpush1.bf16.msra.mxu1 %v13007_v54 }
 0xf3c   : > { %10396 = vmatprep.subr.bf16.mxu1 %v13012_v29 }
 0xf3f   : > { %10397 = vmatpush1.bf16.msra.mxu1 %v13010_v11 }
 0xf40   : > { %10398 = vmatprep.subr.bf16.mxu1 %v13015_v58 }
 0xf43   : > { %10399 = vmatpush1.bf16.msra.mxu1 %v13013_v46 }
 0xf44   : > { %10411 = vmatprep.subr.bf16.mxu1 %v13018_v48 }
 0xf99   : > { %v9298_v5 = vpop.f32.mrb[80].mxu1  ;;  %v9341_v19 = vpop.f32.mrb[88].mxu0 }
 0xf9a   : > { %v15811_v30 = vadd.f32 %v9298_v5, %v8587_v34  ;;  %v15813_v9 = vadd.f32 %v9341_v19, %v8595_v6  ;;  %v9300_v8 = vpop.f32.mrb[81].mxu1  ;;  %v9343_v16 = vpop.f32.mrb[89].mxu0 }
 0xf9b   : > { %v15815_v7 = vadd.f32 %v9300_v8, %v8591_v44  ;;  %v15817_v62 = vadd.f32 %v9343_v16, %v8599_v42  ;;  %v9302_v53 = vpop.f32.mrb[82].mxu1  ;;  %v9345_v41 = vpop.f32.mrb[90].mxu0 }
 0xf9c   : > { %v9452_v20 = vmul.f32 %v15811_v30, %v15811_v30  ;;  %v9454_v57 = vmul.f32 %v15813_v9, %v15813_v9  ;;  %v9304_v35 = vpop.f32.mrb[83].mxu1  ;;  %v9347_v15 = vpop.f32.mrb[91].mxu0  ;;  %v9303_v25 = vadd.f32 %v9302_v53, %v8587_v34  ;;  %v9346_v59 = vadd.f32 %v9345_v41, %v8595_v6 }
 0xf9d   : > { %v9453_v51 = vmul.f32 %v15815_v7, %v15815_v7  ;;  %v9455_v47 = vmul.f32 %v15817_v62, %v15817_v62  ;;  %v9305_v27 = vadd.f32 %v9304_v35, %v8591_v44  ;;  %v15829_v14 = vadd.f32 %v9347_v15, %v8599_v42 }
 0xf9e   : > { %v9468_v60 = vmul.f32 %v9452_v20, %v15811_v30  ;;  %v9470_v37 = vmul.f32 %v9454_v57, %v15813_v9  ;;  %v9460_v63 = vmul.f32 %v9303_v25, %v9303_v25  ;;  %v9462_v26 = vmul.f32 %v9346_v59, %v9346_v59 }
 0xf9f   : > { %v9469_v31 = vmul.f32 %v9453_v51, %v15815_v7  ;;  %v9471_v28 = vmul.f32 %v9455_v47, %v15817_v62  ;;  %v9461_v52 = vmul.f32 %v9305_v27, %v9305_v27  ;;  %v9463_v23 = vmul.f32 %v15829_v14, %v15829_v14 }
 0xfa0   : > { %v9484_v21 = vmul.f32 0.044715, %v9468_v60  ;;  %v9486_v56 = vmul.f32 0.044715, %v9470_v37  ;;  %v9476_v49 = vmul.f32 %v9460_v63, %v9303_v25  ;;  %v9478_v22 = vmul.f32 %v9462_v26, %v9346_v59 }
 0xfa1   : > { %v9485_v12 = vmul.f32 0.044715, %v9469_v31  ;;  %v9487_v13 = vmul.f32 0.044715, %v9471_v28  ;;  %v9477_v38 = vmul.f32 %v9461_v52, %v9305_v27  ;;  %v9479_v3 = vmul.f32 %v9463_v23, %v15829_v14 }
 0xfa2   : > { %v9500_v24 = vadd.f32 %v9484_v21, %v15811_v30  ;;  %v9502_v17 = vadd.f32 %v9486_v56, %v15813_v9  ;;  %v9492_v61 = vmul.f32 0.044715, %v9476_v49  ;;  %v9494_v18 = vmul.f32 0.044715, %v9478_v22 }
 0xfa3   : > { %v9501_v36 = vadd.f32 %v9485_v12, %v15815_v7  ;;  %v9503_v33 = vadd.f32 %v9487_v13, %v15817_v62  ;;  %v9493_v58 = vmul.f32 0.044715, %v9477_v38  ;;  %v9495_v48 = vmul.f32 0.044715, %v9479_v3  ;;  %v13021_v38 = vld [vmem:[%s15674_s2 + $0x114] ss:$8 sps:$4 sm:$0xff]  }
 0xfa4   : > { %v9516_v45 = vmul.f32 0.7978846, %v9500_v24  ;;  %v9518_v10 = vmul.f32 0.7978846, %v9502_v17  ;;  %v9508_v11 = vadd.f32 %v9492_v61, %v9303_v25  ;;  %v9510_v46 = vadd.f32 %v9494_v18, %v9346_v59  ;;  %v13022_v18 = vld [vmem:[%s15674_s2 + $0x120] ss:$8 sps:$4 sm:$0xff]  }
 0xfa5   : > { %v9517_v54 = vmul.f32 0.7978846, %v9501_v36  ;;  %v9519_v29 = vmul.f32 0.7978846, %v9503_v33  ;;  %v9509_v6 = vadd.f32 %v9493_v58, %v9305_v27  ;;  %v9511_v42 = vadd.f32 %v9495_v48, %v15829_v14  ;;  %v13027_v3 = vld [vmem:[%s15674_s2 + $0x134] ss:$8 sps:$4 sm:$0xff]  }
 0xfa6   : > { %13296 = vtanh.f32 %v9516_v45  ;;  %v9524_v34 = vmul.f32 0.7978846, %v9508_v11  ;;  %v9526_v44 = vmul.f32 0.7978846, %v9510_v46  ;;  %v9436_v35 = vmul.f32 0.5, %v15811_v30 }
 0xfa7   : > { %13298 = vtanh.f32 %v9518_v10  ;;  %v9525_v5 = vmul.f32 0.7978846, %v9509_v6  ;;  %v9527_v19 = vmul.f32 0.7978846, %v9511_v42  ;;  %v9438_v15 = vmul.f32 0.5, %v15813_v9 }
 0xfa8   : > { %13300 = vtanh.f32 %v9517_v54  ;;  %v9444_v60 = vmul.f32 0.5, %v9303_v25  ;;  %v9446_v37 = vmul.f32 0.5, %v9346_v59  ;;  %v9437_v21 = vmul.f32 0.5, %v15815_v7  ;;  %v13019_v45 = vld [vmem:[%s15674_s2 + $0x110] ss:$8 sps:$4 sm:$0xff]  }
 0xfa9   : > { %13302 = vtanh.f32 %v9519_v29  ;;  %v9445_v56 = vmul.f32 0.5, %v9305_v27  ;;  %v9439_v9 = vmul.f32 0.5, %v15817_v62  ;;  %v9447_v24 = vmul.f32 0.5, %v15829_v14  ;;  %v13016_v14 = vld [vmem:[%s15674_s2 + $0x100] ss:$8 sps:$4 sm:$0xff]  }
 0xfaa   : > { %13304 = vtanh.f32 %v9524_v34  ;;  %v13024_v10 = vld [vmem:[%s15674_s2 + $0x124] ss:$8 sps:$4 sm:$0xff]   ;;  %v13025_v54 = vld [vmem:[%s15674_s2 + $0x130] ss:$8 sps:$4 sm:$0xff]   ;;  %v13028_v11 = vld [vmem:[%s15674_s2 + $0x140] ss:$8 sps:$4 sm:$0xff]  }
 0xfab   : > { %13306 = vtanh.f32 %v9526_v44  ;;  %v13030_v29 = vld [vmem:[%s15674_s2 + $0x144] ss:$8 sps:$4 sm:$0xff]   ;;  %v13033_v58 = vld [vmem:[%s15674_s2 + $0x154] ss:$8 sps:$4 sm:$0xff]   ;;  %v13031_v46 = vld [vmem:[%s15674_s2 + $0x150] ss:$8 sps:$4 sm:$0xff]  }
 0xfac   : > { %13308 = vtanh.f32 %v9525_v5  ;;  %v13036_v48 = vld [vmem:[%s15674_s2 + $0x164] ss:$8 sps:$4 sm:$0xff]   ;;  %v8610_v34 = vsub.s32 6, %v14475_v40  ;;  %v13034_v6 = vld [vmem:[%s15674_s2 + $0x160] ss:$8 sps:$4 sm:$0xff]   ;;  %v8614_v44 = vsub.s32 7, %v14475_v40  ;;  %v8603_v5 = vrot.slane %v15801_v0, %v1094_v2 }
 0xfad   : > { %13310 = vtanh.f32 %v9527_v19  ;;  %v13039_v42 = vld [vmem:[%s15674_s2 + $0x174] ss:$8 sps:$4 sm:$0xff]  }
 0xfae   : > { %v8611_v19 = vrot.slane %v15801_v0, %v8610_v34  ;;  %v13051_v34 = vld [vmem:[%s15674_s2 + $0x1b4] ss:$8 sps:$4 sm:$0xff]  }
 0xfb0   : > { %v13297_v8 = vpop.eup %13296 }
 0xfb1   : > { %v13299_v16 = vpop.eup %13298  ;;  %v9548_v20 = vadd.f32 1.0, %v13297_v8  ;;  %v13037_v8 = vld [vmem:[%s15674_s2 + $0x170] ss:$8 sps:$4 sm:$0xff]  }
 0xfb2   : > { %v13301_v53 = vpop.eup %13300  ;;  %v9550_v51 = vadd.f32 1.0, %v13299_v16  ;;  %v8607_v16 = vrot.slane %v15801_v0, %v1098_v4 }
 0xfb3   : > { %v13303_v41 = vpop.eup %13302  ;;  %v9549_v31 = vadd.f32 1.0, %v13301_v53  ;;  %v9564_v52 = vmul.f32 %v9548_v20, %v9436_v35  ;;  %v8615_v53 = vrot.slane %v15801_v0, %v8614_v44 }
 0xfb4   : > { %v13305_v57 = vpop.eup %13304  ;;  %v9551_v26 = vadd.f32 1.0, %v13303_v41  ;;  %v15846_v59 = vmul.f32 %v9550_v51, %v9438_v15  ;;  %v13042_v41 = vld [vmem:[%s15674_s2 + $0x184] ss:$8 sps:$4 sm:$0xff]  }
 0xfb5   : > { %v13307_v47 = vpop.eup %13306  ;;  %v9556_v28 = vadd.f32 1.0, %v13305_v57  ;;  %v9565_v7 = vmul.f32 %v9549_v31, %v9437_v21  ;;  %v13045_v21 = vld [vmem:[%s15674_s2 + $0x194] ss:$8 sps:$4 sm:$0xff]  }
 0xfb6   : > { %v13309_v63 = vpop.eup %13308  ;;  %v9558_v12 = vadd.f32 1.0, %v13307_v47  ;;  %v9567_v23 = vmul.f32 %v9551_v26, %v9439_v9 }
 0xfb7   : > { %v13311_v13 = vpop.eup %13310  ;;  %v9557_v49 = vadd.f32 1.0, %v13309_v63  ;;  %v9572_v30 = vmul.f32 %v9556_v28, %v9444_v60 }
 0xfb8   : > { %v9559_v25 = vadd.f32 1.0, %v13311_v13  ;;  %v15848_v17 = vmul.f32 %v9558_v12, %v9446_v37  ;;  %v13040_v37 = vld [vmem:[%s15674_s2 + $0x180] ss:$8 sps:$4 sm:$0xff]  }
 0xfb9   : > { %v9573_v27 = vmul.f32 %v9557_v49, %v9445_v56  ;;  %v9580_v22 = vpack.c.bf16 %v9572_v30, %v9564_v52 }
 0xfba   : > { %v9575_v36 = vmul.f32 %v9559_v25, %v9447_v24  ;;  %v9582_v33 = vpack.c.bf16 %v15848_v17, %v15846_v59  ;;  %v13078_v59 = vld [vmem:[%s15674_s2 + $0x244] ss:$8 sps:$4 sm:$0xff]   ;;  %v13076_v17 = vld [vmem:[%s15674_s2 + $0x240] ss:$8 sps:$4 sm:$0xff]  }
 0xfbb   : > { %v9581_v62 = vpack.c.bf16 %v9573_v27, %v9565_v7  ;;  %v13043_v27 = vld [vmem:[%s15674_s2 + $0x190] ss:$8 sps:$4 sm:$0xff]  }
 0xfbc   : > { %v9583_v61 = vpack.c.bf16 %v9575_v36, %v9567_v23 }
 0xfbd   : > { %10400 = vmatprep.mubr.bf16.mxu1 %v9581_v62  ;;  %v13048_v62 = vld [vmem:[%s15674_s2 + $0x1a4] ss:$8 sps:$4 sm:$0xff]  }
 0xfbe   : > { %10401 = vmatmul.mubr.bf16.vlgmr.msra.gmra.mrb[88].mxu1 %v9580_v22 }
 0xfbf   : > { %10412 = vmatpush1.bf16.msra.mxu1 %v13016_v14  ;;  %10443 = vmatprep.mubr.bf16.mxu1 %v9583_v61 }
 0xfc0   : > { %10413 = vmatprep.subr.bf16.mxu1 %v13021_v38 }
 0xfc3   : > { %10414 = vmatpush1.bf16.msra.mxu1 %v13019_v45 }
 0xfc4   : > { %10415 = vmatprep.subr.bf16.mxu1 %v13024_v10 }
 0xfc7   : > { %10416 = vmatpush1.bf16.msra.mxu1 %v13022_v18 }
 0xfc8   : > { %10417 = vmatprep.subr.bf16.mxu1 %v13027_v3 }
 0xfcb   : > { %10418 = vmatpush1.bf16.msra.mxu1 %v13025_v54 }
 0xfcc   : > { %10419 = vmatprep.subr.bf16.mxu1 %v13030_v29 }
 0xfcf   : > { %10420 = vmatpush1.bf16.msra.mxu1 %v13028_v11 }
 0xfd0   : > { %10421 = vmatprep.subr.bf16.mxu1 %v13033_v58 }
 0xfd3   : > { %10422 = vmatpush1.bf16.msra.mxu1 %v13031_v46 }
 0xfd4   : > { %10423 = vmatprep.subr.bf16.mxu1 %v13036_v48  ;;  %v13046_v48 = vld [vmem:[%s15674_s2 + $0x1a0] ss:$8 sps:$4 sm:$0xff]  }
 0xfd7   : > { %10424 = vmatpush1.bf16.msra.mxu1 %v13034_v6 }
 0xfd8   : > { %10425 = vmatprep.subr.bf16.mxu1 %v13039_v42 }
 0xfd9   : > { %v9384_v20 = vpop.f32.mrb[84].mxu1  ;;  %v9427_v57 = vpop.f32.mrb[92].mxu0 }
 0xfda   : > { %v15878_v35 = vadd.f32 %v9384_v20, %v8603_v5  ;;  %v15880_v15 = vadd.f32 %v9427_v57, %v8611_v19  ;;  %v9386_v2 = vpop.f32.mrb[85].mxu1  ;;  %v9429_v51 = vpop.f32.mrb[93].mxu0 }
 0xfdb   : > { %10426 = vmatpush1.bf16.msra.mxu1 %v13037_v8  ;;  %v15882_v47 = vadd.f32 %v9386_v2, %v8607_v16  ;;  %v15884_v40 = vadd.f32 %v9429_v51, %v8615_v53  ;;  %v9388_v60 = vpop.f32.mrb[86].mxu1  ;;  %v9431_v4 = vpop.f32.mrb[94].mxu0  ;;  %v13049_v51 = vld [vmem:[%s15674_s2 + $0x1b0] ss:$8 sps:$4 sm:$0xff]  }
 0xfdc   : > { %v9456_v0 = vmul.f32 %v15878_v35, %v15878_v35  ;;  %v9458_v31 = vmul.f32 %v15880_v15, %v15880_v15  ;;  %10427 = vmatprep.subr.bf16.mxu1 %v13042_v41  ;;  %v9390_v28 = vpop.f32.mrb[87].mxu1  ;;  %v9433_v63 = vpop.f32.mrb[95].mxu0  ;;  %v15896_v12 = vadd.f32 %v9388_v60, %v8603_v5  ;;  %v15898_v13 = vadd.f32 %v9431_v4, %v8611_v19 }
 0xfdd   : > { %v9457_v56 = vmul.f32 %v15882_v47, %v15882_v47  ;;  %v9459_v26 = vmul.f32 %v15884_v40, %v15884_v40  ;;  %v15902_v30 = vadd.f32 %v9390_v28, %v8607_v16  ;;  %v15904_v9 = vadd.f32 %v9433_v63, %v8615_v53  ;;  %v13052_v28 = vld [vmem:[%s15674_s2 + $0x1c0] ss:$8 sps:$4 sm:$0xff]   ;;  %v13057_v63 = vld [vmem:[%s15674_s2 + $0x1d4] ss:$8 sps:$4 sm:$0xff]  }
 0xfde   : > { %v9472_v49 = vmul.f32 %v9456_v0, %v15878_v35  ;;  %v9474_v52 = vmul.f32 %v9458_v31, %v15880_v15  ;;  %v9464_v7 = vmul.f32 %v15896_v12, %v15896_v12  ;;  %v9466_v36 = vmul.f32 %v15898_v13, %v15898_v13 }
 0xfdf   : > { %v9473_v24 = vmul.f32 %v9457_v56, %v15882_v47  ;;  %v9475_v25 = vmul.f32 %v9459_v26, %v15884_v40  ;;  %10428 = vmatpush1.bf16.msra.mxu1 %v13040_v37  ;;  %v9465_v45 = vmul.f32 %v15902_v30, %v15902_v30  ;;  %v9467_v54 = vmul.f32 %v15904_v9, %v15904_v9  ;;  %v13054_v37 = vld [vmem:[%s15674_s2 + $0x1c4] ss:$8 sps:$4 sm:$0xff]  }
 0xfe0   : > { %v9488_v22 = vmul.f32 0.044715, %v9472_v49  ;;  %v9490_v23 = vmul.f32 0.044715, %v9474_v52  ;;  %10429 = vmatprep.subr.bf16.mxu1 %v13045_v21  ;;  %v9480_v38 = vmul.f32 %v9464_v7, %v15896_v12  ;;  %v9482_v3 = vmul.f32 %v9466_v36, %v15898_v13  ;;  %v13055_v21 = vld [vmem:[%s15674_s2 + $0x1d0] ss:$8 sps:$4 sm:$0xff]  }
 0xfe1   : > { %v9489_v14 = vmul.f32 0.044715, %v9473_v24  ;;  %v9491_v61 = vmul.f32 0.044715, %v9475_v25  ;;  %v9481_v46 = vmul.f32 %v9465_v45, %v15902_v30  ;;  %v9483_v5 = vmul.f32 %v9467_v54, %v15904_v9  ;;  %v13060_v26 = vld [vmem:[%s15674_s2 + $0x1e4] ss:$8 sps:$4 sm:$0xff]  }
 0xfe2   : > { %v9504_v10 = vadd.f32 %v9488_v22, %v15878_v35  ;;  %v9506_v18 = vadd.f32 %v9490_v23, %v15880_v15  ;;  %v9496_v58 = vmul.f32 0.044715, %v9480_v38  ;;  %v9498_v42 = vmul.f32 0.044715, %v9482_v3  ;;  %v13058_v25 = vld [vmem:[%s15674_s2 + $0x1e0] ss:$8 sps:$4 sm:$0xff]  }
 0xfe3   : > { %v9505_v29 = vadd.f32 %v9489_v14, %v15882_v47  ;;  %v9507_v11 = vadd.f32 %v9491_v61, %v15884_v40  ;;  %10430 = vmatpush1.bf16.msra.mxu1 %v13043_v27  ;;  %v9497_v53 = vmul.f32 0.044715, %v9481_v46  ;;  %v9499_v20 = vmul.f32 0.044715, %v9483_v5  ;;  %v13063_v36 = vld [vmem:[%s15674_s2 + $0x1f4] ss:$8 sps:$4 sm:$0xff]  }
 0xfe4   : > { %v9520_v6 = vmul.f32 0.7978846, %v9504_v10  ;;  %v9522_v44 = vmul.f32 0.7978846, %v9506_v18  ;;  %10431 = vmatprep.subr.bf16.mxu1 %v13048_v62  ;;  %v9512_v16 = vadd.f32 %v9496_v58, %v15896_v12  ;;  %v9514_v41 = vadd.f32 %v9498_v42, %v15898_v13 }
 0xfe5   : > { %v9521_v19 = vmul.f32 0.7978846, %v9505_v29  ;;  %v9523_v8 = vmul.f32 0.7978846, %v9507_v11  ;;  %v9513_v2 = vadd.f32 %v9497_v53, %v15902_v30  ;;  %v9515_v4 = vadd.f32 %v9499_v20, %v15904_v9  ;;  %v13061_v11 = vld [vmem:[%s15674_s2 + $0x1f0] ss:$8 sps:$4 sm:$0xff]  }
 0xfe6   : > { %13312 = vtanh.f32 %v9520_v6  ;;  %v9528_v57 = vmul.f32 0.7978846, %v9512_v16  ;;  %v9530_v60 = vmul.f32 0.7978846, %v9514_v41  ;;  %v9440_v22 = vmul.f32 0.5, %v15878_v35 }
 0xfe7   : > { %13314 = vtanh.f32 %v9522_v44  ;;  %10432 = vmatpush1.bf16.msra.mxu1 %v13046_v48  ;;  %v9529_v0 = vmul.f32 0.7978846, %v9513_v2  ;;  %v9531_v31 = vmul.f32 0.7978846, %v9515_v4  ;;  %v9442_v23 = vmul.f32 0.5, %v15880_v15 }
 0xfe8   : > { %13316 = vtanh.f32 %v9521_v19  ;;  %10433 = vmatprep.subr.bf16.mxu1 %v13051_v34  ;;  %v9448_v61 = vmul.f32 0.5, %v15896_v12  ;;  %v9450_v38 = vmul.f32 0.5, %v15898_v13  ;;  %v9441_v3 = vmul.f32 0.5, %v15882_v47  ;;  %v13066_v48 = vld [vmem:[%s15674_s2 + $0x204] ss:$8 sps:$4 sm:$0xff]  }
 0xfe9   : > { %13318 = vtanh.f32 %v9523_v8  ;;  %v9449_v54 = vmul.f32 0.5, %v15902_v30  ;;  %v9443_v13 = vmul.f32 0.5, %v15884_v40  ;;  %v9451_v47 = vmul.f32 0.5, %v15904_v9  ;;  %v13064_v8 = vld [vmem:[%s15674_s2 + $0x200] ss:$8 sps:$4 sm:$0xff]  }
 0xfea   : > { %13320 = vtanh.f32 %v9528_v57  ;;  %v13069_v53 = vld [vmem:[%s15674_s2 + $0x214] ss:$8 sps:$4 sm:$0xff]   ;;  %v13067_v20 = vld [vmem:[%s15674_s2 + $0x210] ss:$8 sps:$4 sm:$0xff]   ;;  %v13072_v57 = vld [vmem:[%s15674_s2 + $0x224] ss:$8 sps:$4 sm:$0xff]  }
 0xfeb   : > { %13322 = vtanh.f32 %v9530_v60  ;;  %10434 = vmatpush1.bf16.msra.mxu1 %v13049_v51  ;;  %v13070_v2 = vld [vmem:[%s15674_s2 + $0x220] ss:$8 sps:$4 sm:$0xff]   ;;  %v13075_v51 = vld [vmem:[%s15674_s2 + $0x234] ss:$8 sps:$4 sm:$0xff]   ;;  %v13073_v60 = vld [vmem:[%s15674_s2 + $0x230] ss:$8 sps:$4 sm:$0xff]  }
 0xfec   : > { %13324 = vtanh.f32 %v9529_v0  ;;  %10435 = vmatprep.subr.bf16.mxu1 %v13054_v37  ;;  %v13079_v4 = vld [vmem:[%s15674_s2 + $0x250] ss:$8 sps:$4 sm:$0xff]   ;;  %v13084_v37 = vld [vmem:[%s15674_s2 + $0x264] ss:$8 sps:$4 sm:$0xff]   ;;  %v13082_v0 = vld [vmem:[%s15674_s2 + $0x260] ss:$8 sps:$4 sm:$0xff]  }
 0xfed   : > { %13326 = vtanh.f32 %v9531_v31  ;;  %v13087_v31 = vld [vmem:[%s15674_s2 + $0x274] ss:$8 sps:$4 sm:$0xff]  }
 0xfef   : > { %10436 = vmatpush1.bf16.msra.mxu1 %v13052_v28  ;;  %v13085_v28 = vld [vmem:[%s15674_s2 + $0x270] ss:$8 sps:$4 sm:$0xff]  }
 0xff0   : > { %v13313_v56 = vpop.eup %13312  ;;  %10437 = vmatprep.subr.bf16.mxu1 %v13057_v63  ;;  %v13090_v63 = vld [vmem:[%s15674_s2 + $0x284] ss:$8 sps:$4 sm:$0xff]  }
 0xff1   : > { %v13315_v49 = vpop.eup %13314  ;;  %v9552_v7 = vadd.f32 1.0, %v13313_v56  ;;  %v13093_v56 = vld [vmem:[%s15674_s2 + $0x294] ss:$8 sps:$4 sm:$0xff]  }
 0xff2   : > { %v13317_v52 = vpop.eup %13316  ;;  %v9554_v62 = vadd.f32 1.0, %v13315_v49  ;;  %v13096_v49 = vld [vmem:[%s15674_s2 + $0x2a4] ss:$8 sps:$4 sm:$0xff]  }
 0xff3   : > { %v13319_v24 = vpop.eup %13318  ;;  %10438 = vmatpush1.bf16.msra.mxu1 %v13055_v21  ;;  %v9553_v45 = vadd.f32 1.0, %v13317_v52  ;;  %v15947_v46 = vmul.f32 %v9552_v7, %v9440_v22  ;;  %v13088_v21 = vld [vmem:[%s15674_s2 + $0x280] ss:$8 sps:$4 sm:$0xff]   ;;  %v13102_v7 = vld [vmem:[%s15674_s2 + $0x2c4] ss:$8 sps:$4 sm:$0xff]  }
 0xff4   : > { %v13321_v27 = vpop.eup %13320  ;;  %10439 = vmatprep.subr.bf16.mxu1 %v13060_v26  ;;  %v9555_v35 = vadd.f32 1.0, %v13319_v24  ;;  %v15954_v30 = vmul.f32 %v9554_v62, %v9442_v23  ;;  %v13091_v26 = vld [vmem:[%s15674_s2 + $0x290] ss:$8 sps:$4 sm:$0xff]   ;;  %v13094_v52 = vld [vmem:[%s15674_s2 + $0x2a0] ss:$8 sps:$4 sm:$0xff]  }
 0xff5   : > { %v13323_v14 = vpop.eup %13322  ;;  %v9560_v10 = vadd.f32 1.0, %v13321_v27  ;;  %v9569_v44 = vmul.f32 %v9553_v45, %v9441_v3  ;;  %v13099_v24 = vld [vmem:[%s15674_s2 + $0x2b4] ss:$8 sps:$4 sm:$0xff]   ;;  %v13100_v27 = vld [vmem:[%s15674_s2 + $0x2c0] ss:$8 sps:$4 sm:$0xff]  }
 0xff6   : > { %v13325_v18 = vpop.eup %13324  ;;  %v9562_v29 = vadd.f32 1.0, %v13323_v14  ;;  %v15960_v19 = vmul.f32 %v9555_v35, %v9443_v13  ;;  %v13105_v22 = vld [vmem:[%s15674_s2 + $0x2d4] ss:$8 sps:$4 sm:$0xff]   ;;  %v13103_v23 = vld [vmem:[%s15674_s2 + $0x2d0] ss:$8 sps:$4 sm:$0xff]  }
 0xff7   : > { %v13327_v15 = vpop.eup %13326  ;;  %10440 = vmatpush1.bf16.msra.mxu1 %v13058_v25  ;;  %v9561_v58 = vadd.f32 1.0, %v13325_v18  ;;  %v15949_v12 = vmul.f32 %v9560_v10, %v9448_v61  ;;  %v13097_v25 = vld [vmem:[%s15674_s2 + $0x2b0] ss:$8 sps:$4 sm:$0xff]   ;;  %v13106_v62 = vld [vmem:[%s15674_s2 + $0x2e0] ss:$8 sps:$4 sm:$0xff]  }
 0xff8   : > { %10441 = vmatprep.subr.bf16.mxu1 %v13063_v36  ;;  %v9563_v34 = vadd.f32 1.0, %v13327_v15  ;;  %v15956_v6 = vmul.f32 %v9562_v29, %v9450_v38  ;;  %v13108_v36 = vld [vmem:[%s15674_s2 + $0x2e4] ss:$8 sps:$4 sm:$0xff]   ;;  %v13111_v14 = vld [vmem:[%s15674_s2 + $0x2f4] ss:$8 sps:$4 sm:$0xff]  }
 0xff9   : > { %v9577_v42 = vmul.f32 %v9561_v58, %v9449_v54  ;;  %v9584_v5 = vpack.c.bf16 %v15949_v12, %v15947_v46  ;;  %v13109_v61 = vld [vmem:[%s15674_s2 + $0x2f0] ss:$8 sps:$4 sm:$0xff]   ;;  %v13114_v38 = vld [vmem:[%s15674_s2 + $0x304] ss:$8 sps:$4 sm:$0xff]   ;;  %v13112_v45 = vld [vmem:[%s15674_s2 + $0x300] ss:$8 sps:$4 sm:$0xff]  }
 0xffa   : > { %v15962_v40 = vmul.f32 %v9563_v34, %v9451_v47  ;;  %v9586_v9 = vpack.c.bf16 %v15956_v6, %v15954_v30  ;;  %v13117_v10 = vld [vmem:[%s15674_s2 + $0x314] ss:$8 sps:$4 sm:$0xff]   ;;  %v13115_v18 = vld [vmem:[%s15674_s2 + $0x310] ss:$8 sps:$4 sm:$0xff]   ;;  %v13120_v3 = vld [vmem:[%s15674_s2 + $0x324] ss:$8 sps:$4 sm:$0xff]  }
 0xffb   : > { %10442 = vmatpush1.bf16.msra.mxu1 %v13061_v11  ;;  %v9585_v16 = vpack.c.bf16 %v9577_v42, %v9569_v44  ;;  %v13118_v54 = vld [vmem:[%s15674_s2 + $0x320] ss:$8 sps:$4 sm:$0xff]   ;;  %v13123_v35 = vld [vmem:[%s15674_s2 + $0x334] ss:$8 sps:$4 sm:$0xff]   ;;  %v13121_v29 = vld [vmem:[%s15674_s2 + $0x330] ss:$8 sps:$4 sm:$0xff]  }
 0xffc   : > { %10454 = vmatprep.subr.bf16.mxu1 %v13066_v48  ;;  %v9587_v41 = vpack.c.bf16 %v15962_v40, %v15960_v19  ;;  %v13126_v15 = vld [vmem:[%s15674_s2 + $0x344] ss:$8 sps:$4 sm:$0xff]   ;;  %v13124_v11 = vld [vmem:[%s15674_s2 + $0x340] ss:$8 sps:$4 sm:$0xff]   ;;  %v13129_v58 = vld [vmem:[%s15674_s2 + $0x354] ss:$8 sps:$4 sm:$0xff]  }
 0xffd   : > { %v13127_v46 = vld [vmem:[%s15674_s2 + $0x350] ss:$8 sps:$4 sm:$0xff]   ;;  %v13132_v12 = vld [vmem:[%s15674_s2 + $0x364] ss:$8 sps:$4 sm:$0xff]   ;;  %v13130_v13 = vld [vmem:[%s15674_s2 + $0x360] ss:$8 sps:$4 sm:$0xff]  }
 0xffe   : > { %10444 = vmatmul.mubr.bf16.vlgmr.msra.gmra.mrb[88].mxu1 %v9582_v33  ;;  %v13081_v33 = vld [vmem:[%s15674_s2 + $0x254] ss:$8 sps:$4 sm:$0xff]   ;;  %v13133_v47 = vld [vmem:[%s15674_s2 + $0x370] ss:$8 sps:$4 sm:$0xff]   ;;  %v13138_v34 = vld [vmem:[%s15674_s2 + $0x384] ss:$8 sps:$4 sm:$0xff]  }
 0xfff   : > { %10455 = vmatpush1.bf16.msra.mxu1 %v13064_v8  ;;  %10486 = vmatprep.mubr.bf16.mxu1 %v9585_v16  ;;  %v13135_v48 = vld [vmem:[%s15674_s2 + $0x374] ss:$8 sps:$4 sm:$0xff]   ;;  %v13136_v44 = vld [vmem:[%s15674_s2 + $0x380] ss:$8 sps:$4 sm:$0xff]   ;;  %v13144_v19 = vld [vmem:[%s15674_s2 + $0x3a4] ss:$8 sps:$4 sm:$0xff]  }
0x1000   : > { %10456 = vmatprep.subr.bf16.mxu1 %v13069_v53  ;;  %v13141_v42 = vld [vmem:[%s15674_s2 + $0x394] ss:$8 sps:$4 sm:$0xff]   ;;  %v13142_v40 = vld [vmem:[%s15674_s2 + $0x3a0] ss:$8 sps:$4 sm:$0xff]   ;;  %v13145_v16 = vld [vmem:[%s15674_s2 + $0x3b0] ss:$8 sps:$4 sm:$0xff]  }
0x1001   : > { %v13147_v8 = vld [vmem:[%s15674_s2 + $0x3b4] ss:$8 sps:$4 sm:$0xff]   ;;  %v13150_v53 = vld [vmem:[%s15674_s2 + $0x3c4] ss:$8 sps:$4 sm:$0xff]  }
0x1003   : > { %10457 = vmatpush1.bf16.msra.mxu1 %v13067_v20  ;;  %v13153_v20 = vld [vmem:[%s15674_s2 + $0x3d4] ss:$8 sps:$4 sm:$0xff]  }
0x1004   : > { %10458 = vmatprep.subr.bf16.mxu1 %v13072_v57  ;;  %v13151_v57 = vld [vmem:[%s15674_s2 + $0x3d0] ss:$8 sps:$4 sm:$0xff]  }
0x1007   : > { %10459 = vmatpush1.bf16.msra.mxu1 %v13070_v2  ;;  %v13156_v2 = vld [vmem:[%s15674_s2 + $0x3e4] ss:$8 sps:$4 sm:$0xff]  }
0x1008   : > { %10460 = vmatprep.subr.bf16.mxu1 %v13075_v51  ;;  %v13154_v51 = vld [vmem:[%s15674_s2 + $0x3e0] ss:$8 sps:$4 sm:$0xff]  }
0x100b   : > { %10461 = vmatpush1.bf16.msra.mxu1 %v13073_v60  ;;  %v13159_v60 = vld [vmem:[%s15674_s2 + $0x3f4] ss:$8 sps:$4 sm:$0xff]  }
0x100c   : > { %10462 = vmatprep.subr.bf16.mxu1 %v13078_v59  ;;  %v13157_v59 = vld [vmem:[%s15674_s2 + $0x3f0] ss:$8 sps:$4 sm:$0xff]  }
0x100f   : > { %10463 = vmatpush1.bf16.msra.mxu1 %v13076_v17  ;;  %v9716_v17 = vld [vmem:[%s949_s13] sm:$0x3] }
0x1010   : > { %10464 = vmatprep.subr.bf16.mxu1 %v13081_v33  ;;  %v9721_v33 = vrot.slane %v9716_v17, %v14485_v43 }
0x1013   : > { %10465 = vmatpush1.bf16.msra.mxu1 %v13079_v4  ;;  %v9725_v4 = vrot.slane %v9716_v17, %v14495_v55 }
0x1014   : > { %10466 = vmatprep.subr.bf16.mxu1 %v13084_v37 }
0x1017   : > { %10467 = vmatpush1.bf16.msra.mxu1 %v13082_v0 }
0x1018   : > { %10468 = vmatprep.subr.bf16.mxu1 %v13087_v31 }
0x101b   : > { %10469 = vmatpush1.bf16.msra.mxu1 %v13085_v28 }
0x101c   : > { %10470 = vmatprep.subr.bf16.mxu1 %v13090_v63 }
0x101f   : > { %10471 = vmatpush1.bf16.msra.mxu1 %v13088_v21 }
0x1020   : > { %10472 = vmatprep.subr.bf16.mxu1 %v13093_v56 }
0x1023   : > { %10473 = vmatpush1.bf16.msra.mxu1 %v13091_v26 }
0x1024   : > { %10474 = vmatprep.subr.bf16.mxu1 %v13096_v49 }
0x1027   : > { %10475 = vmatpush1.bf16.msra.mxu1 %v13094_v52 }
0x1028   : > { %10476 = vmatprep.subr.bf16.mxu1 %v13099_v24 }
0x102b   : > { %10477 = vmatpush1.bf16.msra.mxu1 %v13097_v25 }
0x102c   : > { %10478 = vmatprep.subr.bf16.mxu1 %v13102_v7 }
0x102f   : > { %10479 = vmatpush1.bf16.msra.mxu1 %v13100_v27 }
0x1030   : > { %10480 = vmatprep.subr.bf16.mxu1 %v13105_v22 }
0x1033   : > { %10481 = vmatpush1.bf16.msra.mxu1 %v13103_v23 }
0x1034   : > { %10482 = vmatprep.subr.bf16.mxu1 %v13108_v36 }
0x1037   : > { %10483 = vmatpush1.bf16.msra.mxu1 %v13106_v62 }
0x1038   : > { %10484 = vmatprep.subr.bf16.mxu1 %v13111_v14 }
0x103b   : > { %10485 = vmatpush1.bf16.msra.mxu1 %v13109_v61 }
0x103c   : > { %10497 = vmatprep.subr.bf16.mxu1 %v13114_v38 }
0x103e   : > { %10487 = vmatmul.mubr.bf16.vlgmr.msra.gmra.mrb[88].mxu1 %v9584_v5  ;;  %v13139_v5 = vld [vmem:[%s15674_s2 + $0x390] ss:$8 sps:$4 sm:$0xff]  }
0x103f   : > { %10498 = vmatpush1.bf16.msra.mxu1 %v13112_v45  ;;  %10529 = vmatprep.mubr.bf16.mxu1 %v9587_v41  ;;  %v13148_v41 = vld [vmem:[%s15674_s2 + $0x3c0] ss:$8 sps:$4 sm:$0xff]  }
0x1040   : > { %10499 = vmatprep.subr.bf16.mxu1 %v13117_v10 }
0x1043   : > { %10500 = vmatpush1.bf16.msra.mxu1 %v13115_v18 }
0x1044   : > { %10501 = vmatprep.subr.bf16.mxu1 %v13120_v3 }
0x1047   : > { %10502 = vmatpush1.bf16.msra.mxu1 %v13118_v54 }
0x1048   : > { %10503 = vmatprep.subr.bf16.mxu1 %v13123_v35 }
0x104b   : > { %10504 = vmatpush1.bf16.msra.mxu1 %v13121_v29  ;;  %v10955_v29 = vld [vmem:[%s15058_s26 + $0x4] sm:$0x3] }
0x104c   : > { %10505 = vmatprep.subr.bf16.mxu1 %v13126_v15  ;;  %v10957_v15 = vld [vmem:[%s15054_s28 + $0x4] sm:$0x3]  ;;  %s10616_s28 = sshll.u32 %s13793_s27, 4  ;;  %s10617_s28 = int_to_ptr.vmem [resolvable:$true] %s10616_s28 }
0x104d   : > { %s13692_s26 = scalar_lea.vmem %s10617_s28, 512  ;;  %p13699_p10 = scmp.lt.s32.totalorder %s10617_s28, %s10617_s28 }
0x104e   : > { %p13693_p5 = scmp.ne.s32.totalorder %s10617_s28, %s13692_s26  ;;  %p13700_p13 = scmp.lt.s32.totalorder %s13692_s26, %s13692_s26 }
0x104f   : > { %10506 = vmatpush1.bf16.msra.mxu1 %v13124_v11  ;;  %v10580_v11 = vrot.slane %v10955_v29, %v14485_v43 }
0x1050   : > { %10507 = vmatprep.subr.bf16.mxu1 %v13129_v58  ;;  %v10584_v58 = vrot.slane %v10955_v29, %v14495_v55  ;;  %p13694_p0 = pnand %p13693_p5, %p12350_p12  ;;  %p13701_p3 = por %p13700_p13, %p13699_p10 }
0x1052   : > { %p13695_p9 = pneg %p13694_p0 }
0x1053   : > { %10508 = vmatpush1.bf16.msra.mxu1 %v13127_v46 }
0x1054   : > { %10509 = vmatprep.subr.bf16.mxu1 %v13132_v12  ;;  %v10595_v12 = vrot.slane %v10957_v15, %v14485_v43  ;;  %p13702_p8 = pnand %p13701_p3, %p13695_p9 }
0x1057   : > { %10510 = vmatpush1.bf16.msra.mxu1 %v13130_v13  ;;  %v10599_v13 = vrot.slane %v10957_v15, %v14495_v55 }
0x1058   : > { %10511 = vmatprep.subr.bf16.mxu1 %v13135_v48 }
0x105b   : > { %10512 = vmatpush1.bf16.msra.mxu1 %v13133_v47 }
0x105c   : > { %10513 = vmatprep.subr.bf16.mxu1 %v13138_v34 }
0x105f   : > { %10514 = vmatpush1.bf16.msra.mxu1 %v13136_v44 }
0x1060   : > { %10515 = vmatprep.subr.bf16.mxu1 %v13141_v42 }
0x1063   : > { %10516 = vmatpush1.bf16.msra.mxu1 %v13139_v5 }
0x1064   : > { %10517 = vmatprep.subr.bf16.mxu1 %v13144_v19 }
0x1067   : > { %10518 = vmatpush1.bf16.msra.mxu1 %v13142_v40 }
0x1068   : > { %10519 = vmatprep.subr.bf16.mxu1 %v13147_v8 }
0x106b   : > { %10520 = vmatpush1.bf16.msra.mxu1 %v13145_v16 }
0x106c   : > { %10521 = vmatprep.subr.bf16.mxu1 %v13150_v53 }
0x106f   : > { %10522 = vmatpush1.bf16.msra.mxu1 %v13148_v41 }
0x1070   : > { %10523 = vmatprep.subr.bf16.mxu1 %v13153_v20 }
0x1073   : > { %10524 = vmatpush1.bf16.msra.mxu1 %v13151_v57 }
0x1074   : > { %10525 = vmatprep.subr.bf16.mxu1 %v13156_v2 }
0x1077   : > { %10526 = vmatpush1.bf16.msra.mxu1 %v13154_v51 }
0x1078   : > { %10527 = vmatprep.subr.bf16.mxu1 %v13159_v60 }
0x107b   : > { %10528 = vmatpush1.bf16.msra.mxu1 %v13157_v59 }
0x107e   : > { %10530 = vmatmul.mubr.bf16.vlgmr.msra.gmra.mrb[88].mxu1 %v9586_v9 }
0x1151   : > { %v10531_v37 = vpop.f32.mrb[88].mxu1 }
0x1152   : > { %v12248_v0 = vadd.f32 %v10531_v37, %v9721_v33  ;;  %v10533_v31 = vpop.f32.mrb[89].mxu1 }
0x1153   : > { %v12249_v28 = vadd.f32 %v10533_v31, %v9725_v4  ;;  %v10535_v63 = vpop.f32.mrb[90].mxu1 }
0x1154   : > { %v10540_v21 = vadd.f32 %v12248_v0, %v15690_v1  ;;  %v12250_v56 = vadd.f32 %v10535_v63, %v9721_v33  ;;  %v10537_v30 = vpop.f32.mrb[91].mxu1 }
0x1155   : > { %v10541_v6 = vadd.f32 %v12249_v28, %v15686_v32  ;;  %v12251_v9 = vadd.f32 %v10537_v30, %v9725_v4 }
0x1156   : > { %v10542_v26 = vadd.f32 %v12250_v56, %v15692_v50 }
0x1157   : > { %v10543_v49 = vadd.f32 %v12251_v9, %v15688_v39  ;;  %v10544_v52 = vadd.f32 %v10541_v6, %v10540_v21 }
0x1159   : > { %10545 = vadd.xlane.f32.xlu1 %v10544_v52  ;;  %v10547_v24 = vadd.f32 %v10543_v49, %v10542_v26 }
0x115b   : > { %10548 = vadd.xlane.f32.xlu0 %v10547_v24 }
0x11e6   : > { %v10546_v25 = vpop.xlane.xlu1 %10545 }
0x11e7   : > { %v10550_v7 = vmul.f32 0.00390625, %v10546_v25 }
0x11e8   : > { %v10549_v27 = vpop.xlane.xlu0 %10548 }
0x11e9   : > { %v10552_v22 = vsub.f32 %v10540_v21, %v10550_v7  ;;  %v10553_v23 = vsub.f32 %v10541_v6, %v10550_v7  ;;  %v10551_v36 = vmul.f32 0.00390625, %v10549_v27 }
0x11eb   : > { %v10556_v1 = vmul.f32 %v10552_v22, %v10552_v22  ;;  %v10557_v62 = vmul.f32 %v10553_v23, %v10553_v23  ;;  %v10554_v14 = vsub.f32 %v10542_v26, %v10551_v36  ;;  %v10555_v32 = vsub.f32 %v10543_v49, %v10551_v36 }
0x11ed   : > { %v10558_v61 = vmul.f32 %v10554_v14, %v10554_v14  ;;  %v10559_v50 = vmul.f32 %v10555_v32, %v10555_v32  ;;  %v10560_v38 = vadd.f32 %v10557_v62, %v10556_v1 }
0x11ef   : > { %10561 = vadd.xlane.f32.xlu1 %v10560_v38  ;;  %v10563_v39 = vadd.f32 %v10559_v50, %v10558_v61 }
0x11f1   : > { %10564 = vadd.xlane.f32.xlu0 %v10563_v39 }
0x127c   : > { %v10562_v45 = vpop.xlane.xlu1 %10561 }
0x127d   : > { %v10566_v10 = vmul.f32 0.00390625, %v10562_v45 }
0x127e   : > { %v10565_v18 = vpop.xlane.xlu0 %10564 }
0x127f   : > { %v10568_v3 = vadd.f32 1e-05, %v10566_v10  ;;  %v10567_v54 = vmul.f32 0.00390625, %v10565_v18 }
0x1281   : > { %13328 = vrsqrt.f32 %v10568_v3  ;;  %v10569_v35 = vadd.f32 1e-05, %v10567_v54 }
0x1283   : > { %13330 = vrsqrt.f32 %v10569_v35 }
0x128b   : > { %v13329_v46 = vpop.eup %13328 }
0x128c   : > { %v10572_v48 = vmul.f32 %v13329_v46, %v10552_v22  ;;  %v10573_v47 = vmul.f32 %v13329_v46, %v10553_v23 }
0x128d   : > { %v13331_v34 = vpop.eup %13330 }
0x128e   : > { %v10587_v44 = vmul.f32 %v10580_v11, %v10572_v48  ;;  %v10588_v42 = vmul.f32 %v10584_v58, %v10573_v47  ;;  %v10574_v5 = vmul.f32 %v13331_v34, %v10554_v14  ;;  %v10575_v19 = vmul.f32 %v13331_v34, %v10555_v32 }
0x1290   : > { %v10602_v40 = vadd.f32 %v10595_v12, %v10587_v44  ;;  %v10603_v8 = vadd.f32 %v10599_v13, %v10588_v42  ;;  %v10589_v16 = vmul.f32 %v10580_v11, %v10574_v5  ;;  %v10590_v53 = vmul.f32 %v10584_v58, %v10575_v19 }
0x1292   : > { %10606 = vst [vmem:[#allocation17] sm:$0xff] %v10602_v40  ;;  %10607 = vst [vmem:[#allocation17 + $0x8] sm:$0xff] %v10603_v8  ;;  %v10604_v43 = vadd.f32 %v10595_v12, %v10589_v16  ;;  %v10605_v41 = vadd.f32 %v10599_v13, %v10590_v53 }
0x1294   : > { %10608 = vst [vmem:[#allocation17 + $0x10] sm:$0xff] %v10604_v43  ;;  %10609 = vst [vmem:[#allocation17 + $0x18] sm:$0xff] %v10605_v41 }
0x1295   : > { %13705 = shalt.err (!%p13702_p8)
}
0x1296   : > { %s16215_s21 = sld [smem:[#allocation37_spill]] }
0x129c   : > { %s16216_s3 = smov %s16215_s21  ;;  %s13706_s17 = scalar_lea.hbm %s16215_s21, 512 }
0x129d   : > { %p13707_p2 = scmp.ne.s32.totalorder %s16216_s3, %s13706_s17  ;;  %p13712_p6 = scmp.lt.u32.totalorder %s13706_s17, %s16216_s3 }
0x129f   : > { %p13708_p7 = pnand %p13707_p2, %p12350_p12 }
0x12a1   : > { %p13709_p11 = pneg %p13708_p7 }
0x12a3   : > { %p13714_p4 = pnand %p13712_p6, %p13709_p11 }
0x12a5   : > { %13717 = shalt.err (!%p13714_p4)
}
0x12a6   : > { %s13794_s19 = smov 256   ;;  %s13795_s20 = smov 16  }
0x12a7   : > { %12304 = dma.vmem_to_hbm [thread:$0]  (%p12350_p12), %s10617_s28, 512, %s16216_s3, [#allocation4], %s13794_s19, %s13794_s19, %s13795_s20  }
0x12a8   : > { %13747 = dma.done.wait (%p12350_p12), [#allocation4], 512  }
0x12a9   : > { %13749 = vsyncadd (%p12350_p12), [#allocation4], 4294966784 }
0x12aa PF: > { %s16217_s24 = sld [smem:[#allocation25_spill]]  ;;  %s16218_s21 = sld [smem:[#allocation22_spill]] }
0x12ab   : > { %s16219_s22 = sld [smem:[#allocation23_spill]]  ;;  %s16220_s23 = sld [smem:[#allocation26_spill]] }
0x12b0   : > { %p26_p1 = scmp.ge.s32.totalorder %s16217_s24, 4  }
0x12b2   :  { %28 = sbr.rel (!%p26_p1) target bundleno = 14 (0xe), region = 243 }
0x12b9   :  { %10632 = vsyncpa [#allocation3], 1 }
0x12ba   :  { %10634 = vsyncpa [#allocation3 + $0x1], 1 }
0x12bb   :  { %10635 = vsyncpa [#allocation6], 1 }
0x12bc   :  { %10636 = vsyncpa [#allocation4], 1 }
0x12bd   :  { %10638 = vsyncpa [#allocation4 + $0x1], 1 }

</bundles_post_ra>
